<compile_context>
chip_gen: v5e
topology: v5e:2x2
jax: 0.10.0
libtpu: 0.0.40
codegen_flags: <defaults>
</compile_context>

<pallas_src>
import functools
import math

import jax
import jax.numpy as jnp
from jax import lax
from jax.experimental import pallas as pl
from jax.experimental.pallas import tpu as pltpu


def _vmem_limit_bytes(arrays, extra_bytes=0):
    """Scoped-VMEM limit sized from the actually-resident buffers (+headroom)."""
    total = extra_bytes
    for a in arrays:
        total += math.prod(a.shape) * jnp.dtype(a.dtype).itemsize
    # 2x headroom for compiler temporaries; stay well under v7x's 64 MiB physical.
    return int(min(48 * 1024 * 1024, max(4 * 1024 * 1024, 2 * total + (1 << 20))))


# ============================================================================
# Encoder kernel: LSTM over the source sequence + hoisted attention "ref"
# projections (Conv1d(dim, dim, 1) == per-position matmul), computed ONCE and
# fused into a single (L*B, H) @ (H, 2H) matmul.
# ============================================================================
def encoder_kernel(x_ref, wih_t_ref, whh_t_ref, b_ref, ref_w_t_ref, ref_b_ref,
                   e_ref, h_out_ref, c_out_ref, ctx_sc):
    L, B, E = x_ref.shape
    H = whh_t_ref.shape[0]

    # Hoisted input projection: one big MXU call (bias folded in) instead of
    # L tiny matmuls on the serial recurrence path.
    x_flat = x_ref[...].reshape(L * B, E)
    x_proj = (jnp.dot(x_flat, wih_t_ref[...], preferred_element_type=jnp.float32)
              + b_ref[...]).reshape(L, B, 4 * H)

    whh_t = whh_t_ref[...]
    h = jnp.zeros((B, H), jnp.float32)   # Encoder.enc_init_state is zeros
    c = jnp.zeros((B, H), jnp.float32)

    # Fully unrolled recurrence: fine for small L.
    # TODO(synk): switch to lax.fori_loop with a small unroll for L >~ 32 to bound
    # vreg live ranges.
    for t in range(L):
        gates = x_proj[t] + jnp.dot(h, whh_t, preferred_element_type=jnp.float32)
        # torch.nn.LSTM gate order: i, f, g, o
        i = jax.nn.sigmoid(gates[:, 0:H])
        f = jax.nn.sigmoid(gates[:, H:2 * H])
        g = jnp.tanh(gates[:, 2 * H:3 * H])
        o = jax.nn.sigmoid(gates[:, 3 * H:4 * H])
        c = f * c + i * g
        h = o * jnp.tanh(c)
        ctx_sc[t] = h

    h_out_ref[...] = h
    c_out_ref[...] = c

    # Fused project_ref for glimpse & pointer attention: constant across all
    # decode steps / glimpses -> one (L*B, H) @ (H, 2H) matmul, done exactly once.
    ctx_flat = ctx_sc[...].reshape(L * B, H)
    e_ref[...] = (jnp.dot(ctx_flat, ref_w_t_ref[...],
                          preferred_element_type=jnp.float32)
                  + ref_b_ref[...]).reshape(L, B, 2 * H)


def run_encoder(inputs, params):
    L, B, _ = inputs.shape
    H = params["enc_w_hh_t"].shape[0]
    # Fuse glimpse + pointer ref-projection weights/biases (one-time, outside kernel).
    ref_w_t = jnp.concatenate([params["g_wr_t"], params["p_wr_t"]], axis=1)  # (H, 2H)
    ref_b = jnp.concatenate([params["g_br"], params["p_br"]], axis=1)        # (1, 2H)
    args = (inputs, params["enc_w_ih_t"], params["enc_w_hh_t"], params["enc_b"],
            ref_w_t, ref_b)

    vmem = lambda: pl.BlockSpec(memory_space=pltpu.MemorySpace.VMEM)
    out_shape = (jax.ShapeDtypeStruct((L, B, 2 * H), jnp.float32),   # [e_glimpse | e_pointer]
                 jax.ShapeDtypeStruct((B, H), jnp.float32),          # h_T
                 jax.ShapeDtypeStruct((B, H), jnp.float32))          # c_T
    limit = _vmem_limit_bytes(list(args) + list(out_shape),
                              extra_bytes=L * B * H * 4)             # ctx scratch
    return pl.pallas_call(
        encoder_kernel,
        out_shape=out_shape,
        in_specs=[vmem() for _ in args],
        out_specs=tuple(vmem() for _ in out_shape),
        scratch_shapes=[pltpu.VMEM((L, B, H), jnp.float32)],
        compiler_params=pltpu.CompilerParams(vmem_limit_bytes=limit),
    )(*args)


# ============================================================================
# Fused decoder: the whole stochastic decode loop in ONE pallas_call invocation
# (no grid).  Weights, embedded inputs and the pre-projected attention refs are
# loaded into VMEM once; h/c/mask/decoder-input are plain carried values.
# ============================================================================
def make_decoder_kernel(T, n_glimpses, use_tanh_pointer, tanh_C):
    def kernel(x0_ref, h0_ref, c0_ref, emb_ref, eg_ref, ep_ref, gum_ref,
               w_cat_ref, b_ref,
               g_wq_ref, g_bq_ref, g_v_ref,
               p_wq_ref, p_bq_ref, p_v_ref,
               probs_ref, onehot_ref):
        B, L, H = eg_ref.shape
        neg_inf = jnp.float32(-jnp.inf)

        # Load everything once; the unrolled decode loop only touches vregs/VMEM.
        emb = emb_ref[...]                                   # (B, L, E)
        eg = eg_ref[...]                                     # (B, L, H)
        ep = ep_ref[...]                                     # (B, L, H)
        w_cat = w_cat_ref[...]                               # (E+H, 4H)
        bias = b_ref[...]                                    # (1, 4H)
        g_wq = g_wq_ref[...]; g_bq = g_bq_ref[...]; g_v = g_v_ref[...]
        p_wq = p_wq_ref[...]; p_bq = p_bq_ref[...]; p_v = p_v_ref[...]
        lane = lax.broadcasted_iota(jnp.int32, (B, L), 1)

        x = x0_ref[...]                                      # (B, E)
        h = h0_ref[...]                                      # (B, H)
        c = c0_ref[...]                                      # (B, H)
        mask = jnp.zeros((B, L), jnp.float32)                # 1.0 == already selected

        def attn_logits(query, wq_t, bq, v, e):
            # project_query (Linear); e is the pre-projected ref (hoisted Conv1d).
            q = jnp.dot(query, wq_t, preferred_element_type=jnp.float32) + bq  # (B,H)
            tanh_arg = jnp.tanh(q[:, None, :] + e)                              # (B,L,H)
            return jnp.sum(tanh_arg * v[None, :, :], axis=-1)                   # (B,L)

        def masked_softmax(u, m):
            u = jnp.where(m > 0.5, neg_inf, u)
            mx = jnp.max(u, axis=-1, keepdims=True)
            ex = jnp.exp(u - mx)
            s = jnp.sum(ex, axis=-1, keepdims=True)
            return u, ex * (1.0 / s)       # one divide per row, broadcast multiply

        # TODO(synk): for large T, replace the Python unroll with lax.fori_loop
        # writing via probs_ref[t] (dynamic t) to bound vreg live ranges.
        for t in range(T):
            # ---- Decoder.recurrence LSTM cell: ONE fused (B,E+H)@(E+H,4H) matmul ----
            xh = jnp.concatenate([x, h], axis=1)
            gates = jnp.dot(xh, w_cat, preferred_element_type=jnp.float32) + bias
            ingate = jax.nn.sigmoid(gates[:, 0:H])
            forgetgate = jax.nn.sigmoid(gates[:, H:2 * H])
            cellgate = jnp.tanh(gates[:, 2 * H:3 * H])
            outgate = jax.nn.sigmoid(gates[:, 3 * H:4 * H])
            c = forgetgate * c + ingate * cellgate
            h = outgate * jnp.tanh(c)

            # ---- glimpses (static count -> unrolled) ----
            g_q = h
            for _ in range(n_glimpses):
                u_g = attn_logits(g_q, g_wq, g_bq, g_v, eg)
                _, p_g = masked_softmax(u_g, mask)
                g_q = jnp.sum(p_g[:, :, None] * eg, axis=1)      # bmm(ref, sm(logits))

            # ---- pointer ----
            u_p = attn_logits(g_q, p_wq, p_bq, p_v, ep)
            if use_tanh_pointer:
                u_p = jnp.float32(tanh_C) * jnp.tanh(u_p)
            logits, probs = masked_softmax(u_p, mask)            # (B, L)

            # ---- multinomial sampling via Gumbel-max on the masked logits ----
            # (noise precomputed outside the kernel; same distribution as
            #  torch.multinomial(probs)).
            perturbed = logits + gum_ref[t]                      # masked stay -inf
            row_max = jnp.max(perturbed, axis=-1, keepdims=True)
            idx = jnp.min(jnp.where(perturbed >= row_max, lane, jnp.int32(L)),
                          axis=-1, keepdims=True)                # (B, 1) == argmax
            one_hot = (lane == idx).astype(jnp.float32)          # (B, L)

            probs_ref[t] = probs
            onehot_ref[t] = one_hot

            # ---- carries: mask and next decoder input (one-hot gather) ----
            # (original apply_mask_to_logits adds prev_idxs at the *next* step)
            mask = jnp.maximum(mask, one_hot)
            x = jnp.sum(one_hot[:, :, None] * emb, axis=1)       # (B, E)

    return kernel


def run_decoder(gumbel, x0, h0, c0, emb_ble, eg_blh, ep_blh, params, *,
                n_glimpses, use_tanh, tanh_C):
    B, L, H = eg_blh.shape
    T = gumbel.shape[0]
    # Fuse the decoder LSTM-cell input/hidden weights (one-time, outside kernel).
    w_cat = jnp.concatenate([params["dec_w_in_t"], params["dec_w_hid_t"]], axis=0)

    args = (x0, h0, c0, emb_ble, eg_blh, ep_blh, gumbel,
            w_cat, params["dec_b"],
            params["g_wq_t"], params["g_bq"], params["g_v"],
            params["p_wq_t"], params["p_bq"], params["p_v"])

    kernel = make_decoder_kernel(T, n_glimpses, use_tanh, float(tanh_C))
    vmem = lambda: pl.BlockSpec(memory_space=pltpu.MemorySpace.VMEM)
    out_shape = (jax.ShapeDtypeStruct((T, B, L), jnp.float32),   # per-step probs
                 jax.ShapeDtypeStruct((T, B, L), jnp.float32))   # per-step one-hot sel
    limit = _vmem_limit_bytes(list(args) + list(out_shape))
    probs, onehot = pl.pallas_call(
        kernel,
        out_shape=out_shape,
        in_specs=[vmem() for _ in args],
        out_specs=tuple(vmem() for _ in out_shape),
        compiler_params=pltpu.CompilerParams(vmem_limit_bytes=limit),
    )(*args)
    return probs, onehot


# ----------------------------------------------------------------------------
# Parameter init (deterministic, PyTorch-style uniform bounds).
# Weights pre-transposed to (in, out); paired biases combined once.
# ----------------------------------------------------------------------------
def init_params(key, emb, hidden):
    ks = jax.random.split(key, 20)
    uni = lambda k, shape, b: jax.random.uniform(k, shape, jnp.float32, -b, b)
    sE = 1.0 / math.sqrt(emb)
    sH = 1.0 / math.sqrt(hidden)
    p = {}
    # Encoder nn.LSTM(emb, hidden)
    p["enc_w_ih_t"] = uni(ks[0], (emb, 4 * hidden), sH)
    p["enc_w_hh_t"] = uni(ks[1], (hidden, 4 * hidden), sH)
    p["enc_b"] = uni(ks[2], (1, 4 * hidden), sH) + uni(ks[3], (1, 4 * hidden), sH)
    # Decoder LSTM-cell linears (input_weights + hidden_weights)
    p["dec_w_in_t"] = uni(ks[4], (emb, 4 * hidden), sE)
    p["dec_w_hid_t"] = uni(ks[5], (hidden, 4 * hidden), sH)
    p["dec_b"] = uni(ks[6], (1, 4 * hidden), sE) + uni(ks[7], (1, 4 * hidden), sH)
    # Glimpse attention (Linear + Conv1d(k=1) + v)
    p["g_wq_t"] = uni(ks[8], (hidden, hidden), sH)
    p["g_bq"] = uni(ks[9], (1, hidden), sH)
    p["g_wr_t"] = uni(ks[10], (hidden, hidden), sH)
    p["g_br"] = uni(ks[11], (1, hidden), sH)
    p["g_v"] = uni(ks[12], (1, hidden), sH)
    # Pointer attention
    p["p_wq_t"] = uni(ks[13], (hidden, hidden), sH)
    p["p_bq"] = uni(ks[14], (1, hidden), sH)
    p["p_wr_t"] = uni(ks[15], (hidden, hidden), sH)
    p["p_br"] = uni(ks[16], (1, hidden), sH)
    p["p_v"] = uni(ks[17], (1, hidden), sH)
    # PointerNetwork.decoder_in_0
    p["dec_in_0"] = uni(ks[18], (emb,), sE)
    return p


# ----------------------------------------------------------------------------
# PointerNetwork.forward (stochastic decode)
# ----------------------------------------------------------------------------
@functools.partial(jax.jit,
                   static_argnames=("max_decoding_len", "n_glimpses",
                                    "tanh_exploration", "use_tanh"))
def pointer_network_forward(params, inputs, sample_seed, *,
                            max_decoding_len, n_glimpses=1,
                            tanh_exploration=10.0, use_tanh=True):
    L, B, _ = inputs.shape
    H = params["enc_w_hh_t"].shape[0]
    if max_decoding_len > L:
        # With all sources masked, softmax degenerates (same as the torch module).
        raise ValueError("max_decoding_len must be <= source length")

    # Pad batch to a sublane multiple (8 for f32): dense vregs / unmasked stores.
    B_pad = -(-B // 8) * 8
    inputs_p = (jnp.pad(inputs, ((0, 0), (0, B_pad - B), (0, 0)))
                if B_pad != B else inputs)

    e_lb2h, h_t, c_t = run_encoder(inputs_p, params)

    # One-time layout plumbing outside the hot kernels: batch-major attention
    # tensors so per-step logits come out (B, L) with no in-kernel transposes.
    eg_blh = jnp.transpose(e_lb2h[:, :, :H], (1, 0, 2))
    ep_blh = jnp.transpose(e_lb2h[:, :, H:], (1, 0, 2))
    emb_ble = jnp.transpose(inputs_p, (1, 0, 2))
    x0 = jnp.tile(params["dec_in_0"][None, :], (B_pad, 1))

    # Sampling noise precomputed here (pltpu PRNG primitives have no
    # interpret/CPU lowering); Gumbel-max in-kernel == multinomial sampling.
    key = jax.random.PRNGKey(sample_seed)
    gumbel = jax.random.gumbel(key, (max_decoding_len, B_pad, L), jnp.float32)

    # TODO(synk): beam_search decode branch not implemented (module uses 'stochastic');
    # decode_stochastic's duplicate-resample check is a no-op under masking (prob==0).
    probs, onehot = run_decoder(gumbel, x0, h_t, c_t, emb_ble, eg_blh, ep_blh,
                                params, n_glimpses=n_glimpses, use_tanh=use_tanh,
                                tanh_C=tanh_exploration)
    idxs = jnp.argmax(onehot, axis=-1).astype(jnp.int32)      # (T, B_pad)
    return probs[:, :B, :], idxs[:, :B]


# ----------------------------------------------------------------------------
if __name__ == "__main__":
    EMB = 32
    HID = 32
    SOURCE_L = 8
    BATCH = 4
    MAX_DEC_LEN = 8          # == SOURCE_L so masking never exhausts the source

    root = jax.random.PRNGKey(0)
    k_param, k_data = jax.random.split(root, 2)

    params = init_params(k_param, EMB, HID)
    # inputs: [sourceL x batch_size x embedding_dim]
    inputs = jax.random.uniform(k_data, (SOURCE_L, BATCH, EMB), jnp.float32)

    pointer_probs, input_idxs = pointer_network_forward(
        params, inputs, 1234,
        max_decoding_len=MAX_DEC_LEN, n_glimpses=1,
        tanh_exploration=10.0, use_tanh=True)

    pointer_probs = jax.block_until_ready(pointer_probs)
    input_idxs = jax.block_until_ready(input_idxs)

    assert pointer_probs.shape == (MAX_DEC_LEN, BATCH, SOURCE_L)
    assert input_idxs.shape == (MAX_DEC_LEN, BATCH)
    assert bool(jnp.all(jnp.isfinite(pointer_probs)))
    # rows of each step's probs sum to 1
    assert bool(jnp.allclose(pointer_probs.sum(-1), 1.0, atol=1e-4))
    # valid indices, and masking guarantees distinct selections per batch row
    assert bool(jnp.all((input_idxs >= 0) & (input_idxs < SOURCE_L)))
    for b in range(BATCH):
        assert len(set(int(i) for i in input_idxs[:, b])) == MAX_DEC_LEN

    print("KERNEL_OK")
</pallas_src>

<mosaic_0001>
module attributes {stable_mosaic.version = 11 : i64} {
  func.func @encoder_kernel(%arg0: memref<8x8x32xf32, #tpu.memory_space<vmem>>, %arg1: memref<32x128xf32, #tpu.memory_space<vmem>>, %arg2: memref<32x128xf32, #tpu.memory_space<vmem>>, %arg3: memref<1x128xf32, #tpu.memory_space<vmem>>, %arg4: memref<32x64xf32, #tpu.memory_space<vmem>>, %arg5: memref<1x64xf32, #tpu.memory_space<vmem>>, %arg6: memref<8x8x64xf32, #tpu.memory_space<vmem>>, %arg7: memref<8x32xf32, #tpu.memory_space<vmem>>, %arg8: memref<8x32xf32, #tpu.memory_space<vmem>>, %arg9: memref<8x8x32xf32, #tpu.memory_space<vmem>>) attributes {dimension_semantics = [], scalar_prefetch = 0 : i64, scratch_operands = 1 : i64, tpu.core_type = #tpu.core_type<tc>} {
    %c0 = arith.constant 0 : index
    %c0_0 = arith.constant 0 : index
    %c0_1 = arith.constant 0 : index
    %0 = vector.load %arg0[%c0, %c0_0, %c0_1] : memref<8x8x32xf32, #tpu.memory_space<vmem>>, vector<8x8x32xf32>
    %1 = vector.shape_cast %0 : vector<8x8x32xf32> to vector<64x32xf32>
    %c0_2 = arith.constant 0 : index
    %c0_3 = arith.constant 0 : index
    %2 = vector.load %arg1[%c0_2, %c0_3] : memref<32x128xf32, #tpu.memory_space<vmem>>, vector<32x128xf32>
    %cst = arith.constant dense<0.000000e+00> : vector<64x128xf32>
    %3 = tpu.matmul %1, %2, %cst {dimension_numbers = #tpu.dot_dimension_numbers<[1], [0], [0], [1], [0, 0, 1, 1], [], []>} : vector<64x32xf32>, vector<32x128xf32>, vector<64x128xf32> -> vector<64x128xf32>
    %c0_4 = arith.constant 0 : index
    %c0_5 = arith.constant 0 : index
    %4 = vector.load %arg3[%c0_4, %c0_5] : memref<1x128xf32, #tpu.memory_space<vmem>>, vector<1x128xf32>
    %5 = vector.broadcast %4 : vector<1x128xf32> to vector<64x128xf32>
    %6 = arith.addf %3, %5 : vector<64x128xf32>
    %7 = vector.shape_cast %6 : vector<64x128xf32> to vector<8x8x128xf32>
    %c0_6 = arith.constant 0 : index
    %c0_7 = arith.constant 0 : index
    %8 = vector.load %arg2[%c0_6, %c0_7] : memref<32x128xf32, #tpu.memory_space<vmem>>, vector<32x128xf32>
    %cst_8 = arith.constant 0.000000e+00 : f32
    %9 = vector.broadcast %cst_8 : f32 to vector<8x32xf32>
    %cst_9 = arith.constant 0.000000e+00 : f32
    %10 = vector.broadcast %cst_9 : f32 to vector<8x32xf32>
    %11 = vector.extract_strided_slice %7 {offsets = [0, 0, 0], sizes = [1, 8, 128], strides = [1, 1, 1]} : vector<8x8x128xf32> to vector<1x8x128xf32>
    %12 = vector.shape_cast %11 : vector<1x8x128xf32> to vector<8x128xf32>
    %cst_10 = arith.constant dense<0.000000e+00> : vector<8x128xf32>
    %13 = tpu.matmul %9, %8, %cst_10 {dimension_numbers = #tpu.dot_dimension_numbers<[1], [0], [0], [1], [0, 0, 1, 1], [], []>} : vector<8x32xf32>, vector<32x128xf32>, vector<8x128xf32> -> vector<8x128xf32>
    %14 = arith.addf %12, %13 : vector<8x128xf32>
    %15 = vector.extract_strided_slice %14 {offsets = [0, 0], sizes = [8, 32], strides = [1, 1]} : vector<8x128xf32> to vector<8x32xf32>
    %16 = arith.negf %15 : vector<8x32xf32>
    %17 = math.exp %16 : vector<8x32xf32>
    %cst_11 = arith.constant 1.000000e+00 : f32
    %18 = vector.broadcast %cst_11 : f32 to vector<8x32xf32>
    %19 = arith.addf %18, %17 : vector<8x32xf32>
    %20 = arith.divf %18, %19 : vector<8x32xf32>
    %21 = vector.extract_strided_slice %14 {offsets = [0, 32], sizes = [8, 32], strides = [1, 1]} : vector<8x128xf32> to vector<8x32xf32>
    %22 = arith.negf %21 : vector<8x32xf32>
    %23 = math.exp %22 : vector<8x32xf32>
    %cst_12 = arith.constant 1.000000e+00 : f32
    %24 = vector.broadcast %cst_12 : f32 to vector<8x32xf32>
    %25 = arith.addf %24, %23 : vector<8x32xf32>
    %26 = arith.divf %24, %25 : vector<8x32xf32>
    %27 = vector.extract_strided_slice %14 {offsets = [0, 64], sizes = [8, 32], strides = [1, 1]} : vector<8x128xf32> to vector<8x32xf32>
    %28 = math.tanh %27 : vector<8x32xf32>
    %29 = vector.extract_strided_slice %14 {offsets = [0, 96], sizes = [8, 32], strides = [1, 1]} : vector<8x128xf32> to vector<8x32xf32>
    %30 = arith.negf %29 : vector<8x32xf32>
    %31 = math.exp %30 : vector<8x32xf32>
    %cst_13 = arith.constant 1.000000e+00 : f32
    %32 = vector.broadcast %cst_13 : f32 to vector<8x32xf32>
    %33 = arith.addf %32, %31 : vector<8x32xf32>
    %34 = arith.divf %32, %33 : vector<8x32xf32>
    %35 = arith.mulf %26, %10 : vector<8x32xf32>
    %36 = arith.mulf %20, %28 : vector<8x32xf32>
    %37 = arith.addf %35, %36 : vector<8x32xf32>
    %38 = math.tanh %37 : vector<8x32xf32>
    %39 = arith.mulf %34, %38 : vector<8x32xf32>
    %c0_14 = arith.constant 0 : index
    %c0_15 = arith.constant 0 : index
    %c0_16 = arith.constant 0 : index
    %40 = vector.load %arg9[%c0_14, %c0_15, %c0_16] : memref<8x8x32xf32, #tpu.memory_space<vmem>>, vector<1x8x32xf32>
    %41 = vector.shape_cast %40 : vector<1x8x32xf32> to vector<8x32xf32>
    %42 = vector.shape_cast %39 : vector<8x32xf32> to vector<1x8x32xf32>
    tpu.vector_store %arg9[%c0_14, %c0_15, %c0_16], %42 {strides = array<i32>} : memref<8x8x32xf32, #tpu.memory_space<vmem>>, vector<1x8x32xf32>,
    %43 = vector.extract_strided_slice %7 {offsets = [1, 0, 0], sizes = [1, 8, 128], strides = [1, 1, 1]} : vector<8x8x128xf32> to vector<1x8x128xf32>
    %44 = vector.shape_cast %43 : vector<1x8x128xf32> to vector<8x128xf32>
    %cst_17 = arith.constant dense<0.000000e+00> : vector<8x128xf32>
    %45 = tpu.matmul %39, %8, %cst_17 {dimension_numbers = #tpu.dot_dimension_numbers<[1], [0], [0], [1], [0, 0, 1, 1], [], []>} : vector<8x32xf32>, vector<32x128xf32>, vector<8x128xf32> -> vector<8x128xf32>
    %46 = arith.addf %44, %45 : vector<8x128xf32>
    %47 = vector.extract_strided_slice %46 {offsets = [0, 0], sizes = [8, 32], strides = [1, 1]} : vector<8x128xf32> to vector<8x32xf32>
    %48 = arith.negf %47 : vector<8x32xf32>
    %49 = math.exp %48 : vector<8x32xf32>
    %cst_18 = arith.constant 1.000000e+00 : f32
    %50 = vector.broadcast %cst_18 : f32 to vector<8x32xf32>
    %51 = arith.addf %50, %49 : vector<8x32xf32>
    %52 = arith.divf %50, %51 : vector<8x32xf32>
    %53 = vector.extract_strided_slice %46 {offsets = [0, 32], sizes = [8, 32], strides = [1, 1]} : vector<8x128xf32> to vector<8x32xf32>
    %54 = arith.negf %53 : vector<8x32xf32>
    %55 = math.exp %54 : vector<8x32xf32>
    %cst_19 = arith.constant 1.000000e+00 : f32
    %56 = vector.broadcast %cst_19 : f32 to vector<8x32xf32>
    %57 = arith.addf %56, %55 : vector<8x32xf32>
    %58 = arith.divf %56, %57 : vector<8x32xf32>
    %59 = vector.extract_strided_slice %46 {offsets = [0, 64], sizes = [8, 32], strides = [1, 1]} : vector<8x128xf32> to vector<8x32xf32>
    %60 = math.tanh %59 : vector<8x32xf32>
    %61 = vector.extract_strided_slice %46 {offsets = [0, 96], sizes = [8, 32], strides = [1, 1]} : vector<8x128xf32> to vector<8x32xf32>
    %62 = arith.negf %61 : vector<8x32xf32>
    %63 = math.exp %62 : vector<8x32xf32>
    %cst_20 = arith.constant 1.000000e+00 : f32
    %64 = vector.broadcast %cst_20 : f32 to vector<8x32xf32>
    %65 = arith.addf %64, %63 : vector<8x32xf32>
    %66 = arith.divf %64, %65 : vector<8x32xf32>
    %67 = arith.mulf %58, %37 : vector<8x32xf32>
    %68 = arith.mulf %52, %60 : vector<8x32xf32>
    %69 = arith.addf %67, %68 : vector<8x32xf32>
    %70 = math.tanh %69 : vector<8x32xf32>
    %71 = arith.mulf %66, %70 : vector<8x32xf32>
    %c1 = arith.constant 1 : index
    %c0_21 = arith.constant 0 : index
    %c0_22 = arith.constant 0 : index
    %72 = vector.load %arg9[%c1, %c0_21, %c0_22] : memref<8x8x32xf32, #tpu.memory_space<vmem>>, vector<1x8x32xf32>
    %73 = vector.shape_cast %72 : vector<1x8x32xf32> to vector<8x32xf32>
    %74 = vector.shape_cast %71 : vector<8x32xf32> to vector<1x8x32xf32>
    tpu.vector_store %arg9[%c1, %c0_21, %c0_22], %74 {strides = array<i32>} : memref<8x8x32xf32, #tpu.memory_space<vmem>>, vector<1x8x32xf32>,
    %75 = vector.extract_strided_slice %7 {offsets = [2, 0, 0], sizes = [1, 8, 128], strides = [1, 1, 1]} : vector<8x8x128xf32> to vector<1x8x128xf32>
    %76 = vector.shape_cast %75 : vector<1x8x128xf32> to vector<8x128xf32>
    %cst_23 = arith.constant dense<0.000000e+00> : vector<8x128xf32>
    %77 = tpu.matmul %71, %8, %cst_23 {dimension_numbers = #tpu.dot_dimension_numbers<[1], [0], [0], [1], [0, 0, 1, 1], [], []>} : vector<8x32xf32>, vector<32x128xf32>, vector<8x128xf32> -> vector<8x128xf32>
    %78 = arith.addf %76, %77 : vector<8x128xf32>
    %79 = vector.extract_strided_slice %78 {offsets = [0, 0], sizes = [8, 32], strides = [1, 1]} : vector<8x128xf32> to vector<8x32xf32>
    %80 = arith.negf %79 : vector<8x32xf32>
    %81 = math.exp %80 : vector<8x32xf32>
    %cst_24 = arith.constant 1.000000e+00 : f32
    %82 = vector.broadcast %cst_24 : f32 to vector<8x32xf32>
    %83 = arith.addf %82, %81 : vector<8x32xf32>
    %84 = arith.divf %82, %83 : vector<8x32xf32>
    %85 = vector.extract_strided_slice %78 {offsets = [0, 32], sizes = [8, 32], strides = [1, 1]} : vector<8x128xf32> to vector<8x32xf32>
    %86 = arith.negf %85 : vector<8x32xf32>
    %87 = math.exp %86 : vector<8x32xf32>
    %cst_25 = arith.constant 1.000000e+00 : f32
    %88 = vector.broadcast %cst_25 : f32 to vector<8x32xf32>
    %89 = arith.addf %88, %87 : vector<8x32xf32>
    %90 = arith.divf %88, %89 : vector<8x32xf32>
    %91 = vector.extract_strided_slice %78 {offsets = [0, 64], sizes = [8, 32], strides = [1, 1]} : vector<8x128xf32> to vector<8x32xf32>
    %92 = math.tanh %91 : vector<8x32xf32>
    %93 = vector.extract_strided_slice %78 {offsets = [0, 96], sizes = [8, 32], strides = [1, 1]} : vector<8x128xf32> to vector<8x32xf32>
    %94 = arith.negf %93 : vector<8x32xf32>
    %95 = math.exp %94 : vector<8x32xf32>
    %cst_26 = arith.constant 1.000000e+00 : f32
    %96 = vector.broadcast %cst_26 : f32 to vector<8x32xf32>
    %97 = arith.addf %96, %95 : vector<8x32xf32>
    %98 = arith.divf %96, %97 : vector<8x32xf32>
    %99 = arith.mulf %90, %69 : vector<8x32xf32>
    %100 = arith.mulf %84, %92 : vector<8x32xf32>
    %101 = arith.addf %99, %100 : vector<8x32xf32>
    %102 = math.tanh %101 : vector<8x32xf32>
    %103 = arith.mulf %98, %102 : vector<8x32xf32>
    %c2 = arith.constant 2 : index
    %c0_27 = arith.constant 0 : index
    %c0_28 = arith.constant 0 : index
    %104 = vector.load %arg9[%c2, %c0_27, %c0_28] : memref<8x8x32xf32, #tpu.memory_space<vmem>>, vector<1x8x32xf32>
    %105 = vector.shape_cast %104 : vector<1x8x32xf32> to vector<8x32xf32>
    %106 = vector.shape_cast %103 : vector<8x32xf32> to vector<1x8x32xf32>
    tpu.vector_store %arg9[%c2, %c0_27, %c0_28], %106 {strides = array<i32>} : memref<8x8x32xf32, #tpu.memory_space<vmem>>, vector<1x8x32xf32>,
    %107 = vector.extract_strided_slice %7 {offsets = [3, 0, 0], sizes = [1, 8, 128], strides = [1, 1, 1]} : vector<8x8x128xf32> to vector<1x8x128xf32>
    %108 = vector.shape_cast %107 : vector<1x8x128xf32> to vector<8x128xf32>
    %cst_29 = arith.constant dense<0.000000e+00> : vector<8x128xf32>
    %109 = tpu.matmul %103, %8, %cst_29 {dimension_numbers = #tpu.dot_dimension_numbers<[1], [0], [0], [1], [0, 0, 1, 1], [], []>} : vector<8x32xf32>, vector<32x128xf32>, vector<8x128xf32> -> vector<8x128xf32>
    %110 = arith.addf %108, %109 : vector<8x128xf32>
    %111 = vector.extract_strided_slice %110 {offsets = [0, 0], sizes = [8, 32], strides = [1, 1]} : vector<8x128xf32> to vector<8x32xf32>
    %112 = arith.negf %111 : vector<8x32xf32>
    %113 = math.exp %112 : vector<8x32xf32>
    %cst_30 = arith.constant 1.000000e+00 : f32
    %114 = vector.broadcast %cst_30 : f32 to vector<8x32xf32>
    %115 = arith.addf %114, %113 : vector<8x32xf32>
    %116 = arith.divf %114, %115 : vector<8x32xf32>
    %117 = vector.extract_strided_slice %110 {offsets = [0, 32], sizes = [8, 32], strides = [1, 1]} : vector<8x128xf32> to vector<8x32xf32>
    %118 = arith.negf %117 : vector<8x32xf32>
    %119 = math.exp %118 : vector<8x32xf32>
    %cst_31 = arith.constant 1.000000e+00 : f32
    %120 = vector.broadcast %cst_31 : f32 to vector<8x32xf32>
    %121 = arith.addf %120, %119 : vector<8x32xf32>
    %122 = arith.divf %120, %121 : vector<8x32xf32>
    %123 = vector.extract_strided_slice %110 {offsets = [0, 64], sizes = [8, 32], strides = [1, 1]} : vector<8x128xf32> to vector<8x32xf32>
    %124 = math.tanh %123 : vector<8x32xf32>
    %125 = vector.extract_strided_slice %110 {offsets = [0, 96], sizes = [8, 32], strides = [1, 1]} : vector<8x128xf32> to vector<8x32xf32>
    %126 = arith.negf %125 : vector<8x32xf32>
    %127 = math.exp %126 : vector<8x32xf32>
    %cst_32 = arith.constant 1.000000e+00 : f32
    %128 = vector.broadcast %cst_32 : f32 to vector<8x32xf32>
    %129 = arith.addf %128, %127 : vector<8x32xf32>
    %130 = arith.divf %128, %129 : vector<8x32xf32>
    %131 = arith.mulf %122, %101 : vector<8x32xf32>
    %132 = arith.mulf %116, %124 : vector<8x32xf32>
    %133 = arith.addf %131, %132 : vector<8x32xf32>
    %134 = math.tanh %133 : vector<8x32xf32>
    %135 = arith.mulf %130, %134 : vector<8x32xf32>
    %c3 = arith.constant 3 : index
    %c0_33 = arith.constant 0 : index
    %c0_34 = arith.constant 0 : index
    %136 = vector.load %arg9[%c3, %c0_33, %c0_34] : memref<8x8x32xf32, #tpu.memory_space<vmem>>, vector<1x8x32xf32>
    %137 = vector.shape_cast %136 : vector<1x8x32xf32> to vector<8x32xf32>
    %138 = vector.shape_cast %135 : vector<8x32xf32> to vector<1x8x32xf32>
    tpu.vector_store %arg9[%c3, %c0_33, %c0_34], %138 {strides = array<i32>} : memref<8x8x32xf32, #tpu.memory_space<vmem>>, vector<1x8x32xf32>,
    %139 = vector.extract_strided_slice %7 {offsets = [4, 0, 0], sizes = [1, 8, 128], strides = [1, 1, 1]} : vector<8x8x128xf32> to vector<1x8x128xf32>
    %140 = vector.shape_cast %139 : vector<1x8x128xf32> to vector<8x128xf32>
    %cst_35 = arith.constant dense<0.000000e+00> : vector<8x128xf32>
    %141 = tpu.matmul %135, %8, %cst_35 {dimension_numbers = #tpu.dot_dimension_numbers<[1], [0], [0], [1], [0, 0, 1, 1], [], []>} : vector<8x32xf32>, vector<32x128xf32>, vector<8x128xf32> -> vector<8x128xf32>
    %142 = arith.addf %140, %141 : vector<8x128xf32>
    %143 = vector.extract_strided_slice %142 {offsets = [0, 0], sizes = [8, 32], strides = [1, 1]} : vector<8x128xf32> to vector<8x32xf32>
    %144 = arith.negf %143 : vector<8x32xf32>
    %145 = math.exp %144 : vector<8x32xf32>
    %cst_36 = arith.constant 1.000000e+00 : f32
    %146 = vector.broadcast %cst_36 : f32 to vector<8x32xf32>
    %147 = arith.addf %146, %145 : vector<8x32xf32>
    %148 = arith.divf %146, %147 : vector<8x32xf32>
    %149 = vector.extract_strided_slice %142 {offsets = [0, 32], sizes = [8, 32], strides = [1, 1]} : vector<8x128xf32> to vector<8x32xf32>
    %150 = arith.negf %149 : vector<8x32xf32>
    %151 = math.exp %150 : vector<8x32xf32>
    %cst_37 = arith.constant 1.000000e+00 : f32
    %152 = vector.broadcast %cst_37 : f32 to vector<8x32xf32>
    %153 = arith.addf %152, %151 : vector<8x32xf32>
    %154 = arith.divf %152, %153 : vector<8x32xf32>
    %155 = vector.extract_strided_slice %142 {offsets = [0, 64], sizes = [8, 32], strides = [1, 1]} : vector<8x128xf32> to vector<8x32xf32>
    %156 = math.tanh %155 : vector<8x32xf32>
    %157 = vector.extract_strided_slice %142 {offsets = [0, 96], sizes = [8, 32], strides = [1, 1]} : vector<8x128xf32> to vector<8x32xf32>
    %158 = arith.negf %157 : vector<8x32xf32>
    %159 = math.exp %158 : vector<8x32xf32>
    %cst_38 = arith.constant 1.000000e+00 : f32
    %160 = vector.broadcast %cst_38 : f32 to vector<8x32xf32>
    %161 = arith.addf %160, %159 : vector<8x32xf32>
    %162 = arith.divf %160, %161 : vector<8x32xf32>
    %163 = arith.mulf %154, %133 : vector<8x32xf32>
    %164 = arith.mulf %148, %156 : vector<8x32xf32>
    %165 = arith.addf %163, %164 : vector<8x32xf32>
    %166 = math.tanh %165 : vector<8x32xf32>
    %167 = arith.mulf %162, %166 : vector<8x32xf32>
    %c4 = arith.constant 4 : index
    %c0_39 = arith.constant 0 : index
    %c0_40 = arith.constant 0 : index
    %168 = vector.load %arg9[%c4, %c0_39, %c0_40] : memref<8x8x32xf32, #tpu.memory_space<vmem>>, vector<1x8x32xf32>
    %169 = vector.shape_cast %168 : vector<1x8x32xf32> to vector<8x32xf32>
    %170 = vector.shape_cast %167 : vector<8x32xf32> to vector<1x8x32xf32>
    tpu.vector_store %arg9[%c4, %c0_39, %c0_40], %170 {strides = array<i32>} : memref<8x8x32xf32, #tpu.memory_space<vmem>>, vector<1x8x32xf32>,
    %171 = vector.extract_strided_slice %7 {offsets = [5, 0, 0], sizes = [1, 8, 128], strides = [1, 1, 1]} : vector<8x8x128xf32> to vector<1x8x128xf32>
    %172 = vector.shape_cast %171 : vector<1x8x128xf32> to vector<8x128xf32>
    %cst_41 = arith.constant dense<0.000000e+00> : vector<8x128xf32>
    %173 = tpu.matmul %167, %8, %cst_41 {dimension_numbers = #tpu.dot_dimension_numbers<[1], [0], [0], [1], [0, 0, 1, 1], [], []>} : vector<8x32xf32>, vector<32x128xf32>, vector<8x128xf32> -> vector<8x128xf32>
    %174 = arith.addf %172, %173 : vector<8x128xf32>
    %175 = vector.extract_strided_slice %174 {offsets = [0, 0], sizes = [8, 32], strides = [1, 1]} : vector<8x128xf32> to vector<8x32xf32>
    %176 = arith.negf %175 : vector<8x32xf32>
    %177 = math.exp %176 : vector<8x32xf32>
    %cst_42 = arith.constant 1.000000e+00 : f32
    %178 = vector.broadcast %cst_42 : f32 to vector<8x32xf32>
    %179 = arith.addf %178, %177 : vector<8x32xf32>
    %180 = arith.divf %178, %179 : vector<8x32xf32>
    %181 = vector.extract_strided_slice %174 {offsets = [0, 32], sizes = [8, 32], strides = [1, 1]} : vector<8x128xf32> to vector<8x32xf32>
    %182 = arith.negf %181 : vector<8x32xf32>
    %183 = math.exp %182 : vector<8x32xf32>
    %cst_43 = arith.constant 1.000000e+00 : f32
    %184 = vector.broadcast %cst_43 : f32 to vector<8x32xf32>
    %185 = arith.addf %184, %183 : vector<8x32xf32>
    %186 = arith.divf %184, %185 : vector<8x32xf32>
    %187 = vector.extract_strided_slice %174 {offsets = [0, 64], sizes = [8, 32], strides = [1, 1]} : vector<8x128xf32> to vector<8x32xf32>
    %188 = math.tanh %187 : vector<8x32xf32>
    %189 = vector.extract_strided_slice %174 {offsets = [0, 96], sizes = [8, 32], strides = [1, 1]} : vector<8x128xf32> to vector<8x32xf32>
    %190 = arith.negf %189 : vector<8x32xf32>
    %191 = math.exp %190 : vector<8x32xf32>
    %cst_44 = arith.constant 1.000000e+00 : f32
    %192 = vector.broadcast %cst_44 : f32 to vector<8x32xf32>
    %193 = arith.addf %192, %191 : vector<8x32xf32>
    %194 = arith.divf %192, %193 : vector<8x32xf32>
    %195 = arith.mulf %186, %165 : vector<8x32xf32>
    %196 = arith.mulf %180, %188 : vector<8x32xf32>
    %197 = arith.addf %195, %196 : vector<8x32xf32>
    %198 = math.tanh %197 : vector<8x32xf32>
    %199 = arith.mulf %194, %198 : vector<8x32xf32>
    %c5 = arith.constant 5 : index
    %c0_45 = arith.constant 0 : index
    %c0_46 = arith.constant 0 : index
    %200 = vector.load %arg9[%c5, %c0_45, %c0_46] : memref<8x8x32xf32, #tpu.memory_space<vmem>>, vector<1x8x32xf32>
    %201 = vector.shape_cast %200 : vector<1x8x32xf32> to vector<8x32xf32>
    %202 = vector.shape_cast %199 : vector<8x32xf32> to vector<1x8x32xf32>
    tpu.vector_store %arg9[%c5, %c0_45, %c0_46], %202 {strides = array<i32>} : memref<8x8x32xf32, #tpu.memory_space<vmem>>, vector<1x8x32xf32>,
    %203 = vector.extract_strided_slice %7 {offsets = [6, 0, 0], sizes = [1, 8, 128], strides = [1, 1, 1]} : vector<8x8x128xf32> to vector<1x8x128xf32>
    %204 = vector.shape_cast %203 : vector<1x8x128xf32> to vector<8x128xf32>
    %cst_47 = arith.constant dense<0.000000e+00> : vector<8x128xf32>
    %205 = tpu.matmul %199, %8, %cst_47 {dimension_numbers = #tpu.dot_dimension_numbers<[1], [0], [0], [1], [0, 0, 1, 1], [], []>} : vector<8x32xf32>, vector<32x128xf32>, vector<8x128xf32> -> vector<8x128xf32>
    %206 = arith.addf %204, %205 : vector<8x128xf32>
    %207 = vector.extract_strided_slice %206 {offsets = [0, 0], sizes = [8, 32], strides = [1, 1]} : vector<8x128xf32> to vector<8x32xf32>
    %208 = arith.negf %207 : vector<8x32xf32>
    %209 = math.exp %208 : vector<8x32xf32>
    %cst_48 = arith.constant 1.000000e+00 : f32
    %210 = vector.broadcast %cst_48 : f32 to vector<8x32xf32>
    %211 = arith.addf %210, %209 : vector<8x32xf32>
    %212 = arith.divf %210, %211 : vector<8x32xf32>
    %213 = vector.extract_strided_slice %206 {offsets = [0, 32], sizes = [8, 32], strides = [1, 1]} : vector<8x128xf32> to vector<8x32xf32>
    %214 = arith.negf %213 : vector<8x32xf32>
    %215 = math.exp %214 : vector<8x32xf32>
    %cst_49 = arith.constant 1.000000e+00 : f32
    %216 = vector.broadcast %cst_49 : f32 to vector<8x32xf32>
    %217 = arith.addf %216, %215 : vector<8x32xf32>
    %218 = arith.divf %216, %217 : vector<8x32xf32>
    %219 = vector.extract_strided_slice %206 {offsets = [0, 64], sizes = [8, 32], strides = [1, 1]} : vector<8x128xf32> to vector<8x32xf32>
    %220 = math.tanh %219 : vector<8x32xf32>
    %221 = vector.extract_strided_slice %206 {offsets = [0, 96], sizes = [8, 32], strides = [1, 1]} : vector<8x128xf32> to vector<8x32xf32>
    %222 = arith.negf %221 : vector<8x32xf32>
    %223 = math.exp %222 : vector<8x32xf32>
    %cst_50 = arith.constant 1.000000e+00 : f32
    %224 = vector.broadcast %cst_50 : f32 to vector<8x32xf32>
    %225 = arith.addf %224, %223 : vector<8x32xf32>
    %226 = arith.divf %224, %225 : vector<8x32xf32>
    %227 = arith.mulf %218, %197 : vector<8x32xf32>
    %228 = arith.mulf %212, %220 : vector<8x32xf32>
    %229 = arith.addf %227, %228 : vector<8x32xf32>
    %230 = math.tanh %229 : vector<8x32xf32>
    %231 = arith.mulf %226, %230 : vector<8x32xf32>
    %c6 = arith.constant 6 : index
    %c0_51 = arith.constant 0 : index
    %c0_52 = arith.constant 0 : index
    %232 = vector.load %arg9[%c6, %c0_51, %c0_52] : memref<8x8x32xf32, #tpu.memory_space<vmem>>, vector<1x8x32xf32>
    %233 = vector.shape_cast %232 : vector<1x8x32xf32> to vector<8x32xf32>
    %234 = vector.shape_cast %231 : vector<8x32xf32> to vector<1x8x32xf32>
    tpu.vector_store %arg9[%c6, %c0_51, %c0_52], %234 {strides = array<i32>} : memref<8x8x32xf32, #tpu.memory_space<vmem>>, vector<1x8x32xf32>,
    %235 = vector.extract_strided_slice %7 {offsets = [7, 0, 0], sizes = [1, 8, 128], strides = [1, 1, 1]} : vector<8x8x128xf32> to vector<1x8x128xf32>
    %236 = vector.shape_cast %235 : vector<1x8x128xf32> to vector<8x128xf32>
    %cst_53 = arith.constant dense<0.000000e+00> : vector<8x128xf32>
    %237 = tpu.matmul %231, %8, %cst_53 {dimension_numbers = #tpu.dot_dimension_numbers<[1], [0], [0], [1], [0, 0, 1, 1], [], []>} : vector<8x32xf32>, vector<32x128xf32>, vector<8x128xf32> -> vector<8x128xf32>
    %238 = arith.addf %236, %237 : vector<8x128xf32>
    %239 = vector.extract_strided_slice %238 {offsets = [0, 0], sizes = [8, 32], strides = [1, 1]} : vector<8x128xf32> to vector<8x32xf32>
    %240 = arith.negf %239 : vector<8x32xf32>
    %241 = math.exp %240 : vector<8x32xf32>
    %cst_54 = arith.constant 1.000000e+00 : f32
    %242 = vector.broadcast %cst_54 : f32 to vector<8x32xf32>
    %243 = arith.addf %242, %241 : vector<8x32xf32>
    %244 = arith.divf %242, %243 : vector<8x32xf32>
    %245 = vector.extract_strided_slice %238 {offsets = [0, 32], sizes = [8, 32], strides = [1, 1]} : vector<8x128xf32> to vector<8x32xf32>
    %246 = arith.negf %245 : vector<8x32xf32>
    %247 = math.exp %246 : vector<8x32xf32>
    %cst_55 = arith.constant 1.000000e+00 : f32
    %248 = vector.broadcast %cst_55 : f32 to vector<8x32xf32>
    %249 = arith.addf %248, %247 : vector<8x32xf32>
    %250 = arith.divf %248, %249 : vector<8x32xf32>
    %251 = vector.extract_strided_slice %238 {offsets = [0, 64], sizes = [8, 32], strides = [1, 1]} : vector<8x128xf32> to vector<8x32xf32>
    %252 = math.tanh %251 : vector<8x32xf32>
    %253 = vector.extract_strided_slice %238 {offsets = [0, 96], sizes = [8, 32], strides = [1, 1]} : vector<8x128xf32> to vector<8x32xf32>
    %254 = arith.negf %253 : vector<8x32xf32>
    %255 = math.exp %254 : vector<8x32xf32>
    %cst_56 = arith.constant 1.000000e+00 : f32
    %256 = vector.broadcast %cst_56 : f32 to vector<8x32xf32>
    %257 = arith.addf %256, %255 : vector<8x32xf32>
    %258 = arith.divf %256, %257 : vector<8x32xf32>
    %259 = arith.mulf %250, %229 : vector<8x32xf32>
    %260 = arith.mulf %244, %252 : vector<8x32xf32>
    %261 = arith.addf %259, %260 : vector<8x32xf32>
    %262 = math.tanh %261 : vector<8x32xf32>
    %263 = arith.mulf %258, %262 : vector<8x32xf32>
    %c7 = arith.constant 7 : index
    %c0_57 = arith.constant 0 : index
    %c0_58 = arith.constant 0 : index
    %264 = vector.load %arg9[%c7, %c0_57, %c0_58] : memref<8x8x32xf32, #tpu.memory_space<vmem>>, vector<1x8x32xf32>
    %265 = vector.shape_cast %264 : vector<1x8x32xf32> to vector<8x32xf32>
    %266 = vector.shape_cast %263 : vector<8x32xf32> to vector<1x8x32xf32>
    tpu.vector_store %arg9[%c7, %c0_57, %c0_58], %266 {strides = array<i32>} : memref<8x8x32xf32, #tpu.memory_space<vmem>>, vector<1x8x32xf32>,
    %c0_59 = arith.constant 0 : index
    %c0_60 = arith.constant 0 : index
    %267 = vector.load %arg7[%c0_59, %c0_60] : memref<8x32xf32, #tpu.memory_space<vmem>>, vector<8x32xf32>
    tpu.vector_store %arg7[%c0_59, %c0_60], %263 {strides = array<i32>} : memref<8x32xf32, #tpu.memory_space<vmem>>, vector<8x32xf32>,
    %c0_61 = arith.constant 0 : index
    %c0_62 = arith.constant 0 : index
    %268 = vector.load %arg8[%c0_61, %c0_62] : memref<8x32xf32, #tpu.memory_space<vmem>>, vector<8x32xf32>
    tpu.vector_store %arg8[%c0_61, %c0_62], %261 {strides = array<i32>} : memref<8x32xf32, #tpu.memory_space<vmem>>, vector<8x32xf32>,
    %c0_63 = arith.constant 0 : index
    %c0_64 = arith.constant 0 : index
    %c0_65 = arith.constant 0 : index
    %269 = vector.load %arg9[%c0_63, %c0_64, %c0_65] : memref<8x8x32xf32, #tpu.memory_space<vmem>>, vector<8x8x32xf32>
    %270 = vector.shape_cast %269 : vector<8x8x32xf32> to vector<64x32xf32>
    %c0_66 = arith.constant 0 : index
    %c0_67 = arith.constant 0 : index
    %271 = vector.load %arg4[%c0_66, %c0_67] : memref<32x64xf32, #tpu.memory_space<vmem>>, vector<32x64xf32>
    %cst_68 = arith.constant dense<0.000000e+00> : vector<64x64xf32>
    %272 = tpu.matmul %270, %271, %cst_68 {dimension_numbers = #tpu.dot_dimension_numbers<[1], [0], [0], [1], [0, 0, 1, 1], [], []>} : vector<64x32xf32>, vector<32x64xf32>, vector<64x64xf32> -> vector<64x64xf32>
    %c0_69 = arith.constant 0 : index
    %c0_70 = arith.constant 0 : index
    %273 = vector.load %arg5[%c0_69, %c0_70] : memref<1x64xf32, #tpu.memory_space<vmem>>, vector<1x64xf32>
    %274 = vector.broadcast %273 : vector<1x64xf32> to vector<64x64xf32>
    %275 = arith.addf %272, %274 : vector<64x64xf32>
    %276 = vector.shape_cast %275 : vector<64x64xf32> to vector<8x8x64xf32>
    %c0_71 = arith.constant 0 : index
    %c0_72 = arith.constant 0 : index
    %c0_73 = arith.constant 0 : index
    %277 = vector.load %arg6[%c0_71, %c0_72, %c0_73] : memref<8x8x64xf32, #tpu.memory_space<vmem>>, vector<8x8x64xf32>
    tpu.vector_store %arg6[%c0_71, %c0_72, %c0_73], %276 {strides = array<i32>} : memref<8x8x64xf32, #tpu.memory_space<vmem>>, vector<8x8x64xf32>,
    return
  }
}

module attributes {stable_mosaic.version = 11 : i64} {
  func.func @kernel(%arg0: memref<8x32xf32, #tpu.memory_space<vmem>>, %arg1: memref<8x32xf32, #tpu.memory_space<vmem>>, %arg2: memref<8x32xf32, #tpu.memory_space<vmem>>, %arg3: memref<8x8x32xf32, #tpu.memory_space<vmem>>, %arg4: memref<8x8x32xf32, #tpu.memory_space<vmem>>, %arg5: memref<8x8x32xf32, #tpu.memory_space<vmem>>, %arg6: memref<8x8x8xf32, #tpu.memory_space<vmem>>, %arg7: memref<64x128xf32, #tpu.memory_space<vmem>>, %arg8: memref<1x128xf32, #tpu.memory_space<vmem>>, %arg9: memref<32x32xf32, #tpu.memory_space<vmem>>, %arg10: memref<1x32xf32, #tpu.memory_space<vmem>>, %arg11: memref<1x32xf32, #tpu.memory_space<vmem>>, %arg12: memref<32x32xf32, #tpu.memory_space<vmem>>, %arg13: memref<1x32xf32, #tpu.memory_space<vmem>>, %arg14: memref<1x32xf32, #tpu.memory_space<vmem>>, %arg15: memref<8x8x8xf32, #tpu.memory_space<vmem>>, %arg16: memref<8x8x8xf32, #tpu.memory_space<vmem>>) attributes {dimension_semantics = [], scalar_prefetch = 0 : i64, scratch_operands = 0 : i64, tpu.core_type = #tpu.core_type<tc>} {
    %c0 = arith.constant 0 : index
    %c0_0 = arith.constant 0 : index
    %c0_1 = arith.constant 0 : index
    %0 = vector.load %arg3[%c0, %c0_0, %c0_1] : memref<8x8x32xf32, #tpu.memory_space<vmem>>, vector<8x8x32xf32>
    %c0_2 = arith.constant 0 : index
    %c0_3 = arith.constant 0 : index
    %c0_4 = arith.constant 0 : index
    %1 = vector.load %arg4[%c0_2, %c0_3, %c0_4] : memref<8x8x32xf32, #tpu.memory_space<vmem>>, vector<8x8x32xf32>
    %c0_5 = arith.constant 0 : index
    %c0_6 = arith.constant 0 : index
    %c0_7 = arith.constant 0 : index
    %2 = vector.load %arg5[%c0_5, %c0_6, %c0_7] : memref<8x8x32xf32, #tpu.memory_space<vmem>>, vector<8x8x32xf32>
    %c0_8 = arith.constant 0 : index
    %c0_9 = arith.constant 0 : index
    %3 = vector.load %arg7[%c0_8, %c0_9] : memref<64x128xf32, #tpu.memory_space<vmem>>, vector<64x128xf32>
    %c0_10 = arith.constant 0 : index
    %c0_11 = arith.constant 0 : index
    %4 = vector.load %arg8[%c0_10, %c0_11] : memref<1x128xf32, #tpu.memory_space<vmem>>, vector<1x128xf32>
    %c0_12 = arith.constant 0 : index
    %c0_13 = arith.constant 0 : index
    %5 = vector.load %arg9[%c0_12, %c0_13] : memref<32x32xf32, #tpu.memory_space<vmem>>, vector<32x32xf32>
    %c0_14 = arith.constant 0 : index
    %c0_15 = arith.constant 0 : index
    %6 = vector.load %arg10[%c0_14, %c0_15] : memref<1x32xf32, #tpu.memory_space<vmem>>, vector<1x32xf32>
    %c0_16 = arith.constant 0 : index
    %c0_17 = arith.constant 0 : index
    %7 = vector.load %arg11[%c0_16, %c0_17] : memref<1x32xf32, #tpu.memory_space<vmem>>, vector<1x32xf32>
    %c0_18 = arith.constant 0 : index
    %c0_19 = arith.constant 0 : index
    %8 = vector.load %arg12[%c0_18, %c0_19] : memref<32x32xf32, #tpu.memory_space<vmem>>, vector<32x32xf32>
    %c0_20 = arith.constant 0 : index
    %c0_21 = arith.constant 0 : index
    %9 = vector.load %arg13[%c0_20, %c0_21] : memref<1x32xf32, #tpu.memory_space<vmem>>, vector<1x32xf32>
    %c0_22 = arith.constant 0 : index
    %c0_23 = arith.constant 0 : index
    %10 = vector.load %arg14[%c0_22, %c0_23] : memref<1x32xf32, #tpu.memory_space<vmem>>, vector<1x32xf32>
    %11 = tpu.iota {dimensions = array<i32: 1>} : vector<8x8xi32>
    %c0_24 = arith.constant 0 : index
    %c0_25 = arith.constant 0 : index
    %12 = vector.load %arg0[%c0_24, %c0_25] : memref<8x32xf32, #tpu.memory_space<vmem>>, vector<8x32xf32>
    %c0_26 = arith.constant 0 : index
    %c0_27 = arith.constant 0 : index
    %13 = vector.load %arg1[%c0_26, %c0_27] : memref<8x32xf32, #tpu.memory_space<vmem>>, vector<8x32xf32>
    %c0_28 = arith.constant 0 : index
    %c0_29 = arith.constant 0 : index
    %14 = vector.load %arg2[%c0_28, %c0_29] : memref<8x32xf32, #tpu.memory_space<vmem>>, vector<8x32xf32>
    %cst = arith.constant 0.000000e+00 : f32
    %15 = vector.broadcast %cst : f32 to vector<8x8xf32>
    %16 = tpu.concatenate %12, %13 in 1 : vector<8x32xf32>, vector<8x32xf32> -> vector<8x64xf32>
    %cst_30 = arith.constant dense<0.000000e+00> : vector<8x128xf32>
    %17 = tpu.matmul %16, %3, %cst_30 {dimension_numbers = #tpu.dot_dimension_numbers<[1], [0], [0], [1], [0, 0, 1, 1], [], []>} : vector<8x64xf32>, vector<64x128xf32>, vector<8x128xf32> -> vector<8x128xf32>
    %18 = vector.broadcast %4 : vector<1x128xf32> to vector<8x128xf32>
    %19 = arith.addf %17, %18 : vector<8x128xf32>
    %20 = vector.extract_strided_slice %19 {offsets = [0, 0], sizes = [8, 32], strides = [1, 1]} : vector<8x128xf32> to vector<8x32xf32>
    %21 = arith.negf %20 : vector<8x32xf32>
    %22 = math.exp %21 : vector<8x32xf32>
    %cst_31 = arith.constant 1.000000e+00 : f32
    %23 = vector.broadcast %cst_31 : f32 to vector<8x32xf32>
    %24 = arith.addf %23, %22 : vector<8x32xf32>
    %25 = arith.divf %23, %24 : vector<8x32xf32>
    %26 = vector.extract_strided_slice %19 {offsets = [0, 32], sizes = [8, 32], strides = [1, 1]} : vector<8x128xf32> to vector<8x32xf32>
    %27 = arith.negf %26 : vector<8x32xf32>
    %28 = math.exp %27 : vector<8x32xf32>
    %cst_32 = arith.constant 1.000000e+00 : f32
    %29 = vector.broadcast %cst_32 : f32 to vector<8x32xf32>
    %30 = arith.addf %29, %28 : vector<8x32xf32>
    %31 = arith.divf %29, %30 : vector<8x32xf32>
    %32 = vector.extract_strided_slice %19 {offsets = [0, 64], sizes = [8, 32], strides = [1, 1]} : vector<8x128xf32> to vector<8x32xf32>
    %33 = math.tanh %32 : vector<8x32xf32>
    %34 = vector.extract_strided_slice %19 {offsets = [0, 96], sizes = [8, 32], strides = [1, 1]} : vector<8x128xf32> to vector<8x32xf32>
    %35 = arith.negf %34 : vector<8x32xf32>
    %36 = math.exp %35 : vector<8x32xf32>
    %cst_33 = arith.constant 1.000000e+00 : f32
    %37 = vector.broadcast %cst_33 : f32 to vector<8x32xf32>
    %38 = arith.addf %37, %36 : vector<8x32xf32>
    %39 = arith.divf %37, %38 : vector<8x32xf32>
    %40 = arith.mulf %31, %14 : vector<8x32xf32>
    %41 = arith.mulf %25, %33 : vector<8x32xf32>
    %42 = arith.addf %40, %41 : vector<8x32xf32>
    %43 = math.tanh %42 : vector<8x32xf32>
    %44 = arith.mulf %39, %43 : vector<8x32xf32>
    %cst_34 = arith.constant dense<0.000000e+00> : vector<8x32xf32>
    %45 = tpu.matmul %44, %5, %cst_34 {dimension_numbers = #tpu.dot_dimension_numbers<[1], [0], [0], [1], [0, 0, 1, 1], [], []>} : vector<8x32xf32>, vector<32x32xf32>, vector<8x32xf32> -> vector<8x32xf32>
    %46 = vector.broadcast %6 : vector<1x32xf32> to vector<8x32xf32>
    %47 = arith.addf %45, %46 : vector<8x32xf32>
    %48 = vector.shape_cast %47 : vector<8x32xf32> to vector<8x1x32xf32>
    %49 = vector.broadcast %48 : vector<8x1x32xf32> to vector<8x8x32xf32>
    %50 = arith.addf %49, %1 : vector<8x8x32xf32>
    %51 = math.tanh %50 : vector<8x8x32xf32>
    %52 = vector.shape_cast %7 : vector<1x32xf32> to vector<1x1x32xf32>
    %53 = vector.broadcast %52 : vector<1x1x32xf32> to vector<8x8x32xf32>
    %54 = arith.mulf %51, %53 : vector<8x8x32xf32>
    %cst_35 = arith.constant dense<0.000000e+00> : vector<8x8xf32>
    %55 = vector.multi_reduction <add>, %54, %cst_35 [2] : vector<8x8x32xf32> to vector<8x8xf32>
    %cst_36 = arith.constant 5.000000e-01 : f32
    %56 = vector.broadcast %cst_36 : f32 to vector<8x8xf32>
    %57 = arith.cmpf ogt, %15, %56 : vector<8x8xf32>
    %cst_37 = arith.constant 0xFF800000 : f32
    %58 = vector.broadcast %cst_37 : f32 to vector<8x8xf32>
    %59 = arith.select %57, %58, %55 : vector<8x8xi1>, vector<8x8xf32>
    %cst_38 = arith.constant dense<0xFF800000> : vector<8xf32>
    %60 = vector.multi_reduction <maximumf>, %59, %cst_38 [1] : vector<8x8xf32> to vector<8xf32>
    %61 = vector.shape_cast %60 : vector<8xf32> to vector<8x1xf32>
    %62 = vector.broadcast %61 : vector<8x1xf32> to vector<8x8xf32>
    %63 = arith.subf %59, %62 : vector<8x8xf32>
    %64 = math.exp %63 : vector<8x8xf32>
    %cst_39 = arith.constant dense<0.000000e+00> : vector<8xf32>
    %65 = vector.multi_reduction <add>, %64, %cst_39 [1] : vector<8x8xf32> to vector<8xf32>
    %66 = vector.shape_cast %65 : vector<8xf32> to vector<8x1xf32>
    %cst_40 = arith.constant 1.000000e+00 : f32
    %67 = vector.broadcast %cst_40 : f32 to vector<8x1xf32>
    %68 = arith.divf %67, %66 : vector<8x1xf32>
    %69 = vector.broadcast %68 : vector<8x1xf32> to vector<8x8xf32>
    %70 = arith.mulf %64, %69 : vector<8x8xf32>
    %71 = vector.shape_cast %70 : vector<8x8xf32> to vector<8x8x1xf32>
    %72 = vector.broadcast %71 : vector<8x8x1xf32> to vector<8x8x32xf32>
    %73 = arith.mulf %72, %1 : vector<8x8x32xf32>
    %cst_41 = arith.constant dense<0.000000e+00> : vector<8x32xf32>
    %74 = vector.multi_reduction <add>, %73, %cst_41 [1] : vector<8x8x32xf32> to vector<8x32xf32>
    %cst_42 = arith.constant dense<0.000000e+00> : vector<8x32xf32>
    %75 = tpu.matmul %74, %8, %cst_42 {dimension_numbers = #tpu.dot_dimension_numbers<[1], [0], [0], [1], [0, 0, 1, 1], [], []>} : vector<8x32xf32>, vector<32x32xf32>, vector<8x32xf32> -> vector<8x32xf32>
    %76 = vector.broadcast %9 : vector<1x32xf32> to vector<8x32xf32>
    %77 = arith.addf %75, %76 : vector<8x32xf32>
    %78 = vector.shape_cast %77 : vector<8x32xf32> to vector<8x1x32xf32>
    %79 = vector.broadcast %78 : vector<8x1x32xf32> to vector<8x8x32xf32>
    %80 = arith.addf %79, %2 : vector<8x8x32xf32>
    %81 = math.tanh %80 : vector<8x8x32xf32>
    %82 = vector.shape_cast %10 : vector<1x32xf32> to vector<1x1x32xf32>
    %83 = vector.broadcast %82 : vector<1x1x32xf32> to vector<8x8x32xf32>
    %84 = arith.mulf %81, %83 : vector<8x8x32xf32>
    %cst_43 = arith.constant dense<0.000000e+00> : vector<8x8xf32>
    %85 = vector.multi_reduction <add>, %84, %cst_43 [2] : vector<8x8x32xf32> to vector<8x8xf32>
    %86 = math.tanh %85 : vector<8x8xf32>
    %cst_44 = arith.constant 1.000000e+01 : f32
    %87 = vector.broadcast %cst_44 : f32 to vector<8x8xf32>
    %88 = arith.mulf %87, %86 : vector<8x8xf32>
    %cst_45 = arith.constant 5.000000e-01 : f32
    %89 = vector.broadcast %cst_45 : f32 to vector<8x8xf32>
    %90 = arith.cmpf ogt, %15, %89 : vector<8x8xf32>
    %cst_46 = arith.constant 0xFF800000 : f32
    %91 = vector.broadcast %cst_46 : f32 to vector<8x8xf32>
    %92 = arith.select %90, %91, %88 : vector<8x8xi1>, vector<8x8xf32>
    %cst_47 = arith.constant dense<0xFF800000> : vector<8xf32>
    %93 = vector.multi_reduction <maximumf>, %92, %cst_47 [1] : vector<8x8xf32> to vector<8xf32>
    %94 = vector.shape_cast %93 : vector<8xf32> to vector<8x1xf32>
    %95 = vector.broadcast %94 : vector<8x1xf32> to vector<8x8xf32>
    %96 = arith.subf %92, %95 : vector<8x8xf32>
    %97 = math.exp %96 : vector<8x8xf32>
    %cst_48 = arith.constant dense<0.000000e+00> : vector<8xf32>
    %98 = vector.multi_reduction <add>, %97, %cst_48 [1] : vector<8x8xf32> to vector<8xf32>
    %99 = vector.shape_cast %98 : vector<8xf32> to vector<8x1xf32>
    %cst_49 = arith.constant 1.000000e+00 : f32
    %100 = vector.broadcast %cst_49 : f32 to vector<8x1xf32>
    %101 = arith.divf %100, %99 : vector<8x1xf32>
    %102 = vector.broadcast %101 : vector<8x1xf32> to vector<8x8xf32>
    %103 = arith.mulf %97, %102 : vector<8x8xf32>
    %c0_50 = arith.constant 0 : index
    %c0_51 = arith.constant 0 : index
    %c0_52 = arith.constant 0 : index
    %104 = vector.load %arg6[%c0_50, %c0_51, %c0_52] : memref<8x8x8xf32, #tpu.memory_space<vmem>>, vector<1x8x8xf32>
    %105 = vector.shape_cast %104 : vector<1x8x8xf32> to vector<8x8xf32>
    %106 = arith.addf %92, %105 : vector<8x8xf32>
    %cst_53 = arith.constant dense<0xFF800000> : vector<8xf32>
    %107 = vector.multi_reduction <maximumf>, %106, %cst_53 [1] : vector<8x8xf32> to vector<8xf32>
    %108 = vector.shape_cast %107 : vector<8xf32> to vector<8x1xf32>
    %109 = vector.broadcast %108 : vector<8x1xf32> to vector<8x8xf32>
    %110 = arith.cmpf oge, %106, %109 : vector<8x8xf32>
    %c8_i32 = arith.constant 8 : i32
    %111 = vector.broadcast %c8_i32 : i32 to vector<8x8xi32>
    %112 = arith.select %110, %11, %111 : vector<8x8xi1>, vector<8x8xi32>
    %cst_54 = arith.constant dense<2147483647> : vector<8xi32>
    %113 = vector.multi_reduction <minsi>, %112, %cst_54 [1] : vector<8x8xi32> to vector<8xi32>
    %114 = vector.shape_cast %113 : vector<8xi32> to vector<8x1xi32>
    %115 = vector.broadcast %114 : vector<8x1xi32> to vector<8x8xi32>
    %116 = arith.cmpi eq, %11, %115 : vector<8x8xi32>
    %117 = arith.extui %116 : vector<8x8xi1> to vector<8x8xi32>
    %118 = arith.sitofp %117 : vector<8x8xi32> to vector<8x8xf32>
    %c0_55 = arith.constant 0 : index
    %c0_56 = arith.constant 0 : index
    %c0_57 = arith.constant 0 : index
    %119 = vector.load %arg15[%c0_55, %c0_56, %c0_57] : memref<8x8x8xf32, #tpu.memory_space<vmem>>, vector<1x8x8xf32>
    %120 = vector.shape_cast %119 : vector<1x8x8xf32> to vector<8x8xf32>
    %121 = vector.shape_cast %103 : vector<8x8xf32> to vector<1x8x8xf32>
    tpu.vector_store %arg15[%c0_55, %c0_56, %c0_57], %121 {strides = array<i32>} : memref<8x8x8xf32, #tpu.memory_space<vmem>>, vector<1x8x8xf32>,
    %c0_58 = arith.constant 0 : index
    %c0_59 = arith.constant 0 : index
    %c0_60 = arith.constant 0 : index
    %122 = vector.load %arg16[%c0_58, %c0_59, %c0_60] : memref<8x8x8xf32, #tpu.memory_space<vmem>>, vector<1x8x8xf32>
    %123 = vector.shape_cast %122 : vector<1x8x8xf32> to vector<8x8xf32>
    %124 = vector.shape_cast %118 : vector<8x8xf32> to vector<1x8x8xf32>
    tpu.vector_store %arg16[%c0_58, %c0_59, %c0_60], %124 {strides = array<i32>} : memref<8x8x8xf32, #tpu.memory_space<vmem>>, vector<1x8x8xf32>,
    %125 = arith.maximumf %15, %118 : vector<8x8xf32>
    %126 = vector.shape_cast %118 : vector<8x8xf32> to vector<8x8x1xf32>
    %127 = vector.broadcast %126 : vector<8x8x1xf32> to vector<8x8x32xf32>
    %128 = arith.mulf %127, %0 : vector<8x8x32xf32>
    %cst_61 = arith.constant dense<0.000000e+00> : vector<8x32xf32>
    %129 = vector.multi_reduction <add>, %128, %cst_61 [1] : vector<8x8x32xf32> to vector<8x32xf32>
    %130 = tpu.concatenate %129, %44 in 1 : vector<8x32xf32>, vector<8x32xf32> -> vector<8x64xf32>
    %cst_62 = arith.constant dense<0.000000e+00> : vector<8x128xf32>
    %131 = tpu.matmul %130, %3, %cst_62 {dimension_numbers = #tpu.dot_dimension_numbers<[1], [0], [0], [1], [0, 0, 1, 1], [], []>} : vector<8x64xf32>, vector<64x128xf32>, vector<8x128xf32> -> vector<8x128xf32>
    %132 = vector.broadcast %4 : vector<1x128xf32> to vector<8x128xf32>
    %133 = arith.addf %131, %132 : vector<8x128xf32>
    %134 = vector.extract_strided_slice %133 {offsets = [0, 0], sizes = [8, 32], strides = [1, 1]} : vector<8x128xf32> to vector<8x32xf32>
    %135 = arith.negf %134 : vector<8x32xf32>
    %136 = math.exp %135 : vector<8x32xf32>
    %cst_63 = arith.constant 1.000000e+00 : f32
    %137 = vector.broadcast %cst_63 : f32 to vector<8x32xf32>
    %138 = arith.addf %137, %136 : vector<8x32xf32>
    %139 = arith.divf %137, %138 : vector<8x32xf32>
    %140 = vector.extract_strided_slice %133 {offsets = [0, 32], sizes = [8, 32], strides = [1, 1]} : vector<8x128xf32> to vector<8x32xf32>
    %141 = arith.negf %140 : vector<8x32xf32>
    %142 = math.exp %141 : vector<8x32xf32>
    %cst_64 = arith.constant 1.000000e+00 : f32
    %143 = vector.broadcast %cst_64 : f32 to vector<8x32xf32>
    %144 = arith.addf %143, %142 : vector<8x32xf32>
    %145 = arith.divf %143, %144 : vector<8x32xf32>
    %146 = vector.extract_strided_slice %133 {offsets = [0, 64], sizes = [8, 32], strides = [1, 1]} : vector<8x128xf32> to vector<8x32xf32>
    %147 = math.tanh %146 : vector<8x32xf32>
    %148 = vector.extract_strided_slice %133 {offsets = [0, 96], sizes = [8, 32], strides = [1, 1]} : vector<8x128xf32> to vector<8x32xf32>
    %149 = arith.negf %148 : vector<8x32xf32>
    %150 = math.exp %149 : vector<8x32xf32>
    %cst_65 = arith.constant 1.000000e+00 : f32
    %151 = vector.broadcast %cst_65 : f32 to vector<8x32xf32>
    %152 = arith.addf %151, %150 : vector<8x32xf32>
    %153 = arith.divf %151, %152 : vector<8x32xf32>
    %154 = arith.mulf %145, %42 : vector<8x32xf32>
    %155 = arith.mulf %139, %147 : vector<8x32xf32>
    %156 = arith.addf %154, %155 : vector<8x32xf32>
    %157 = math.tanh %156 : vector<8x32xf32>
    %158 = arith.mulf %153, %157 : vector<8x32xf32>
    %cst_66 = arith.constant dense<0.000000e+00> : vector<8x32xf32>
    %159 = tpu.matmul %158, %5, %cst_66 {dimension_numbers = #tpu.dot_dimension_numbers<[1], [0], [0], [1], [0, 0, 1, 1], [], []>} : vector<8x32xf32>, vector<32x32xf32>, vector<8x32xf32> -> vector<8x32xf32>
    %160 = vector.broadcast %6 : vector<1x32xf32> to vector<8x32xf32>
    %161 = arith.addf %159, %160 : vector<8x32xf32>
    %162 = vector.shape_cast %161 : vector<8x32xf32> to vector<8x1x32xf32>
    %163 = vector.broadcast %162 : vector<8x1x32xf32> to vector<8x8x32xf32>
    %164 = arith.addf %163, %1 : vector<8x8x32xf32>
    %165 = math.tanh %164 : vector<8x8x32xf32>
    %166 = vector.shape_cast %7 : vector<1x32xf32> to vector<1x1x32xf32>
    %167 = vector.broadcast %166 : vector<1x1x32xf32> to vector<8x8x32xf32>
    %168 = arith.mulf %165, %167 : vector<8x8x32xf32>
    %cst_67 = arith.constant dense<0.000000e+00> : vector<8x8xf32>
    %169 = vector.multi_reduction <add>, %168, %cst_67 [2] : vector<8x8x32xf32> to vector<8x8xf32>
    %cst_68 = arith.constant 5.000000e-01 : f32
    %170 = vector.broadcast %cst_68 : f32 to vector<8x8xf32>
    %171 = arith.cmpf ogt, %125, %170 : vector<8x8xf32>
    %cst_69 = arith.constant 0xFF800000 : f32
    %172 = vector.broadcast %cst_69 : f32 to vector<8x8xf32>
    %173 = arith.select %171, %172, %169 : vector<8x8xi1>, vector<8x8xf32>
    %cst_70 = arith.constant dense<0xFF800000> : vector<8xf32>
    %174 = vector.multi_reduction <maximumf>, %173, %cst_70 [1] : vector<8x8xf32> to vector<8xf32>
    %175 = vector.shape_cast %174 : vector<8xf32> to vector<8x1xf32>
    %176 = vector.broadcast %175 : vector<8x1xf32> to vector<8x8xf32>
    %177 = arith.subf %173, %176 : vector<8x8xf32>
    %178 = math.exp %177 : vector<8x8xf32>
    %cst_71 = arith.constant dense<0.000000e+00> : vector<8xf32>
    %179 = vector.multi_reduction <add>, %178, %cst_71 [1] : vector<8x8xf32> to vector<8xf32>
    %180 = vector.shape_cast %179 : vector<8xf32> to vector<8x1xf32>
    %cst_72 = arith.constant 1.000000e+00 : f32
    %181 = vector.broadcast %cst_72 : f32 to vector<8x1xf32>
    %182 = arith.divf %181, %180 : vector<8x1xf32>
    %183 = vector.broadcast %182 : vector<8x1xf32> to vector<8x8xf32>
    %184 = arith.mulf %178, %183 : vector<8x8xf32>
    %185 = vector.shape_cast %184 : vector<8x8xf32> to vector<8x8x1xf32>
    %186 = vector.broadcast %185 : vector<8x8x1xf32> to vector<8x8x32xf32>
    %187 = arith.mulf %186, %1 : vector<8x8x32xf32>
    %cst_73 = arith.constant dense<0.000000e+00> : vector<8x32xf32>
    %188 = vector.multi_reduction <add>, %187, %cst_73 [1] : vector<8x8x32xf32> to vector<8x32xf32>
    %cst_74 = arith.constant dense<0.000000e+00> : vector<8x32xf32>
    %189 = tpu.matmul %188, %8, %cst_74 {dimension_numbers = #tpu.dot_dimension_numbers<[1], [0], [0], [1], [0, 0, 1, 1], [], []>} : vector<8x32xf32>, vector<32x32xf32>, vector<8x32xf32> -> vector<8x32xf32>
    %190 = vector.broadcast %9 : vector<1x32xf32> to vector<8x32xf32>
    %191 = arith.addf %189, %190 : vector<8x32xf32>
    %192 = vector.shape_cast %191 : vector<8x32xf32> to vector<8x1x32xf32>
    %193 = vector.broadcast %192 : vector<8x1x32xf32> to vector<8x8x32xf32>
    %194 = arith.addf %193, %2 : vector<8x8x32xf32>
    %195 = math.tanh %194 : vector<8x8x32xf32>
    %196 = vector.shape_cast %10 : vector<1x32xf32> to vector<1x1x32xf32>
    %197 = vector.broadcast %196 : vector<1x1x32xf32> to vector<8x8x32xf32>
    %198 = arith.mulf %195, %197 : vector<8x8x32xf32>
    %cst_75 = arith.constant dense<0.000000e+00> : vector<8x8xf32>
    %199 = vector.multi_reduction <add>, %198, %cst_75 [2] : vector<8x8x32xf32> to vector<8x8xf32>
    %200 = math.tanh %199 : vector<8x8xf32>
    %cst_76 = arith.constant 1.000000e+01 : f32
    %201 = vector.broadcast %cst_76 : f32 to vector<8x8xf32>
    %202 = arith.mulf %201, %200 : vector<8x8xf32>
    %cst_77 = arith.constant 5.000000e-01 : f32
    %203 = vector.broadcast %cst_77 : f32 to vector<8x8xf32>
    %204 = arith.cmpf ogt, %125, %203 : vector<8x8xf32>
    %cst_78 = arith.constant 0xFF800000 : f32
    %205 = vector.broadcast %cst_78 : f32 to vector<8x8xf32>
    %206 = arith.select %204, %205, %202 : vector<8x8xi1>, vector<8x8xf32>
    %cst_79 = arith.constant dense<0xFF800000> : vector<8xf32>
    %207 = vector.multi_reduction <maximumf>, %206, %cst_79 [1] : vector<8x8xf32> to vector<8xf32>
    %208 = vector.shape_cast %207 : vector<8xf32> to vector<8x1xf32>
    %209 = vector.broadcast %208 : vector<8x1xf32> to vector<8x8xf32>
    %210 = arith.subf %206, %209 : vector<8x8xf32>
    %211 = math.exp %210 : vector<8x8xf32>
    %cst_80 = arith.constant dense<0.000000e+00> : vector<8xf32>
    %212 = vector.multi_reduction <add>, %211, %cst_80 [1] : vector<8x8xf32> to vector<8xf32>
    %213 = vector.shape_cast %212 : vector<8xf32> to vector<8x1xf32>
    %cst_81 = arith.constant 1.000000e+00 : f32
    %214 = vector.broadcast %cst_81 : f32 to vector<8x1xf32>
    %215 = arith.divf %214, %213 : vector<8x1xf32>
    %216 = vector.broadcast %215 : vector<8x1xf32> to vector<8x8xf32>
    %217 = arith.mulf %211, %216 : vector<8x8xf32>
    %c1 = arith.constant 1 : index
    %c0_82 = arith.constant 0 : index
    %c0_83 = arith.constant 0 : index
    %218 = vector.load %arg6[%c1, %c0_82, %c0_83] : memref<8x8x8xf32, #tpu.memory_space<vmem>>, vector<1x8x8xf32>
    %219 = vector.shape_cast %218 : vector<1x8x8xf32> to vector<8x8xf32>
    %220 = arith.addf %206, %219 : vector<8x8xf32>
    %cst_84 = arith.constant dense<0xFF800000> : vector<8xf32>
    %221 = vector.multi_reduction <maximumf>, %220, %cst_84 [1] : vector<8x8xf32> to vector<8xf32>
    %222 = vector.shape_cast %221 : vector<8xf32> to vector<8x1xf32>
    %223 = vector.broadcast %222 : vector<8x1xf32> to vector<8x8xf32>
    %224 = arith.cmpf oge, %220, %223 : vector<8x8xf32>
    %c8_i32_85 = arith.constant 8 : i32
    %225 = vector.broadcast %c8_i32_85 : i32 to vector<8x8xi32>
    %226 = arith.select %224, %11, %225 : vector<8x8xi1>, vector<8x8xi32>
    %cst_86 = arith.constant dense<2147483647> : vector<8xi32>
    %227 = vector.multi_reduction <minsi>, %226, %cst_86 [1] : vector<8x8xi32> to vector<8xi32>
    %228 = vector.shape_cast %227 : vector<8xi32> to vector<8x1xi32>
    %229 = vector.broadcast %228 : vector<8x1xi32> to vector<8x8xi32>
    %230 = arith.cmpi eq, %11, %229 : vector<8x8xi32>
    %231 = arith.extui %230 : vector<8x8xi1> to vector<8x8xi32>
    %232 = arith.sitofp %231 : vector<8x8xi32> to vector<8x8xf32>
    %c1_87 = arith.constant 1 : index
    %c0_88 = arith.constant 0 : index
    %c0_89 = arith.constant 0 : index
    %233 = vector.load %arg15[%c1_87, %c0_88, %c0_89] : memref<8x8x8xf32, #tpu.memory_space<vmem>>, vector<1x8x8xf32>
    %234 = vector.shape_cast %233 : vector<1x8x8xf32> to vector<8x8xf32>
    %235 = vector.shape_cast %217 : vector<8x8xf32> to vector<1x8x8xf32>
    tpu.vector_store %arg15[%c1_87, %c0_88, %c0_89], %235 {strides = array<i32>} : memref<8x8x8xf32, #tpu.memory_space<vmem>>, vector<1x8x8xf32>,
    %c1_90 = arith.constant 1 : index
    %c0_91 = arith.constant 0 : index
    %c0_92 = arith.constant 0 : index
    %236 = vector.load %arg16[%c1_90, %c0_91, %c0_92] : memref<8x8x8xf32, #tpu.memory_space<vmem>>, vector<1x8x8xf32>
    %237 = vector.shape_cast %236 : vector<1x8x8xf32> to vector<8x8xf32>
    %238 = vector.shape_cast %232 : vector<8x8xf32> to vector<1x8x8xf32>
    tpu.vector_store %arg16[%c1_90, %c0_91, %c0_92], %238 {strides = array<i32>} : memref<8x8x8xf32, #tpu.memory_space<vmem>>, vector<1x8x8xf32>,
    %239 = arith.maximumf %125, %232 : vector<8x8xf32>
    %240 = vector.shape_cast %232 : vector<8x8xf32> to vector<8x8x1xf32>
    %241 = vector.broadcast %240 : vector<8x8x1xf32> to vector<8x8x32xf32>
    %242 = arith.mulf %241, %0 : vector<8x8x32xf32>
    %cst_93 = arith.constant dense<0.000000e+00> : vector<8x32xf32>
    %243 = vector.multi_reduction <add>, %242, %cst_93 [1] : vector<8x8x32xf32> to vector<8x32xf32>
    %244 = tpu.concatenate %243, %158 in 1 : vector<8x32xf32>, vector<8x32xf32> -> vector<8x64xf32>
    %cst_94 = arith.constant dense<0.000000e+00> : vector<8x128xf32>
    %245 = tpu.matmul %244, %3, %cst_94 {dimension_numbers = #tpu.dot_dimension_numbers<[1], [0], [0], [1], [0, 0, 1, 1], [], []>} : vector<8x64xf32>, vector<64x128xf32>, vector<8x128xf32> -> vector<8x128xf32>
    %246 = vector.broadcast %4 : vector<1x128xf32> to vector<8x128xf32>
    %247 = arith.addf %245, %246 : vector<8x128xf32>
    %248 = vector.extract_strided_slice %247 {offsets = [0, 0], sizes = [8, 32], strides = [1, 1]} : vector<8x128xf32> to vector<8x32xf32>
    %249 = arith.negf %248 : vector<8x32xf32>
    %250 = math.exp %249 : vector<8x32xf32>
    %cst_95 = arith.constant 1.000000e+00 : f32
    %251 = vector.broadcast %cst_95 : f32 to vector<8x32xf32>
    %252 = arith.addf %251, %250 : vector<8x32xf32>
    %253 = arith.divf %251, %252 : vector<8x32xf32>
    %254 = vector.extract_strided_slice %247 {offsets = [0, 32], sizes = [8, 32], strides = [1, 1]} : vector<8x128xf32> to vector<8x32xf32>
    %255 = arith.negf %254 : vector<8x32xf32>
    %256 = math.exp %255 : vector<8x32xf32>
    %cst_96 = arith.constant 1.000000e+00 : f32
    %257 = vector.broadcast %cst_96 : f32 to vector<8x32xf32>
    %258 = arith.addf %257, %256 : vector<8x32xf32>
    %259 = arith.divf %257, %258 : vector<8x32xf32>
    %260 = vector.extract_strided_slice %247 {offsets = [0, 64], sizes = [8, 32], strides = [1, 1]} : vector<8x128xf32> to vector<8x32xf32>
    %261 = math.tanh %260 : vector<8x32xf32>
    %262 = vector.extract_strided_slice %247 {offsets = [0, 96], sizes = [8, 32], strides = [1, 1]} : vector<8x128xf32> to vector<8x32xf32>
    %263 = arith.negf %262 : vector<8x32xf32>
    %264 = math.exp %263 : vector<8x32xf32>
    %cst_97 = arith.constant 1.000000e+00 : f32
    %265 = vector.broadcast %cst_97 : f32 to vector<8x32xf32>
    %266 = arith.addf %265, %264 : vector<8x32xf32>
    %267 = arith.divf %265, %266 : vector<8x32xf32>
    %268 = arith.mulf %259, %156 : vector<8x32xf32>
    %269 = arith.mulf %253, %261 : vector<8x32xf32>
    %270 = arith.addf %268, %269 : vector<8x32xf32>
    %271 = math.tanh %270 : vector<8x32xf32>
    %272 = arith.mulf %267, %271 : vector<8x32xf32>
    %cst_98 = arith.constant dense<0.000000e+00> : vector<8x32xf32>
    %273 = tpu.matmul %272, %5, %cst_98 {dimension_numbers = #tpu.dot_dimension_numbers<[1], [0], [0], [1], [0, 0, 1, 1], [], []>} : vector<8x32xf32>, vector<32x32xf32>, vector<8x32xf32> -> vector<8x32xf32>
    %274 = vector.broadcast %6 : vector<1x32xf32> to vector<8x32xf32>
    %275 = arith.addf %273, %274 : vector<8x32xf32>
    %276 = vector.shape_cast %275 : vector<8x32xf32> to vector<8x1x32xf32>
    %277 = vector.broadcast %276 : vector<8x1x32xf32> to vector<8x8x32xf32>
    %278 = arith.addf %277, %1 : vector<8x8x32xf32>
    %279 = math.tanh %278 : vector<8x8x32xf32>
    %280 = vector.shape_cast %7 : vector<1x32xf32> to vector<1x1x32xf32>
    %281 = vector.broadcast %280 : vector<1x1x32xf32> to vector<8x8x32xf32>
    %282 = arith.mulf %279, %281 : vector<8x8x32xf32>
    %cst_99 = arith.constant dense<0.000000e+00> : vector<8x8xf32>
    %283 = vector.multi_reduction <add>, %282, %cst_99 [2] : vector<8x8x32xf32> to vector<8x8xf32>
    %cst_100 = arith.constant 5.000000e-01 : f32
    %284 = vector.broadcast %cst_100 : f32 to vector<8x8xf32>
    %285 = arith.cmpf ogt, %239, %284 : vector<8x8xf32>
    %cst_101 = arith.constant 0xFF800000 : f32
    %286 = vector.broadcast %cst_101 : f32 to vector<8x8xf32>
    %287 = arith.select %285, %286, %283 : vector<8x8xi1>, vector<8x8xf32>
    %cst_102 = arith.constant dense<0xFF800000> : vector<8xf32>
    %288 = vector.multi_reduction <maximumf>, %287, %cst_102 [1] : vector<8x8xf32> to vector<8xf32>
    %289 = vector.shape_cast %288 : vector<8xf32> to vector<8x1xf32>
    %290 = vector.broadcast %289 : vector<8x1xf32> to vector<8x8xf32>
    %291 = arith.subf %287, %290 : vector<8x8xf32>
    %292 = math.exp %291 : vector<8x8xf32>
    %cst_103 = arith.constant dense<0.000000e+00> : vector<8xf32>
    %293 = vector.multi_reduction <add>, %292, %cst_103 [1] : vector<8x8xf32> to vector<8xf32>
    %294 = vector.shape_cast %293 : vector<8xf32> to vector<8x1xf32>
    %cst_104 = arith.constant 1.000000e+00 : f32
    %295 = vector.broadcast %cst_104 : f32 to vector<8x1xf32>
    %296 = arith.divf %295, %294 : vector<8x1xf32>
    %297 = vector.broadcast %296 : vector<8x1xf32> to vector<8x8xf32>
    %298 = arith.mulf %292, %297 : vector<8x8xf32>
    %299 = vector.shape_cast %298 : vector<8x8xf32> to vector<8x8x1xf32>
    %300 = vector.broadcast %299 : vector<8x8x1xf32> to vector<8x8x32xf32>
    %301 = arith.mulf %300, %1 : vector<8x8x32xf32>
    %cst_105 = arith.constant dense<0.000000e+00> : vector<8x32xf32>
    %302 = vector.multi_reduction <add>, %301, %cst_105 [1] : vector<8x8x32xf32> to vector<8x32xf32>
    %cst_106 = arith.constant dense<0.000000e+00> : vector<8x32xf32>
    %303 = tpu.matmul %302, %8, %cst_106 {dimension_numbers = #tpu.dot_dimension_numbers<[1], [0], [0], [1], [0, 0, 1, 1], [], []>} : vector<8x32xf32>, vector<32x32xf32>, vector<8x32xf32> -> vector<8x32xf32>
    %304 = vector.broadcast %9 : vector<1x32xf32> to vector<8x32xf32>
    %305 = arith.addf %303, %304 : vector<8x32xf32>
    %306 = vector.shape_cast %305 : vector<8x32xf32> to vector<8x1x32xf32>
    %307 = vector.broadcast %306 : vector<8x1x32xf32> to vector<8x8x32xf32>
    %308 = arith.addf %307, %2 : vector<8x8x32xf32>
    %309 = math.tanh %308 : vector<8x8x32xf32>
    %310 = vector.shape_cast %10 : vector<1x32xf32> to vector<1x1x32xf32>
    %311 = vector.broadcast %310 : vector<1x1x32xf32> to vector<8x8x32xf32>
    %312 = arith.mulf %309, %311 : vector<8x8x32xf32>
    %cst_107 = arith.constant dense<0.000000e+00> : vector<8x8xf32>
    %313 = vector.multi_reduction <add>, %312, %cst_107 [2] : vector<8x8x32xf32> to vector<8x8xf32>
    %314 = math.tanh %313 : vector<8x8xf32>
    %cst_108 = arith.constant 1.000000e+01 : f32
    %315 = vector.broadcast %cst_108 : f32 to vector<8x8xf32>
    %316 = arith.mulf %315, %314 : vector<8x8xf32>
    %cst_109 = arith.constant 5.000000e-01 : f32
    %317 = vector.broadcast %cst_109 : f32 to vector<8x8xf32>
    %318 = arith.cmpf ogt, %239, %317 : vector<8x8xf32>
    %cst_110 = arith.constant 0xFF800000 : f32
    %319 = vector.broadcast %cst_110 : f32 to vector<8x8xf32>
    %320 = arith.select %318, %319, %316 : vector<8x8xi1>, vector<8x8xf32>
    %cst_111 = arith.constant dense<0xFF800000> : vector<8xf32>
    %321 = vector.multi_reduction <maximumf>, %320, %cst_111 [1] : vector<8x8xf32> to vector<8xf32>
    %322 = vector.shape_cast %321 : vector<8xf32> to vector<8x1xf32>
    %323 = vector.broadcast %322 : vector<8x1xf32> to vector<8x8xf32>
    %324 = arith.subf %320, %323 : vector<8x8xf32>
    %325 = math.exp %324 : vector<8x8xf32>
    %cst_112 = arith.constant dense<0.000000e+00> : vector<8xf32>
    %326 = vector.multi_reduction <add>, %325, %cst_112 [1] : vector<8x8xf32> to vector<8xf32>
    %327 = vector.shape_cast %326 : vector<8xf32> to vector<8x1xf32>
    %cst_113 = arith.constant 1.000000e+00 : f32
    %328 = vector.broadcast %cst_113 : f32 to vector<8x1xf32>
    %329 = arith.divf %328, %327 : vector<8x1xf32>
    %330 = vector.broadcast %329 : vector<8x1xf32> to vector<8x8xf32>
    %331 = arith.mulf %325, %330 : vector<8x8xf32>
    %c2 = arith.constant 2 : index
    %c0_114 = arith.constant 0 : index
    %c0_115 = arith.constant 0 : index
    %332 = vector.load %arg6[%c2, %c0_114, %c0_115] : memref<8x8x8xf32, #tpu.memory_space<vmem>>, vector<1x8x8xf32>
    %333 = vector.shape_cast %332 : vector<1x8x8xf32> to vector<8x8xf32>
    %334 = arith.addf %320, %333 : vector<8x8xf32>
    %cst_116 = arith.constant dense<0xFF800000> : vector<8xf32>
    %335 = vector.multi_reduction <maximumf>, %334, %cst_116 [1] : vector<8x8xf32> to vector<8xf32>
    %336 = vector.shape_cast %335 : vector<8xf32> to vector<8x1xf32>
    %337 = vector.broadcast %336 : vector<8x1xf32> to vector<8x8xf32>
    %338 = arith.cmpf oge, %334, %337 : vector<8x8xf32>
    %c8_i32_117 = arith.constant 8 : i32
    %339 = vector.broadcast %c8_i32_117 : i32 to vector<8x8xi32>
    %340 = arith.select %338, %11, %339 : vector<8x8xi1>, vector<8x8xi32>
    %cst_118 = arith.constant dense<2147483647> : vector<8xi32>
    %341 = vector.multi_reduction <minsi>, %340, %cst_118 [1] : vector<8x8xi32> to vector<8xi32>
    %342 = vector.shape_cast %341 : vector<8xi32> to vector<8x1xi32>
    %343 = vector.broadcast %342 : vector<8x1xi32> to vector<8x8xi32>
    %344 = arith.cmpi eq, %11, %343 : vector<8x8xi32>
    %345 = arith.extui %344 : vector<8x8xi1> to vector<8x8xi32>
    %346 = arith.sitofp %345 : vector<8x8xi32> to vector<8x8xf32>
    %c2_119 = arith.constant 2 : index
    %c0_120 = arith.constant 0 : index
    %c0_121 = arith.constant 0 : index
    %347 = vector.load %arg15[%c2_119, %c0_120, %c0_121] : memref<8x8x8xf32, #tpu.memory_space<vmem>>, vector<1x8x8xf32>
    %348 = vector.shape_cast %347 : vector<1x8x8xf32> to vector<8x8xf32>
    %349 = vector.shape_cast %331 : vector<8x8xf32> to vector<1x8x8xf32>
    tpu.vector_store %arg15[%c2_119, %c0_120, %c0_121], %349 {strides = array<i32>} : memref<8x8x8xf32, #tpu.memory_space<vmem>>, vector<1x8x8xf32>,
    %c2_122 = arith.constant 2 : index
    %c0_123 = arith.constant 0 : index
    %c0_124 = arith.constant 0 : index
    %350 = vector.load %arg16[%c2_122, %c0_123, %c0_124] : memref<8x8x8xf32, #tpu.memory_space<vmem>>, vector<1x8x8xf32>
    %351 = vector.shape_cast %350 : vector<1x8x8xf32> to vector<8x8xf32>
    %352 = vector.shape_cast %346 : vector<8x8xf32> to vector<1x8x8xf32>
    tpu.vector_store %arg16[%c2_122, %c0_123, %c0_124], %352 {strides = array<i32>} : memref<8x8x8xf32, #tpu.memory_space<vmem>>, vector<1x8x8xf32>,
    %353 = arith.maximumf %239, %346 : vector<8x8xf32>
    %354 = vector.shape_cast %346 : vector<8x8xf32> to vector<8x8x1xf32>
    %355 = vector.broadcast %354 : vector<8x8x1xf32> to vector<8x8x32xf32>
    %356 = arith.mulf %355, %0 : vector<8x8x32xf32>
    %cst_125 = arith.constant dense<0.000000e+00> : vector<8x32xf32>
    %357 = vector.multi_reduction <add>, %356, %cst_125 [1] : vector<8x8x32xf32> to vector<8x32xf32>
    %358 = tpu.concatenate %357, %272 in 1 : vector<8x32xf32>, vector<8x32xf32> -> vector<8x64xf32>
    %cst_126 = arith.constant dense<0.000000e+00> : vector<8x128xf32>
    %359 = tpu.matmul %358, %3, %cst_126 {dimension_numbers = #tpu.dot_dimension_numbers<[1], [0], [0], [1], [0, 0, 1, 1], [], []>} : vector<8x64xf32>, vector<64x128xf32>, vector<8x128xf32> -> vector<8x128xf32>
    %360 = vector.broadcast %4 : vector<1x128xf32> to vector<8x128xf32>
    %361 = arith.addf %359, %360 : vector<8x128xf32>
    %362 = vector.extract_strided_slice %361 {offsets = [0, 0], sizes = [8, 32], strides = [1, 1]} : vector<8x128xf32> to vector<8x32xf32>
    %363 = arith.negf %362 : vector<8x32xf32>
    %364 = math.exp %363 : vector<8x32xf32>
    %cst_127 = arith.constant 1.000000e+00 : f32
    %365 = vector.broadcast %cst_127 : f32 to vector<8x32xf32>
    %366 = arith.addf %365, %364 : vector<8x32xf32>
    %367 = arith.divf %365, %366 : vector<8x32xf32>
    %368 = vector.extract_strided_slice %361 {offsets = [0, 32], sizes = [8, 32], strides = [1, 1]} : vector<8x128xf32> to vector<8x32xf32>
    %369 = arith.negf %368 : vector<8x32xf32>
    %370 = math.exp %369 : vector<8x32xf32>
    %cst_128 = arith.constant 1.000000e+00 : f32
    %371 = vector.broadcast %cst_128 : f32 to vector<8x32xf32>
    %372 = arith.addf %371, %370 : vector<8x32xf32>
    %373 = arith.divf %371, %372 : vector<8x32xf32>
    %374 = vector.extract_strided_slice %361 {offsets = [0, 64], sizes = [8, 32], strides = [1, 1]} : vector<8x128xf32> to vector<8x32xf32>
    %375 = math.tanh %374 : vector<8x32xf32>
    %376 = vector.extract_strided_slice %361 {offsets = [0, 96], sizes = [8, 32], strides = [1, 1]} : vector<8x128xf32> to vector<8x32xf32>
    %377 = arith.negf %376 : vector<8x32xf32>
    %378 = math.exp %377 : vector<8x32xf32>
    %cst_129 = arith.constant 1.000000e+00 : f32
    %379 = vector.broadcast %cst_129 : f32 to vector<8x32xf32>
    %380 = arith.addf %379, %378 : vector<8x32xf32>
    %381 = arith.divf %379, %380 : vector<8x32xf32>
    %382 = arith.mulf %373, %270 : vector<8x32xf32>
    %383 = arith.mulf %367, %375 : vector<8x32xf32>
    %384 = arith.addf %382, %383 : vector<8x32xf32>
    %385 = math.tanh %384 : vector<8x32xf32>
    %386 = arith.mulf %381, %385 : vector<8x32xf32>
    %cst_130 = arith.constant dense<0.000000e+00> : vector<8x32xf32>
    %387 = tpu.matmul %386, %5, %cst_130 {dimension_numbers = #tpu.dot_dimension_numbers<[1], [0], [0], [1], [0, 0, 1, 1], [], []>} : vector<8x32xf32>, vector<32x32xf32>, vector<8x32xf32> -> vector<8x32xf32>
    %388 = vector.broadcast %6 : vector<1x32xf32> to vector<8x32xf32>
    %389 = arith.addf %387, %388 : vector<8x32xf32>
    %390 = vector.shape_cast %389 : vector<8x32xf32> to vector<8x1x32xf32>
    %391 = vector.broadcast %390 : vector<8x1x32xf32> to vector<8x8x32xf32>
    %392 = arith.addf %391, %1 : vector<8x8x32xf32>
    %393 = math.tanh %392 : vector<8x8x32xf32>
    %394 = vector.shape_cast %7 : vector<1x32xf32> to vector<1x1x32xf32>
    %395 = vector.broadcast %394 : vector<1x1x32xf32> to vector<8x8x32xf32>
    %396 = arith.mulf %393, %395 : vector<8x8x32xf32>
    %cst_131 = arith.constant dense<0.000000e+00> : vector<8x8xf32>
    %397 = vector.multi_reduction <add>, %396, %cst_131 [2] : vector<8x8x32xf32> to vector<8x8xf32>
    %cst_132 = arith.constant 5.000000e-01 : f32
    %398 = vector.broadcast %cst_132 : f32 to vector<8x8xf32>
    %399 = arith.cmpf ogt, %353, %398 : vector<8x8xf32>
    %cst_133 = arith.constant 0xFF800000 : f32
    %400 = vector.broadcast %cst_133 : f32 to vector<8x8xf32>
    %401 = arith.select %399, %400, %397 : vector<8x8xi1>, vector<8x8xf32>
    %cst_134 = arith.constant dense<0xFF800000> : vector<8xf32>
    %402 = vector.multi_reduction <maximumf>, %401, %cst_134 [1] : vector<8x8xf32> to vector<8xf32>
    %403 = vector.shape_cast %402 : vector<8xf32> to vector<8x1xf32>
    %404 = vector.broadcast %403 : vector<8x1xf32> to vector<8x8xf32>
    %405 = arith.subf %401, %404 : vector<8x8xf32>
    %406 = math.exp %405 : vector<8x8xf32>
    %cst_135 = arith.constant dense<0.000000e+00> : vector<8xf32>
    %407 = vector.multi_reduction <add>, %406, %cst_135 [1] : vector<8x8xf32> to vector<8xf32>
    %408 = vector.shape_cast %407 : vector<8xf32> to vector<8x1xf32>
    %cst_136 = arith.constant 1.000000e+00 : f32
    %409 = vector.broadcast %cst_136 : f32 to vector<8x1xf32>
    %410 = arith.divf %409, %408 : vector<8x1xf32>
    %411 = vector.broadcast %410 : vector<8x1xf32> to vector<8x8xf32>
    %412 = arith.mulf %406, %411 : vector<8x8xf32>
    %413 = vector.shape_cast %412 : vector<8x8xf32> to vector<8x8x1xf32>
    %414 = vector.broadcast %413 : vector<8x8x1xf32> to vector<8x8x32xf32>
    %415 = arith.mulf %414, %1 : vector<8x8x32xf32>
    %cst_137 = arith.constant dense<0.000000e+00> : vector<8x32xf32>
    %416 = vector.multi_reduction <add>, %415, %cst_137 [1] : vector<8x8x32xf32> to vector<8x32xf32>
    %cst_138 = arith.constant dense<0.000000e+00> : vector<8x32xf32>
    %417 = tpu.matmul %416, %8, %cst_138 {dimension_numbers = #tpu.dot_dimension_numbers<[1], [0], [0], [1], [0, 0, 1, 1], [], []>} : vector<8x32xf32>, vector<32x32xf32>, vector<8x32xf32> -> vector<8x32xf32>
    %418 = vector.broadcast %9 : vector<1x32xf32> to vector<8x32xf32>
    %419 = arith.addf %417, %418 : vector<8x32xf32>
    %420 = vector.shape_cast %419 : vector<8x32xf32> to vector<8x1x32xf32>
    %421 = vector.broadcast %420 : vector<8x1x32xf32> to vector<8x8x32xf32>
    %422 = arith.addf %421, %2 : vector<8x8x32xf32>
    %423 = math.tanh %422 : vector<8x8x32xf32>
    %424 = vector.shape_cast %10 : vector<1x32xf32> to vector<1x1x32xf32>
    %425 = vector.broadcast %424 : vector<1x1x32xf32> to vector<8x8x32xf32>
    %426 = arith.mulf %423, %425 : vector<8x8x32xf32>
    %cst_139 = arith.constant dense<0.000000e+00> : vector<8x8xf32>
    %427 = vector.multi_reduction <add>, %426, %cst_139 [2] : vector<8x8x32xf32> to vector<8x8xf32>
    %428 = math.tanh %427 : vector<8x8xf32>
    %cst_140 = arith.constant 1.000000e+01 : f32
    %429 = vector.broadcast %cst_140 : f32 to vector<8x8xf32>
    %430 = arith.mulf %429, %428 : vector<8x8xf32>
    %cst_141 = arith.constant 5.000000e-01 : f32
    %431 = vector.broadcast %cst_141 : f32 to vector<8x8xf32>
    %432 = arith.cmpf ogt, %353, %431 : vector<8x8xf32>
    %cst_142 = arith.constant 0xFF800000 : f32
    %433 = vector.broadcast %cst_142 : f32 to vector<8x8xf32>
    %434 = arith.select %432, %433, %430 : vector<8x8xi1>, vector<8x8xf32>
    %cst_143 = arith.constant dense<0xFF800000> : vector<8xf32>
    %435 = vector.multi_reduction <maximumf>, %434, %cst_143 [1] : vector<8x8xf32> to vector<8xf32>
    %436 = vector.shape_cast %435 : vector<8xf32> to vector<8x1xf32>
    %437 = vector.broadcast %436 : vector<8x1xf32> to vector<8x8xf32>
    %438 = arith.subf %434, %437 : vector<8x8xf32>
    %439 = math.exp %438 : vector<8x8xf32>
    %cst_144 = arith.constant dense<0.000000e+00> : vector<8xf32>
    %440 = vector.multi_reduction <add>, %439, %cst_144 [1] : vector<8x8xf32> to vector<8xf32>
    %441 = vector.shape_cast %440 : vector<8xf32> to vector<8x1xf32>
    %cst_145 = arith.constant 1.000000e+00 : f32
    %442 = vector.broadcast %cst_145 : f32 to vector<8x1xf32>
    %443 = arith.divf %442, %441 : vector<8x1xf32>
    %444 = vector.broadcast %443 : vector<8x1xf32> to vector<8x8xf32>
    %445 = arith.mulf %439, %444 : vector<8x8xf32>
    %c3 = arith.constant 3 : index
    %c0_146 = arith.constant 0 : index
    %c0_147 = arith.constant 0 : index
    %446 = vector.load %arg6[%c3, %c0_146, %c0_147] : memref<8x8x8xf32, #tpu.memory_space<vmem>>, vector<1x8x8xf32>
    %447 = vector.shape_cast %446 : vector<1x8x8xf32> to vector<8x8xf32>
    %448 = arith.addf %434, %447 : vector<8x8xf32>
    %cst_148 = arith.constant dense<0xFF800000> : vector<8xf32>
    %449 = vector.multi_reduction <maximumf>, %448, %cst_148 [1] : vector<8x8xf32> to vector<8xf32>
    %450 = vector.shape_cast %449 : vector<8xf32> to vector<8x1xf32>
    %451 = vector.broadcast %450 : vector<8x1xf32> to vector<8x8xf32>
    %452 = arith.cmpf oge, %448, %451 : vector<8x8xf32>
    %c8_i32_149 = arith.constant 8 : i32
    %453 = vector.broadcast %c8_i32_149 : i32 to vector<8x8xi32>
    %454 = arith.select %452, %11, %453 : vector<8x8xi1>, vector<8x8xi32>
    %cst_150 = arith.constant dense<2147483647> : vector<8xi32>
    %455 = vector.multi_reduction <minsi>, %454, %cst_150 [1] : vector<8x8xi32> to vector<8xi32>
    %456 = vector.shape_cast %455 : vector<8xi32> to vector<8x1xi32>
    %457 = vector.broadcast %456 : vector<8x1xi32> to vector<8x8xi32>
    %458 = arith.cmpi eq, %11, %457 : vector<8x8xi32>
    %459 = arith.extui %458 : vector<8x8xi1> to vector<8x8xi32>
    %460 = arith.sitofp %459 : vector<8x8xi32> to vector<8x8xf32>
    %c3_151 = arith.constant 3 : index
    %c0_152 = arith.constant 0 : index
    %c0_153 = arith.constant 0 : index
    %461 = vector.load %arg15[%c3_151, %c0_152, %c0_153] : memref<8x8x8xf32, #tpu.memory_space<vmem>>, vector<1x8x8xf32>
    %462 = vector.shape_cast %461 : vector<1x8x8xf32> to vector<8x8xf32>
    %463 = vector.shape_cast %445 : vector<8x8xf32> to vector<1x8x8xf32>
    tpu.vector_store %arg15[%c3_151, %c0_152, %c0_153], %463 {strides = array<i32>} : memref<8x8x8xf32, #tpu.memory_space<vmem>>, vector<1x8x8xf32>,
    %c3_154 = arith.constant 3 : index
    %c0_155 = arith.constant 0 : index
    %c0_156 = arith.constant 0 : index
    %464 = vector.load %arg16[%c3_154, %c0_155, %c0_156] : memref<8x8x8xf32, #tpu.memory_space<vmem>>, vector<1x8x8xf32>
    %465 = vector.shape_cast %464 : vector<1x8x8xf32> to vector<8x8xf32>
    %466 = vector.shape_cast %460 : vector<8x8xf32> to vector<1x8x8xf32>
    tpu.vector_store %arg16[%c3_154, %c0_155, %c0_156], %466 {strides = array<i32>} : memref<8x8x8xf32, #tpu.memory_space<vmem>>, vector<1x8x8xf32>,
    %467 = arith.maximumf %353, %460 : vector<8x8xf32>
    %468 = vector.shape_cast %460 : vector<8x8xf32> to vector<8x8x1xf32>
    %469 = vector.broadcast %468 : vector<8x8x1xf32> to vector<8x8x32xf32>
    %470 = arith.mulf %469, %0 : vector<8x8x32xf32>
    %cst_157 = arith.constant dense<0.000000e+00> : vector<8x32xf32>
    %471 = vector.multi_reduction <add>, %470, %cst_157 [1] : vector<8x8x32xf32> to vector<8x32xf32>
    %472 = tpu.concatenate %471, %386 in 1 : vector<8x32xf32>, vector<8x32xf32> -> vector<8x64xf32>
    %cst_158 = arith.constant dense<0.000000e+00> : vector<8x128xf32>
    %473 = tpu.matmul %472, %3, %cst_158 {dimension_numbers = #tpu.dot_dimension_numbers<[1], [0], [0], [1], [0, 0, 1, 1], [], []>} : vector<8x64xf32>, vector<64x128xf32>, vector<8x128xf32> -> vector<8x128xf32>
    %474 = vector.broadcast %4 : vector<1x128xf32> to vector<8x128xf32>
    %475 = arith.addf %473, %474 : vector<8x128xf32>
    %476 = vector.extract_strided_slice %475 {offsets = [0, 0], sizes = [8, 32], strides = [1, 1]} : vector<8x128xf32> to vector<8x32xf32>
    %477 = arith.negf %476 : vector<8x32xf32>
    %478 = math.exp %477 : vector<8x32xf32>
    %cst_159 = arith.constant 1.000000e+00 : f32
    %479 = vector.broadcast %cst_159 : f32 to vector<8x32xf32>
    %480 = arith.addf %479, %478 : vector<8x32xf32>
    %481 = arith.divf %479, %480 : vector<8x32xf32>
    %482 = vector.extract_strided_slice %475 {offsets = [0, 32], sizes = [8, 32], strides = [1, 1]} : vector<8x128xf32> to vector<8x32xf32>
    %483 = arith.negf %482 : vector<8x32xf32>
    %484 = math.exp %483 : vector<8x32xf32>
    %cst_160 = arith.constant 1.000000e+00 : f32
    %485 = vector.broadcast %cst_160 : f32 to vector<8x32xf32>
    %486 = arith.addf %485, %484 : vector<8x32xf32>
    %487 = arith.divf %485, %486 : vector<8x32xf32>
    %488 = vector.extract_strided_slice %475 {offsets = [0, 64], sizes = [8, 32], strides = [1, 1]} : vector<8x128xf32> to vector<8x32xf32>
    %489 = math.tanh %488 : vector<8x32xf32>
    %490 = vector.extract_strided_slice %475 {offsets = [0, 96], sizes = [8, 32], strides = [1, 1]} : vector<8x128xf32> to vector<8x32xf32>
    %491 = arith.negf %490 : vector<8x32xf32>
    %492 = math.exp %491 : vector<8x32xf32>
    %cst_161 = arith.constant 1.000000e+00 : f32
    %493 = vector.broadcast %cst_161 : f32 to vector<8x32xf32>
    %494 = arith.addf %493, %492 : vector<8x32xf32>
    %495 = arith.divf %493, %494 : vector<8x32xf32>
    %496 = arith.mulf %487, %384 : vector<8x32xf32>
    %497 = arith.mulf %481, %489 : vector<8x32xf32>
    %498 = arith.addf %496, %497 : vector<8x32xf32>
    %499 = math.tanh %498 : vector<8x32xf32>
    %500 = arith.mulf %495, %499 : vector<8x32xf32>
    %cst_162 = arith.constant dense<0.000000e+00> : vector<8x32xf32>
    %501 = tpu.matmul %500, %5, %cst_162 {dimension_numbers = #tpu.dot_dimension_numbers<[1], [0], [0], [1], [0, 0, 1, 1], [], []>} : vector<8x32xf32>, vector<32x32xf32>, vector<8x32xf32> -> vector<8x32xf32>
    %502 = vector.broadcast %6 : vector<1x32xf32> to vector<8x32xf32>
    %503 = arith.addf %501, %502 : vector<8x32xf32>
    %504 = vector.shape_cast %503 : vector<8x32xf32> to vector<8x1x32xf32>
    %505 = vector.broadcast %504 : vector<8x1x32xf32> to vector<8x8x32xf32>
    %506 = arith.addf %505, %1 : vector<8x8x32xf32>
    %507 = math.tanh %506 : vector<8x8x32xf32>
    %508 = vector.shape_cast %7 : vector<1x32xf32> to vector<1x1x32xf32>
    %509 = vector.broadcast %508 : vector<1x1x32xf32> to vector<8x8x32xf32>
    %510 = arith.mulf %507, %509 : vector<8x8x32xf32>
    %cst_163 = arith.constant dense<0.000000e+00> : vector<8x8xf32>
    %511 = vector.multi_reduction <add>, %510, %cst_163 [2] : vector<8x8x32xf32> to vector<8x8xf32>
    %cst_164 = arith.constant 5.000000e-01 : f32
    %512 = vector.broadcast %cst_164 : f32 to vector<8x8xf32>
    %513 = arith.cmpf ogt, %467, %512 : vector<8x8xf32>
    %cst_165 = arith.constant 0xFF800000 : f32
    %514 = vector.broadcast %cst_165 : f32 to vector<8x8xf32>
    %515 = arith.select %513, %514, %511 : vector<8x8xi1>, vector<8x8xf32>
    %cst_166 = arith.constant dense<0xFF800000> : vector<8xf32>
    %516 = vector.multi_reduction <maximumf>, %515, %cst_166 [1] : vector<8x8xf32> to vector<8xf32>
    %517 = vector.shape_cast %516 : vector<8xf32> to vector<8x1xf32>
    %518 = vector.broadcast %517 : vector<8x1xf32> to vector<8x8xf32>
    %519 = arith.subf %515, %518 : vector<8x8xf32>
    %520 = math.exp %519 : vector<8x8xf32>
    %cst_167 = arith.constant dense<0.000000e+00> : vector<8xf32>
    %521 = vector.multi_reduction <add>, %520, %cst_167 [1] : vector<8x8xf32> to vector<8xf32>
    %522 = vector.shape_cast %521 : vector<8xf32> to vector<8x1xf32>
    %cst_168 = arith.constant 1.000000e+00 : f32
    %523 = vector.broadcast %cst_168 : f32 to vector<8x1xf32>
    %524 = arith.divf %523, %522 : vector<8x1xf32>
    %525 = vector.broadcast %524 : vector<8x1xf32> to vector<8x8xf32>
    %526 = arith.mulf %520, %525 : vector<8x8xf32>
    %527 = vector.shape_cast %526 : vector<8x8xf32> to vector<8x8x1xf32>
    %528 = vector.broadcast %527 : vector<8x8x1xf32> to vector<8x8x32xf32>
    %529 = arith.mulf %528, %1 : vector<8x8x32xf32>
    %cst_169 = arith.constant dense<0.000000e+00> : vector<8x32xf32>
    %530 = vector.multi_reduction <add>, %529, %cst_169 [1] : vector<8x8x32xf32> to vector<8x32xf32>
    %cst_170 = arith.constant dense<0.000000e+00> : vector<8x32xf32>
    %531 = tpu.matmul %530, %8, %cst_170 {dimension_numbers = #tpu.dot_dimension_numbers<[1], [0], [0], [1], [0, 0, 1, 1], [], []>} : vector<8x32xf32>, vector<32x32xf32>, vector<8x32xf32> -> vector<8x32xf32>
    %532 = vector.broadcast %9 : vector<1x32xf32> to vector<8x32xf32>
    %533 = arith.addf %531, %532 : vector<8x32xf32>
    %534 = vector.shape_cast %533 : vector<8x32xf32> to vector<8x1x32xf32>
    %535 = vector.broadcast %534 : vector<8x1x32xf32> to vector<8x8x32xf32>
    %536 = arith.addf %535, %2 : vector<8x8x32xf32>
    %537 = math.tanh %536 : vector<8x8x32xf32>
    %538 = vector.shape_cast %10 : vector<1x32xf32> to vector<1x1x32xf32>
    %539 = vector.broadcast %538 : vector<1x1x32xf32> to vector<8x8x32xf32>
    %540 = arith.mulf %537, %539 : vector<8x8x32xf32>
    %cst_171 = arith.constant dense<0.000000e+00> : vector<8x8xf32>
    %541 = vector.multi_reduction <add>, %540, %cst_171 [2] : vector<8x8x32xf32> to vector<8x8xf32>
    %542 = math.tanh %541 : vector<8x8xf32>
    %cst_172 = arith.constant 1.000000e+01 : f32
    %543 = vector.broadcast %cst_172 : f32 to vector<8x8xf32>
    %544 = arith.mulf %543, %542 : vector<8x8xf32>
    %cst_173 = arith.constant 5.000000e-01 : f32
    %545 = vector.broadcast %cst_173 : f32 to vector<8x8xf32>
    %546 = arith.cmpf ogt, %467, %545 : vector<8x8xf32>
    %cst_174 = arith.constant 0xFF800000 : f32
    %547 = vector.broadcast %cst_174 : f32 to vector<8x8xf32>
    %548 = arith.select %546, %547, %544 : vector<8x8xi1>, vector<8x8xf32>
    %cst_175 = arith.constant dense<0xFF800000> : vector<8xf32>
    %549 = vector.multi_reduction <maximumf>, %548, %cst_175 [1] : vector<8x8xf32> to vector<8xf32>
    %550 = vector.shape_cast %549 : vector<8xf32> to vector<8x1xf32>
    %551 = vector.broadcast %550 : vector<8x1xf32> to vector<8x8xf32>
    %552 = arith.subf %548, %551 : vector<8x8xf32>
    %553 = math.exp %552 : vector<8x8xf32>
    %cst_176 = arith.constant dense<0.000000e+00> : vector<8xf32>
    %554 = vector.multi_reduction <add>, %553, %cst_176 [1] : vector<8x8xf32> to vector<8xf32>
    %555 = vector.shape_cast %554 : vector<8xf32> to vector<8x1xf32>
    %cst_177 = arith.constant 1.000000e+00 : f32
    %556 = vector.broadcast %cst_177 : f32 to vector<8x1xf32>
    %557 = arith.divf %556, %555 : vector<8x1xf32>
    %558 = vector.broadcast %557 : vector<8x1xf32> to vector<8x8xf32>
    %559 = arith.mulf %553, %558 : vector<8x8xf32>
    %c4 = arith.constant 4 : index
    %c0_178 = arith.constant 0 : index
    %c0_179 = arith.constant 0 : index
    %560 = vector.load %arg6[%c4, %c0_178, %c0_179] : memref<8x8x8xf32, #tpu.memory_space<vmem>>, vector<1x8x8xf32>
    %561 = vector.shape_cast %560 : vector<1x8x8xf32> to vector<8x8xf32>
    %562 = arith.addf %548, %561 : vector<8x8xf32>
    %cst_180 = arith.constant dense<0xFF800000> : vector<8xf32>
    %563 = vector.multi_reduction <maximumf>, %562, %cst_180 [1] : vector<8x8xf32> to vector<8xf32>
    %564 = vector.shape_cast %563 : vector<8xf32> to vector<8x1xf32>
    %565 = vector.broadcast %564 : vector<8x1xf32> to vector<8x8xf32>
    %566 = arith.cmpf oge, %562, %565 : vector<8x8xf32>
    %c8_i32_181 = arith.constant 8 : i32
    %567 = vector.broadcast %c8_i32_181 : i32 to vector<8x8xi32>
    %568 = arith.select %566, %11, %567 : vector<8x8xi1>, vector<8x8xi32>
    %cst_182 = arith.constant dense<2147483647> : vector<8xi32>
    %569 = vector.multi_reduction <minsi>, %568, %cst_182 [1] : vector<8x8xi32> to vector<8xi32>
    %570 = vector.shape_cast %569 : vector<8xi32> to vector<8x1xi32>
    %571 = vector.broadcast %570 : vector<8x1xi32> to vector<8x8xi32>
    %572 = arith.cmpi eq, %11, %571 : vector<8x8xi32>
    %573 = arith.extui %572 : vector<8x8xi1> to vector<8x8xi32>
    %574 = arith.sitofp %573 : vector<8x8xi32> to vector<8x8xf32>
    %c4_183 = arith.constant 4 : index
    %c0_184 = arith.constant 0 : index
    %c0_185 = arith.constant 0 : index
    %575 = vector.load %arg15[%c4_183, %c0_184, %c0_185] : memref<8x8x8xf32, #tpu.memory_space<vmem>>, vector<1x8x8xf32>
    %576 = vector.shape_cast %575 : vector<1x8x8xf32> to vector<8x8xf32>
    %577 = vector.shape_cast %559 : vector<8x8xf32> to vector<1x8x8xf32>
    tpu.vector_store %arg15[%c4_183, %c0_184, %c0_185], %577 {strides = array<i32>} : memref<8x8x8xf32, #tpu.memory_space<vmem>>, vector<1x8x8xf32>,
    %c4_186 = arith.constant 4 : index
    %c0_187 = arith.constant 0 : index
    %c0_188 = arith.constant 0 : index
    %578 = vector.load %arg16[%c4_186, %c0_187, %c0_188] : memref<8x8x8xf32, #tpu.memory_space<vmem>>, vector<1x8x8xf32>
    %579 = vector.shape_cast %578 : vector<1x8x8xf32> to vector<8x8xf32>
    %580 = vector.shape_cast %574 : vector<8x8xf32> to vector<1x8x8xf32>
    tpu.vector_store %arg16[%c4_186, %c0_187, %c0_188], %580 {strides = array<i32>} : memref<8x8x8xf32, #tpu.memory_space<vmem>>, vector<1x8x8xf32>,
    %581 = arith.maximumf %467, %574 : vector<8x8xf32>
    %582 = vector.shape_cast %574 : vector<8x8xf32> to vector<8x8x1xf32>
    %583 = vector.broadcast %582 : vector<8x8x1xf32> to vector<8x8x32xf32>
    %584 = arith.mulf %583, %0 : vector<8x8x32xf32>
    %cst_189 = arith.constant dense<0.000000e+00> : vector<8x32xf32>
    %585 = vector.multi_reduction <add>, %584, %cst_189 [1] : vector<8x8x32xf32> to vector<8x32xf32>
    %586 = tpu.concatenate %585, %500 in 1 : vector<8x32xf32>, vector<8x32xf32> -> vector<8x64xf32>
    %cst_190 = arith.constant dense<0.000000e+00> : vector<8x128xf32>
    %587 = tpu.matmul %586, %3, %cst_190 {dimension_numbers = #tpu.dot_dimension_numbers<[1], [0], [0], [1], [0, 0, 1, 1], [], []>} : vector<8x64xf32>, vector<64x128xf32>, vector<8x128xf32> -> vector<8x128xf32>
    %588 = vector.broadcast %4 : vector<1x128xf32> to vector<8x128xf32>
    %589 = arith.addf %587, %588 : vector<8x128xf32>
    %590 = vector.extract_strided_slice %589 {offsets = [0, 0], sizes = [8, 32], strides = [1, 1]} : vector<8x128xf32> to vector<8x32xf32>
    %591 = arith.negf %590 : vector<8x32xf32>
    %592 = math.exp %591 : vector<8x32xf32>
    %cst_191 = arith.constant 1.000000e+00 : f32
    %593 = vector.broadcast %cst_191 : f32 to vector<8x32xf32>
    %594 = arith.addf %593, %592 : vector<8x32xf32>
    %595 = arith.divf %593, %594 : vector<8x32xf32>
    %596 = vector.extract_strided_slice %589 {offsets = [0, 32], sizes = [8, 32], strides = [1, 1]} : vector<8x128xf32> to vector<8x32xf32>
    %597 = arith.negf %596 : vector<8x32xf32>
    %598 = math.exp %597 : vector<8x32xf32>
    %cst_192 = arith.constant 1.000000e+00 : f32
    %599 = vector.broadcast %cst_192 : f32 to vector<8x32xf32>
    %600 = arith.addf %599, %598 : vector<8x32xf32>
    %601 = arith.divf %599, %600 : vector<8x32xf32>
    %602 = vector.extract_strided_slice %589 {offsets = [0, 64], sizes = [8, 32], strides = [1, 1]} : vector<8x128xf32> to vector<8x32xf32>
    %603 = math.tanh %602 : vector<8x32xf32>
    %604 = vector.extract_strided_slice %589 {offsets = [0, 96], sizes = [8, 32], strides = [1, 1]} : vector<8x128xf32> to vector<8x32xf32>
    %605 = arith.negf %604 : vector<8x32xf32>
    %606 = math.exp %605 : vector<8x32xf32>
    %cst_193 = arith.constant 1.000000e+00 : f32
    %607 = vector.broadcast %cst_193 : f32 to vector<8x32xf32>
    %608 = arith.addf %607, %606 : vector<8x32xf32>
    %609 = arith.divf %607, %608 : vector<8x32xf32>
    %610 = arith.mulf %601, %498 : vector<8x32xf32>
    %611 = arith.mulf %595, %603 : vector<8x32xf32>
    %612 = arith.addf %610, %611 : vector<8x32xf32>
    %613 = math.tanh %612 : vector<8x32xf32>
    %614 = arith.mulf %609, %613 : vector<8x32xf32>
    %cst_194 = arith.constant dense<0.000000e+00> : vector<8x32xf32>
    %615 = tpu.matmul %614, %5, %cst_194 {dimension_numbers = #tpu.dot_dimension_numbers<[1], [0], [0], [1], [0, 0, 1, 1], [], []>} : vector<8x32xf32>, vector<32x32xf32>, vector<8x32xf32> -> vector<8x32xf32>
    %616 = vector.broadcast %6 : vector<1x32xf32> to vector<8x32xf32>
    %617 = arith.addf %615, %616 : vector<8x32xf32>
    %618 = vector.shape_cast %617 : vector<8x32xf32> to vector<8x1x32xf32>
    %619 = vector.broadcast %618 : vector<8x1x32xf32> to vector<8x8x32xf32>
    %620 = arith.addf %619, %1 : vector<8x8x32xf32>
    %621 = math.tanh %620 : vector<8x8x32xf32>
    %622 = vector.shape_cast %7 : vector<1x32xf32> to vector<1x1x32xf32>
    %623 = vector.broadcast %622 : vector<1x1x32xf32> to vector<8x8x32xf32>
    %624 = arith.mulf %621, %623 : vector<8x8x32xf32>
    %cst_195 = arith.constant dense<0.000000e+00> : vector<8x8xf32>
    %625 = vector.multi_reduction <add>, %624, %cst_195 [2] : vector<8x8x32xf32> to vector<8x8xf32>
    %cst_196 = arith.constant 5.000000e-01 : f32
    %626 = vector.broadcast %cst_196 : f32 to vector<8x8xf32>
    %627 = arith.cmpf ogt, %581, %626 : vector<8x8xf32>
    %cst_197 = arith.constant 0xFF800000 : f32
    %628 = vector.broadcast %cst_197 : f32 to vector<8x8xf32>
    %629 = arith.select %627, %628, %625 : vector<8x8xi1>, vector<8x8xf32>
    %cst_198 = arith.constant dense<0xFF800000> : vector<8xf32>
    %630 = vector.multi_reduction <maximumf>, %629, %cst_198 [1] : vector<8x8xf32> to vector<8xf32>
    %631 = vector.shape_cast %630 : vector<8xf32> to vector<8x1xf32>
    %632 = vector.broadcast %631 : vector<8x1xf32> to vector<8x8xf32>
    %633 = arith.subf %629, %632 : vector<8x8xf32>
    %634 = math.exp %633 : vector<8x8xf32>
    %cst_199 = arith.constant dense<0.000000e+00> : vector<8xf32>
    %635 = vector.multi_reduction <add>, %634, %cst_199 [1] : vector<8x8xf32> to vector<8xf32>
    %636 = vector.shape_cast %635 : vector<8xf32> to vector<8x1xf32>
    %cst_200 = arith.constant 1.000000e+00 : f32
    %637 = vector.broadcast %cst_200 : f32 to vector<8x1xf32>
    %638 = arith.divf %637, %636 : vector<8x1xf32>
    %639 = vector.broadcast %638 : vector<8x1xf32> to vector<8x8xf32>
    %640 = arith.mulf %634, %639 : vector<8x8xf32>
    %641 = vector.shape_cast %640 : vector<8x8xf32> to vector<8x8x1xf32>
    %642 = vector.broadcast %641 : vector<8x8x1xf32> to vector<8x8x32xf32>
    %643 = arith.mulf %642, %1 : vector<8x8x32xf32>
    %cst_201 = arith.constant dense<0.000000e+00> : vector<8x32xf32>
    %644 = vector.multi_reduction <add>, %643, %cst_201 [1] : vector<8x8x32xf32> to vector<8x32xf32>
    %cst_202 = arith.constant dense<0.000000e+00> : vector<8x32xf32>
    %645 = tpu.matmul %644, %8, %cst_202 {dimension_numbers = #tpu.dot_dimension_numbers<[1], [0], [0], [1], [0, 0, 1, 1], [], []>} : vector<8x32xf32>, vector<32x32xf32>, vector<8x32xf32> -> vector<8x32xf32>
    %646 = vector.broadcast %9 : vector<1x32xf32> to vector<8x32xf32>
    %647 = arith.addf %645, %646 : vector<8x32xf32>
    %648 = vector.shape_cast %647 : vector<8x32xf32> to vector<8x1x32xf32>
    %649 = vector.broadcast %648 : vector<8x1x32xf32> to vector<8x8x32xf32>
    %650 = arith.addf %649, %2 : vector<8x8x32xf32>
    %651 = math.tanh %650 : vector<8x8x32xf32>
    %652 = vector.shape_cast %10 : vector<1x32xf32> to vector<1x1x32xf32>
    %653 = vector.broadcast %652 : vector<1x1x32xf32> to vector<8x8x32xf32>
    %654 = arith.mulf %651, %653 : vector<8x8x32xf32>
    %cst_203 = arith.constant dense<0.000000e+00> : vector<8x8xf32>
    %655 = vector.multi_reduction <add>, %654, %cst_203 [2] : vector<8x8x32xf32> to vector<8x8xf32>
    %656 = math.tanh %655 : vector<8x8xf32>
    %cst_204 = arith.constant 1.000000e+01 : f32
    %657 = vector.broadcast %cst_204 : f32 to vector<8x8xf32>
    %658 = arith.mulf %657, %656 : vector<8x8xf32>
    %cst_205 = arith.constant 5.000000e-01 : f32
    %659 = vector.broadcast %cst_205 : f32 to vector<8x8xf32>
    %660 = arith.cmpf ogt, %581, %659 : vector<8x8xf32>
    %cst_206 = arith.constant 0xFF800000 : f32
    %661 = vector.broadcast %cst_206 : f32 to vector<8x8xf32>
    %662 = arith.select %660, %661, %658 : vector<8x8xi1>, vector<8x8xf32>
    %cst_207 = arith.constant dense<0xFF800000> : vector<8xf32>
    %663 = vector.multi_reduction <maximumf>, %662, %cst_207 [1] : vector<8x8xf32> to vector<8xf32>
    %664 = vector.shape_cast %663 : vector<8xf32> to vector<8x1xf32>
    %665 = vector.broadcast %664 : vector<8x1xf32> to vector<8x8xf32>
    %666 = arith.subf %662, %665 : vector<8x8xf32>
    %667 = math.exp %666 : vector<8x8xf32>
    %cst_208 = arith.constant dense<0.000000e+00> : vector<8xf32>
    %668 = vector.multi_reduction <add>, %667, %cst_208 [1] : vector<8x8xf32> to vector<8xf32>
    %669 = vector.shape_cast %668 : vector<8xf32> to vector<8x1xf32>
    %cst_209 = arith.constant 1.000000e+00 : f32
    %670 = vector.broadcast %cst_209 : f32 to vector<8x1xf32>
    %671 = arith.divf %670, %669 : vector<8x1xf32>
    %672 = vector.broadcast %671 : vector<8x1xf32> to vector<8x8xf32>
    %673 = arith.mulf %667, %672 : vector<8x8xf32>
    %c5 = arith.constant 5 : index
    %c0_210 = arith.constant 0 : index
    %c0_211 = arith.constant 0 : index
    %674 = vector.load %arg6[%c5, %c0_210, %c0_211] : memref<8x8x8xf32, #tpu.memory_space<vmem>>, vector<1x8x8xf32>
    %675 = vector.shape_cast %674 : vector<1x8x8xf32> to vector<8x8xf32>
    %676 = arith.addf %662, %675 : vector<8x8xf32>
    %cst_212 = arith.constant dense<0xFF800000> : vector<8xf32>
    %677 = vector.multi_reduction <maximumf>, %676, %cst_212 [1] : vector<8x8xf32> to vector<8xf32>
    %678 = vector.shape_cast %677 : vector<8xf32> to vector<8x1xf32>
    %679 = vector.broadcast %678 : vector<8x1xf32> to vector<8x8xf32>
    %680 = arith.cmpf oge, %676, %679 : vector<8x8xf32>
    %c8_i32_213 = arith.constant 8 : i32
    %681 = vector.broadcast %c8_i32_213 : i32 to vector<8x8xi32>
    %682 = arith.select %680, %11, %681 : vector<8x8xi1>, vector<8x8xi32>
    %cst_214 = arith.constant dense<2147483647> : vector<8xi32>
    %683 = vector.multi_reduction <minsi>, %682, %cst_214 [1] : vector<8x8xi32> to vector<8xi32>
    %684 = vector.shape_cast %683 : vector<8xi32> to vector<8x1xi32>
    %685 = vector.broadcast %684 : vector<8x1xi32> to vector<8x8xi32>
    %686 = arith.cmpi eq, %11, %685 : vector<8x8xi32>
    %687 = arith.extui %686 : vector<8x8xi1> to vector<8x8xi32>
    %688 = arith.sitofp %687 : vector<8x8xi32> to vector<8x8xf32>
    %c5_215 = arith.constant 5 : index
    %c0_216 = arith.constant 0 : index
    %c0_217 = arith.constant 0 : index
    %689 = vector.load %arg15[%c5_215, %c0_216, %c0_217] : memref<8x8x8xf32, #tpu.memory_space<vmem>>, vector<1x8x8xf32>
    %690 = vector.shape_cast %689 : vector<1x8x8xf32> to vector<8x8xf32>
    %691 = vector.shape_cast %673 : vector<8x8xf32> to vector<1x8x8xf32>
    tpu.vector_store %arg15[%c5_215, %c0_216, %c0_217], %691 {strides = array<i32>} : memref<8x8x8xf32, #tpu.memory_space<vmem>>, vector<1x8x8xf32>,
    %c5_218 = arith.constant 5 : index
    %c0_219 = arith.constant 0 : index
    %c0_220 = arith.constant 0 : index
    %692 = vector.load %arg16[%c5_218, %c0_219, %c0_220] : memref<8x8x8xf32, #tpu.memory_space<vmem>>, vector<1x8x8xf32>
    %693 = vector.shape_cast %692 : vector<1x8x8xf32> to vector<8x8xf32>
    %694 = vector.shape_cast %688 : vector<8x8xf32> to vector<1x8x8xf32>
    tpu.vector_store %arg16[%c5_218, %c0_219, %c0_220], %694 {strides = array<i32>} : memref<8x8x8xf32, #tpu.memory_space<vmem>>, vector<1x8x8xf32>,
    %695 = arith.maximumf %581, %688 : vector<8x8xf32>
    %696 = vector.shape_cast %688 : vector<8x8xf32> to vector<8x8x1xf32>
    %697 = vector.broadcast %696 : vector<8x8x1xf32> to vector<8x8x32xf32>
    %698 = arith.mulf %697, %0 : vector<8x8x32xf32>
    %cst_221 = arith.constant dense<0.000000e+00> : vector<8x32xf32>
    %699 = vector.multi_reduction <add>, %698, %cst_221 [1] : vector<8x8x32xf32> to vector<8x32xf32>
    %700 = tpu.concatenate %699, %614 in 1 : vector<8x32xf32>, vector<8x32xf32> -> vector<8x64xf32>
    %cst_222 = arith.constant dense<0.000000e+00> : vector<8x128xf32>
    %701 = tpu.matmul %700, %3, %cst_222 {dimension_numbers = #tpu.dot_dimension_numbers<[1], [0], [0], [1], [0, 0, 1, 1], [], []>} : vector<8x64xf32>, vector<64x128xf32>, vector<8x128xf32> -> vector<8x128xf32>
    %702 = vector.broadcast %4 : vector<1x128xf32> to vector<8x128xf32>
    %703 = arith.addf %701, %702 : vector<8x128xf32>
    %704 = vector.extract_strided_slice %703 {offsets = [0, 0], sizes = [8, 32], strides = [1, 1]} : vector<8x128xf32> to vector<8x32xf32>
    %705 = arith.negf %704 : vector<8x32xf32>
    %706 = math.exp %705 : vector<8x32xf32>
    %cst_223 = arith.constant 1.000000e+00 : f32
    %707 = vector.broadcast %cst_223 : f32 to vector<8x32xf32>
    %708 = arith.addf %707, %706 : vector<8x32xf32>
    %709 = arith.divf %707, %708 : vector<8x32xf32>
    %710 = vector.extract_strided_slice %703 {offsets = [0, 32], sizes = [8, 32], strides = [1, 1]} : vector<8x128xf32> to vector<8x32xf32>
    %711 = arith.negf %710 : vector<8x32xf32>
    %712 = math.exp %711 : vector<8x32xf32>
    %cst_224 = arith.constant 1.000000e+00 : f32
    %713 = vector.broadcast %cst_224 : f32 to vector<8x32xf32>
    %714 = arith.addf %713, %712 : vector<8x32xf32>
    %715 = arith.divf %713, %714 : vector<8x32xf32>
    %716 = vector.extract_strided_slice %703 {offsets = [0, 64], sizes = [8, 32], strides = [1, 1]} : vector<8x128xf32> to vector<8x32xf32>
    %717 = math.tanh %716 : vector<8x32xf32>
    %718 = vector.extract_strided_slice %703 {offsets = [0, 96], sizes = [8, 32], strides = [1, 1]} : vector<8x128xf32> to vector<8x32xf32>
    %719 = arith.negf %718 : vector<8x32xf32>
    %720 = math.exp %719 : vector<8x32xf32>
    %cst_225 = arith.constant 1.000000e+00 : f32
    %721 = vector.broadcast %cst_225 : f32 to vector<8x32xf32>
    %722 = arith.addf %721, %720 : vector<8x32xf32>
    %723 = arith.divf %721, %722 : vector<8x32xf32>
    %724 = arith.mulf %715, %612 : vector<8x32xf32>
    %725 = arith.mulf %709, %717 : vector<8x32xf32>
    %726 = arith.addf %724, %725 : vector<8x32xf32>
    %727 = math.tanh %726 : vector<8x32xf32>
    %728 = arith.mulf %723, %727 : vector<8x32xf32>
    %cst_226 = arith.constant dense<0.000000e+00> : vector<8x32xf32>
    %729 = tpu.matmul %728, %5, %cst_226 {dimension_numbers = #tpu.dot_dimension_numbers<[1], [0], [0], [1], [0, 0, 1, 1], [], []>} : vector<8x32xf32>, vector<32x32xf32>, vector<8x32xf32> -> vector<8x32xf32>
    %730 = vector.broadcast %6 : vector<1x32xf32> to vector<8x32xf32>
    %731 = arith.addf %729, %730 : vector<8x32xf32>
    %732 = vector.shape_cast %731 : vector<8x32xf32> to vector<8x1x32xf32>
    %733 = vector.broadcast %732 : vector<8x1x32xf32> to vector<8x8x32xf32>
    %734 = arith.addf %733, %1 : vector<8x8x32xf32>
    %735 = math.tanh %734 : vector<8x8x32xf32>
    %736 = vector.shape_cast %7 : vector<1x32xf32> to vector<1x1x32xf32>
    %737 = vector.broadcast %736 : vector<1x1x32xf32> to vector<8x8x32xf32>
    %738 = arith.mulf %735, %737 : vector<8x8x32xf32>
    %cst_227 = arith.constant dense<0.000000e+00> : vector<8x8xf32>
    %739 = vector.multi_reduction <add>, %738, %cst_227 [2] : vector<8x8x32xf32> to vector<8x8xf32>
    %cst_228 = arith.constant 5.000000e-01 : f32
    %740 = vector.broadcast %cst_228 : f32 to vector<8x8xf32>
    %741 = arith.cmpf ogt, %695, %740 : vector<8x8xf32>
    %cst_229 = arith.constant 0xFF800000 : f32
    %742 = vector.broadcast %cst_229 : f32 to vector<8x8xf32>
    %743 = arith.select %741, %742, %739 : vector<8x8xi1>, vector<8x8xf32>
    %cst_230 = arith.constant dense<0xFF800000> : vector<8xf32>
    %744 = vector.multi_reduction <maximumf>, %743, %cst_230 [1] : vector<8x8xf32> to vector<8xf32>
    %745 = vector.shape_cast %744 : vector<8xf32> to vector<8x1xf32>
    %746 = vector.broadcast %745 : vector<8x1xf32> to vector<8x8xf32>
    %747 = arith.subf %743, %746 : vector<8x8xf32>
    %748 = math.exp %747 : vector<8x8xf32>
    %cst_231 = arith.constant dense<0.000000e+00> : vector<8xf32>
    %749 = vector.multi_reduction <add>, %748, %cst_231 [1] : vector<8x8xf32> to vector<8xf32>
    %750 = vector.shape_cast %749 : vector<8xf32> to vector<8x1xf32>
    %cst_232 = arith.constant 1.000000e+00 : f32
    %751 = vector.broadcast %cst_232 : f32 to vector<8x1xf32>
    %752 = arith.divf %751, %750 : vector<8x1xf32>
    %753 = vector.broadcast %752 : vector<8x1xf32> to vector<8x8xf32>
    %754 = arith.mulf %748, %753 : vector<8x8xf32>
    %755 = vector.shape_cast %754 : vector<8x8xf32> to vector<8x8x1xf32>
    %756 = vector.broadcast %755 : vector<8x8x1xf32> to vector<8x8x32xf32>
    %757 = arith.mulf %756, %1 : vector<8x8x32xf32>
    %cst_233 = arith.constant dense<0.000000e+00> : vector<8x32xf32>
    %758 = vector.multi_reduction <add>, %757, %cst_233 [1] : vector<8x8x32xf32> to vector<8x32xf32>
    %cst_234 = arith.constant dense<0.000000e+00> : vector<8x32xf32>
    %759 = tpu.matmul %758, %8, %cst_234 {dimension_numbers = #tpu.dot_dimension_numbers<[1], [0], [0], [1], [0, 0, 1, 1], [], []>} : vector<8x32xf32>, vector<32x32xf32>, vector<8x32xf32> -> vector<8x32xf32>
    %760 = vector.broadcast %9 : vector<1x32xf32> to vector<8x32xf32>
    %761 = arith.addf %759, %760 : vector<8x32xf32>
    %762 = vector.shape_cast %761 : vector<8x32xf32> to vector<8x1x32xf32>
    %763 = vector.broadcast %762 : vector<8x1x32xf32> to vector<8x8x32xf32>
    %764 = arith.addf %763, %2 : vector<8x8x32xf32>
    %765 = math.tanh %764 : vector<8x8x32xf32>
    %766 = vector.shape_cast %10 : vector<1x32xf32> to vector<1x1x32xf32>
    %767 = vector.broadcast %766 : vector<1x1x32xf32> to vector<8x8x32xf32>
    %768 = arith.mulf %765, %767 : vector<8x8x32xf32>
    %cst_235 = arith.constant dense<0.000000e+00> : vector<8x8xf32>
    %769 = vector.multi_reduction <add>, %768, %cst_235 [2] : vector<8x8x32xf32> to vector<8x8xf32>
    %770 = math.tanh %769 : vector<8x8xf32>
    %cst_236 = arith.constant 1.000000e+01 : f32
    %771 = vector.broadcast %cst_236 : f32 to vector<8x8xf32>
    %772 = arith.mulf %771, %770 : vector<8x8xf32>
    %cst_237 = arith.constant 5.000000e-01 : f32
    %773 = vector.broadcast %cst_237 : f32 to vector<8x8xf32>
    %774 = arith.cmpf ogt, %695, %773 : vector<8x8xf32>
    %cst_238 = arith.constant 0xFF800000 : f32
    %775 = vector.broadcast %cst_238 : f32 to vector<8x8xf32>
    %776 = arith.select %774, %775, %772 : vector<8x8xi1>, vector<8x8xf32>
    %cst_239 = arith.constant dense<0xFF800000> : vector<8xf32>
    %777 = vector.multi_reduction <maximumf>, %776, %cst_239 [1] : vector<8x8xf32> to vector<8xf32>
    %778 = vector.shape_cast %777 : vector<8xf32> to vector<8x1xf32>
    %779 = vector.broadcast %778 : vector<8x1xf32> to vector<8x8xf32>
    %780 = arith.subf %776, %779 : vector<8x8xf32>
    %781 = math.exp %780 : vector<8x8xf32>
    %cst_240 = arith.constant dense<0.000000e+00> : vector<8xf32>
    %782 = vector.multi_reduction <add>, %781, %cst_240 [1] : vector<8x8xf32> to vector<8xf32>
    %783 = vector.shape_cast %782 : vector<8xf32> to vector<8x1xf32>
    %cst_241 = arith.constant 1.000000e+00 : f32
    %784 = vector.broadcast %cst_241 : f32 to vector<8x1xf32>
    %785 = arith.divf %784, %783 : vector<8x1xf32>
    %786 = vector.broadcast %785 : vector<8x1xf32> to vector<8x8xf32>
    %787 = arith.mulf %781, %786 : vector<8x8xf32>
    %c6 = arith.constant 6 : index
    %c0_242 = arith.constant 0 : index
    %c0_243 = arith.constant 0 : index
    %788 = vector.load %arg6[%c6, %c0_242, %c0_243] : memref<8x8x8xf32, #tpu.memory_space<vmem>>, vector<1x8x8xf32>
    %789 = vector.shape_cast %788 : vector<1x8x8xf32> to vector<8x8xf32>
    %790 = arith.addf %776, %789 : vector<8x8xf32>
    %cst_244 = arith.constant dense<0xFF800000> : vector<8xf32>
    %791 = vector.multi_reduction <maximumf>, %790, %cst_244 [1] : vector<8x8xf32> to vector<8xf32>
    %792 = vector.shape_cast %791 : vector<8xf32> to vector<8x1xf32>
    %793 = vector.broadcast %792 : vector<8x1xf32> to vector<8x8xf32>
    %794 = arith.cmpf oge, %790, %793 : vector<8x8xf32>
    %c8_i32_245 = arith.constant 8 : i32
    %795 = vector.broadcast %c8_i32_245 : i32 to vector<8x8xi32>
    %796 = arith.select %794, %11, %795 : vector<8x8xi1>, vector<8x8xi32>
    %cst_246 = arith.constant dense<2147483647> : vector<8xi32>
    %797 = vector.multi_reduction <minsi>, %796, %cst_246 [1] : vector<8x8xi32> to vector<8xi32>
    %798 = vector.shape_cast %797 : vector<8xi32> to vector<8x1xi32>
    %799 = vector.broadcast %798 : vector<8x1xi32> to vector<8x8xi32>
    %800 = arith.cmpi eq, %11, %799 : vector<8x8xi32>
    %801 = arith.extui %800 : vector<8x8xi1> to vector<8x8xi32>
    %802 = arith.sitofp %801 : vector<8x8xi32> to vector<8x8xf32>
    %c6_247 = arith.constant 6 : index
    %c0_248 = arith.constant 0 : index
    %c0_249 = arith.constant 0 : index
    %803 = vector.load %arg15[%c6_247, %c0_248, %c0_249] : memref<8x8x8xf32, #tpu.memory_space<vmem>>, vector<1x8x8xf32>
    %804 = vector.shape_cast %803 : vector<1x8x8xf32> to vector<8x8xf32>
    %805 = vector.shape_cast %787 : vector<8x8xf32> to vector<1x8x8xf32>
    tpu.vector_store %arg15[%c6_247, %c0_248, %c0_249], %805 {strides = array<i32>} : memref<8x8x8xf32, #tpu.memory_space<vmem>>, vector<1x8x8xf32>,
    %c6_250 = arith.constant 6 : index
    %c0_251 = arith.constant 0 : index
    %c0_252 = arith.constant 0 : index
    %806 = vector.load %arg16[%c6_250, %c0_251, %c0_252] : memref<8x8x8xf32, #tpu.memory_space<vmem>>, vector<1x8x8xf32>
    %807 = vector.shape_cast %806 : vector<1x8x8xf32> to vector<8x8xf32>
    %808 = vector.shape_cast %802 : vector<8x8xf32> to vector<1x8x8xf32>
    tpu.vector_store %arg16[%c6_250, %c0_251, %c0_252], %808 {strides = array<i32>} : memref<8x8x8xf32, #tpu.memory_space<vmem>>, vector<1x8x8xf32>,
    %809 = arith.maximumf %695, %802 : vector<8x8xf32>
    %810 = vector.shape_cast %802 : vector<8x8xf32> to vector<8x8x1xf32>
    %811 = vector.broadcast %810 : vector<8x8x1xf32> to vector<8x8x32xf32>
    %812 = arith.mulf %811, %0 : vector<8x8x32xf32>
    %cst_253 = arith.constant dense<0.000000e+00> : vector<8x32xf32>
    %813 = vector.multi_reduction <add>, %812, %cst_253 [1] : vector<8x8x32xf32> to vector<8x32xf32>
    %814 = tpu.concatenate %813, %728 in 1 : vector<8x32xf32>, vector<8x32xf32> -> vector<8x64xf32>
    %cst_254 = arith.constant dense<0.000000e+00> : vector<8x128xf32>
    %815 = tpu.matmul %814, %3, %cst_254 {dimension_numbers = #tpu.dot_dimension_numbers<[1], [0], [0], [1], [0, 0, 1, 1], [], []>} : vector<8x64xf32>, vector<64x128xf32>, vector<8x128xf32> -> vector<8x128xf32>
    %816 = vector.broadcast %4 : vector<1x128xf32> to vector<8x128xf32>
    %817 = arith.addf %815, %816 : vector<8x128xf32>
    %818 = vector.extract_strided_slice %817 {offsets = [0, 0], sizes = [8, 32], strides = [1, 1]} : vector<8x128xf32> to vector<8x32xf32>
    %819 = arith.negf %818 : vector<8x32xf32>
    %820 = math.exp %819 : vector<8x32xf32>
    %cst_255 = arith.constant 1.000000e+00 : f32
    %821 = vector.broadcast %cst_255 : f32 to vector<8x32xf32>
    %822 = arith.addf %821, %820 : vector<8x32xf32>
    %823 = arith.divf %821, %822 : vector<8x32xf32>
    %824 = vector.extract_strided_slice %817 {offsets = [0, 32], sizes = [8, 32], strides = [1, 1]} : vector<8x128xf32> to vector<8x32xf32>
    %825 = arith.negf %824 : vector<8x32xf32>
    %826 = math.exp %825 : vector<8x32xf32>
    %cst_256 = arith.constant 1.000000e+00 : f32
    %827 = vector.broadcast %cst_256 : f32 to vector<8x32xf32>
    %828 = arith.addf %827, %826 : vector<8x32xf32>
    %829 = arith.divf %827, %828 : vector<8x32xf32>
    %830 = vector.extract_strided_slice %817 {offsets = [0, 64], sizes = [8, 32], strides = [1, 1]} : vector<8x128xf32> to vector<8x32xf32>
    %831 = math.tanh %830 : vector<8x32xf32>
    %832 = vector.extract_strided_slice %817 {offsets = [0, 96], sizes = [8, 32], strides = [1, 1]} : vector<8x128xf32> to vector<8x32xf32>
    %833 = arith.negf %832 : vector<8x32xf32>
    %834 = math.exp %833 : vector<8x32xf32>
    %cst_257 = arith.constant 1.000000e+00 : f32
    %835 = vector.broadcast %cst_257 : f32 to vector<8x32xf32>
    %836 = arith.addf %835, %834 : vector<8x32xf32>
    %837 = arith.divf %835, %836 : vector<8x32xf32>
    %838 = arith.mulf %829, %726 : vector<8x32xf32>
    %839 = arith.mulf %823, %831 : vector<8x32xf32>
    %840 = arith.addf %838, %839 : vector<8x32xf32>
    %841 = math.tanh %840 : vector<8x32xf32>
    %842 = arith.mulf %837, %841 : vector<8x32xf32>
    %cst_258 = arith.constant dense<0.000000e+00> : vector<8x32xf32>
    %843 = tpu.matmul %842, %5, %cst_258 {dimension_numbers = #tpu.dot_dimension_numbers<[1], [0], [0], [1], [0, 0, 1, 1], [], []>} : vector<8x32xf32>, vector<32x32xf32>, vector<8x32xf32> -> vector<8x32xf32>
    %844 = vector.broadcast %6 : vector<1x32xf32> to vector<8x32xf32>
    %845 = arith.addf %843, %844 : vector<8x32xf32>
    %846 = vector.shape_cast %845 : vector<8x32xf32> to vector<8x1x32xf32>
    %847 = vector.broadcast %846 : vector<8x1x32xf32> to vector<8x8x32xf32>
    %848 = arith.addf %847, %1 : vector<8x8x32xf32>
    %849 = math.tanh %848 : vector<8x8x32xf32>
    %850 = vector.shape_cast %7 : vector<1x32xf32> to vector<1x1x32xf32>
    %851 = vector.broadcast %850 : vector<1x1x32xf32> to vector<8x8x32xf32>
    %852 = arith.mulf %849, %851 : vector<8x8x32xf32>
    %cst_259 = arith.constant dense<0.000000e+00> : vector<8x8xf32>
    %853 = vector.multi_reduction <add>, %852, %cst_259 [2] : vector<8x8x32xf32> to vector<8x8xf32>
    %cst_260 = arith.constant 5.000000e-01 : f32
    %854 = vector.broadcast %cst_260 : f32 to vector<8x8xf32>
    %855 = arith.cmpf ogt, %809, %854 : vector<8x8xf32>
    %cst_261 = arith.constant 0xFF800000 : f32
    %856 = vector.broadcast %cst_261 : f32 to vector<8x8xf32>
    %857 = arith.select %855, %856, %853 : vector<8x8xi1>, vector<8x8xf32>
    %cst_262 = arith.constant dense<0xFF800000> : vector<8xf32>
    %858 = vector.multi_reduction <maximumf>, %857, %cst_262 [1] : vector<8x8xf32> to vector<8xf32>
    %859 = vector.shape_cast %858 : vector<8xf32> to vector<8x1xf32>
    %860 = vector.broadcast %859 : vector<8x1xf32> to vector<8x8xf32>
    %861 = arith.subf %857, %860 : vector<8x8xf32>
    %862 = math.exp %861 : vector<8x8xf32>
    %cst_263 = arith.constant dense<0.000000e+00> : vector<8xf32>
    %863 = vector.multi_reduction <add>, %862, %cst_263 [1] : vector<8x8xf32> to vector<8xf32>
    %864 = vector.shape_cast %863 : vector<8xf32> to vector<8x1xf32>
    %cst_264 = arith.constant 1.000000e+00 : f32
    %865 = vector.broadcast %cst_264 : f32 to vector<8x1xf32>
    %866 = arith.divf %865, %864 : vector<8x1xf32>
    %867 = vector.broadcast %866 : vector<8x1xf32> to vector<8x8xf32>
    %868 = arith.mulf %862, %867 : vector<8x8xf32>
    %869 = vector.shape_cast %868 : vector<8x8xf32> to vector<8x8x1xf32>
    %870 = vector.broadcast %869 : vector<8x8x1xf32> to vector<8x8x32xf32>
    %871 = arith.mulf %870, %1 : vector<8x8x32xf32>
    %cst_265 = arith.constant dense<0.000000e+00> : vector<8x32xf32>
    %872 = vector.multi_reduction <add>, %871, %cst_265 [1] : vector<8x8x32xf32> to vector<8x32xf32>
    %cst_266 = arith.constant dense<0.000000e+00> : vector<8x32xf32>
    %873 = tpu.matmul %872, %8, %cst_266 {dimension_numbers = #tpu.dot_dimension_numbers<[1], [0], [0], [1], [0, 0, 1, 1], [], []>} : vector<8x32xf32>, vector<32x32xf32>, vector<8x32xf32> -> vector<8x32xf32>
    %874 = vector.broadcast %9 : vector<1x32xf32> to vector<8x32xf32>
    %875 = arith.addf %873, %874 : vector<8x32xf32>
    %876 = vector.shape_cast %875 : vector<8x32xf32> to vector<8x1x32xf32>
    %877 = vector.broadcast %876 : vector<8x1x32xf32> to vector<8x8x32xf32>
    %878 = arith.addf %877, %2 : vector<8x8x32xf32>
    %879 = math.tanh %878 : vector<8x8x32xf32>
    %880 = vector.shape_cast %10 : vector<1x32xf32> to vector<1x1x32xf32>
    %881 = vector.broadcast %880 : vector<1x1x32xf32> to vector<8x8x32xf32>
    %882 = arith.mulf %879, %881 : vector<8x8x32xf32>
    %cst_267 = arith.constant dense<0.000000e+00> : vector<8x8xf32>
    %883 = vector.multi_reduction <add>, %882, %cst_267 [2] : vector<8x8x32xf32> to vector<8x8xf32>
    %884 = math.tanh %883 : vector<8x8xf32>
    %cst_268 = arith.constant 1.000000e+01 : f32
    %885 = vector.broadcast %cst_268 : f32 to vector<8x8xf32>
    %886 = arith.mulf %885, %884 : vector<8x8xf32>
    %cst_269 = arith.constant 5.000000e-01 : f32
    %887 = vector.broadcast %cst_269 : f32 to vector<8x8xf32>
    %888 = arith.cmpf ogt, %809, %887 : vector<8x8xf32>
    %cst_270 = arith.constant 0xFF800000 : f32
    %889 = vector.broadcast %cst_270 : f32 to vector<8x8xf32>
    %890 = arith.select %888, %889, %886 : vector<8x8xi1>, vector<8x8xf32>
    %cst_271 = arith.constant dense<0xFF800000> : vector<8xf32>
    %891 = vector.multi_reduction <maximumf>, %890, %cst_271 [1] : vector<8x8xf32> to vector<8xf32>
    %892 = vector.shape_cast %891 : vector<8xf32> to vector<8x1xf32>
    %893 = vector.broadcast %892 : vector<8x1xf32> to vector<8x8xf32>
    %894 = arith.subf %890, %893 : vector<8x8xf32>
    %895 = math.exp %894 : vector<8x8xf32>
    %cst_272 = arith.constant dense<0.000000e+00> : vector<8xf32>
    %896 = vector.multi_reduction <add>, %895, %cst_272 [1] : vector<8x8xf32> to vector<8xf32>
    %897 = vector.shape_cast %896 : vector<8xf32> to vector<8x1xf32>
    %cst_273 = arith.constant 1.000000e+00 : f32
    %898 = vector.broadcast %cst_273 : f32 to vector<8x1xf32>
    %899 = arith.divf %898, %897 : vector<8x1xf32>
    %900 = vector.broadcast %899 : vector<8x1xf32> to vector<8x8xf32>
    %901 = arith.mulf %895, %900 : vector<8x8xf32>
    %c7 = arith.constant 7 : index
    %c0_274 = arith.constant 0 : index
    %c0_275 = arith.constant 0 : index
    %902 = vector.load %arg6[%c7, %c0_274, %c0_275] : memref<8x8x8xf32, #tpu.memory_space<vmem>>, vector<1x8x8xf32>
    %903 = vector.shape_cast %902 : vector<1x8x8xf32> to vector<8x8xf32>
    %904 = arith.addf %890, %903 : vector<8x8xf32>
    %cst_276 = arith.constant dense<0xFF800000> : vector<8xf32>
    %905 = vector.multi_reduction <maximumf>, %904, %cst_276 [1] : vector<8x8xf32> to vector<8xf32>
    %906 = vector.shape_cast %905 : vector<8xf32> to vector<8x1xf32>
    %907 = vector.broadcast %906 : vector<8x1xf32> to vector<8x8xf32>
    %908 = arith.cmpf oge, %904, %907 : vector<8x8xf32>
    %c8_i32_277 = arith.constant 8 : i32
    %909 = vector.broadcast %c8_i32_277 : i32 to vector<8x8xi32>
    %910 = arith.select %908, %11, %909 : vector<8x8xi1>, vector<8x8xi32>
    %cst_278 = arith.constant dense<2147483647> : vector<8xi32>
    %911 = vector.multi_reduction <minsi>, %910, %cst_278 [1] : vector<8x8xi32> to vector<8xi32>
    %912 = vector.shape_cast %911 : vector<8xi32> to vector<8x1xi32>
    %913 = vector.broadcast %912 : vector<8x1xi32> to vector<8x8xi32>
    %914 = arith.cmpi eq, %11, %913 : vector<8x8xi32>
    %915 = arith.extui %914 : vector<8x8xi1> to vector<8x8xi32>
    %916 = arith.sitofp %915 : vector<8x8xi32> to vector<8x8xf32>
    %c7_279 = arith.constant 7 : index
    %c0_280 = arith.constant 0 : index
    %c0_281 = arith.constant 0 : index
    %917 = vector.load %arg15[%c7_279, %c0_280, %c0_281] : memref<8x8x8xf32, #tpu.memory_space<vmem>>, vector<1x8x8xf32>
    %918 = vector.shape_cast %917 : vector<1x8x8xf32> to vector<8x8xf32>
    %919 = vector.shape_cast %901 : vector<8x8xf32> to vector<1x8x8xf32>
    tpu.vector_store %arg15[%c7_279, %c0_280, %c0_281], %919 {strides = array<i32>} : memref<8x8x8xf32, #tpu.memory_space<vmem>>, vector<1x8x8xf32>,
    %c7_282 = arith.constant 7 : index
    %c0_283 = arith.constant 0 : index
    %c0_284 = arith.constant 0 : index
    %920 = vector.load %arg16[%c7_282, %c0_283, %c0_284] : memref<8x8x8xf32, #tpu.memory_space<vmem>>, vector<1x8x8xf32>
    %921 = vector.shape_cast %920 : vector<1x8x8xf32> to vector<8x8xf32>
    %922 = vector.shape_cast %916 : vector<8x8xf32> to vector<1x8x8xf32>
    tpu.vector_store %arg16[%c7_282, %c0_283, %c0_284], %922 {strides = array<i32>} : memref<8x8x8xf32, #tpu.memory_space<vmem>>, vector<1x8x8xf32>,
    return
  }
}

</mosaic_0001>

<bundles_post_ra>
// kernel: pointer_network_forward.2
= control target key start
LH: loop header
LB: loop body
LE: loop exit
PB: predicated region body
PF: predicated region fallthrough
CT: control target
= control target key end

     0   :  { %vm42_vm0 = vcmask 261120   ;;  %v857_v11 = vmov 0.0   ;;  %s858_s27 = smov 64   ;;  %s860_s14 = smov 96   ;;  %s1149_s1 = inlined_call_operand.vmem [shape: f32[32,128], index: 1, kind: input, shape index: {}]   ;;  %s1150_s2 = inlined_call_operand.vmem [shape: f32[32,128], index: 2, kind: input, shape index: {}]   ;;  %s1151_s0 = inlined_call_operand.vmem [shape: f32[8,8,32], index: 0, kind: input, shape index: {}]   ;;  %s1152_s3 = inlined_call_operand.vmem [shape: f32[1,128], index: 3, kind: input, shape index: {}]   ;;  %s1153_s4 = inlined_call_operand.vmem [shape: f32[32,64], index: 4, kind: input, shape index: {}]   ;;  %s1154_s5 = inlined_call_operand.vmem [shape: f32[1,64], index: 5, kind: input, shape index: {}]   ;;  %s1155_s6 = inlined_call_operand.vmem [shape: f32[8,8,64], index: 6, kind: output, shape index: {0}]   ;;  %s1156_s8 = inlined_call_operand.vmem [shape: f32[8,32], index: 8, kind: output, shape index: {2}]   ;;  %s1157_s7 = inlined_call_operand.vmem [shape: f32[8,32], index: 7, kind: output, shape index: {1}]  }
   0x1   :  { %v37_v0 = vld [vmem:[%s1149_s1 + $0x18] sm:$0xff]  ;;  %v36_v1 = vld [vmem:[%s1149_s1 + $0x10] sm:$0xff]  ;;  %v35_v3 = vld [vmem:[%s1149_s1 + $0x8] sm:$0xff] }
   0x2   :  { %779 = vmatpush.msra.mxu2 %v37_v0  ;;  %v915_v2 = vld [vmem:[%s1150_s2 + $0x18] sm:$0xff]  ;;  %79 = vmatpush.msra.mxu0 %v37_v0  ;;  %v925_v4 = vld [vmem:[%s1150_s2 + $0x10] sm:$0xff]  ;;  %v34_v5 = vld [vmem:[%s1149_s1] sm:$0xff] }
   0x3   :  { %258 = vmatpush.msra.mxu3 %v915_v2  ;;  %324 = vmatpush.msra.mxu1 %v915_v2  ;;  %v32_v6 = vld [vmem:[%s1151_s0 + $0x30] sm:$0xff]  ;;  %v938_v7 = vld [vmem:[%s1150_s2 + $0x8] sm:$0xff]  ;;  %v26_v8 = vld [vmem:[%s1151_s0] sm:$0xff] }
   0x4   :  { %780 = vmatpush.msra.mxu2 %v36_v1  ;;  %80 = vmatpush.msra.mxu0 %v36_v1  ;;  %v949_v9 = vld [vmem:[%s1150_s2] sm:$0xff]  ;;  %v33_v10 = vld [vmem:[%s1151_s0 + $0x38] sm:$0xff]  ;;  %v27_v41 = vld [vmem:[%s1151_s0 + $0x8] sm:$0xff] }
   0x5   :  { %259 = vmatpush.msra.mxu3 %v925_v4  ;;  %325 = vmatpush.msra.mxu1 %v925_v4  ;;  %v985_v15 = vld [vmem:[%s1152_s3] ss:$0 sm:$0xff]  ;;  %s859_s3 = smov 32  }
   0x6   :  { %781 = vmatpush.msra.mxu2 %v35_v3  ;;  %81 = vmatpush.msra.mxu0 %v35_v3 }
   0x7   :  { %260 = vmatpush.msra.mxu3 %v938_v7  ;;  %326 = vmatpush.msra.mxu1 %v938_v7 }
   0x8   :  { %782 = vmatpush.msra.mxu2 %v34_v5  ;;  %82 = vmatpush.msra.mxu0 %v34_v5  ;;  %v28_v5 = vld [vmem:[%s1151_s0 + $0x10] sm:$0xff] }
   0x9   :  { %754 = vmatmul.msk.f32.vlgmr.msra.gmra.mxu2 %vm42_vm0, %v32_v6  ;;  %748 = vmatmul.msk.f32.vlgmr.msra.gmra.mxu0 %vm42_vm0, %v26_v8 }
   0xa   :  { %127 = vmatpush.msrb.mxu2 %v915_v2  ;;  %261 = vmatpush.msra.mxu3 %v949_v9 }
   0xb   :  { %327 = vmatpush.msra.mxu1 %v949_v9 }
   0xc   :  { %456 = vmatpush.msrb.mxu3 %v915_v2  ;;  %128 = vmatpush.msrb.mxu2 %v925_v4 }
   0xd   :  { %522 = vmatpush.msrb.mxu1 %v915_v2 }
   0xe   :  { %457 = vmatpush.msrb.mxu3 %v925_v4  ;;  %129 = vmatpush.msrb.mxu2 %v938_v7 }
   0xf   :  { %523 = vmatpush.msrb.mxu1 %v925_v4 }
  0x10   :  { %458 = vmatpush.msrb.mxu3 %v938_v7  ;;  %130 = vmatpush.msrb.mxu2 %v949_v9 }
  0x11   :  { %524 = vmatpush.msrb.mxu1 %v938_v7  ;;  %755 = vmatmul.msk.f32.gmra.mxu2 %vm42_vm0, %v33_v10 }
  0x12   :  { %459 = vmatpush.msrb.mxu3 %v949_v9  ;;  %192 = vmatpush.msra.mxu2 %v915_v2 }
  0x13   :  { %525 = vmatpush.msrb.mxu1 %v949_v9  ;;  %749 = vmatmul.msk.f32.gmra.mxu0 %vm42_vm0, %v27_v41 }
  0x14   :  { %193 = vmatpush.msra.mxu2 %v925_v4 }
  0x16   :  { %194 = vmatpush.msra.mxu2 %v938_v7 }
  0x18   :  { %195 = vmatpush.msra.mxu2 %v949_v9 }
  0x19   :  { %131 = vmatmul.f32.vlgmr.msrb.gmra.mxu2 %v857_v11 }
  0x1a   :  { %390 = vmatpush.msrb.mxu2 %v915_v2 }
  0x1b   :  { %750 = vmatmul.msk.f32.gmra.mxu0 %vm42_vm0, %v28_v5 }
  0x1c   :  { %391 = vmatpush.msrb.mxu2 %v925_v4 }
  0x1e   :  { %392 = vmatpush.msrb.mxu2 %v938_v7 }
  0x20   :  { %393 = vmatpush.msrb.mxu2 %v949_v9 }
  0x86   :  { %v84_v14 = vpop.f32.mrf.mxu0 }
  0x87   :  { %v85_v16 = vadd.f32 %v985_v15, %v84_v14 }
  0x8c   :  { %v978_v12 = vpop.f32.mrf.mxu2 }
  0x90   :  { %v87_v43 = vpop.f32.mrf.mxu0 }
  0x91   :  { %v88_v44 = vadd.f32 %v985_v15, %v87_v43 }
  0x94   :  { %v980_v13 = vpop.f32.mrf.mxu2 }
  0x9c   :  { %v132_v17 = vpop.f32.mrf.mxu2 }
  0x9d   :  { %v135_v18 = vadd.f32 %v132_v17, %v85_v16 }
  0x9f   :  { %793 = vtanh.f32 %v135_v18  ;;  %v756_v20 = vmul.f32 -1.442695, %v135_v18 }
  0xa1   :  { %795 = vpow2.f32 %v756_v20 }
  0xa5   :  { %v794_v19 = vpop.eup %793 }
  0xa6   :  { %158 = vrot.lane.b32.xlu0 %v794_v19, %s858_s27 }
  0xa7   :  { %v796_v21 = vpop.eup %795 }
  0xa8   :  { %v139_v22 = vadd.f32 1.0, %v796_v21 }
  0xaa   :  { %797 = vrcp.f32 %v139_v22  ;;  %v151_v28 = vand.u32 2147483648, %v139_v22  ;;  %vm145_vm2 = vweird.f32 %v139_v22  ;;  %v149_v29 = vand.u32 2147483647, %v139_v22 }
  0xac   :  { %v152_v31 = vor.u32 1.1754944e-38, %v151_v28  ;;  %vm150_vm4 = vcmp.eq.f32.partialorder %v149_v29, 8.507059e+37 }
  0xb0   :  { %v798_v23 = vpop.eup %797 }
  0xb1   :  { %v141_v24 = vmul.f32 %v798_v23, %v139_v22  ;;  %vm146_vm1 = vweird.f32 %v798_v23 }
  0xb2   :  { %vm147_vm3 = vmor %vm145_vm2, %vm146_vm1 }
  0xb3   :  { %v142_v25 = vsub.f32 1.0, %v141_v24 }
  0xb5   :  { %v143_v26 = vmul.f32 %v798_v23, %v142_v25 }
  0xb7   :  { %v144_v27 = vadd.f32 %v798_v23, %v143_v26 }
  0xb9   :  { %v148_v30 = vsel %vm147_vm3, %v798_v23, %v144_v27 }
  0xba   :  { %v153_v33 = vsel %vm150_vm4, %v152_v31, %v148_v30 }
  0xbb   :  { %v156_v35 = vmul.f32 0.0, %v153_v33 }
 0x118   :  { %v159_v32 = vpop.permute.xlu0 %158 }
 0x119   :  { %v161_v34 = vmul.f32 %v159_v32, %v153_v33 }
 0x11b   :  { %163 = vrot.lane.b32.xlu0 %v161_v34, %s859_s3  ;;  %v29_v34 = vld [vmem:[%s1151_s0 + $0x18] sm:$0xff] }
 0x11c   :  { %751 = vmatmul.msk.f32.gmra.mxu0 %vm42_vm0, %v29_v34  ;;  %v655_v34 = vld [vmem:[%s1153_s4 + $0x8] sm:$0xff] }
 0x18d   :  { %v164_v36 = vpop.permute.xlu0 %163 }
 0x18e   :  { %v166_v37 = vadd.f32 %v164_v36, %v156_v35 }
 0x190   :  { %799 = vtanh.f32 %v166_v37 }
 0x196   :  { %v800_v38 = vpop.eup %799 }
 0x197   :  { %169 = vrot.lane.b32.xlu1 %v800_v38, %s858_s27 }
 0x209   :  { %v170_v39 = vpop.permute.xlu1 %169 }
 0x20a   :  { %v172_v40 = vmul.f32 %v170_v39, %v153_v33 }
 0x20c   :  { %174 = vrot.lane.b32.xlu1 %v172_v40, %s859_s3 }
 0x27e   :  { %v175_v42 = vpop.permute.xlu1 %174 }
 0x27f   :  { %177 = vst.msk [vmem:[#allocation2] sm:$0xff] %vm42_vm0, %v175_v42  ;;  %757 = vmatmul.msk.f32.vlgmr.msra.gmra.mxu2 %vm42_vm0, %v175_v42 }
 0x280   :  { %588 = vmatpush.msra.mxu2 %v915_v2 }
 0x282   :  { %589 = vmatpush.msra.mxu2 %v925_v4 }
 0x284   :  { %590 = vmatpush.msra.mxu2 %v938_v7  ;;  %v90_v7 = vpop.f32.mrf.mxu0 }
 0x285   :  { %v91_v8 = vadd.f32 %v985_v15, %v90_v7 }
 0x286   :  { %591 = vmatpush.msra.mxu2 %v949_v9 }
 0x28c   :  { %v93_v38 = vpop.f32.mrf.mxu0 }
 0x28d   :  { %v94_v39 = vadd.f32 %v985_v15, %v93_v38 }
 0x302   :  { %v197_v45 = vpop.f32.mrf.mxu2 }
 0x303   :  { %v200_v46 = vadd.f32 %v197_v45, %v88_v44 }
 0x305   :  { %801 = vtanh.f32 %v200_v46  ;;  %v758_v48 = vmul.f32 -1.442695, %v200_v46 }
 0x307   :  { %803 = vpow2.f32 %v758_v48 }
 0x30b   :  { %v802_v47 = vpop.eup %801 }
 0x30c   :  { %223 = vrot.lane.b32.xlu2 %v802_v47, %s858_s27 }
 0x30d   :  { %v804_v49 = vpop.eup %803 }
 0x30e   :  { %v204_v50 = vadd.f32 1.0, %v804_v49 }
 0x310   :  { %805 = vrcp.f32 %v204_v50  ;;  %v216_v56 = vand.u32 2147483648, %v204_v50  ;;  %vm210_vm6 = vweird.f32 %v204_v50  ;;  %v214_v57 = vand.u32 2147483647, %v204_v50 }
 0x312   :  { %v217_v59 = vor.u32 1.1754944e-38, %v216_v56  ;;  %vm215_vm8 = vcmp.eq.f32.partialorder %v214_v57, 8.507059e+37 }
 0x316   :  { %v806_v51 = vpop.eup %805 }
 0x317   :  { %v206_v52 = vmul.f32 %v806_v51, %v204_v50  ;;  %vm211_vm5 = vweird.f32 %v806_v51 }
 0x318   :  { %vm212_vm7 = vmor %vm210_vm6, %vm211_vm5  ;;  %vm727_vm6 = vcmask 523264  }
 0x319   :  { %v207_v53 = vsub.f32 1.0, %v206_v52 }
 0x31b   :  { %v208_v54 = vmul.f32 %v806_v51, %v207_v53 }
 0x31d   :  { %v209_v55 = vadd.f32 %v806_v51, %v208_v54 }
 0x31f   :  { %v213_v58 = vsel %vm212_vm7, %v806_v51, %v209_v55 }
 0x320   :  { %v218_v61 = vsel %vm215_vm8, %v217_v59, %v213_v58 }
 0x321   :  { %v221_v63 = vmul.f32 %v218_v61, %v166_v37 }
 0x366   :  { %v224_v60 = vpop.permute.xlu2 %223 }
 0x367   :  { %v226_v62 = vmul.f32 %v224_v60, %v218_v61 }
 0x369   :  { %228 = vrot.lane.b32.xlu2 %v226_v62, %s859_s3 }
 0x3c3   :  { %v229_v0 = vpop.permute.xlu2 %228 }
 0x3c4   :  { %v231_v1 = vadd.f32 %v229_v0, %v221_v63  ;;  %v30_v0 = vld [vmem:[%s1151_s0 + $0x20] sm:$0xff] }
 0x3c5   :  { %752 = vmatmul.msk.f32.gmra.mxu0 %vm42_vm0, %v30_v0 }
 0x3c6   :  { %807 = vtanh.f32 %v231_v1 }
 0x3cc   :  { %v808_v2 = vpop.eup %807 }
 0x3cd   :  { %234 = vrot.lane.b32.xlu0 %v808_v2, %s858_s27 }
 0x43f   :  { %v235_v3 = vpop.permute.xlu0 %234 }
 0x440   :  { %v237_v4 = vmul.f32 %v235_v3, %v218_v61 }
 0x442   :  { %239 = vrot.lane.b32.xlu1 %v237_v4, %s859_s3  ;;  %v96_v2 = vpop.f32.mrf.mxu0 }
 0x443   :  { %v97_v3 = vadd.f32 %v985_v15, %v96_v2 }
 0x4b4   :  { %v240_v6 = vpop.permute.xlu1 %239 }
 0x4b5   :  { %243 = vst.msk [vmem:[#allocation2 + $0x8] sm:$0xff] %vm42_vm0, %v240_v6  ;;  %759 = vmatmul.msk.f32.vlgmr.msra.gmra.mxu3 %vm42_vm0, %v240_v6 }
 0x538   :  { %v263_v9 = vpop.f32.mrf.mxu3 }
 0x539   :  { %v266_v10 = vadd.f32 %v263_v9, %v91_v8 }
 0x53b   :  { %809 = vtanh.f32 %v266_v10  ;;  %v760_v14 = vmul.f32 -1.442695, %v266_v10 }
 0x53d   :  { %811 = vpow2.f32 %v760_v14 }
 0x541   :  { %v810_v11 = vpop.eup %809 }
 0x542   :  { %289 = vrot.lane.b32.xlu2 %v810_v11, %s858_s27 }
 0x543   :  { %v812_v16 = vpop.eup %811 }
 0x544   :  { %v270_v17 = vadd.f32 1.0, %v812_v16 }
 0x546   :  { %813 = vrcp.f32 %v270_v17  ;;  %v282_v23 = vand.u32 2147483648, %v270_v17  ;;  %vm276_vm10 = vweird.f32 %v270_v17  ;;  %v280_v24 = vand.u32 2147483647, %v270_v17 }
 0x548   :  { %v283_v26 = vor.u32 1.1754944e-38, %v282_v23  ;;  %vm281_vm12 = vcmp.eq.f32.partialorder %v280_v24, 8.507059e+37 }
 0x54c   :  { %v814_v18 = vpop.eup %813 }
 0x54d   :  { %v272_v19 = vmul.f32 %v814_v18, %v270_v17  ;;  %vm277_vm9 = vweird.f32 %v814_v18 }
 0x54e   :  { %vm278_vm11 = vmor %vm276_vm10, %vm277_vm9 }
 0x54f   :  { %v273_v20 = vsub.f32 1.0, %v272_v19 }
 0x551   :  { %v274_v21 = vmul.f32 %v814_v18, %v273_v20 }
 0x553   :  { %v275_v22 = vadd.f32 %v814_v18, %v274_v21 }
 0x555   :  { %v279_v25 = vsel %vm278_vm11, %v814_v18, %v275_v22 }
 0x556   :  { %v284_v28 = vsel %vm281_vm12, %v283_v26, %v279_v25 }
 0x557   :  { %v287_v30 = vmul.f32 %v284_v28, %v231_v1 }
 0x59c   :  { %v290_v27 = vpop.permute.xlu2 %289 }
 0x59d   :  { %v292_v29 = vmul.f32 %v290_v27, %v284_v28 }
 0x59f   :  { %294 = vrot.lane.b32.xlu0 %v292_v29, %s859_s3 }
 0x611   :  { %v295_v31 = vpop.permute.xlu0 %294 }
 0x612   :  { %v297_v32 = vadd.f32 %v295_v31, %v287_v30  ;;  %v657_v31 = vld [vmem:[%s1153_s4 + $0x18] sm:$0xff] }
 0x613   :  { %783 = vmatpush.msra.mxu3 %v657_v31 }
 0x614   :  { %815 = vtanh.f32 %v297_v32 }
 0x61a   :  { %v816_v33 = vpop.eup %815 }
 0x61b   :  { %300 = vrot.lane.b32.xlu1 %v816_v33, %s858_s27  ;;  %v31_v33 = vld [vmem:[%s1151_s0 + $0x28] sm:$0xff] }
 0x61c   :  { %753 = vmatmul.msk.f32.gmra.mxu0 %vm42_vm0, %v31_v33 }
 0x68d   :  { %v301_v35 = vpop.permute.xlu1 %300 }
 0x68e   :  { %v303_v36 = vmul.f32 %v301_v35, %v284_v28  ;;  %v654_v35 = vld [vmem:[%s1153_s4] sm:$0xff] }
 0x690   :  { %305 = vrot.lane.b32.xlu2 %v303_v36, %s859_s3 }
 0x699   :  { %v99_v38 = vpop.f32.mrf.mxu0 }
 0x6ea   :  { %v306_v37 = vpop.permute.xlu2 %305 }
 0x6eb   :  { %309 = vst.msk [vmem:[#allocation2 + $0x10] sm:$0xff] %vm42_vm0, %v306_v37  ;;  %761 = vmatmul.msk.f32.vlgmr.msra.gmra.mxu1 %vm42_vm0, %v306_v37 }
 0x6ec   :  { %698 = vmatpush.msra.mxu1 %v657_v31 }
 0x768   :  { %v329_v40 = vpop.f32.mrf.mxu1 }
 0x769   :  { %v332_v41 = vadd.f32 %v329_v40, %v94_v39  ;;  %v100_v39 = vadd.f32 %v985_v15, %v99_v38 }
 0x76b   :  { %817 = vtanh.f32 %v332_v41  ;;  %v762_v43 = vmul.f32 -1.442695, %v332_v41 }
 0x76d   :  { %819 = vpow2.f32 %v762_v43 }
 0x771   :  { %v818_v42 = vpop.eup %817 }
 0x772   :  { %355 = vrot.lane.b32.xlu0 %v818_v42, %s858_s27  ;;  %v1066_v42 = vld [vmem:[%s1154_s5] ss:$0 sm:$0xff] }
 0x773   :  { %v820_v44 = vpop.eup %819 }
 0x774   :  { %v336_v45 = vadd.f32 1.0, %v820_v44 }
 0x776   :  { %821 = vrcp.f32 %v336_v45  ;;  %v348_v51 = vand.u32 2147483648, %v336_v45  ;;  %vm342_vm14 = vweird.f32 %v336_v45  ;;  %v346_v52 = vand.u32 2147483647, %v336_v45 }
 0x778   :  { %v349_v54 = vor.u32 1.1754944e-38, %v348_v51  ;;  %vm347_vm1 = vcmp.eq.f32.partialorder %v346_v52, 8.507059e+37 }
 0x77c   :  { %v822_v46 = vpop.eup %821 }
 0x77d   :  { %v338_v47 = vmul.f32 %v822_v46, %v336_v45  ;;  %vm343_vm13 = vweird.f32 %v822_v46 }
 0x77e   :  { %vm344_vm15 = vmor %vm342_vm14, %vm343_vm13 }
 0x77f   :  { %v339_v48 = vsub.f32 1.0, %v338_v47 }
 0x781   :  { %v340_v49 = vmul.f32 %v822_v46, %v339_v48 }
 0x783   :  { %v341_v50 = vadd.f32 %v822_v46, %v340_v49 }
 0x785   :  { %v345_v53 = vsel %vm344_vm15, %v822_v46, %v341_v50 }
 0x786   :  { %v350_v56 = vsel %vm347_vm1, %v349_v54, %v345_v53 }
 0x787   :  { %v353_v58 = vmul.f32 %v350_v56, %v297_v32  ;;  %v656_v32 = vld [vmem:[%s1153_s4 + $0x10] sm:$0xff] }
 0x788   :  { %784 = vmatpush.msra.mxu3 %v656_v32  ;;  %699 = vmatpush.msra.mxu1 %v656_v32 }
 0x78a   :  { %785 = vmatpush.msra.mxu3 %v655_v34  ;;  %700 = vmatpush.msra.mxu1 %v655_v34 }
 0x78c   :  { %786 = vmatpush.msra.mxu3 %v654_v35  ;;  %701 = vmatpush.msra.mxu1 %v654_v35 }
 0x7e4   :  { %v356_v55 = vpop.permute.xlu0 %355 }
 0x7e5   :  { %v358_v57 = vmul.f32 %v356_v55, %v350_v56 }
 0x7e7   :  { %360 = vrot.lane.b32.xlu1 %v358_v57, %s859_s3 }
 0x859   :  { %v361_v59 = vpop.permute.xlu1 %360 }
 0x85a   :  { %v363_v60 = vadd.f32 %v361_v59, %v353_v58 }
 0x85c   :  { %823 = vtanh.f32 %v363_v60 }
 0x862   :  { %v824_v61 = vpop.eup %823 }
 0x863   :  { %366 = vrot.lane.b32.xlu2 %v824_v61, %s858_s27 }
 0x8bd   :  { %v367_v62 = vpop.permute.xlu2 %366 }
 0x8be   :  { %v369_v63 = vmul.f32 %v367_v62, %v350_v56 }
 0x8c0   :  { %371 = vrot.lane.b32.xlu0 %v369_v63, %s859_s3 }
 0x932   :  { %v372_v1 = vpop.permute.xlu0 %371 }
 0x933   :  { %375 = vst.msk [vmem:[#allocation2 + $0x18] sm:$0xff] %vm42_vm0, %v372_v1  ;;  %763 = vmatmul.msk.f32.vlgmr.msrb.gmra.mxu2 %vm42_vm0, %v372_v1 }
 0x9b6   :  { %v395_v4 = vpop.f32.mrf.mxu2 }
 0x9b7   :  { %v398_v5 = vadd.f32 %v395_v4, %v97_v3  ;;  %v646_v4 = vld [vmem:[#allocation2] sm:$0xff] }
 0x9b9   :  { %825 = vtanh.f32 %v398_v5  ;;  %v764_v7 = vmul.f32 -1.442695, %v398_v5 }
 0x9bb   :  { %827 = vpow2.f32 %v764_v7  ;;  %v648_v7 = vld [vmem:[#allocation2 + $0x10] sm:$0xff] }
 0x9bf   :  { %v826_v6 = vpop.eup %825 }
 0x9c0   :  { %421 = vrot.lane.b32.xlu1 %v826_v6, %s858_s27  ;;  %v647_v6 = vld [vmem:[#allocation2 + $0x8] sm:$0xff] }
 0x9c1   :  { %v828_v8 = vpop.eup %827 }
 0x9c2   :  { %v402_v9 = vadd.f32 1.0, %v828_v8  ;;  %v649_v8 = vld [vmem:[#allocation2 + $0x18] sm:$0xff] }
 0x9c4   :  { %829 = vrcp.f32 %v402_v9  ;;  %v414_v18 = vand.u32 2147483648, %v402_v9  ;;  %vm408_vm3 = vweird.f32 %v402_v9  ;;  %v412_v19 = vand.u32 2147483647, %v402_v9 }
 0x9c6   :  { %v415_v21 = vor.u32 1.1754944e-38, %v414_v18  ;;  %vm413_vm5 = vcmp.eq.f32.partialorder %v412_v19, 8.507059e+37 }
 0x9ca   :  { %v830_v10 = vpop.eup %829 }
 0x9cb   :  { %v404_v11 = vmul.f32 %v830_v10, %v402_v9  ;;  %vm409_vm2 = vweird.f32 %v830_v10  ;;  %v103_v9 = vadd.f32 %v985_v15, %v978_v12 }
 0x9cc   :  { %vm410_vm4 = vmor %vm408_vm3, %vm409_vm2 }
 0x9cd   :  { %v405_v14 = vsub.f32 1.0, %v404_v11 }
 0x9cf   :  { %v406_v16 = vmul.f32 %v830_v10, %v405_v14 }
 0x9d1   :  { %v407_v17 = vadd.f32 %v830_v10, %v406_v16 }
 0x9d3   :  { %v411_v20 = vsel %vm410_vm4, %v830_v10, %v407_v17 }
 0x9d4   :  { %v416_v23 = vsel %vm413_vm5, %v415_v21, %v411_v20 }
 0x9d5   :  { %v419_v25 = vmul.f32 %v416_v23, %v363_v60 }
 0xa32   :  { %v422_v22 = vpop.permute.xlu1 %421 }
 0xa33   :  { %v424_v24 = vmul.f32 %v422_v22, %v416_v23 }
 0xa35   :  { %426 = vrot.lane.b32.xlu2 %v424_v24, %s859_s3 }
 0xa8f   :  { %v427_v26 = vpop.permute.xlu2 %426 }
 0xa90   :  { %v1038_v27 = vadd.f32 %v427_v26, %v419_v25 }
 0xa92   :  { %831 = vtanh.f32 %v1038_v27 }
 0xa98   :  { %v832_v28 = vpop.eup %831 }
 0xa99   :  { %432 = vrot.lane.b32.xlu0 %v832_v28, %s858_s27 }
 0xb0b   :  { %v433_v29 = vpop.permute.xlu0 %432 }
 0xb0c   :  { %v435_v30 = vmul.f32 %v433_v29, %v416_v23 }
 0xb0e   :  { %437 = vrot.lane.b32.xlu1 %v435_v30, %s859_s3 }
 0xb80   :  { %v438_v36 = vpop.permute.xlu1 %437 }
 0xb81   :  { %441 = vst.msk [vmem:[#allocation2 + $0x20] sm:$0xff] %vm42_vm0, %v438_v36  ;;  %765 = vmatmul.msk.f32.vlgmr.msrb.gmra.mxu3 %vm42_vm0, %v438_v36 }
 0xb88   :  { %v650_v37 = vld [vmem:[#allocation2 + $0x20] sm:$0xff] }
 0xb89   :  { %775 = vmatmul.msk.f32.vlgmr.msra.gmra.mxu3 %vm42_vm0, %v650_v37 }
 0xc04   :  { %v461_v40 = vpop.f32.mrf.mxu3 }
 0xc05   :  { %v464_v41 = vadd.f32 %v461_v40, %v100_v39 }
 0xc07   :  { %833 = vtanh.f32 %v464_v41  ;;  %v766_v46 = vmul.f32 -1.442695, %v464_v41 }
 0xc09   :  { %835 = vpow2.f32 %v766_v46 }
 0xc0c   :  { %v715_v43 = vpop.f32.mrf.mxu3 }
 0xc0d   :  { %v834_v44 = vpop.eup %833  ;;  %v716_v45 = vadd.f32 %v1066_v42, %v715_v43 }
 0xc0e   :  { %487 = vrot.lane.b32.xlu2 %v834_v44, %s858_s27 }
 0xc0f   :  { %732 = vst.msk [vmem:[%s1155_s6 + $0x20] sm:$0xff] %vm727_vm6, %v716_v45  ;;  %v836_v47 = vpop.eup %835 }
 0xc10   :  { %v468_v48 = vadd.f32 1.0, %v836_v47 }
 0xc12   :  { %837 = vrcp.f32 %v468_v48  ;;  %v480_v54 = vand.u32 2147483648, %v468_v48  ;;  %vm474_vm8 = vweird.f32 %v468_v48  ;;  %v478_v55 = vand.u32 2147483647, %v468_v48 }
 0xc14   :  { %v481_v57 = vor.u32 1.1754944e-38, %v480_v54  ;;  %vm479_vm10 = vcmp.eq.f32.partialorder %v478_v55, 8.507059e+37 }
 0xc18   :  { %v838_v49 = vpop.eup %837 }
 0xc19   :  { %v470_v50 = vmul.f32 %v838_v49, %v468_v48  ;;  %vm475_vm7 = vweird.f32 %v838_v49 }
 0xc1a   :  { %vm476_vm9 = vmor %vm474_vm8, %vm475_vm7 }
 0xc1b   :  { %v471_v51 = vsub.f32 1.0, %v470_v50 }
 0xc1d   :  { %v472_v52 = vmul.f32 %v838_v49, %v471_v51 }
 0xc1f   :  { %v473_v53 = vadd.f32 %v838_v49, %v472_v52 }
 0xc21   :  { %v477_v56 = vsel %vm476_vm9, %v838_v49, %v473_v53  ;;  %v106_v49 = vadd.f32 %v985_v15, %v980_v13 }
 0xc22   :  { %v482_v59 = vsel %vm479_vm10, %v481_v57, %v477_v56 }
 0xc23   :  { %v485_v61 = vmul.f32 %v482_v59, %v1038_v27 }
 0xc68   :  { %v488_v58 = vpop.permute.xlu2 %487 }
 0xc69   :  { %v490_v60 = vmul.f32 %v488_v58, %v482_v59 }
 0xc6b   :  { %492 = vrot.lane.b32.xlu0 %v490_v60, %s859_s3 }
 0xcdd   :  { %v493_v62 = vpop.permute.xlu0 %492 }
 0xcde   :  { %v1076_v63 = vadd.f32 %v493_v62, %v485_v61 }
 0xce0   :  { %839 = vtanh.f32 %v1076_v63 }
 0xce6   :  { %v840_v0 = vpop.eup %839 }
 0xce7   :  { %498 = vrot.lane.b32.xlu1 %v840_v0, %s858_s27 }
 0xd59   :  { %v499_v1 = vpop.permute.xlu1 %498 }
 0xd5a   :  { %v501_v2 = vmul.f32 %v499_v1, %v482_v59 }
 0xd5c   :  { %503 = vrot.lane.b32.xlu2 %v501_v2, %s859_s3 }
 0xdb6   :  { %v504_v3 = vpop.permute.xlu2 %503 }
 0xdb7   :  { %507 = vst.msk [vmem:[#allocation2 + $0x28] sm:$0xff] %vm42_vm0, %v504_v3  ;;  %767 = vmatmul.msk.f32.vlgmr.msrb.gmra.mxu1 %vm42_vm0, %v504_v3 }
 0xdbe   :  { %v651_v5 = vld [vmem:[#allocation2 + $0x28] sm:$0xff] }
 0xdbf   :  { %771 = vmatmul.msk.f32.vlgmr.msra.gmra.mxu1 %vm42_vm0, %v646_v4  ;;  %776 = vmatmul.msk.f32.gmra.mxu3 %vm42_vm0, %v651_v5 }
 0xdc7   :  { %772 = vmatmul.msk.f32.gmra.mxu1 %vm42_vm0, %v647_v6 }
 0xdcf   :  { %773 = vmatmul.msk.f32.gmra.mxu1 %vm42_vm0, %v648_v7 }
 0xdd7   :  { %774 = vmatmul.msk.f32.gmra.mxu1 %vm42_vm0, %v649_v8 }
 0xe34   :  { %v527_v10 = vpop.f32.mrf.mxu1 }
 0xe35   :  { %v530_v11 = vadd.f32 %v527_v10, %v103_v9 }
 0xe37   :  { %841 = vtanh.f32 %v530_v11  ;;  %v768_v25 = vmul.f32 -1.442695, %v530_v11 }
 0xe39   :  { %843 = vpow2.f32 %v768_v25 }
 0xe3c   :  { %v703_v14 = vpop.f32.mrf.mxu1 }
 0xe3d   :  { %v842_v16 = vpop.eup %841  ;;  %v704_v17 = vadd.f32 %v1066_v42, %v703_v14 }
 0xe3e   :  { %553 = vrot.lane.b32.xlu0 %v842_v16, %s858_s27 }
 0xe3f   :  { %728 = vst.msk [vmem:[%s1155_s6] sm:$0xff] %vm727_vm6, %v704_v17  ;;  %v844_v26 = vpop.eup %843 }
 0xe40   :  { %v534_v27 = vadd.f32 1.0, %v844_v26 }
 0xe42   :  { %v718_v18 = vpop.f32.mrf.mxu3  ;;  %845 = vrcp.f32 %v534_v27  ;;  %v546_v33 = vand.u32 2147483648, %v534_v27  ;;  %vm540_vm12 = vweird.f32 %v534_v27  ;;  %v544_v34 = vand.u32 2147483647, %v534_v27 }
 0xe43   :  { %v719_v19 = vadd.f32 %v1066_v42, %v718_v18 }
 0xe44   :  { %v706_v20 = vpop.f32.mrf.mxu1  ;;  %v547_v36 = vor.u32 1.1754944e-38, %v546_v33  ;;  %vm545_vm14 = vcmp.eq.f32.partialorder %v544_v34, 8.507059e+37 }
 0xe45   :  { %733 = vst.msk [vmem:[%s1155_s6 + $0x28] sm:$0xff] %vm727_vm6, %v719_v19  ;;  %v707_v12 = vadd.f32 %v1066_v42, %v706_v20 }
 0xe47   :  { %729 = vst.msk [vmem:[%s1155_s6 + $0x8] sm:$0xff] %vm727_vm6, %v707_v12 }
 0xe48   :  { %v846_v28 = vpop.eup %845 }
 0xe49   :  { %v536_v29 = vmul.f32 %v846_v28, %v534_v27  ;;  %vm541_vm11 = vweird.f32 %v846_v28 }
 0xe4a   :  { %vm542_vm13 = vmor %vm540_vm12, %vm541_vm11 }
 0xe4b   :  { %v537_v30 = vsub.f32 1.0, %v536_v29 }
 0xe4c   :  { %v709_v21 = vpop.f32.mrf.mxu1 }
 0xe4d   :  { %v710_v22 = vadd.f32 %v1066_v42, %v709_v21  ;;  %v538_v31 = vmul.f32 %v846_v28, %v537_v30 }
 0xe4f   :  { %730 = vst.msk [vmem:[%s1155_s6 + $0x10] sm:$0xff] %vm727_vm6, %v710_v22  ;;  %v539_v32 = vadd.f32 %v846_v28, %v538_v31 }
 0xe51   :  { %v543_v35 = vsel %vm542_vm13, %v846_v28, %v539_v32 }
 0xe52   :  { %v548_v38 = vsel %vm545_vm14, %v547_v36, %v543_v35 }
 0xe53   :  { %v551_v40 = vmul.f32 %v548_v38, %v1076_v63 }
 0xe54   :  { %v712_v23 = vpop.f32.mrf.mxu1 }
 0xe55   :  { %v713_v24 = vadd.f32 %v1066_v42, %v712_v23 }
 0xe57   :  { %731 = vst.msk [vmem:[%s1155_s6 + $0x18] sm:$0xff] %vm727_vm6, %v713_v24 }
 0xeb0   :  { %v554_v37 = vpop.permute.xlu0 %553 }
 0xeb1   :  { %v556_v39 = vmul.f32 %v554_v37, %v548_v38 }
 0xeb3   :  { %558 = vrot.lane.b32.xlu1 %v556_v39, %s859_s3 }
 0xf25   :  { %v559_v41 = vpop.permute.xlu1 %558 }
 0xf26   :  { %v561_v43 = vadd.f32 %v559_v41, %v551_v40 }
 0xf28   :  { %847 = vtanh.f32 %v561_v43 }
 0xf2e   :  { %v848_v44 = vpop.eup %847 }
 0xf2f   :  { %564 = vrot.lane.b32.xlu2 %v848_v44, %s858_s27 }
 0xf89   :  { %v565_v45 = vpop.permute.xlu2 %564 }
 0xf8a   :  { %v567_v46 = vmul.f32 %v565_v45, %v548_v38 }
 0xf8c   :  { %569 = vrot.lane.b32.xlu0 %v567_v46, %s859_s3 }
 0xffe   :  { %v570_v47 = vpop.permute.xlu0 %569 }
 0xfff   :  { %573 = vst.msk [vmem:[#allocation2 + $0x30] sm:$0xff] %vm42_vm0, %v570_v47  ;;  %769 = vmatmul.msk.f32.vlgmr.msra.gmra.mxu2 %vm42_vm0, %v570_v47 }
0x1006   :  { %v652_v48 = vld [vmem:[#allocation2 + $0x30] sm:$0xff] }
0x1007   :  { %777 = vmatmul.msk.f32.gmra.mxu3 %vm42_vm0, %v652_v48 }
0x1082   :  { %v593_v50 = vpop.f32.mrf.mxu2 }
0x1083   :  { %v596_v51 = vadd.f32 %v593_v50, %v106_v49 }
0x1085   :  { %849 = vtanh.f32 %v596_v51  ;;  %v770_v55 = vmul.f32 -1.442695, %v596_v51 }
0x1087   :  { %851 = vpow2.f32 %v770_v55 }
0x108a   :  { %v721_v52 = vpop.f32.mrf.mxu3 }
0x108b   :  { %v850_v53 = vpop.eup %849  ;;  %v722_v54 = vadd.f32 %v1066_v42, %v721_v52 }
0x108c   :  { %619 = vrot.lane.b32.xlu1 %v850_v53, %s858_s27 }
0x108d   :  { %734 = vst.msk [vmem:[%s1155_s6 + $0x30] sm:$0xff] %vm727_vm6, %v722_v54  ;;  %v852_v56 = vpop.eup %851 }
0x108e   :  { %v600_v57 = vadd.f32 1.0, %v852_v56 }
0x1090   :  { %853 = vrcp.f32 %v600_v57  ;;  %v612_v61 = vand.u32 2147483648, %v600_v57  ;;  %vm606_vm1 = vweird.f32 %v600_v57  ;;  %v610_v62 = vand.u32 2147483647, %v600_v57 }
0x1092   :  { %v613_v0 = vor.u32 1.1754944e-38, %v612_v61  ;;  %vm611_vm3 = vcmp.eq.f32.partialorder %v610_v62, 8.507059e+37 }
0x1096   :  { %v854_v13 = vpop.eup %853 }
0x1097   :  { %v602_v15 = vmul.f32 %v854_v13, %v600_v57  ;;  %vm607_vm15 = vweird.f32 %v854_v13 }
0x1098   :  { %vm608_vm2 = vmor %vm606_vm1, %vm607_vm15 }
0x1099   :  { %v603_v58 = vsub.f32 1.0, %v602_v15 }
0x109b   :  { %v604_v59 = vmul.f32 %v854_v13, %v603_v58 }
0x109d   :  { %v605_v60 = vadd.f32 %v854_v13, %v604_v59 }
0x109f   :  { %v609_v63 = vsel %vm608_vm2, %v854_v13, %v605_v60 }
0x10a0   :  { %v614_v2 = vsel %vm611_vm3, %v613_v0, %v609_v63 }
0x10a1   :  { %v617_v4 = vmul.f32 %v614_v2, %v561_v43 }
0x10fe   :  { %v620_v1 = vpop.permute.xlu1 %619 }
0x10ff   :  { %v622_v3 = vmul.f32 %v620_v1, %v614_v2 }
0x1101   :  { %624 = vrot.lane.b32.xlu2 %v622_v3, %s859_s3 }
0x115b   :  { %v625_v5 = vpop.permute.xlu2 %624 }
0x115c   :  { %v627_v6 = vadd.f32 %v625_v5, %v617_v4 }
0x115e   :  { %855 = vtanh.f32 %v627_v6  ;;  %642 = vrot.lane.b32.xlu2 %v627_v6, %s860_s14 }
0x1164   :  { %v856_v7 = vpop.eup %855 }
0x1165   :  { %630 = vrot.lane.b32.xlu0 %v856_v7, %s858_s27 }
0x11b8   :  { %v643_v8 = vpop.permute.xlu2 %642 }
0x11b9   :  { %645 = vst.msk [vmem:[%s1156_s8] sm:$0xff] %vm42_vm0, %v643_v8 }
0x11d7   :  { %v631_v9 = vpop.permute.xlu0 %630 }
0x11d8   :  { %v633_v10 = vmul.f32 %v631_v9, %v614_v2 }
0x11da   :  { %635 = vrot.lane.b32.xlu1 %v633_v10, %s859_s3 }
0x124c   :  { %v636_v11 = vpop.permute.xlu1 %635 }
0x124d   :  { %639 = vst.msk [vmem:[#allocation2 + $0x38] sm:$0xff] %vm42_vm0, %v636_v11 }
0x124e   :  { %640 = vst.msk [vmem:[%s1157_s7] sm:$0xff] %vm42_vm0, %v636_v11 }
0x1254   :  { %v653_v14 = vld [vmem:[#allocation2 + $0x38] sm:$0xff] }
0x1255   :  { %778 = vmatmul.msk.f32.gmra.mxu3 %vm42_vm0, %v653_v14 }
0x12d8   :  { %v724_v16 = vpop.f32.mrf.mxu3 }
0x12d9   :  { %v725_v17 = vadd.f32 %v1066_v42, %v724_v16 }
0x12db   :  { %735 = vst.msk [vmem:[%s1155_s6 + $0x38] sm:$0xff] %vm727_vm6, %v725_v17 }

// kernel: pointer_network_forward.3
= control target key start
LH: loop header
LB: loop body
LE: loop exit
PB: predicated region body
PF: predicated region fallthrough
CT: control target
= control target key end

     0   :  { %s6787_s28 = smov 32   ;;  %vm106_vm0 = vcmask 261120   ;;  %vm111_vm1 = vcmask 523264   ;;  %vm304_vm6 = vcmask 1041409   ;;  %vm306_vm7 = vcmask 1042434   ;;  %s9536_s1 = inlined_call_operand.vmem [shape: f32[8,32], index: 1, kind: input, shape index: {}]   ;;  %s9537_s7 = inlined_call_operand.vmem [shape: f32[64,128], index: 7, kind: input, shape index: {}]   ;;  %s9538_s8 = inlined_call_operand.vmem [shape: f32[1,128], index: 8, kind: input, shape index: {}]   ;;  %s9539_s2 = inlined_call_operand.vmem [shape: f32[8,32], index: 2, kind: input, shape index: {}]   ;;  %s9540_s0 = inlined_call_operand.vmem [shape: f32[8,32], index: 0, kind: input, shape index: {}]   ;;  %s9541_s10 = inlined_call_operand.vmem [shape: f32[1,32], index: 10, kind: input, shape index: {}]   ;;  %s9542_s9 = inlined_call_operand.vmem [shape: f32[32,32], index: 9, kind: input, shape index: {}]   ;;  %s9543_s11 = inlined_call_operand.vmem [shape: f32[1,32], index: 11, kind: input, shape index: {}]   ;;  %s9544_s4 = inlined_call_operand.vmem [shape: f32[8,8,32], index: 4, kind: input, shape index: {}]   ;;  %s9545_s13 = inlined_call_operand.vmem [shape: f32[1,32], index: 13, kind: input, shape index: {}]   ;;  %s9546_s12 = inlined_call_operand.vmem [shape: f32[32,32], index: 12, kind: input, shape index: {}]   ;;  %s9547_s6 = inlined_call_operand.vmem [shape: f32[8,8,8], index: 6, kind: input, shape index: {}]   ;;  %s9548_s14 = inlined_call_operand.vmem [shape: f32[1,32], index: 14, kind: input, shape index: {}]   ;;  %s9549_s5 = inlined_call_operand.vmem [shape: f32[8,8,32], index: 5, kind: input, shape index: {}]   ;;  %s9550_s16 = inlined_call_operand.vmem [shape: f32[8,8,8], index: 16, kind: output, shape index: {1}]   ;;  %s9551_s3 = inlined_call_operand.vmem [shape: f32[8,8,32], index: 3, kind: input, shape index: {}]   ;;  %s9552_s15 = inlined_call_operand.vmem [shape: f32[8,8,8], index: 15, kind: output, shape index: {0}]  }
   0x1   :  { %9592 = sst [smem:[#allocation22_spill]] %s9536_s1  ;;  %v83_v1 = vld [vmem:[%s9537_s7 + $0x38] sm:$0xff]  ;;  %v82_v2 = vld [vmem:[%s9537_s7 + $0x30] sm:$0xff]  ;;  %v81_v3 = vld [vmem:[%s9537_s7 + $0x28] sm:$0xff]  ;;  %vm308_vm8 = vcmask 1043459   ;;  %vm310_vm9 = vcmask 1044484  }
   0x2   :  { %s9593_s23 = sld [smem:[#allocation22_spill]]  ;;  %123 = vmatpush.msra.mxu0 %v83_v1  ;;  %1280 = vmatpush.msra.mxu3 %v83_v1  ;;  %v80_v4 = vld [vmem:[%s9537_s7 + $0x20] sm:$0xff]  ;;  %v79_v5 = vld [vmem:[%s9537_s7 + $0x18] sm:$0xff]  ;;  %v78_v6 = vld [vmem:[%s9537_s7 + $0x10] sm:$0xff]  ;;  %vm312_vm10 = vcmask 1045509   ;;  %vm314_vm11 = vcmask 1046534  }
   0x3   :  { %v77_v7 = vld [vmem:[%s9537_s7 + $0x8] sm:$0xff]  ;;  %v76_v8 = vld [vmem:[%s9537_s7] sm:$0xff]  ;;  %v88_v37 = vld [vmem:[%s9542_s9 + $0x18] sm:$0xff]  ;;  %vm316_vm12 = vcmask 1047559   ;;  %vm319_vm13 = vcmask 64512  }
   0x4   :  { %124 = vmatpush.msra.mxu0 %v82_v2  ;;  %1281 = vmatpush.msra.mxu3 %v82_v2  ;;  %v101_v9 = vld [vmem:[%s9539_s2] sm:$0xff]  ;;  %v87_v38 = vld [vmem:[%s9542_s9 + $0x10] sm:$0xff]  ;;  %v86_v39 = vld [vmem:[%s9542_s9 + $0x8] sm:$0xff] }
   0x5   :  { %156 = vrot.lane.b32.xlu1 %v101_v9, %s6787_s28  ;;  %v99_v10 = vld [vmem:[%s9540_s0] sm:$0xff]  ;;  %s6788_s0 = smov 64   ;;  %196 = vmatpush.msra.mxu1 %v88_v37  ;;  %v6950_v52 = vld [vmem:[%s9544_s4 + $0x10] sm:$0xff]  ;;  %v6955_v53 = vld [vmem:[%s9544_s4 + $0x8] sm:$0xff] }
   0x6   :  { %125 = vmatpush.msra.mxu0 %v81_v3  ;;  %1282 = vmatpush.msra.mxu3 %v81_v3  ;;  %v6077_v13 = vld [vmem:[%s9538_s8] ss:$0 sm:$0xff]  ;;  %v6966_v61 = vld [vmem:[%s9544_s4 + $0x18] sm:$0xff] }
   0x7   :  { %197 = vmatpush.msra.mxu1 %v87_v38  ;;  %v85_v40 = vld [vmem:[%s9542_s9] sm:$0xff] }
   0x8   :  { %v100_v0 = vld [vmem:[%s9593_s23] sm:$0xff]  ;;  %126 = vmatpush.msra.mxu0 %v80_v4  ;;  %1283 = vmatpush.msra.mxu3 %v80_v4 }
   0x9   :  { %103 = vrot.lane.b32.xlu0 %v100_v0, %s6787_s28  ;;  %198 = vmatpush.msra.mxu1 %v86_v39  ;;  %v6078_v44 = vld [vmem:[%s9541_s10] ss:$0 sm:$0xff] }
   0xa   :  { %127 = vmatpush.msra.mxu0 %v79_v5  ;;  %1284 = vmatpush.msra.mxu3 %v79_v5  ;;  %v6945_v47 = vld [vmem:[%s9544_s4] sm:$0xff] }
   0xb   :  { %199 = vmatpush.msra.mxu1 %v85_v40  ;;  %v6960_v54 = vld [vmem:[%s9544_s4 + $0x20] sm:$0xff] }
   0xc   :  { %128 = vmatpush.msra.mxu0 %v78_v6  ;;  %1285 = vmatpush.msra.mxu3 %v78_v6 }
   0xd   :  { %1346 = vmatpush.msrb.mxu1 %v88_v37 }
   0xe   :  { %129 = vmatpush.msra.mxu0 %v77_v7  ;;  %1286 = vmatpush.msra.mxu3 %v77_v7 }
   0xf   :  { %1347 = vmatpush.msrb.mxu1 %v87_v38 }
  0x10   :  { %130 = vmatpush.msra.mxu0 %v76_v8  ;;  %1287 = vmatpush.msra.mxu3 %v76_v8 }
  0x11   :  { %1348 = vmatpush.msrb.mxu1 %v86_v39 }
  0x12   :  { %1954 = vmatpush.msrb.mxu0 %v83_v1  ;;  %2628 = vmatpush.msrb.mxu3 %v83_v1 }
  0x13   :  { %1349 = vmatpush.msrb.mxu1 %v85_v40 }
  0x14   :  { %1955 = vmatpush.msrb.mxu0 %v82_v2  ;;  %2629 = vmatpush.msrb.mxu3 %v82_v2 }
  0x16   :  { %1956 = vmatpush.msrb.mxu0 %v81_v3  ;;  %2630 = vmatpush.msrb.mxu3 %v81_v3 }
  0x18   :  { %1957 = vmatpush.msrb.mxu0 %v80_v4  ;;  %2631 = vmatpush.msrb.mxu3 %v80_v4 }
  0x1a   :  { %1958 = vmatpush.msrb.mxu0 %v79_v5  ;;  %2632 = vmatpush.msrb.mxu3 %v79_v5 }
  0x1c   :  { %1959 = vmatpush.msrb.mxu0 %v78_v6  ;;  %2633 = vmatpush.msrb.mxu3 %v78_v6 }
  0x1e   :  { %1960 = vmatpush.msrb.mxu0 %v77_v7  ;;  %2634 = vmatpush.msrb.mxu3 %v77_v7 }
  0x20   :  { %1961 = vmatpush.msrb.mxu0 %v76_v8  ;;  %2635 = vmatpush.msrb.mxu3 %v76_v8 }
  0x77   :  { %v157_v32 = vpop.permute.xlu1 %156 }
  0x7b   :  { %v104_v11 = vpop.permute.xlu0 %103 }
  0x7c   :  { %v107_v12 = vsel %vm106_vm0, %v99_v10, %v104_v11  ;;  %v6984_v10 = vld [vmem:[%s9544_s4 + $0x38] sm:$0xff] }
  0x7d   :  { %5854 = vmatmul.msk.f32.vlgmr.msra.gmra.mxu0 %vm111_vm1, %v107_v12 }
  0x7e   :  { %3302 = vmatpush.msra.mxu0 %v83_v1 }
  0x80   :  { %3303 = vmatpush.msra.mxu0 %v82_v2 }
  0x82   :  { %3304 = vmatpush.msra.mxu0 %v81_v3 }
  0x84   :  { %3305 = vmatpush.msra.mxu0 %v80_v4  ;;  %v6974_v4 = vld [vmem:[%s9544_s4 + $0x28] sm:$0xff] }
  0x86   :  { %3306 = vmatpush.msra.mxu0 %v79_v5 }
  0x88   :  { %3307 = vmatpush.msra.mxu0 %v78_v6 }
  0x8a   :  { %3308 = vmatpush.msra.mxu0 %v77_v7  ;;  %v6079_v7 = vld [vmem:[%s9543_s11] ss:$0 sm:$0xff] }
  0x8c   :  { %3309 = vmatpush.msra.mxu0 %v76_v8 }
  0xfa   :  { %v132_v14 = vpop.f32.mrf.mxu0 }
  0xfb   :  { %v133_v15 = vadd.f32 %v6077_v13, %v132_v14  ;;  %v6989_v14 = vld [vmem:[%s9544_s4 + $0x30] sm:$0xff] }
  0xfd   :  { %6082 = vtanh.f32 %v133_v15  ;;  %v5855_v17 = vmul.f32 -1.442695, %v133_v15 }
  0xff   :  { %6084 = vpow2.f32 %v5855_v17 }
 0x103   :  { %v6083_v16 = vpop.eup %6082 }
 0x104   :  { %161 = vrot.lane.b32.xlu0 %v6083_v16, %s6788_s0 }
 0x105   :  { %v6085_v18 = vpop.eup %6084 }
 0x106   :  { %v138_v19 = vadd.f32 1.0, %v6085_v18 }
 0x108   :  { %6086 = vrcp.f32 %v138_v19  ;;  %v150_v25 = vand.u32 2147483648, %v138_v19  ;;  %vm144_vm3 = vweird.f32 %v138_v19  ;;  %v148_v26 = vand.u32 2147483647, %v138_v19 }
 0x10a   :  { %v151_v28 = vor.u32 1.1754944e-38, %v150_v25  ;;  %vm149_vm5 = vcmp.eq.f32.partialorder %v148_v26, 8.507059e+37 }
 0x10e   :  { %v6087_v20 = vpop.eup %6086 }
 0x10f   :  { %v140_v21 = vmul.f32 %v6087_v20, %v138_v19  ;;  %vm145_vm2 = vweird.f32 %v6087_v20 }
 0x110   :  { %vm146_vm4 = vmor %vm144_vm3, %vm145_vm2 }
 0x111   :  { %v141_v22 = vsub.f32 1.0, %v140_v21 }
 0x113   :  { %v142_v23 = vmul.f32 %v6087_v20, %v141_v22 }
 0x115   :  { %v143_v24 = vadd.f32 %v6087_v20, %v142_v23 }
 0x117   :  { %v147_v27 = vsel %vm146_vm4, %v6087_v20, %v143_v24 }
 0x118   :  { %v152_v29 = vsel %vm149_vm5, %v151_v28, %v147_v27 }
 0x119   :  { %v159_v33 = vmul.f32 %v157_v32, %v152_v29 }
 0x176   :  { %v162_v30 = vpop.permute.xlu0 %161 }
 0x177   :  { %v164_v31 = vmul.f32 %v162_v30, %v152_v29 }
 0x179   :  { %166 = vrot.lane.b32.xlu1 %v164_v31, %s6787_s28 }
 0x1eb   :  { %v167_v34 = vpop.permute.xlu1 %166 }
 0x1ec   :  { %v6918_v35 = vadd.f32 %v167_v34, %v159_v33 }
 0x1ee   :  { %6088 = vtanh.f32 %v6918_v35 }
 0x1f4   :  { %v6089_v36 = vpop.eup %6088 }
 0x1f5   :  { %172 = vrot.lane.b32.xlu2 %v6089_v36, %s6788_s0 }
 0x24f   :  { %v173_v41 = vpop.permute.xlu2 %172 }
 0x250   :  { %v6934_v42 = vmul.f32 %v173_v41, %v152_v29 }
 0x252   :  { %180 = vrot.lane.b32.xlu2 %v6934_v42, %s6787_s28 }
 0x2ac   :  { %v181_v43 = vpop.permute.xlu2 %180 }
 0x2ad   :  { %5856 = vmatmul.msk.f32.vlgmr.msra.gmra.mxu1 %vm106_vm0, %v181_v43 }
 0x2ae   :  { %2020 = vmatpush.msra.mxu1 %v88_v37 }
 0x2b0   :  { %2021 = vmatpush.msra.mxu1 %v87_v38 }
 0x2b2   :  { %2022 = vmatpush.msra.mxu1 %v86_v39 }
 0x2b4   :  { %2023 = vmatpush.msra.mxu1 %v85_v40  ;;  %v97_v40 = vlaneseq }
 0x32a   :  { %v201_v45 = vpop.f32.mrf.mxu1 }
 0x32b   :  { %v202_v46 = vadd.f32 %v6078_v44, %v201_v45  ;;  %v7002_v45 = vand.u32 127, %v97_v40 }
 0x32d   :  { %v212_v48 = vperm.slane %v202_v46, 0  ;;  %v206_v49 = vrot.slane %v202_v46, 2  ;;  %v205_v50 = vrot.slane %v202_v46, 1  ;;  %v208_v51 = vrot.slane %v202_v46, 4 }
 0x32e   :  { %v207_v55 = vrot.slane %v202_v46, 3  ;;  %v209_v56 = vrot.slane %v202_v46, 5  ;;  %v211_v0 = vrot.slane %v202_v46, 7  ;;  %v210_v6 = vrot.slane %v202_v46, 6 }
 0x32f   :  { %v228_v57 = vadd.f32 %v212_v48, %v6945_v47  ;;  %v214_v58 = vperm.slane %v206_v49, 0  ;;  %v213_v59 = vperm.slane %v205_v50, 0  ;;  %v216_v60 = vperm.slane %v208_v51, 0 }
 0x330   :  { %v215_v62 = vperm.slane %v207_v55, 0  ;;  %v217_v63 = vperm.slane %v209_v56, 0  ;;  %v219_v9 = vperm.slane %v211_v0, 0  ;;  %v218_v12 = vperm.slane %v210_v6, 0 }
 0x331   :  { %6090 = vtanh.f32 %v228_v57  ;;  %v230_v1 = vadd.f32 %v214_v58, %v6950_v52  ;;  %v229_v2 = vadd.f32 %v213_v59, %v6955_v53  ;;  %v232_v3 = vadd.f32 %v216_v60, %v6960_v54 }
 0x332   :  { %v231_v5 = vadd.f32 %v215_v62, %v6966_v61  ;;  %v233_v8 = vadd.f32 %v217_v63, %v6974_v4  ;;  %v235_v16 = vadd.f32 %v219_v9, %v6984_v10  ;;  %v234_v22 = vadd.f32 %v218_v12, %v6989_v14 }
 0x333   :  { %6092 = vtanh.f32 %v230_v1  ;;  %v9553_v9 = vmov 0  }
 0x334   :  { %6094 = vtanh.f32 %v229_v2  ;;  %5921 = vset.pattern.permute.xlu1 %v9553_v9  ;;  %5920 = vset.pattern.permute.xlu0 %v9553_v9 }
 0x335   :  { %6096 = vtanh.f32 %v232_v3  ;;  %5919 = vset.pattern.permute.xlu2 %v9553_v9 }
 0x336   :  { %6098 = vtanh.f32 %v231_v5 }
 0x337   :  { %v6091_v11 = vpop.eup %6090  ;;  %6100 = vtanh.f32 %v233_v8 }
 0x338   :  { %v247_v13 = vmul.f32 %v6091_v11, %v6079_v7  ;;  %6102 = vtanh.f32 %v235_v16 }
 0x339   :  { %v6093_v15 = vpop.eup %6092  ;;  %6104 = vtanh.f32 %v234_v22 }
 0x33a   :  { %v6095_v17 = vpop.eup %6094  ;;  %v255_v18 = vsel %vm106_vm0, %v247_v13, 0.0  ;;  %v249_v19 = vmul.f32 %v6093_v15, %v6079_v7 }
 0x33b   :  { %v6097_v20 = vpop.eup %6096  ;;  %256 = vadd.xlane.f32.xlu0 %v255_v18  ;;  %v248_v21 = vmul.f32 %v6095_v17, %v6079_v7 }
 0x33c   :  { %v261_v23 = vsel %vm106_vm0, %v249_v19, 0.0  ;;  %v6099_v24 = vpop.eup %6098  ;;  %v251_v27 = vmul.f32 %v6097_v20, %v6079_v7 }
 0x33d   :  { %262 = vadd.xlane.f32.xlu2 %v261_v23  ;;  %v258_v25 = vsel %vm106_vm0, %v248_v21, 0.0  ;;  %v6101_v26 = vpop.eup %6100  ;;  %v250_v28 = vmul.f32 %v6099_v24, %v6079_v7 }
 0x33e   :  { %259 = vadd.xlane.f32.xlu1 %v258_v25  ;;  %v252_v29 = vmul.f32 %v6101_v26, %v6079_v7  ;;  %v267_v30 = vsel %vm106_vm0, %v251_v27, 0.0  ;;  %v6103_v31 = vpop.eup %6102 }
 0x33f   :  { %v264_v32 = vsel %vm106_vm0, %v250_v28, 0.0  ;;  %v6105_v33 = vpop.eup %6104  ;;  %v254_v36 = vmul.f32 %v6103_v31, %v6079_v7 }
 0x340   :  { %v270_v34 = vsel %vm106_vm0, %v252_v29, 0.0  ;;  %v253_v37 = vmul.f32 %v6105_v33, %v6079_v7 }
 0x341   :  { %v276_v38 = vsel %vm106_vm0, %v254_v36, 0.0 }
 0x342   :  { %v273_v39 = vsel %vm106_vm0, %v253_v37, 0.0 }
 0x343   :  { %268 = vadd.xlane.f32.xlu0 %v267_v30 }
 0x345   :  { %265 = vadd.xlane.f32.xlu2 %v264_v32 }
 0x346   :  { %271 = vadd.xlane.f32.xlu1 %v270_v34 }
 0x34b   :  { %277 = vadd.xlane.f32.xlu0 %v276_v38 }
 0x34d   :  { %274 = vadd.xlane.f32.xlu2 %v273_v39 }
 0x3ae   :  { %v257_v41 = vpop.xlane.xlu0 %256 }
 0x3af   :  { %v296_v48 = vperm.slane %v257_v41, %v7002_v45 }
 0x3b0   :  { %v263_v43 = vpop.xlane.xlu2 %262 }
 0x3b1   :  { %v260_v44 = vpop.xlane.xlu1 %259  ;;  %v298_v50 = vperm.slane %v263_v43, %v7002_v45 }
 0x3b2   :  { %v297_v46 = vperm.slane %v260_v44, %v7002_v45 }
 0x3b4   :  { %v305_v51 = vsel %vm304_vm6, %v297_v46, %v296_v48 }
 0x3b5   :  { %v307_v57 = vsel %vm306_vm7, %v298_v50, %v305_v51 }
 0x3b6   :  { %v269_v49 = vpop.xlane.xlu0 %268 }
 0x3b7   :  { %v300_v59 = vperm.slane %v269_v49, %v7002_v45 }
 0x3b8   :  { %v266_v55 = vpop.xlane.xlu2 %265 }
 0x3b9   :  { %v299_v56 = vperm.slane %v266_v55, %v7002_v45  ;;  %v272_v60 = vpop.xlane.xlu1 %271 }
 0x3ba   :  { %v301_v0 = vperm.slane %v272_v60, %v7002_v45 }
 0x3bb   :  { %v309_v58 = vsel %vm308_vm8, %v299_v56, %v307_v57 }
 0x3bc   :  { %v311_v63 = vsel %vm310_vm9, %v300_v59, %v309_v58 }
 0x3bd   :  { %v313_v5 = vsel %vm312_vm10, %v301_v0, %v311_v63 }
 0x3be   :  { %v278_v62 = vpop.xlane.xlu0 %277 }
 0x3bf   :  { %v303_v3 = vperm.slane %v278_v62, %v7002_v45 }
 0x3c0   :  { %v275_v1 = vpop.xlane.xlu2 %274 }
 0x3c1   :  { %v302_v2 = vperm.slane %v275_v1, %v7002_v45 }
 0x3c3   :  { %v315_v6 = vsel %vm314_vm11, %v302_v2, %v313_v5 }
 0x3c4   :  { %v317_v7 = vsel %vm316_vm12, %v303_v3, %v315_v6 }
 0x3c5   :  { %v320_v8 = vsel %vm319_vm13, %v317_v7, -inf }
 0x3c6   :  { %321 = vmax.xlane.f32.xlu1 %v320_v8 }
 0x439   :  { %v322_v11 = vpop.xlane.xlu1 %321 }
 0x43a   :  { %v326_v12 = vperm.slane %v322_v11, 2  ;;  %v325_v13 = vperm.slane %v322_v11, 1  ;;  %v324_v15 = vperm.slane %v322_v11, 0  ;;  %v328_v19 = vperm.slane %v322_v11, 4 }
 0x43b   :  { %v327_v20 = vperm.slane %v322_v11, 3  ;;  %v330_v27 = vperm.slane %v322_v11, 6  ;;  %v329_v30 = vperm.slane %v322_v11, 5  ;;  %v331_v39 = vperm.slane %v322_v11, 7 }
 0x43c   :  { %v342_v16 = vsub.f32 %v263_v43, %v326_v12  ;;  %v341_v17 = vsub.f32 %v260_v44, %v325_v13  ;;  %v340_v18 = vsub.f32 %v257_v41, %v324_v15  ;;  %v344_v24 = vsub.f32 %v269_v49, %v328_v19 }
 0x43d   :  { %v343_v25 = vsub.f32 %v266_v55, %v327_v20  ;;  %v346_v33 = vsub.f32 %v275_v1, %v330_v27  ;;  %v345_v34 = vsub.f32 %v272_v60, %v329_v30  ;;  %v347_v43 = vsub.f32 %v278_v62, %v331_v39 }
 0x43e   :  { %v352_v21 = vmul.f32 1.442695, %v342_v16  ;;  %v350_v22 = vmul.f32 1.442695, %v341_v17  ;;  %v348_v23 = vmul.f32 1.442695, %v340_v18 }
 0x43f   :  { %v356_v26 = vmul.f32 1.442695, %v344_v24  ;;  %v354_v29 = vmul.f32 1.442695, %v343_v25  ;;  %v360_v36 = vmul.f32 1.442695, %v346_v33 }
 0x440   :  { %6106 = vpow2.f32 %v352_v21  ;;  %v358_v38 = vmul.f32 1.442695, %v345_v34  ;;  %v362_v46 = vmul.f32 1.442695, %v347_v43 }
 0x441   :  { %6108 = vpow2.f32 %v350_v22 }
 0x442   :  { %6110 = vpow2.f32 %v348_v23 }
 0x443   :  { %6112 = vpow2.f32 %v356_v26 }
 0x444   :  { %6114 = vpow2.f32 %v354_v29 }
 0x445   :  { %6116 = vpow2.f32 %v360_v36 }
 0x446   :  { %v7023_v28 = vpop.eup %6106  ;;  %6118 = vpow2.f32 %v358_v38 }
 0x447   :  { %v7025_v31 = vpop.eup %6108  ;;  %379 = vperm.xlu1 %5921, %v7023_v28   ;;  %6120 = vpow2.f32 %v362_v46 }
 0x448   :  { %v7028_v32 = vpop.eup %6110  ;;  %376 = vperm.xlu0 %5920, %v7025_v31  }
 0x449   :  { %373 = vperm.xlu2 %5919, %v7028_v32   ;;  %v7032_v37 = vpop.eup %6112 }
 0x44a   :  { %v6115_v41 = vpop.eup %6114 }
 0x44b   :  { %v7035_v44 = vpop.eup %6116 }
 0x44c   :  { %v6119_v48 = vpop.eup %6118 }
 0x44d   :  { %v7038_v49 = vpop.eup %6120 }
 0x44f   :  { %385 = vperm.xlu1 %5921, %v7032_v37  }
 0x451   :  { %382 = vperm.xlu2 %5919, %v6115_v41  }
 0x457   :  { %391 = vperm.xlu1 %5921, %v7035_v44  }
 0x459   :  { %388 = vperm.xlu2 %5919, %v6119_v48  }
 0x461   :  { %394 = vperm.xlu2 %5919, %v7038_v49  }
 0x4a3   :  { %v374_v50 = vpop.permute.xlu2 %373 }
 0x4a4   :  { %v396_v59 = vperm.slane %v374_v50, %v7002_v45 }
 0x4ab   :  { %v383_v51 = vpop.permute.xlu2 %382 }
 0x4ac   :  { %v399_v2 = vperm.slane %v383_v51, %v7002_v45 }
 0x4b3   :  { %v389_v58 = vpop.permute.xlu2 %388 }
 0x4b4   :  { %v401_v7 = vperm.slane %v389_v58, %v7002_v45 }
 0x4b9   :  { %v380_v55 = vpop.permute.xlu1 %379 }
 0x4ba   :  { %v377_v56 = vpop.permute.xlu0 %376  ;;  %v398_v60 = vperm.slane %v380_v55, %v7002_v45 }
 0x4bb   :  { %v397_v57 = vperm.slane %v377_v56, %v7002_v45  ;;  %v395_v5 = vpop.permute.xlu2 %394 }
 0x4bc   :  { %v403_v12 = vperm.slane %v395_v5, %v7002_v45 }
 0x4bd   :  { %v404_v62 = vsel %vm304_vm6, %v397_v57, %v396_v59 }
 0x4be   :  { %v405_v0 = vsel %vm306_vm7, %v398_v60, %v404_v62 }
 0x4bf   :  { %v406_v3 = vsel %vm308_vm8, %v399_v2, %v405_v0 }
 0x4c1   :  { %v386_v63 = vpop.permute.xlu1 %385 }
 0x4c2   :  { %v400_v1 = vperm.slane %v386_v63, %v7002_v45 }
 0x4c4   :  { %v407_v6 = vsel %vm310_vm9, %v400_v1, %v406_v3  ;;  %v7088_v3 = vld [vmem:[%s9546_s12] sm:$0xff] }
 0x4c5   :  { %v408_v13 = vsel %vm312_vm10, %v401_v7, %v407_v6 }
 0x4c9   :  { %v392_v8 = vpop.permute.xlu1 %391 }
 0x4ca   :  { %v402_v11 = vperm.slane %v392_v8, %v7002_v45  ;;  %v7095_v8 = vshrl.u32 %v97_v40, 7 }
 0x4cc   :  { %v409_v15 = vsel %vm314_vm11, %v402_v11, %v408_v13  ;;  %9594 = vst [vmem:[#allocation2_spill] sm:$0xff] %v7095_v8  ;;  %5923 = vset.pattern.permute.xlu0 %v7095_v8 }
 0x4cd   :  { %v410_v16 = vsel %vm316_vm12, %v403_v12, %v409_v15 }
 0x4ce   :  { %v412_v17 = vsel %vm319_vm13, %v410_v16, 0.0 }
 0x4cf   :  { %413 = vadd.xlane.f32.xlu0 %v412_v17 }
 0x542   :  { %v414_v18 = vpop.xlane.xlu0 %413 }
 0x543   :  { %6122 = vrcp.f32 %v414_v18  ;;  %v426_v22 = vand.u32 2147483648, %v414_v18  ;;  %v424_v24 = vand.u32 2147483647, %v414_v18  ;;  %vm420_vm15 = vweird.f32 %v414_v18 }
 0x545   :  { %v427_v26 = vor.u32 1.1754944e-38, %v426_v22  ;;  %vm425_vm3 = vcmp.eq.f32.partialorder %v424_v24, 8.507059e+37 }
 0x549   :  { %v6123_v19 = vpop.eup %6122 }
 0x54a   :  { %v416_v20 = vmul.f32 %v6123_v19, %v414_v18  ;;  %vm421_vm14 = vweird.f32 %v6123_v19 }
 0x54b   :  { %vm422_vm2 = vmor %vm420_vm15, %vm421_vm14 }
 0x54c   :  { %v417_v21 = vsub.f32 1.0, %v416_v20 }
 0x54e   :  { %v418_v23 = vmul.f32 %v6123_v19, %v417_v21 }
 0x550   :  { %v419_v25 = vadd.f32 %v6123_v19, %v418_v23 }
 0x552   :  { %v423_v27 = vsel %vm422_vm2, %v6123_v19, %v419_v25 }
 0x553   :  { %v428_v29 = vsel %vm425_vm3, %v427_v26, %v423_v27 }
 0x554   :  { %v432_v30 = vperm.slane %v428_v29, 1  ;;  %v431_v33 = vperm.slane %v428_v29, 0  ;;  %v434_v38 = vperm.slane %v428_v29, 3  ;;  %v433_v39 = vperm.slane %v428_v29, 2 }
 0x555   :  { %v436_v50 = vperm.slane %v428_v29, 5  ;;  %v435_v51 = vperm.slane %v428_v29, 4  ;;  %v438_v57 = vperm.slane %v428_v29, 7 }
 0x556   :  { %v448_v34 = vmul.f32 %v7025_v31, %v432_v30  ;;  %v447_v36 = vmul.f32 %v7028_v32, %v431_v33  ;;  %v450_v43 = vmul.f32 %v6115_v41, %v434_v38  ;;  %v449_v46 = vmul.f32 %v7023_v28, %v433_v39 }
 0x557   :  { %v452_v55 = vmul.f32 %v6119_v48, %v436_v50  ;;  %v451_v56 = vmul.f32 %v7032_v37, %v435_v51  ;;  %v437_v31 = vperm.slane %v428_v29, 6  ;;  %v454_v32 = vmul.f32 %v7038_v49, %v438_v57  ;;  %v7070_v49 = vld [vmem:[%s9546_s12 + $0x18] sm:$0xff] }
 0x558   :  { %462 = vperm.xlu2 %5919, %v448_v34   ;;  %457 = vperm.xlu1 %5921, %v447_v36  }
 0x559   :  { %v453_v58 = vmul.f32 %v7035_v44, %v437_v31  ;;  %v7075_v44 = vld [vmem:[%s9546_s12 + $0x10] sm:$0xff]  ;;  %591 = vmatpush.msra.mxu2 %v7070_v49 }
 0x55b   :  { %592 = vmatpush.msra.mxu2 %v7075_v44 }
 0x560   :  { %472 = vperm.xlu2 %5919, %v450_v43   ;;  %467 = vperm.xlu1 %5921, %v449_v46  }
 0x568   :  { %482 = vperm.xlu2 %5919, %v452_v55   ;;  %477 = vperm.xlu1 %5921, %v451_v56  }
 0x570   :  { %492 = vperm.xlu2 %5919, %v454_v32   ;;  %487 = vperm.xlu1 %5921, %v453_v58  }
 0x578   :  { %5922 = vset.pattern.permute.xlu2 %v7095_v8  ;;  %5924 = vset.pattern.permute.xlu1 %v7095_v8 }
 0x5b2   :  { %v463_v41 = vpop.permute.xlu2 %462 }
 0x5b3   :  { %v496_v60 = vmul.f32 %v463_v41, %v6955_v53 }
 0x5b5   :  { %v510_v37 = vsel %vm106_vm0, %v496_v60, 0.0 }
 0x5b6   :  { %v511_v0 = vrot.slane %v510_v37, 4 }
 0x5b8   :  { %v512_v11 = vadd.f32 %v511_v0, %v510_v37 }
 0x5ba   :  { %v473_v59 = vpop.permute.xlu2 %472  ;;  %v513_v18 = vrot.slane %v512_v11, 2 }
 0x5bb   :  { %v498_v53 = vmul.f32 %v473_v59, %v6966_v61 }
 0x5bc   :  { %v514_v38 = vadd.f32 %v513_v18, %v512_v11 }
 0x5bd   :  { %v524_v61 = vsel %vm106_vm0, %v498_v53, 0.0 }
 0x5be   :  { %v515_v32 = vrot.slane %v514_v38, 1 }
 0x5c0   :  { %v516_v0 = vadd.f32 %v515_v32, %v514_v38  ;;  %v6081_v32 = vld [vmem:[%s9548_s14] ss:$0 sm:$0xff] }
 0x5c2   :  { %v483_v28 = vpop.permute.xlu2 %482 }
 0x5c3   :  { %v500_v7 = vmul.f32 %v483_v28, %v6974_v4  ;;  %v7105_v4 = vld [vmem:[%s9547_s6] sm:$0xff] }
 0x5c4   :  { %v859_v22 = vperm.slane %v7105_v4, 0  ;;  %v873_v23 = vperm.slane %v7105_v4, 2  ;;  %v866_v27 = vperm.slane %v7105_v4, 1  ;;  %v880_v57 = vperm.slane %v7105_v4, 3 }
 0x5c5   :  { %v538_v40 = vsel %vm106_vm0, %v500_v7, 0.0  ;;  %v887_v31 = vperm.slane %v7105_v4, 4 }
 0x5c6   :  { %v539_v25 = vrot.slane %v538_v40, 4  ;;  %864 = vperm.xlu2 %5922, %v859_v22   ;;  %878 = vperm.xlu1 %5924, %v873_v23  }
 0x5c7   :  { %871 = vperm.xlu0 %5923, %v866_v27  }
 0x5c8   :  { %v540_v43 = vadd.f32 %v539_v25, %v538_v40 }
 0x5ca   :  { %v458_v62 = vpop.permute.xlu1 %457  ;;  %v493_v5 = vpop.permute.xlu2 %492  ;;  %v541_v41 = vrot.slane %v540_v43, 2 }
 0x5cb   :  { %v495_v48 = vmul.f32 %v458_v62, %v6945_v47  ;;  %v7082_v47 = vld [vmem:[%s9546_s12 + $0x8] sm:$0xff]  ;;  %v502_v15 = vmul.f32 %v493_v5, %v6984_v10 }
 0x5cc   :  { %593 = vmatpush.msra.mxu2 %v7082_v47 }
 0x5cd   :  { %v503_v63 = vsel %vm106_vm0, %v495_v48, 0.0  ;;  %v552_v19 = vsel %vm106_vm0, %v502_v15, 0.0 }
 0x5ce   :  { %v504_v1 = vrot.slane %v503_v63, 4  ;;  %594 = vmatpush.msra.mxu2 %v7088_v3  ;;  %v553_v29 = vrot.slane %v552_v19, 4  ;;  %885 = vperm.xlu2 %5922, %v880_v57  }
 0x5cf   :  { %892 = vperm.xlu1 %5924, %v887_v31   ;;  %5925 = vset.pattern.permute.xlu0 %v9553_v9 }
 0x5d0   :  { %v505_v12 = vadd.f32 %v504_v1, %v503_v63  ;;  %1626 = vmatpush.msrb.mxu2 %v7070_v49 }
 0x5d2   :  { %v468_v2 = vpop.permute.xlu1 %467  ;;  %v506_v10 = vrot.slane %v505_v12, 2  ;;  %1627 = vmatpush.msrb.mxu2 %v7075_v44 }
 0x5d3   :  { %v497_v6 = vmul.f32 %v468_v2, %v6950_v52  ;;  %v525_v52 = vrot.slane %v524_v61, 4  ;;  %v542_v2 = vadd.f32 %v541_v41, %v540_v43 }
 0x5d4   :  { %1628 = vmatpush.msrb.mxu2 %v7082_v47  ;;  %v507_v30 = vadd.f32 %v506_v10, %v505_v12 }
 0x5d5   :  { %v517_v13 = vsel %vm106_vm0, %v497_v6, 0.0  ;;  %v526_v24 = vadd.f32 %v525_v52, %v524_v61 }
 0x5d6   :  { %v518_v16 = vrot.slane %v517_v13, 4  ;;  %1629 = vmatpush.msrb.mxu2 %v7088_v3  ;;  %v508_v50 = vrot.slane %v507_v30, 1 }
 0x5d7   :  { %v527_v39 = vrot.slane %v526_v24, 2 }
 0x5d8   :  { %v519_v17 = vadd.f32 %v518_v16, %v517_v13  ;;  %v509_v62 = vadd.f32 %v508_v50, %v507_v30  ;;  %v901_v13 = vperm.slane %v7105_v4, 6  ;;  %v543_v16 = vrot.slane %v542_v2, 1 }
 0x5d9   :  { %v528_v58 = vadd.f32 %v527_v39, %v526_v24  ;;  %v908_v24 = vperm.slane %v7105_v4, 7 }
 0x5da   :  { %v520_v20 = vrot.slane %v519_v17, 2  ;;  %v478_v21 = vpop.permute.xlu1 %477  ;;  %v570_v61 = vsel %vm304_vm6, %v516_v0, %v509_v62  ;;  %906 = vperm.xlu1 %5924, %v901_v13  }
 0x5db   :  { %v499_v26 = vmul.f32 %v478_v21, %v6960_v54  ;;  %v554_v54 = vadd.f32 %v553_v29, %v552_v19  ;;  %v529_v1 = vrot.slane %v528_v58, 1  ;;  %v544_v19 = vadd.f32 %v543_v16, %v542_v2 }
 0x5dc   :  { %v521_v34 = vadd.f32 %v520_v20, %v519_v17 }
 0x5dd   :  { %v531_v33 = vsel %vm106_vm0, %v499_v26, 0.0  ;;  %v555_v60 = vrot.slane %v554_v54, 2  ;;  %v530_v15 = vadd.f32 %v529_v1, %v528_v58 }
 0x5de   :  { %v532_v36 = vrot.slane %v531_v33, 4  ;;  %v522_v51 = vrot.slane %v521_v34, 1 }
 0x5df   :  { %v556_v6 = vadd.f32 %v555_v60, %v554_v54  ;;  %v71_v54 = vld [vmem:[%s9549_s5 + $0x18] sm:$0xff] }
 0x5e0   :  { %v533_v46 = vadd.f32 %v532_v36, %v531_v33  ;;  %v523_v37 = vadd.f32 %v522_v51, %v521_v34  ;;  %v75_v34 = vld [vmem:[%s9549_s5 + $0x38] sm:$0xff] }
 0x5e1   :  { %v557_v40 = vrot.slane %v556_v6, 1 }
 0x5e2   :  { %v534_v55 = vrot.slane %v533_v46, 2  ;;  %v488_v56 = vpop.permute.xlu1 %487  ;;  %v571_v12 = vsel %vm306_vm7, %v523_v37, %v570_v61  ;;  %5926 = vset.pattern.permute.xlu1 %v9553_v9 }
 0x5e3   :  { %v501_v59 = vmul.f32 %v488_v56, %v6989_v14  ;;  %v894_v14 = vperm.slane %v7105_v4, 5  ;;  %v572_v17 = vsel %vm308_vm8, %v530_v15, %v571_v12  ;;  %v558_v21 = vadd.f32 %v557_v40, %v556_v6  ;;  %v6080_v4 = vld [vmem:[%s9545_s13] ss:$0 sm:$0xff] }
 0x5e4   :  { %v535_v28 = vadd.f32 %v534_v55, %v533_v46 }
 0x5e5   :  { %v545_v48 = vsel %vm106_vm0, %v501_v59, 0.0  ;;  %899 = vperm.xlu2 %5922, %v894_v14  }
 0x5e6   :  { %v536_v63 = vrot.slane %v535_v28, 1  ;;  %v546_v53 = vrot.slane %v545_v48, 4 }
 0x5e8   :  { %v547_v5 = vadd.f32 %v546_v53, %v545_v48  ;;  %v537_v7 = vadd.f32 %v536_v63, %v535_v28  ;;  %v72_v28 = vld [vmem:[%s9549_s5 + $0x20] sm:$0xff] }
 0x5ea   :  { %v548_v11 = vrot.slane %v547_v5, 2  ;;  %v573_v10 = vsel %vm310_vm9, %v537_v7, %v572_v17 }
 0x5eb   :  { %v574_v22 = vsel %vm312_vm10, %v544_v19, %v573_v10 }
 0x5ec   :  { %v549_v52 = vadd.f32 %v548_v11, %v547_v5  ;;  %v73_v11 = vld [vmem:[%s9549_s5 + $0x28] sm:$0xff] }
 0x5ed   :  { %913 = vperm.xlu2 %5922, %v908_v24  }
 0x5ee   :  { %v550_v18 = vrot.slane %v549_v52, 1 }
 0x5f0   :  { %v551_v20 = vadd.f32 %v550_v18, %v549_v52  ;;  %v74_v18 = vld [vmem:[%s9549_s5 + $0x30] sm:$0xff] }
 0x5f2   :  { %v575_v23 = vsel %vm314_vm11, %v551_v20, %v574_v22 }
 0x5f3   :  { %v576_v25 = vsel %vm316_vm12, %v558_v21, %v575_v23 }
 0x5f4   :  { %5857 = vmatmul.msk.f32.vlgmr.msra.gmra.mxu2 %vm106_vm0, %v576_v25 }
 0x5f5   :  { %2300 = vmatpush.msra.mxu2 %v7070_v49  ;;  %5927 = vset.pattern.permute.xlu2 %v9553_v9  ;;  %v68_v49 = vld [vmem:[%s9549_s5] sm:$0xff] }
 0x5f7   :  { %2301 = vmatpush.msra.mxu2 %v7075_v44 }
 0x5f9   :  { %2302 = vmatpush.msra.mxu2 %v7082_v47  ;;  %v70_v47 = vld [vmem:[%s9549_s5 + $0x10] sm:$0xff] }
 0x5fb   :  { %2303 = vmatpush.msra.mxu2 %v7088_v3  ;;  %v69_v3 = vld [vmem:[%s9549_s5 + $0x8] sm:$0xff] }
 0x677   :  { %v596_v26 = vpop.f32.mrf.mxu2 }
 0x678   :  { %v597_v27 = vadd.f32 %v6080_v4, %v596_v26  ;;  %v865_v4 = vpop.permute.xlu2 %864  ;;  %v879_v26 = vpop.permute.xlu1 %878 }
 0x67a   :  { %v607_v29 = vperm.slane %v597_v27, 0  ;;  %v601_v30 = vrot.slane %v597_v27, 2  ;;  %v600_v33 = vrot.slane %v597_v27, 1  ;;  %v606_v44 = vrot.slane %v597_v27, 7 }
 0x67b   :  { %v602_v36 = vrot.slane %v597_v27, 3  ;;  %v603_v31 = vrot.slane %v597_v27, 4  ;;  %v604_v1 = vrot.slane %v597_v27, 5  ;;  %v605_v15 = vrot.slane %v597_v27, 6 }
 0x67c   :  { %v623_v38 = vadd.f32 %v607_v29, %v68_v49  ;;  %v609_v39 = vperm.slane %v601_v30, 0  ;;  %v608_v43 = vperm.slane %v600_v33, 0  ;;  %v614_v46 = vperm.slane %v606_v44, 0  ;;  %v872_v33 = vpop.permute.xlu0 %871 }
 0x67d   :  { %v610_v50 = vperm.slane %v602_v36, 0  ;;  %v611_v41 = vperm.slane %v603_v31, 0  ;;  %v612_v14 = vperm.slane %v604_v1, 0  ;;  %v613_v40 = vperm.slane %v605_v15, 0 }
 0x67e   :  { %6124 = vtanh.f32 %v623_v38  ;;  %v625_v51 = vadd.f32 %v609_v39, %v70_v47  ;;  %v624_v55 = vadd.f32 %v608_v43, %v69_v3  ;;  %v630_v56 = vadd.f32 %v614_v46, %v75_v34 }
 0x67f   :  { %v626_v57 = vadd.f32 %v610_v50, %v71_v54  ;;  %v627_v0 = vadd.f32 %v611_v41, %v72_v28  ;;  %v628_v13 = vadd.f32 %v612_v14, %v73_v11  ;;  %v629_v10 = vadd.f32 %v613_v40, %v74_v18 }
 0x680   :  { %6126 = vtanh.f32 %v625_v51  ;;  %v886_v27 = vpop.permute.xlu2 %885  ;;  %v893_v49 = vpop.permute.xlu1 %892 }
 0x681   :  { %6128 = vtanh.f32 %v624_v55 }
 0x682   :  { %6130 = vtanh.f32 %v630_v56 }
 0x683   :  { %6132 = vtanh.f32 %v626_v57 }
 0x684   :  { %v6125_v58 = vpop.eup %6124  ;;  %6134 = vtanh.f32 %v627_v0 }
 0x685   :  { %v642_v59 = vmul.f32 %v6125_v58, %v6081_v32  ;;  %6136 = vtanh.f32 %v628_v13 }
 0x686   :  { %v6127_v60 = vpop.eup %6126  ;;  %6138 = vtanh.f32 %v629_v10 }
 0x687   :  { %v6129_v62 = vpop.eup %6128  ;;  %v650_v48 = vsel %vm106_vm0, %v642_v59, 0.0  ;;  %v644_v37 = vmul.f32 %v6127_v60, %v6081_v32 }
 0x688   :  { %v6131_v63 = vpop.eup %6130  ;;  %651 = vadd.xlane.f32.xlu1 %v650_v48  ;;  %v643_v53 = vmul.f32 %v6129_v62, %v6081_v32  ;;  %v900_v29 = vpop.permute.xlu2 %899 }
 0x689   :  { %v656_v2 = vsel %vm106_vm0, %v644_v37, 0.0  ;;  %v6133_v5 = vpop.eup %6132  ;;  %v649_v61 = vmul.f32 %v6131_v63, %v6081_v32  ;;  %v907_v30 = vpop.permute.xlu1 %906 }
 0x68a   :  { %657 = vadd.xlane.f32.xlu0 %v656_v2  ;;  %v653_v6 = vsel %vm106_vm0, %v643_v53, 0.0  ;;  %v645_v7 = vmul.f32 %v6133_v5, %v6081_v32  ;;  %v6135_v52 = vpop.eup %6134 }
 0x68b   :  { %654 = vadd.xlane.f32.xlu2 %v653_v6  ;;  %v671_v12 = vsel %vm106_vm0, %v649_v61, 0.0  ;;  %v646_v17 = vmul.f32 %v6135_v52, %v6081_v32  ;;  %v6137_v20 = vpop.eup %6136 }
 0x68c   :  { %v659_v16 = vsel %vm106_vm0, %v645_v7, 0.0  ;;  %v647_v21 = vmul.f32 %v6137_v20, %v6081_v32  ;;  %v6139_v23 = vpop.eup %6138 }
 0x68d   :  { %v662_v19 = vsel %vm106_vm0, %v646_v17, 0.0  ;;  %v648_v24 = vmul.f32 %v6139_v23, %v6081_v32 }
 0x68e   :  { %v665_v22 = vsel %vm106_vm0, %v647_v21, 0.0 }
 0x68f   :  { %v668_v25 = vsel %vm106_vm0, %v648_v24, 0.0 }
 0x690   :  { %672 = vadd.xlane.f32.xlu1 %v671_v12  ;;  %v914_v44 = vpop.permute.xlu2 %913 }
 0x692   :  { %660 = vadd.xlane.f32.xlu0 %v659_v16 }
 0x69a   :  { %663 = vadd.xlane.f32.xlu0 %v662_v19 }
 0x6a2   :  { %666 = vadd.xlane.f32.xlu0 %v665_v22 }
 0x6aa   :  { %669 = vadd.xlane.f32.xlu0 %v668_v25 }
 0x6fb   :  { %v652_v47 = vpop.xlane.xlu1 %651 }
 0x6fc   :  { %6140 = vtanh.f32 %v652_v47 }
 0x6fd   :  { %v658_v3 = vpop.xlane.xlu0 %657 }
 0x6fe   :  { %v655_v34 = vpop.xlane.xlu2 %654  ;;  %6142 = vtanh.f32 %v658_v3 }
 0x6ff   :  { %6144 = vtanh.f32 %v655_v34 }
 0x702   :  { %v6141_v36 = vpop.eup %6140 }
 0x703   :  { %v7179_v38 = vmul.f32 10.0, %v6141_v36  ;;  %v673_v58 = vpop.xlane.xlu1 %672 }
 0x704   :  { %v6143_v39 = vpop.eup %6142 }
 0x705   :  { %9595 = vst [vmem:[#allocation3_spill] sm:$0xff] %v7179_v38  ;;  %v6145_v43 = vpop.eup %6144  ;;  %v7181_v46 = vmul.f32 10.0, %v6143_v39  ;;  %v661_v54 = vpop.xlane.xlu0 %660  ;;  %v7184_v50 = vadd.f32 %v865_v4, %v7179_v38 }
 0x706   :  { %v7186_v51 = vmul.f32 10.0, %v6145_v43  ;;  %6146 = vtanh.f32 %v661_v54 }
 0x707   :  { %9596 = vst [vmem:[#allocation4_spill] sm:$0xff] %v7181_v46  ;;  %940 = vperm.xlu0 %5925, %v7184_v50   ;;  %v7190_v55 = vadd.f32 %v879_v26, %v7181_v46 }
 0x708   :  { %9597 = vst [vmem:[#allocation5_spill] sm:$0xff] %v7186_v51  ;;  %v7193_v56 = vadd.f32 %v872_v33, %v7186_v51 }
 0x709   :  { %946 = vperm.xlu2 %5927, %v7190_v55  }
 0x70a   :  { %943 = vperm.xlu1 %5926, %v7193_v56  }
 0x70c   :  { %v6147_v57 = vpop.eup %6146 }
 0x70d   :  { %v7197_v31 = vmul.f32 10.0, %v6147_v57  ;;  %v664_v32 = vpop.xlane.xlu0 %663 }
 0x70e   :  { %6148 = vtanh.f32 %v664_v32 }
 0x70f   :  { %9598 = vst [vmem:[#allocation6_spill] sm:$0xff] %v7197_v31  ;;  %v7200_v41 = vadd.f32 %v886_v27, %v7197_v31  ;;  %6150 = vtanh.f32 %v673_v58 }
 0x712   :  { %949 = vperm.xlu1 %5926, %v7200_v41  }
 0x714   :  { %v6149_v59 = vpop.eup %6148 }
 0x715   :  { %v7203_v28 = vmul.f32 10.0, %v6149_v59  ;;  %v667_v60 = vpop.xlane.xlu0 %666  ;;  %v6151_v48 = vpop.eup %6150 }
 0x716   :  { %6152 = vtanh.f32 %v667_v60  ;;  %v7209_v37 = vmul.f32 10.0, %v6151_v48 }
 0x717   :  { %9599 = vst [vmem:[#allocation7_spill] sm:$0xff] %v7203_v28  ;;  %v7206_v62 = vadd.f32 %v893_v49, %v7203_v28 }
 0x718   :  { %9600 = vst [vmem:[#allocation8_spill] sm:$0xff] %v7209_v37  ;;  %v7214_v1 = vadd.f32 %v914_v44, %v7209_v37 }
 0x719   :  { %952 = vperm.xlu2 %5927, %v7206_v62  }
 0x71c   :  { %v6153_v63 = vpop.eup %6152 }
 0x71d   :  { %v7211_v53 = vmul.f32 10.0, %v6153_v63  ;;  %v670_v0 = vpop.xlane.xlu0 %669 }
 0x71e   :  { %6154 = vtanh.f32 %v670_v0 }
 0x71f   :  { %9601 = vst [vmem:[#allocation9_spill] sm:$0xff] %v7211_v53  ;;  %v928_v2 = vadd.f32 %v900_v29, %v7211_v53 }
 0x721   :  { %961 = vperm.xlu2 %5927, %v7214_v1   ;;  %955 = vperm.xlu0 %5925, %v928_v2  }
 0x724   :  { %v6155_v5 = vpop.eup %6154 }
 0x725   :  { %v7218_v6 = vmul.f32 10.0, %v6155_v5 }
 0x727   :  { %9602 = vst [vmem:[#allocation10_spill] sm:$0xff] %v7218_v6  ;;  %v929_v61 = vadd.f32 %v907_v30, %v7218_v6 }
 0x729   :  { %958 = vperm.xlu1 %5926, %v929_v61   ;;  %5936 = vset.pattern.permute.xlu0 %v7095_v8 }
 0x731   :  { %5928 = vset.pattern.permute.xlu1 %v7095_v8 }
 0x739   :  { %1011 = vperm.xlu1 %5928, %v7002_v45  }
 0x741   :  { %5929 = vset.pattern.permute.xlu1 %v9553_v9 }
 0x763   :  { %v947_v14 = vpop.permute.xlu2 %946 }
 0x764   :  { %v965_v17 = vperm.slane %v947_v14, %v7002_v45 }
 0x773   :  { %v953_v12 = vpop.permute.xlu2 %952 }
 0x774   :  { %v967_v21 = vperm.slane %v953_v12, %v7002_v45 }
 0x779   :  { %v941_v11 = vpop.permute.xlu0 %940 }
 0x77a   :  { %v963_v16 = vperm.slane %v941_v11, %v7002_v45 }
 0x77b   :  { %v962_v22 = vpop.permute.xlu2 %961 }
 0x77c   :  { %v944_v7 = vpop.permute.xlu1 %943  ;;  %v970_v4 = vperm.slane %v962_v22, %v7002_v45 }
 0x77d   :  { %v964_v13 = vperm.slane %v944_v7, %v7002_v45 }
 0x77f   :  { %v971_v52 = vsel %vm304_vm6, %v964_v13, %v963_v16 }
 0x780   :  { %v972_v10 = vsel %vm306_vm7, %v965_v17, %v971_v52 }
 0x784   :  { %v950_v15 = vpop.permute.xlu1 %949 }
 0x785   :  { %v966_v40 = vperm.slane %v950_v15, %v7002_v45 }
 0x787   :  { %v973_v19 = vsel %vm308_vm8, %v966_v40, %v972_v10 }
 0x788   :  { %v974_v25 = vsel %vm310_vm9, %v967_v21, %v973_v19 }
 0x793   :  { %v956_v18 = vpop.permute.xlu0 %955 }
 0x794   :  { %v968_v20 = vperm.slane %v956_v18, %v7002_v45 }
 0x796   :  { %v975_v26 = vsel %vm312_vm10, %v968_v20, %v974_v25 }
 0x79b   :  { %v959_v23 = vpop.permute.xlu1 %958 }
 0x79c   :  { %v969_v24 = vperm.slane %v959_v23, %v7002_v45 }
 0x79e   :  { %v976_v27 = vsel %vm314_vm11, %v969_v24, %v975_v26 }
 0x79f   :  { %v977_v49 = vsel %vm316_vm12, %v970_v4, %v976_v27 }
 0x7a0   :  { %v979_v29 = vsel %vm319_vm13, %v977_v49, -inf }
 0x7a1   :  { %980 = vmax.xlane.f32.xlu0 %v979_v29 }
 0x7ab   :  { %v1012_v33 = vpop.permute.xlu1 %1011 }
 0x814   :  { %v981_v30 = vpop.xlane.xlu0 %980 }
 0x815   :  { %v984_v44 = vperm.slane %v981_v30, 1  ;;  %v983_v47 = vperm.slane %v981_v30, 0  ;;  %v986_v36 = vperm.slane %v981_v30, 3  ;;  %v985_v39 = vperm.slane %v981_v30, 2 }
 0x816   :  { %v988_v57 = vperm.slane %v981_v30, 5  ;;  %v987_v32 = vperm.slane %v981_v30, 4  ;;  %v990_v58 = vperm.slane %v981_v30, 7  ;;  %v989_v59 = vperm.slane %v981_v30, 6 }
 0x817   :  { %vm1000_vm4 = vcmp.ge.f32.partialorder %v7193_v56, %v984_v44  ;;  %vm999_vm5 = vcmp.ge.f32.partialorder %v7184_v50, %v983_v47  ;;  %vm1002_vm14 = vcmp.ge.f32.partialorder %v7200_v41, %v986_v36  ;;  %vm1001_vm15 = vcmp.ge.f32.partialorder %v7190_v55, %v985_v39 }
 0x818   :  { %v1014_v3 = vsel %vm1000_vm4, %v1012_v33, 8  ;;  %v1013_v34 = vsel %vm999_vm5, %v1012_v33, 8  ;;  %v1016_v43 = vsel %vm1002_vm14, %v1012_v33, 8  ;;  %v1015_v54 = vsel %vm1001_vm15, %v1012_v33, 8 }
 0x819   :  { %1025 = vperm.xlu1 %5929, %v1014_v3   ;;  %1022 = vperm.xlu2 %5927, %v1013_v34   ;;  %vm1004_vm2 = vcmp.ge.f32.partialorder %v928_v2, %v988_v57  ;;  %vm1003_vm3 = vcmp.ge.f32.partialorder %v7206_v62, %v987_v32  ;;  %vm1006_vm4 = vcmp.ge.f32.partialorder %v7214_v1, %v990_v58  ;;  %v9556_v44 = vmov 0.0  }
 0x81a   :  { %v1018_v50 = vsel %vm1004_vm2, %v1012_v33, 8  ;;  %v1017_v56 = vsel %vm1003_vm3, %v1012_v33, 8  ;;  %vm1005_vm5 = vcmp.ge.f32.partialorder %v929_v61, %v989_v59  ;;  %v1020_v41 = vsel %vm1006_vm4, %v1012_v33, 8 }
 0x81b   :  { %v1019_v55 = vsel %vm1005_vm5, %v1012_v33, 8 }
 0x821   :  { %1031 = vperm.xlu1 %5929, %v1016_v43   ;;  %1028 = vperm.xlu2 %5927, %v1015_v54  }
 0x829   :  { %1037 = vperm.xlu1 %5929, %v1018_v50   ;;  %1034 = vperm.xlu2 %5927, %v1017_v56  }
 0x831   :  { %1043 = vperm.xlu1 %5929, %v1020_v41   ;;  %1040 = vperm.xlu2 %5927, %v1019_v55   ;;  %v54_v41 = vld [vmem:[%s9551_s3 + $0x10] sm:$0xff]  ;;  %v55_v55 = vld [vmem:[%s9551_s3 + $0x18] sm:$0xff] }
 0x839   :  { %5930 = vset.pattern.permute.xlu1 %v7095_v8  ;;  %5952 = vset.pattern.permute.xlu2 %v7095_v8 }
 0x873   :  { %v1023_v60 = vpop.permute.xlu2 %1022 }
 0x874   :  { %v1045_v5 = vperm.slane %v1023_v60, %v7002_v45 }
 0x87b   :  { %v1029_v62 = vpop.permute.xlu2 %1028 }
 0x87c   :  { %v1047_v14 = vperm.slane %v1029_v62, %v7002_v45  ;;  %v53_v62 = vld [vmem:[%s9551_s3 + $0x8] sm:$0xff] }
 0x883   :  { %v1035_v0 = vpop.permute.xlu2 %1034 }
 0x884   :  { %v1049_v15 = vperm.slane %v1035_v0, %v7002_v45 }
 0x88b   :  { %v1026_v48 = vpop.permute.xlu1 %1025  ;;  %v1041_v16 = vpop.permute.xlu2 %1040 }
 0x88c   :  { %v1046_v2 = vperm.slane %v1026_v48, %v7002_v45  ;;  %v1051_v17 = vperm.slane %v1041_v16, %v7002_v45  ;;  %v52_v48 = vld [vmem:[%s9551_s3] sm:$0xff] }
 0x88e   :  { %v1053_v1 = vsel %vm304_vm6, %v1046_v2, %v1045_v5 }
 0x88f   :  { %v1054_v11 = vsel %vm306_vm7, %v1047_v14, %v1053_v1 }
 0x893   :  { %v1032_v63 = vpop.permute.xlu1 %1031 }
 0x894   :  { %v1048_v61 = vperm.slane %v1032_v63, %v7002_v45 }
 0x896   :  { %v1055_v12 = vsel %vm308_vm8, %v1048_v61, %v1054_v11 }
 0x897   :  { %v1056_v52 = vsel %vm310_vm9, %v1049_v15, %v1055_v12 }
 0x89b   :  { %v1038_v7 = vpop.permute.xlu1 %1037 }
 0x89c   :  { %v1050_v13 = vperm.slane %v1038_v7, %v7002_v45 }
 0x89e   :  { %v1057_v40 = vsel %vm312_vm10, %v1050_v13, %v1056_v52 }
 0x89f   :  { %v1058_v19 = vsel %vm314_vm11, %v1051_v17, %v1057_v40 }
 0x8a3   :  { %v1044_v18 = vpop.permute.xlu1 %1043 }
 0x8a4   :  { %v1052_v10 = vperm.slane %v1044_v18, %v7002_v45 }
 0x8a6   :  { %v1059_v20 = vsel %vm316_vm12, %v1052_v10, %v1058_v19 }
 0x8a7   :  { %v1060_v21 = vsel %vm319_vm13, %v1059_v20, 2147483647  ;;  %v7303_v20 = vld [vmem:[%s9551_s3 + $0x20] sm:$0xff] }
 0x8a8   :  { %v1062_v22 = vshra.s32 %v1060_v21, 16  ;;  %v1061_v24 = vand.u32 65535, %v1060_v21  ;;  %v7308_v21 = vld [vmem:[%s9551_s3 + $0x28] sm:$0xff] }
 0x8aa   :  { %v1064_v23 = vcvt.s32.f32 %v1062_v22  ;;  %v1063_v4 = vcvt.s32.f32 %v1061_v24 }
 0x8ac   :  { %1065 = vmin.xlane.f32.xlu2 %v1064_v23 }
 0x91f   :  { %v1066_v25 = vpop.xlane.xlu2 %1065 }
 0x920   :  { %vm1067_vm14 = vcmp.eq.f32.partialorder %v1064_v23, %v1066_v25  ;;  %v1072_v27 = vcvt.f32.s32 %v1066_v25 }
 0x921   :  { %v1068_v26 = vsel %vm1067_vm14, %v1063_v4, inf }
 0x922   :  { %1069 = vmin.xlane.f32.xlu0 %v1068_v26  ;;  %v1073_v29 = vshll.u32 %v1072_v27, 16 }
 0x995   :  { %v1070_v49 = vpop.xlane.xlu0 %1069 }
 0x996   :  { %v1071_v30 = vcvt.f32.s32 %v1070_v49 }
 0x998   :  { %v1074_v33 = vadd.s32 %v1073_v29, %v1071_v30 }
 0x99a   :  { %vm1075_vm15 = vcmp.eq.s32.totalorder %v7002_v45, %v1074_v33 }
 0x99b   :  { %v7267_v47 = vsel %vm1075_vm15, 1.0, %v9556_v44 }
 0x99c   :  { %v1143_v3 = vperm.slane %v7267_v47, 2  ;;  %v1150_v34 = vperm.slane %v7267_v47, 3  ;;  %v1129_v36 = vperm.slane %v7267_v47, 0  ;;  %v1136_v39 = vperm.slane %v7267_v47, 1  ;;  %1127 = vst.msk [vmem:[%s9550_s16] sm:$0xff] %vm319_vm13, %v7267_v47 }
 0x99d   :  { %v1157_v57 = vperm.slane %v7267_v47, 4  ;;  %v1164_v32 = vperm.slane %v7267_v47, 5  ;;  %v1171_v56 = vperm.slane %v7267_v47, 6  ;;  %v1178_v58 = vperm.slane %v7267_v47, 7 }
 0x99e   :  { %v5937_v43 = vpack.i.bf16 %v1150_v34, %v1143_v3  ;;  %v5931_v54 = vpack.i.bf16 %v1136_v39, %v1129_v36 }
 0x99f   :  { %v5942_v50 = vpack.i.bf16 %v1164_v32, %v1157_v57  ;;  %v5947_v59 = vpack.i.bf16 %v1178_v58, %v1171_v56  ;;  %v59_v56 = vld [vmem:[%s9551_s3 + $0x38] sm:$0xff] }
 0x9a0   :  { %5938 = vperm.xlu0 %5936, %v5937_v43   ;;  %5932 = vperm.xlu1 %5930, %v5931_v54  }
 0x9a8   :  { %5943 = vperm.xlu1 %5930, %v5942_v50   ;;  %v58_v50 = vld [vmem:[%s9551_s3 + $0x30] sm:$0xff] }
 0x9b0   :  { %5948 = vperm.xlu1 %5930, %v5947_v59  }
 0x9b8   :  { %1265 = vrot.lane.b32.xlu1 %v6934_v42, %s6788_s0 }
 0xa12   :  { %v5939_v60 = vpop.permute.xlu0 %5938  ;;  %v5933_v63 = vpop.permute.xlu1 %5932 }
 0xa13   :  { %v5941_v0 = vunpack.i.h.bf16 %v5939_v60  ;;  %v5940_v42 = vunpack.i.l.bf16 %v5939_v60  ;;  %v5935_v2 = vunpack.i.h.bf16 %v5933_v63  ;;  %v5934_v5 = vunpack.i.l.bf16 %v5933_v63 }
 0xa15   :  { %v1188_v1 = vmul.f32 %v5941_v0, %v55_v55  ;;  %v1187_v61 = vmul.f32 %v5940_v42, %v54_v41  ;;  %v1186_v14 = vmul.f32 %v5935_v2, %v53_v62  ;;  %v1185_v7 = vmul.f32 %v5934_v5, %v52_v48 }
 0xa17   :  { %v1214_v11 = vsel %vm106_vm0, %v1188_v1, 0.0  ;;  %v1207_v12 = vsel %vm106_vm0, %v1187_v61, 0.0  ;;  %v1200_v13 = vsel %vm106_vm0, %v1186_v14, 0.0  ;;  %v1193_v15 = vsel %vm106_vm0, %v1185_v7, 0.0 }
 0xa18   :  { %v1215_v16 = vrot.slane %v1214_v11, 4  ;;  %v1208_v52 = vrot.slane %v1207_v12, 4  ;;  %v1201_v40 = vrot.slane %v1200_v13, 4  ;;  %v1194_v17 = vrot.slane %v1193_v15, 4 }
 0xa1a   :  { %v1209_v18 = vadd.f32 %v1208_v52, %v1207_v12  ;;  %v1202_v10 = vadd.f32 %v1201_v40, %v1200_v13  ;;  %v1195_v19 = vadd.f32 %v1194_v17, %v1193_v15  ;;  %v5944_v22 = vpop.permute.xlu1 %5943  ;;  %v1216_v25 = vadd.f32 %v1215_v16, %v1214_v11 }
 0xa1b   :  { %v5946_v23 = vunpack.i.h.bf16 %v5944_v22  ;;  %v5945_v24 = vunpack.i.l.bf16 %v5944_v22 }
 0xa1c   :  { %v1210_v4 = vrot.slane %v1209_v18, 2  ;;  %v1203_v26 = vrot.slane %v1202_v10, 2  ;;  %v1196_v27 = vrot.slane %v1195_v19, 2  ;;  %v1217_v36 = vrot.slane %v1216_v25, 2 }
 0xa1d   :  { %v1190_v49 = vmul.f32 %v5946_v23, %v7308_v21  ;;  %v1189_v29 = vmul.f32 %v5945_v24, %v7303_v20 }
 0xa1e   :  { %v1204_v30 = vadd.f32 %v1203_v26, %v1202_v10  ;;  %v1197_v33 = vadd.f32 %v1196_v27, %v1195_v19  ;;  %v1211_v39 = vadd.f32 %v1210_v4, %v1209_v18  ;;  %v1218_v48 = vadd.f32 %v1217_v36, %v1216_v25 }
 0xa1f   :  { %v1228_v3 = vsel %vm106_vm0, %v1190_v49, 0.0  ;;  %v1221_v34 = vsel %vm106_vm0, %v1189_v29, 0.0 }
 0xa20   :  { %v1205_v43 = vrot.slane %v1204_v30, 1  ;;  %v1198_v54 = vrot.slane %v1197_v33, 1  ;;  %v1229_v57 = vrot.slane %v1228_v3, 4  ;;  %v1222_v32 = vrot.slane %v1221_v34, 4 }
 0xa21   :  { %v1212_v62 = vrot.slane %v1211_v39, 1  ;;  %v1219_v16 = vrot.slane %v1218_v48, 1 }
 0xa22   :  { %v5949_v58 = vpop.permute.xlu1 %5948  ;;  %v1230_v59 = vadd.f32 %v1229_v57, %v1228_v3  ;;  %v1223_v41 = vadd.f32 %v1222_v32, %v1221_v34  ;;  %v1206_v63 = vadd.f32 %v1205_v43, %v1204_v30  ;;  %v1199_v0 = vadd.f32 %v1198_v54, %v1197_v33  ;;  %v7334_v32 = vld [vmem:[%s9537_s7 + $0x38] sm:$0xff] }
 0xa23   :  { %v5951_v55 = vunpack.i.h.bf16 %v5949_v58  ;;  %v5950_v60 = vunpack.i.l.bf16 %v5949_v58  ;;  %v1213_v12 = vadd.f32 %v1212_v62, %v1211_v39  ;;  %v1220_v25 = vadd.f32 %v1219_v16, %v1218_v48  ;;  %v7352_v58 = vld [vmem:[%s9537_s7 + $0x20] sm:$0xff] }
 0xa24   :  { %v1231_v42 = vrot.slane %v1230_v59, 2  ;;  %v1224_v2 = vrot.slane %v1223_v41, 2  ;;  %v1257_v52 = vsel %vm304_vm6, %v1206_v63, %v1199_v0  ;;  %v7382_v62 = vld [vmem:[%s9538_s8] ss:$0 sm:$0xff] }
 0xa25   :  { %v1192_v5 = vmul.f32 %v5951_v55, %v59_v56  ;;  %v1191_v1 = vmul.f32 %v5950_v60, %v58_v50  ;;  %v1258_v24 = vsel %vm306_vm7, %v1213_v12, %v1257_v52  ;;  %v7340_v50 = vld [vmem:[%s9537_s7 + $0x30] sm:$0xff]  ;;  %v7346_v56 = vld [vmem:[%s9537_s7 + $0x28] sm:$0xff]  ;;  %v7376_v60 = vld [vmem:[%s9537_s7] sm:$0xff] }
 0xa26   :  { %v1232_v61 = vadd.f32 %v1231_v42, %v1230_v59  ;;  %v1225_v14 = vadd.f32 %v1224_v2, %v1223_v41  ;;  %v1259_v49 = vsel %vm308_vm8, %v1220_v25, %v1258_v24  ;;  %v7358_v59 = vld [vmem:[%s9537_s7 + $0x18] sm:$0xff]  ;;  %v7364_v41 = vld [vmem:[%s9537_s7 + $0x10] sm:$0xff]  ;;  %v7370_v55 = vld [vmem:[%s9537_s7 + $0x8] sm:$0xff] }
 0xa27   :  { %v1242_v7 = vsel %vm106_vm0, %v1192_v5, 0.0  ;;  %v1235_v11 = vsel %vm106_vm0, %v1191_v1, 0.0 }
 0xa28   :  { %v1243_v13 = vrot.slane %v1242_v7, 4  ;;  %v1236_v15 = vrot.slane %v1235_v11, 4  ;;  %v1226_v40 = vrot.slane %v1225_v14, 1  ;;  %v1233_v10 = vrot.slane %v1232_v61, 1 }
 0xa2a   :  { %v1244_v17 = vadd.f32 %v1243_v13, %v1242_v7  ;;  %v1237_v18 = vadd.f32 %v1236_v15, %v1235_v11  ;;  %v1227_v19 = vadd.f32 %v1226_v40, %v1225_v14  ;;  %v1234_v27 = vadd.f32 %v1233_v10, %v1232_v61  ;;  %v1266_v43 = vpop.permute.xlu1 %1265 }
 0xa2c   :  { %v1245_v22 = vrot.slane %v1244_v17, 2  ;;  %v1238_v23 = vrot.slane %v1237_v18, 2  ;;  %v1260_v33 = vsel %vm310_vm9, %v1227_v19, %v1259_v49 }
 0xa2d   :  { %v1261_v36 = vsel %vm312_vm10, %v1234_v27, %v1260_v33  ;;  %v7418_v27 = vld [vmem:[%s9542_s9] sm:$0xff] }
 0xa2e   :  { %v1239_v4 = vadd.f32 %v1238_v23, %v1237_v18  ;;  %v1246_v26 = vadd.f32 %v1245_v22, %v1244_v17 }
 0xa30   :  { %v1240_v29 = vrot.slane %v1239_v4, 1  ;;  %v1247_v30 = vrot.slane %v1246_v26, 1 }
 0xa32   :  { %v1241_v3 = vadd.f32 %v1240_v29, %v1239_v4  ;;  %v1248_v34 = vadd.f32 %v1247_v30, %v1246_v26  ;;  %v7406_v4 = vld [vmem:[%s9542_s9 + $0x10] sm:$0xff]  ;;  %v7412_v26 = vld [vmem:[%s9542_s9 + $0x8] sm:$0xff]  ;;  %v7424_v29 = vld [vmem:[%s9541_s10] ss:$0 sm:$0xff] }
 0xa34   :  { %v1262_v39 = vsel %vm314_vm11, %v1241_v3, %v1261_v36 }
 0xa35   :  { %v1263_v54 = vsel %vm316_vm12, %v1248_v34, %v1262_v39 }
 0xa36   :  { %v1268_v57 = vsel %vm106_vm0, %v1263_v54, %v1266_v43  ;;  %v7430_v54 = vld [vmem:[%s9544_s4] sm:$0xff] }
 0xa37   :  { %5859 = vmatmul.msk.f32.vlgmr.msra.gmra.mxu3 %vm111_vm1, %v1268_v57 }
 0xa38   :  { %3976 = vmatpush.msra.mxu3 %v7334_v32 }
 0xa3a   :  { %3977 = vmatpush.msra.mxu3 %v7340_v50 }
 0xa3c   :  { %3978 = vmatpush.msra.mxu3 %v7346_v56 }
 0xa3e   :  { %3979 = vmatpush.msra.mxu3 %v7352_v58 }
 0xa40   :  { %3980 = vmatpush.msra.mxu3 %v7358_v59 }
 0xa42   :  { %3981 = vmatpush.msra.mxu3 %v7364_v41 }
 0xa44   :  { %3982 = vmatpush.msra.mxu3 %v7370_v55 }
 0xa46   :  { %3983 = vmatpush.msra.mxu3 %v7376_v60 }
 0xaba   :  { %v1289_v48 = vpop.f32.mrf.mxu3 }
 0xabb   :  { %v1290_v63 = vadd.f32 %v7382_v62, %v1289_v48 }
 0xabd   :  { %6156 = vtanh.f32 %v1290_v63  ;;  %v5860_v42 = vmul.f32 -1.442695, %v1290_v63 }
 0xabf   :  { %6158 = vpow2.f32 %v5860_v42 }
 0xac3   :  { %v6157_v0 = vpop.eup %6156 }
 0xac4   :  { %1314 = vrot.lane.b32.xlu1 %v6157_v0, %s6788_s0 }
 0xac5   :  { %v6159_v2 = vpop.eup %6158 }
 0xac6   :  { %v1295_v5 = vadd.f32 1.0, %v6159_v2 }
 0xac8   :  { %6160 = vrcp.f32 %v1295_v5  ;;  %v1307_v12 = vand.u32 2147483648, %v1295_v5  ;;  %vm1301_vm3 = vweird.f32 %v1295_v5  ;;  %v1305_v13 = vand.u32 2147483647, %v1295_v5 }
 0xaca   :  { %v1308_v16 = vor.u32 1.1754944e-38, %v1307_v12  ;;  %vm1306_vm5 = vcmp.eq.f32.partialorder %v1305_v13, 8.507059e+37  ;;  %v7454_v13 = vld [vmem:[%s9544_s4 + $0x30] sm:$0xff] }
 0xace   :  { %v6161_v1 = vpop.eup %6160 }
 0xacf   :  { %v1297_v61 = vmul.f32 %v6161_v1, %v1295_v5  ;;  %vm1302_vm2 = vweird.f32 %v6161_v1 }
 0xad0   :  { %vm1303_vm4 = vmor %vm1301_vm3, %vm1302_vm2 }
 0xad1   :  { %v1298_v14 = vsub.f32 1.0, %v1297_v61 }
 0xad3   :  { %v1299_v7 = vmul.f32 %v6161_v1, %v1298_v14  ;;  %v7442_v14 = vld [vmem:[%s9544_s4 + $0x8] sm:$0xff] }
 0xad5   :  { %v1300_v11 = vadd.f32 %v6161_v1, %v1299_v7 }
 0xad7   :  { %v1304_v15 = vsel %vm1303_vm4, %v6161_v1, %v1300_v11  ;;  %v7436_v1 = vld [vmem:[%s9544_s4 + $0x10] sm:$0xff]  ;;  %v7448_v11 = vld [vmem:[%s9544_s4 + $0x18] sm:$0xff] }
 0xad8   :  { %v1309_v40 = vsel %vm1306_vm5, %v1308_v16, %v1304_v15  ;;  %v7460_v16 = vld [vmem:[%s9544_s4 + $0x20] sm:$0xff] }
 0xad9   :  { %v1312_v18 = vmul.f32 %v1309_v40, %v6918_v35  ;;  %v7400_v35 = vld [vmem:[%s9542_s9 + $0x18] sm:$0xff] }
 0xb36   :  { %v1315_v52 = vpop.permute.xlu1 %1314 }
 0xb37   :  { %v1317_v17 = vmul.f32 %v1315_v52, %v1309_v40 }
 0xb39   :  { %1319 = vrot.lane.b32.xlu2 %v1317_v17, %s6787_s28 }
 0xb93   :  { %v1320_v10 = vpop.permute.xlu2 %1319 }
 0xb94   :  { %v7388_v19 = vadd.f32 %v1320_v10, %v1312_v18  ;;  %v7466_v10 = vld [vmem:[%s9543_s11] ss:$0 sm:$0xff] }
 0xb96   :  { %6162 = vtanh.f32 %v7388_v19 }
 0xb9c   :  { %v6163_v22 = vpop.eup %6162 }
 0xb9d   :  { %1325 = vrot.lane.b32.xlu1 %v6163_v22, %s6788_s0 }
 0xc0f   :  { %v1326_v23 = vpop.permute.xlu1 %1325 }
 0xc10   :  { %v7392_v24 = vmul.f32 %v1326_v23, %v1309_v40 }
 0xc12   :  { %1330 = vrot.lane.b32.xlu0 %v7392_v24, %s6787_s28 }
 0xc84   :  { %v1331_v25 = vpop.permute.xlu0 %1330 }
 0xc85   :  { %5861 = vmatmul.msk.f32.vlgmr.msrb.gmra.mxu1 %vm106_vm0, %v1331_v25 }
 0xc86   :  { %2694 = vmatpush.msrb.mxu1 %v7400_v35 }
 0xc88   :  { %2695 = vmatpush.msrb.mxu1 %v7406_v4 }
 0xc8a   :  { %2696 = vmatpush.msrb.mxu1 %v7412_v26 }
 0xc8c   :  { %2697 = vmatpush.msrb.mxu1 %v7418_v27 }
 0xd02   :  { %v1351_v49 = vpop.f32.mrf.mxu1 }
 0xd03   :  { %v1352_v30 = vadd.f32 %v7424_v29, %v1351_v49  ;;  %v7472_v49 = vld [vmem:[%s9544_s4 + $0x28] sm:$0xff] }
 0xd05   :  { %v1362_v33 = vperm.slane %v1352_v30, 0  ;;  %v1356_v3 = vrot.slane %v1352_v30, 2  ;;  %v1355_v34 = vrot.slane %v1352_v30, 1  ;;  %v1357_v36 = vrot.slane %v1352_v30, 3 }
 0xd06   :  { %v1360_v39 = vrot.slane %v1352_v30, 6  ;;  %v1358_v43 = vrot.slane %v1352_v30, 4  ;;  %v1359_v5 = vrot.slane %v1352_v30, 5  ;;  %v1361_v40 = vrot.slane %v1352_v30, 7 }
 0xd07   :  { %v1378_v57 = vadd.f32 %v7430_v54, %v1362_v33  ;;  %v1364_v48 = vperm.slane %v1356_v3, 0  ;;  %v1363_v63 = vperm.slane %v1355_v34, 0  ;;  %v1365_v0 = vperm.slane %v1357_v36, 0 }
 0xd08   :  { %v1368_v42 = vperm.slane %v1360_v39, 0  ;;  %v1366_v2 = vperm.slane %v1358_v43, 0  ;;  %v1367_v17 = vperm.slane %v1359_v5, 0  ;;  %v1369_v23 = vperm.slane %v1361_v40, 0 }
 0xd09   :  { %6164 = vtanh.f32 %v1378_v57  ;;  %v1380_v61 = vadd.f32 %v7436_v1, %v1364_v48  ;;  %v1379_v7 = vadd.f32 %v7442_v14, %v1363_v63  ;;  %v1381_v12 = vadd.f32 %v7448_v11, %v1365_v0  ;;  %v7482_v57 = vld [vmem:[%s9544_s4 + $0x38] sm:$0xff] }
 0xd0a   :  { %v1384_v15 = vadd.f32 %v7454_v13, %v1368_v42  ;;  %v1382_v52 = vadd.f32 %v7460_v16, %v1366_v2  ;;  %v1383_v30 = vadd.f32 %v7472_v49, %v1367_v17  ;;  %v1385_v48 = vadd.f32 %v7482_v57, %v1369_v23 }
 0xd0b   :  { %6166 = vtanh.f32 %v1380_v61 }
 0xd0c   :  { %6168 = vtanh.f32 %v1379_v7 }
 0xd0d   :  { %6170 = vtanh.f32 %v1381_v12 }
 0xd0e   :  { %6172 = vtanh.f32 %v1384_v15 }
 0xd0f   :  { %v6165_v18 = vpop.eup %6164  ;;  %6174 = vtanh.f32 %v1382_v52 }
 0xd10   :  { %v1394_v22 = vmul.f32 %v7466_v10, %v6165_v18  ;;  %6176 = vtanh.f32 %v1383_v30 }
 0xd11   :  { %v6167_v25 = vpop.eup %6166  ;;  %6178 = vtanh.f32 %v1385_v48 }
 0xd12   :  { %v6169_v33 = vpop.eup %6168  ;;  %v1402_v3 = vsel %vm106_vm0, %v1394_v22, 0.0  ;;  %v1396_v34 = vmul.f32 %v7466_v10, %v6167_v25 }
 0xd13   :  { %v6171_v36 = vpop.eup %6170  ;;  %1403 = vadd.xlane.f32.xlu1 %v1402_v3  ;;  %v1395_v39 = vmul.f32 %v7466_v10, %v6169_v33 }
 0xd14   :  { %v1408_v43 = vsel %vm106_vm0, %v1396_v34, 0.0  ;;  %v6173_v63 = vpop.eup %6172  ;;  %v1397_v2 = vmul.f32 %v7466_v10, %v6171_v36 }
 0xd15   :  { %1409 = vadd.xlane.f32.xlu2 %v1408_v43  ;;  %v1405_v0 = vsel %vm106_vm0, %v1395_v39, 0.0  ;;  %v6175_v42 = vpop.eup %6174  ;;  %v1400_v5 = vmul.f32 %v7466_v10, %v6173_v63 }
 0xd16   :  { %1406 = vadd.xlane.f32.xlu0 %v1405_v0  ;;  %v1398_v61 = vmul.f32 %v7466_v10, %v6175_v42  ;;  %v1411_v7 = vsel %vm106_vm0, %v1397_v2, 0.0  ;;  %v6177_v12 = vpop.eup %6176 }
 0xd17   :  { %v1420_v15 = vsel %vm106_vm0, %v1400_v5, 0.0  ;;  %v6179_v40 = vpop.eup %6178  ;;  %v1399_v17 = vmul.f32 %v7466_v10, %v6177_v12 }
 0xd18   :  { %v1414_v52 = vsel %vm106_vm0, %v1398_v61, 0.0  ;;  %v1401_v18 = vmul.f32 %v7466_v10, %v6179_v40 }
 0xd19   :  { %v1417_v22 = vsel %vm106_vm0, %v1399_v17, 0.0 }
 0xd1a   :  { %v1423_v23 = vsel %vm106_vm0, %v1401_v18, 0.0 }
 0xd1b   :  { %1412 = vadd.xlane.f32.xlu1 %v1411_v7 }
 0xd1d   :  { %1421 = vadd.xlane.f32.xlu2 %v1420_v15 }
 0xd1e   :  { %1415 = vadd.xlane.f32.xlu0 %v1414_v52  ;;  %v9555_v52 = vmax.f32 %v7267_v47, 0.0 }
 0xd20   :  { %vm7513_vm14 = vcmp.gt.f32.partialorder %v9555_v52, 0.5 }
 0xd23   :  { %1418 = vadd.xlane.f32.xlu1 %v1417_v22 }
 0xd26   :  { %1424 = vadd.xlane.f32.xlu0 %v1423_v23 }
 0xd86   :  { %v1404_v25 = vpop.xlane.xlu1 %1403 }
 0xd87   :  { %v1435_v36 = vperm.slane %v1404_v25, %v7002_v45 }
 0xd88   :  { %v1410_v33 = vpop.xlane.xlu2 %1409 }
 0xd89   :  { %v1407_v30 = vpop.xlane.xlu0 %1406  ;;  %v1437_v39 = vperm.slane %v1410_v33, %v7002_v45 }
 0xd8a   :  { %v1436_v3 = vperm.slane %v1407_v30, %v7002_v45 }
 0xd8c   :  { %v1443_v43 = vsel %vm304_vm6, %v1436_v3, %v1435_v36 }
 0xd8d   :  { %v1444_v0 = vsel %vm306_vm7, %v1437_v39, %v1443_v43 }
 0xd8e   :  { %v1413_v34 = vpop.xlane.xlu1 %1412 }
 0xd8f   :  { %v1438_v48 = vperm.slane %v1413_v34, %v7002_v45 }
 0xd90   :  { %v1422_v5 = vpop.xlane.xlu2 %1421 }
 0xd91   :  { %v1416_v63 = vpop.xlane.xlu0 %1415  ;;  %v1445_v2 = vsel %vm308_vm8, %v1438_v48, %v1444_v0  ;;  %v1441_v12 = vperm.slane %v1422_v5, %v7002_v45 }
 0xd92   :  { %v1439_v42 = vperm.slane %v1416_v63, %v7002_v45 }
 0xd94   :  { %v1446_v15 = vsel %vm310_vm9, %v1439_v42, %v1445_v2 }
 0xd96   :  { %v1419_v61 = vpop.xlane.xlu1 %1418 }
 0xd97   :  { %v1440_v7 = vperm.slane %v1419_v61, %v7002_v45 }
 0xd99   :  { %v1447_v40 = vsel %vm312_vm10, %v1440_v7, %v1446_v15  ;;  %v1425_v17 = vpop.xlane.xlu0 %1424 }
 0xd9a   :  { %v1442_v18 = vperm.slane %v1425_v17, %v7002_v45  ;;  %v1448_v22 = vsel %vm314_vm11, %v1441_v12, %v1447_v40 }
 0xd9c   :  { %v1449_v25 = vsel %vm316_vm12, %v1442_v18, %v1448_v22 }
 0xd9d   :  { %v1451_v30 = vsel %vm7513_vm14, -inf, %v1449_v25 }
 0xd9e   :  { %v1452_v33 = vsel %vm319_vm13, %v1451_v30, -inf }
 0xd9f   :  { %1453 = vmax.xlane.f32.xlu1 %v1452_v33 }
 0xe12   :  { %v1454_v3 = vpop.xlane.xlu1 %1453 }
 0xe13   :  { %v1455_v34 = vsub.f32 %v1451_v30, %v1454_v3 }
 0xe15   :  { %v1456_v36 = vmul.f32 1.442695, %v1455_v34 }
 0xe17   :  { %6180 = vpow2.f32 %v1456_v36 }
 0xe1d   :  { %v6181_v39 = vpop.eup %6180 }
 0xe1e   :  { %v1458_v43 = vsel %vm319_vm13, %v6181_v39, 0.0 }
 0xe1f   :  { %1459 = vadd.xlane.f32.xlu2 %v1458_v43 }
 0xe92   :  { %v1460_v48 = vpop.xlane.xlu2 %1459 }
 0xe93   :  { %6182 = vrcp.f32 %v1460_v48  ;;  %v1472_v2 = vand.u32 2147483648, %v1460_v48  ;;  %v1470_v61 = vand.u32 2147483647, %v1460_v48  ;;  %vm1466_vm2 = vweird.f32 %v1460_v48 }
 0xe95   :  { %v1473_v12 = vor.u32 1.1754944e-38, %v1472_v2  ;;  %vm1471_vm4 = vcmp.eq.f32.partialorder %v1470_v61, 8.507059e+37 }
 0xe99   :  { %v6183_v63 = vpop.eup %6182 }
 0xe9a   :  { %v1462_v0 = vmul.f32 %v6183_v63, %v1460_v48  ;;  %vm1467_vm15 = vweird.f32 %v6183_v63 }
 0xe9b   :  { %vm1468_vm3 = vmor %vm1466_vm2, %vm1467_vm15 }
 0xe9c   :  { %v1463_v42 = vsub.f32 1.0, %v1462_v0 }
 0xe9e   :  { %v1464_v5 = vmul.f32 %v6183_v63, %v1463_v42 }
 0xea0   :  { %v1465_v7 = vadd.f32 %v6183_v63, %v1464_v5 }
 0xea2   :  { %v1469_v15 = vsel %vm1468_vm3, %v6183_v63, %v1465_v7 }
 0xea3   :  { %v1474_v40 = vsel %vm1471_vm4, %v1473_v12, %v1469_v15 }
 0xea4   :  { %v1476_v17 = vmul.f32 %v6181_v39, %v1474_v40 }
 0xea6   :  { %v1491_v18 = vperm.slane %v1476_v17, 2  ;;  %v1484_v22 = vperm.slane %v1476_v17, 1  ;;  %v1477_v25 = vperm.slane %v1476_v17, 0  ;;  %v1519_v30 = vperm.slane %v1476_v17, 6 }
 0xea7   :  { %v1505_v33 = vperm.slane %v1476_v17, 4  ;;  %v1498_v3 = vperm.slane %v1476_v17, 3  ;;  %v1526_v34 = vperm.slane %v1476_v17, 7  ;;  %v1512_v36 = vperm.slane %v1476_v17, 5 }
 0xea8   :  { %1496 = vperm.xlu2 %5952, %v1491_v18   ;;  %1489 = vperm.xlu1 %5930, %v1484_v22  }
 0xea9   :  { %1482 = vperm.xlu0 %5936, %v1477_v25  }
 0xeb0   :  { %1524 = vperm.xlu2 %5952, %v1519_v30   ;;  %1510 = vperm.xlu1 %5930, %v1505_v33  }
 0xeb1   :  { %1503 = vperm.xlu0 %5936, %v1498_v3  }
 0xeb8   :  { %1531 = vperm.xlu1 %5930, %v1526_v34  }
 0xeb9   :  { %1517 = vperm.xlu0 %5936, %v1512_v36  }
 0xf02   :  { %v1497_v43 = vpop.permute.xlu2 %1496 }
 0xf03   :  { %v1535_v48 = vmul.f32 %v7436_v1, %v1497_v43 }
 0xf05   :  { %v1555_v5 = vsel %vm106_vm0, %v1535_v48, 0.0 }
 0xf06   :  { %v1556_v17 = vrot.slane %v1555_v5, 4 }
 0xf08   :  { %v1557_v43 = vadd.f32 %v1556_v17, %v1555_v5 }
 0xf0a   :  { %v1525_v42 = vpop.permute.xlu2 %1524 }
 0xf0b   :  { %v1539_v15 = vmul.f32 %v7454_v13, %v1525_v42 }
 0xf0d   :  { %v1583_v30 = vsel %vm106_vm0, %v1539_v15, 0.0 }
 0xf1a   :  { %v1490_v39 = vpop.permute.xlu1 %1489 }
 0xf1b   :  { %v1534_v63 = vmul.f32 %v7442_v14, %v1490_v39  ;;  %v1483_v0 = vpop.permute.xlu0 %1482 }
 0xf1c   :  { %v1533_v2 = vmul.f32 %v7430_v54, %v1483_v0 }
 0xf1d   :  { %v1548_v61 = vsel %vm106_vm0, %v1534_v63, 0.0  ;;  %v1584_v63 = vrot.slane %v1583_v30, 4 }
 0xf1e   :  { %v1549_v7 = vrot.slane %v1548_v61, 4  ;;  %v1541_v12 = vsel %vm106_vm0, %v1533_v2, 0.0 }
 0xf1f   :  { %v1542_v40 = vrot.slane %v1541_v12, 4 }
 0xf20   :  { %v1550_v18 = vadd.f32 %v1549_v7, %v1548_v61  ;;  %v1558_v7 = vrot.slane %v1557_v43, 2 }
 0xf21   :  { %v1543_v22 = vadd.f32 %v1542_v40, %v1541_v12  ;;  %v1585_v40 = vadd.f32 %v1584_v63, %v1583_v30 }
 0xf22   :  { %v1511_v25 = vpop.permute.xlu1 %1510  ;;  %v1551_v33 = vrot.slane %v1550_v18, 2 }
 0xf23   :  { %v1544_v3 = vrot.slane %v1543_v22, 2  ;;  %v1537_v34 = vmul.f32 %v7460_v16, %v1511_v25  ;;  %v1504_v36 = vpop.permute.xlu0 %1503 }
 0xf24   :  { %v1536_v48 = vmul.f32 %v7448_v11, %v1504_v36  ;;  %v1552_v42 = vadd.f32 %v1551_v33, %v1550_v18 }
 0xf25   :  { %v1569_v39 = vsel %vm106_vm0, %v1537_v34, 0.0  ;;  %v1545_v2 = vadd.f32 %v1544_v3, %v1543_v22  ;;  %v1559_v34 = vadd.f32 %v1558_v7, %v1557_v43  ;;  %v1586_v22 = vrot.slane %v1585_v40, 2 }
 0xf26   :  { %v1570_v0 = vrot.slane %v1569_v39, 4  ;;  %v1562_v13 = vsel %vm106_vm0, %v1536_v48, 0.0  ;;  %v1553_v25 = vrot.slane %v1552_v42, 1 }
 0xf27   :  { %v1563_v61 = vrot.slane %v1562_v13, 4  ;;  %v1546_v44 = vrot.slane %v1545_v2, 1 }
 0xf28   :  { %v1571_v12 = vadd.f32 %v1570_v0, %v1569_v39  ;;  %v1554_v30 = vadd.f32 %v1553_v25, %v1552_v42 }
 0xf29   :  { %v1564_v15 = vadd.f32 %v1563_v61, %v1562_v13  ;;  %v1547_v39 = vadd.f32 %v1546_v44, %v1545_v2  ;;  %v1560_v13 = vrot.slane %v1559_v34, 1 }
 0xf2a   :  { %v1572_v9 = vrot.slane %v1571_v12, 2  ;;  %v1532_v52 = vpop.permute.xlu1 %1531 }
 0xf2b   :  { %v1565_v5 = vrot.slane %v1564_v15, 2  ;;  %v1540_v17 = vmul.f32 %v7482_v57, %v1532_v52  ;;  %v1518_v36 = vpop.permute.xlu0 %1517  ;;  %v1587_v52 = vadd.f32 %v1586_v22, %v1585_v40  ;;  %v1605_v7 = vsel %vm304_vm6, %v1554_v30, %v1547_v39  ;;  %v7573_v30 = vld [vmem:[%s9545_s13] ss:$0 sm:$0xff] }
 0xf2c   :  { %v1538_v8 = vmul.f32 %v7472_v49, %v1518_v36  ;;  %v1573_v33 = vadd.f32 %v1572_v9, %v1571_v12 }
 0xf2d   :  { %v1566_v37 = vadd.f32 %v1565_v5, %v1564_v15  ;;  %v1590_v18 = vsel %vm106_vm0, %v1540_v17, 0.0  ;;  %v1561_v17 = vadd.f32 %v1560_v13, %v1559_v34  ;;  %v1588_v12 = vrot.slane %v1587_v52, 1 }
 0xf2e   :  { %v1591_v3 = vrot.slane %v1590_v18, 4  ;;  %v1576_v48 = vsel %vm106_vm0, %v1538_v8, 0.0  ;;  %v1574_v53 = vrot.slane %v1573_v33, 1 }
 0xf2f   :  { %v1567_v63 = vrot.slane %v1566_v37, 1  ;;  %v1577_v0 = vrot.slane %v1576_v48, 4  ;;  %v1606_v8 = vsel %vm306_vm7, %v1561_v17, %v1605_v7  ;;  %v7579_v7 = vld [vmem:[%s9549_s5] sm:$0xff] }
 0xf30   :  { %v1592_v61 = vadd.f32 %v1591_v3, %v1590_v18  ;;  %v1575_v28 = vadd.f32 %v1574_v53, %v1573_v33  ;;  %v1589_v18 = vadd.f32 %v1588_v12, %v1587_v52  ;;  %v7549_v53 = vld [vmem:[%s9546_s12 + $0x18] sm:$0xff]  ;;  %v7567_v33 = vld [vmem:[%s9546_s12] sm:$0xff] }
 0xf31   :  { %v1578_v6 = vadd.f32 %v1577_v0, %v1576_v48  ;;  %v1568_v15 = vadd.f32 %v1567_v63, %v1566_v37 }
 0xf32   :  { %v1593_v43 = vrot.slane %v1592_v61, 2 }
 0xf33   :  { %v1579_v5 = vrot.slane %v1578_v6, 2  ;;  %v1607_v2 = vsel %vm308_vm8, %v1568_v15, %v1606_v8 }
 0xf34   :  { %v1594_v36 = vadd.f32 %v1593_v43, %v1592_v61  ;;  %v1608_v40 = vsel %vm310_vm9, %v1575_v28, %v1607_v2  ;;  %v7555_v28 = vld [vmem:[%s9546_s12 + $0x10] sm:$0xff]  ;;  %v7591_v2 = vld [vmem:[%s9549_s5 + $0x8] sm:$0xff] }
 0xf35   :  { %v1580_v9 = vadd.f32 %v1579_v5, %v1578_v6  ;;  %v7561_v6 = vld [vmem:[%s9546_s12 + $0x8] sm:$0xff]  ;;  %9606 = vst [vmem:[#allocation12_spill] sm:$0xff] %v7591_v2 }
 0xf36   :  { %v1595_v44 = vrot.slane %v1594_v36, 1 }
 0xf37   :  { %v1581_v42 = vrot.slane %v1580_v9, 1 }
 0xf38   :  { %v1596_v22 = vadd.f32 %v1595_v44, %v1594_v36  ;;  %v7585_v44 = vld [vmem:[%s9549_s5 + $0x10] sm:$0xff] }
 0xf39   :  { %v1582_v25 = vadd.f32 %v1581_v42, %v1580_v9  ;;  %9605 = vst [vmem:[#allocation11_spill] sm:$0xff] %v7585_v44 }
 0xf3b   :  { %v1609_v3 = vsel %vm312_vm10, %v1582_v25, %v1608_v40 }
 0xf3c   :  { %v1610_v37 = vsel %vm314_vm11, %v1589_v18, %v1609_v3  ;;  %v6653_v18 = vld [vmem:[%s9549_s5 + $0x20] sm:$0xff] }
 0xf3d   :  { %v1611_v34 = vsel %vm316_vm12, %v1596_v22, %v1610_v37  ;;  %v7600_v22 = vld [vmem:[%s9549_s5 + $0x28] sm:$0xff]  ;;  %v7606_v37 = vld [vmem:[%s9549_s5 + $0x18] sm:$0xff] }
 0xf3e   :  { %5862 = vmatmul.msk.f32.vlgmr.msrb.gmra.mxu2 %vm106_vm0, %v1611_v34  ;;  %9607 = vst [vmem:[#allocation13_spill] sm:$0xff] %v7600_v22 }
 0xf3f   :  { %2974 = vmatpush.msrb.mxu2 %v7549_v53  ;;  %9608 = vst [vmem:[#allocation14_spill] sm:$0xff] %v7606_v37 }
 0xf41   :  { %2975 = vmatpush.msrb.mxu2 %v7555_v28 }
 0xf43   :  { %2976 = vmatpush.msrb.mxu2 %v7561_v6 }
 0xf45   :  { %2977 = vmatpush.msrb.mxu2 %v7567_v33 }
 0xfc1   :  { %v1631_v48 = vpop.f32.mrf.mxu2 }
 0xfc2   :  { %v1632_v39 = vadd.f32 %v7573_v30, %v1631_v48 }
 0xfc4   :  { %v1642_v63 = vperm.slane %v1632_v39, 0  ;;  %v1636_v0 = vrot.slane %v1632_v39, 2  ;;  %v1635_v13 = vrot.slane %v1632_v39, 1  ;;  %v1638_v61 = vrot.slane %v1632_v39, 4 }
 0xfc5   :  { %v1639_v52 = vrot.slane %v1632_v39, 5  ;;  %v1637_v43 = vrot.slane %v1632_v39, 3  ;;  %v1641_v8 = vrot.slane %v1632_v39, 7  ;;  %v1640_v48 = vrot.slane %v1632_v39, 6 }
 0xfc6   :  { %v1658_v15 = vadd.f32 %v7579_v7, %v1642_v63  ;;  %v1644_v5 = vperm.slane %v1636_v0, 0  ;;  %v1643_v17 = vperm.slane %v1635_v13, 0  ;;  %v1646_v36 = vperm.slane %v1638_v61, 0  ;;  %v7612_v13 = vld [vmem:[%s9548_s14] ss:$0 sm:$0xff] }
 0xfc7   :  { %v1647_v9 = vperm.slane %v1639_v52, 0  ;;  %v1645_v12 = vperm.slane %v1637_v43, 0  ;;  %v1649_v63 = vperm.slane %v1641_v8, 0  ;;  %9609 = vst [vmem:[#allocation15_spill] sm:$0xff] %v7612_v13  ;;  %v1648_v52 = vperm.slane %v1640_v48, 0 }
 0xfc8   :  { %6184 = vtanh.f32 %v1658_v15  ;;  %v1660_v42 = vadd.f32 %v7585_v44, %v1644_v5  ;;  %v1659_v25 = vadd.f32 %v7591_v2, %v1643_v17  ;;  %v1662_v40 = vadd.f32 %v6653_v18, %v1646_v36  ;;  %v6657_v15 = vld [vmem:[%s9549_s5 + $0x38] sm:$0xff] }
 0xfc9   :  { %v1663_v3 = vadd.f32 %v7600_v22, %v1647_v9  ;;  %v1661_v34 = vadd.f32 %v7606_v37, %v1645_v12  ;;  %v1665_v5 = vadd.f32 %v6657_v15, %v1649_v63 }
 0xfca   :  { %6186 = vtanh.f32 %v1660_v42  ;;  %v7625_v42 = vld [vmem:[%s9549_s5 + $0x30] sm:$0xff] }
 0xfcb   :  { %6188 = vtanh.f32 %v1659_v25  ;;  %9610 = vst [vmem:[#allocation16_spill] sm:$0xff] %v7625_v42  ;;  %v1664_v25 = vadd.f32 %v7625_v42, %v1648_v52 }
 0xfcc   :  { %6190 = vtanh.f32 %v1662_v40 }
 0xfcd   :  { %6192 = vtanh.f32 %v1663_v3 }
 0xfce   :  { %v6185_v0 = vpop.eup %6184  ;;  %6194 = vtanh.f32 %v1661_v34 }
 0xfcf   :  { %v1674_v61 = vmul.f32 %v7612_v13, %v6185_v0  ;;  %6196 = vtanh.f32 %v1665_v5 }
 0xfd0   :  { %v6187_v43 = vpop.eup %6186  ;;  %6198 = vtanh.f32 %v1664_v25 }
 0xfd1   :  { %v6189_v39 = vpop.eup %6188  ;;  %v1682_v17 = vsel %vm106_vm0, %v1674_v61, 0.0  ;;  %v1676_v36 = vmul.f32 %v7612_v13, %v6187_v43 }
 0xfd2   :  { %v6191_v9 = vpop.eup %6190  ;;  %1683 = vadd.xlane.f32.xlu0 %v1682_v17  ;;  %v1675_v12 = vmul.f32 %v7612_v13, %v6189_v39 }
 0xfd3   :  { %v1688_v8 = vsel %vm106_vm0, %v1676_v36, 0.0  ;;  %v6193_v18 = vpop.eup %6192  ;;  %v1678_v34 = vmul.f32 %v7612_v13, %v6191_v9 }
 0xfd4   :  { %1689 = vadd.xlane.f32.xlu1 %v1688_v8  ;;  %v1685_v40 = vsel %vm106_vm0, %v1675_v12, 0.0  ;;  %v6195_v3 = vpop.eup %6194  ;;  %v1679_v48 = vmul.f32 %v7612_v13, %v6193_v18 }
 0xfd5   :  { %1686 = vadd.xlane.f32.xlu2 %v1685_v40  ;;  %v1677_v63 = vmul.f32 %v7612_v13, %v6195_v3  ;;  %v1694_v0 = vsel %vm106_vm0, %v1678_v34, 0.0  ;;  %v6197_v61 = vpop.eup %6196 }
 0xfd6   :  { %v1697_v52 = vsel %vm106_vm0, %v1679_v48, 0.0  ;;  %v6199_v15 = vpop.eup %6198  ;;  %v1681_v5 = vmul.f32 %v7612_v13, %v6197_v61 }
 0xfd7   :  { %v1691_v43 = vsel %vm106_vm0, %v1677_v63, 0.0  ;;  %v1680_v39 = vmul.f32 %v7612_v13, %v6199_v15 }
 0xfd8   :  { %v1703_v17 = vsel %vm106_vm0, %v1681_v5, 0.0 }
 0xfd9   :  { %v1700_v36 = vsel %vm106_vm0, %v1680_v39, 0.0 }
 0xfda   :  { %1695 = vadd.xlane.f32.xlu0 %v1694_v0 }
 0xfdc   :  { %1698 = vadd.xlane.f32.xlu1 %v1697_v52 }
 0xfdd   :  { %1692 = vadd.xlane.f32.xlu2 %v1691_v43 }
 0xfe2   :  { %1704 = vadd.xlane.f32.xlu0 %v1703_v17 }
 0xfe5   :  { %1701 = vadd.xlane.f32.xlu2 %v1700_v36 }
0x1045   :  { %v1684_v9 = vpop.xlane.xlu0 %1683 }
0x1047   :  { %v1690_v12 = vpop.xlane.xlu1 %1689 }
0x1048   :  { %v1687_v8 = vpop.xlane.xlu2 %1686 }
0x1049   :  { %6200 = vtanh.f32 %v1687_v8 }
0x104a   :  { %6202 = vtanh.f32 %v1684_v9 }
0x104b   :  { %6204 = vtanh.f32 %v1690_v12 }
0x104d   :  { %v1696_v25 = vpop.xlane.xlu0 %1695 }
0x104e   :  { %6206 = vtanh.f32 %v1696_v25 }
0x104f   :  { %v6201_v18 = vpop.eup %6200  ;;  %v1699_v63 = vpop.xlane.xlu1 %1698 }
0x1050   :  { %v6203_v40 = vpop.eup %6202  ;;  %v1693_v3 = vpop.xlane.xlu2 %1692  ;;  %v1715_v48 = vmul.f32 10.0, %v6201_v18 }
0x1051   :  { %v6205_v34 = vpop.eup %6204  ;;  %6208 = vtanh.f32 %v1693_v3  ;;  %v1714_v0 = vmul.f32 10.0, %v6203_v40 }
0x1052   :  { %v1716_v61 = vmul.f32 10.0, %v6205_v34  ;;  %6210 = vtanh.f32 %v1699_v63  ;;  %v1731_v52 = vperm.slane %v1715_v48, %v7002_v45 }
0x1053   :  { %v1730_v39 = vperm.slane %v1714_v0, %v7002_v45 }
0x1054   :  { %v6207_v15 = vpop.eup %6206  ;;  %v1732_v17 = vperm.slane %v1716_v61, %v7002_v45 }
0x1055   :  { %v1705_v43 = vpop.xlane.xlu0 %1704  ;;  %v1738_v12 = vsel %vm304_vm6, %v1731_v52, %v1730_v39  ;;  %v1718_v25 = vmul.f32 10.0, %v6207_v15 }
0x1056   :  { %6212 = vtanh.f32 %v1705_v43  ;;  %v1739_v3 = vsel %vm306_vm7, %v1732_v17, %v1738_v12 }
0x1057   :  { %v6209_v5 = vpop.eup %6208  ;;  %v1734_v63 = vperm.slane %v1718_v25, %v7002_v45 }
0x1058   :  { %v1717_v36 = vmul.f32 10.0, %v6209_v5  ;;  %v1702_v9 = vpop.xlane.xlu2 %1701  ;;  %v6211_v8 = vpop.eup %6210 }
0x1059   :  { %6214 = vtanh.f32 %v1702_v9  ;;  %v1719_v34 = vmul.f32 10.0, %v6211_v8  ;;  %v5863_v9 = vld [vmem:[%s9547_s6 + $0x8] sm:$0xff] }
0x105a   :  { %v1733_v18 = vperm.slane %v1717_v36, %v7002_v45 }
0x105b   :  { %v1735_v52 = vperm.slane %v1719_v34, %v7002_v45 }
0x105c   :  { %v6213_v40 = vpop.eup %6212  ;;  %v1740_v48 = vsel %vm308_vm8, %v1733_v18, %v1739_v3 }
0x105d   :  { %v1721_v43 = vmul.f32 10.0, %v6213_v40  ;;  %v1741_v61 = vsel %vm310_vm9, %v1734_v63, %v1740_v48 }
0x105e   :  { %v1742_v36 = vsel %vm312_vm10, %v1735_v52, %v1741_v61 }
0x105f   :  { %v6215_v0 = vpop.eup %6214  ;;  %v1737_v15 = vperm.slane %v1721_v43, %v7002_v45 }
0x1060   :  { %v1720_v5 = vmul.f32 10.0, %v6215_v0 }
0x1062   :  { %v1736_v39 = vperm.slane %v1720_v5, %v7002_v45 }
0x1064   :  { %v1743_v17 = vsel %vm314_vm11, %v1736_v39, %v1742_v36 }
0x1065   :  { %v1744_v12 = vsel %vm316_vm12, %v1737_v15, %v1743_v17  ;;  %v9612_v17 = vmov 0.0  }
0x1066   :  { %v7659_v8 = vsel %vm7513_vm14, -inf, %v1744_v12 }
0x1067   :  { %9611 = vst [vmem:[#allocation17_spill] sm:$0xff] %v7659_v8  ;;  %v1774_v25 = vadd.f32 %v5863_v9, %v7659_v8 }
0x1069   :  { %v1775_v18 = vsel %vm319_vm13, %v1774_v25, -inf }
0x106a   :  { %1776 = vmax.xlane.f32.xlu1 %v1775_v18 }
0x10dd   :  { %v1777_v40 = vpop.xlane.xlu1 %1776 }
0x10de   :  { %vm1778_vm5 = vcmp.ge.f32.partialorder %v1774_v25, %v1777_v40 }
0x10df   :  { %v1779_v3 = vsel %vm1778_vm5, %v7002_v45, 8 }
0x10e0   :  { %v1780_v34 = vsel %vm319_vm13, %v1779_v3, 2147483647 }
0x10e1   :  { %v1782_v48 = vshra.s32 %v1780_v34, 16  ;;  %v1781_v0 = vand.u32 65535, %v1780_v34 }
0x10e3   :  { %v1784_v63 = vcvt.s32.f32 %v1782_v48  ;;  %v1783_v61 = vcvt.s32.f32 %v1781_v0 }
0x10e5   :  { %1785 = vmin.xlane.f32.xlu2 %v1784_v63 }
0x1158   :  { %v1786_v43 = vpop.xlane.xlu2 %1785 }
0x1159   :  { %vm1787_vm15 = vcmp.eq.f32.partialorder %v1784_v63, %v1786_v43  ;;  %v1792_v5 = vcvt.f32.s32 %v1786_v43 }
0x115a   :  { %v1788_v23 = vsel %vm1787_vm15, %v1783_v61, inf }
0x115b   :  { %1789 = vmin.xlane.f32.xlu0 %v1788_v23  ;;  %v1793_v39 = vshll.u32 %v1792_v5, 16 }
0x11ce   :  { %v1790_v52 = vpop.xlane.xlu0 %1789 }
0x11cf   :  { %v1791_v15 = vcvt.f32.s32 %v1790_v52 }
0x11d1   :  { %v1794_v36 = vadd.s32 %v1793_v39, %v1791_v15  ;;  %v6659_v15 = vld [vmem:[%s9551_s3 + $0x18] sm:$0xff] }
0x11d3   :  { %vm1795_vm14 = vcmp.eq.s32.totalorder %v7002_v45, %v1794_v36 }
0x11d4   :  { %v7667_v9 = vsel %vm1795_vm14, 1.0, %v9612_v17 }
0x11d5   :  { %v1831_v12 = vperm.slane %v7667_v9, 4  ;;  %v1838_v25 = vperm.slane %v7667_v9, 5  ;;  %v1817_v18 = vperm.slane %v7667_v9, 2  ;;  %v1824_v40 = vperm.slane %v7667_v9, 3  ;;  %5866 = vst.msk [vmem:[%s9550_s16 + $0x8] sm:$0xff] %vm319_vm13, %v7667_v9 }
0x11d6   :  { %v1803_v3 = vperm.slane %v7667_v9, 0  ;;  %v1810_v34 = vperm.slane %v7667_v9, 1  ;;  %v1845_v43 = vperm.slane %v7667_v9, 6  ;;  %v1852_v61 = vperm.slane %v7667_v9, 7 }
0x11d7   :  { %v5963_v48 = vpack.i.bf16 %v1838_v25, %v1831_v12  ;;  %v5958_v63 = vpack.i.bf16 %v1824_v40, %v1817_v18  ;;  %v6660_v12 = vld [vmem:[%s9551_s3 + $0x10] sm:$0xff] }
0x11d8   :  { %v5953_v0 = vpack.i.bf16 %v1810_v34, %v1803_v3  ;;  %v5968_v23 = vpack.i.bf16 %v1852_v61, %v1845_v43 }
0x11d9   :  { %5964 = vperm.xlu0 %5936, %v5963_v48   ;;  %5959 = vperm.xlu2 %5952, %v5958_v63  }
0x11da   :  { %5954 = vperm.xlu1 %5930, %v5953_v0  }
0x11e1   :  { %5969 = vperm.xlu0 %5936, %v5968_v23  }
0x11e2   :  { %1939 = vrot.lane.b32.xlu1 %v7392_v24, %s6788_s0 }
0x1233   :  { %v5960_v5 = vpop.permute.xlu2 %5959 }
0x1234   :  { %v5962_v52 = vunpack.i.h.bf16 %v5960_v5  ;;  %v5961_v39 = vunpack.i.l.bf16 %v5960_v5 }
0x1236   :  { %v1862_v36 = vmul.f32 %v6659_v15, %v5962_v52  ;;  %v1861_v25 = vmul.f32 %v6660_v12, %v5961_v39  ;;  %v7697_v39 = vld [vmem:[%s9551_s3 + $0x8] sm:$0xff]  ;;  %v7703_v12 = vld [vmem:[%s9551_s3] sm:$0xff] }
0x1237   :  { %9613 = vst [vmem:[#allocation18_spill] sm:$0xff] %v7697_v39 }
0x1238   :  { %v1888_v18 = vsel %vm106_vm0, %v1862_v36, 0.0  ;;  %v1881_v40 = vsel %vm106_vm0, %v1861_v25, 0.0  ;;  %9614 = vst [vmem:[#allocation19_spill] sm:$0xff] %v7703_v12 }
0x1239   :  { %v1889_v3 = vrot.slane %v1888_v18, 4  ;;  %v1882_v34 = vrot.slane %v1881_v40, 4 }
0x123b   :  { %v1890_v48 = vadd.f32 %v1889_v3, %v1888_v18  ;;  %v1883_v63 = vadd.f32 %v1882_v34, %v1881_v40 }
0x123d   :  { %v1891_v18 = vrot.slane %v1890_v48, 2  ;;  %v1884_v40 = vrot.slane %v1883_v63, 2 }
0x124b   :  { %v5965_v24 = vpop.permute.xlu0 %5964 }
0x124c   :  { %v5967_v0 = vunpack.i.h.bf16 %v5965_v24  ;;  %v5966_v43 = vunpack.i.l.bf16 %v5965_v24  ;;  %v5955_v61 = vpop.permute.xlu1 %5954 }
0x124d   :  { %v5957_v23 = vunpack.i.h.bf16 %v5955_v61  ;;  %v5956_v5 = vunpack.i.l.bf16 %v5955_v61 }
0x124e   :  { %v1864_v52 = vmul.f32 %v5967_v0, %v7308_v21  ;;  %v1863_v15 = vmul.f32 %v5966_v43, %v7303_v20 }
0x124f   :  { %v1860_v36 = vmul.f32 %v7697_v39, %v5957_v23  ;;  %v1859_v25 = vmul.f32 %v7703_v12, %v5956_v5  ;;  %v1892_v12 = vadd.f32 %v1891_v18, %v1890_v48  ;;  %v1885_v39 = vadd.f32 %v1884_v40, %v1883_v63 }
0x1250   :  { %v1902_v21 = vsel %vm106_vm0, %v1864_v52, 0.0  ;;  %v1895_v20 = vsel %vm106_vm0, %v1863_v15, 0.0 }
0x1251   :  { %v1903_v3 = vrot.slane %v1902_v21, 4  ;;  %v1896_v34 = vrot.slane %v1895_v20, 4  ;;  %v1874_v24 = vsel %vm106_vm0, %v1860_v36, 0.0  ;;  %v1867_v0 = vsel %vm106_vm0, %v1859_v25, 0.0  ;;  %v7713_v36 = vld [vmem:[%s9551_s3 + $0x38] sm:$0xff] }
0x1252   :  { %v1875_v43 = vrot.slane %v1874_v24, 4  ;;  %v1868_v61 = vrot.slane %v1867_v0, 4  ;;  %9615 = vst [vmem:[#allocation20_spill] sm:$0xff] %v7713_v36 }
0x1253   :  { %v1904_v23 = vadd.f32 %v1903_v3, %v1902_v21  ;;  %v1897_v8 = vadd.f32 %v1896_v34, %v1895_v20  ;;  %v5970_v31 = vpop.permute.xlu0 %5969  ;;  %v7719_v21 = vld [vmem:[%s9551_s3 + $0x30] sm:$0xff]  ;;  %v1886_v3 = vrot.slane %v1885_v39, 1 }
0x1254   :  { %v1876_v46 = vadd.f32 %v1875_v43, %v1874_v24  ;;  %v1869_v38 = vadd.f32 %v1868_v61, %v1867_v0  ;;  %v5972_v5 = vunpack.i.h.bf16 %v5970_v31  ;;  %v5971_v51 = vunpack.i.l.bf16 %v5970_v31  ;;  %9616 = vst [vmem:[#allocation21_spill] sm:$0xff] %v7719_v21 }
0x1255   :  { %v1905_v52 = vrot.slane %v1904_v23, 2  ;;  %v1898_v17 = vrot.slane %v1897_v8, 2  ;;  %v1893_v0 = vrot.slane %v1892_v12, 1 }
0x1256   :  { %v1877_v15 = vrot.slane %v1876_v46, 2  ;;  %v1870_v42 = vrot.slane %v1869_v38, 2  ;;  %v1866_v25 = vmul.f32 %v7713_v36, %v5972_v5  ;;  %v1865_v31 = vmul.f32 %v7719_v21, %v5971_v51 }
0x1257   :  { %v1899_v48 = vadd.f32 %v1898_v17, %v1897_v8  ;;  %v1906_v43 = vadd.f32 %v1905_v52, %v1904_v23  ;;  %v1887_v51 = vadd.f32 %v1886_v3, %v1885_v39  ;;  %v1940_v3 = vpop.permute.xlu1 %1939 }
0x1258   :  { %v1878_v63 = vadd.f32 %v1877_v15, %v1876_v46  ;;  %v1871_v18 = vadd.f32 %v1870_v42, %v1869_v38  ;;  %v1916_v40 = vsel %vm106_vm0, %v1866_v25, 0.0  ;;  %v1909_v20 = vsel %vm106_vm0, %v1865_v31, 0.0 }
0x1259   :  { %v1917_v34 = vrot.slane %v1916_v40, 4  ;;  %v1910_v24 = vrot.slane %v1909_v20, 4  ;;  %v1900_v36 = vrot.slane %v1899_v48, 1  ;;  %v1894_v38 = vadd.f32 %v1893_v0, %v1892_v12 }
0x125a   :  { %v1879_v61 = vrot.slane %v1878_v63, 1  ;;  %v1872_v5 = vrot.slane %v1871_v18, 1  ;;  %v1907_v42 = vrot.slane %v1906_v43, 1 }
0x125b   :  { %v1918_v13 = vadd.f32 %v1917_v34, %v1916_v40  ;;  %v1911_v22 = vadd.f32 %v1910_v24, %v1909_v20  ;;  %v1901_v15 = vadd.f32 %v1900_v36, %v1899_v48 }
0x125c   :  { %v1880_v37 = vadd.f32 %v1879_v61, %v1878_v63  ;;  %v1873_v2 = vadd.f32 %v1872_v5, %v1871_v18  ;;  %v1908_v63 = vadd.f32 %v1907_v42, %v1906_v43 }
0x125d   :  { %v1919_v8 = vrot.slane %v1918_v13, 2  ;;  %v1912_v46 = vrot.slane %v1911_v22, 2 }
0x125e   :  { %v1931_v17 = vsel %vm304_vm6, %v1880_v37, %v1873_v2 }
0x125f   :  { %v1913_v25 = vadd.f32 %v1912_v46, %v1911_v22  ;;  %v1920_v31 = vadd.f32 %v1919_v8, %v1918_v13  ;;  %v1932_v21 = vsel %vm306_vm7, %v1887_v51, %v1931_v17 }
0x1260   :  { %v1933_v23 = vsel %vm308_vm8, %v1894_v38, %v1932_v21 }
0x1261   :  { %v1914_v52 = vrot.slane %v1913_v25, 1  ;;  %v1921_v44 = vrot.slane %v1920_v31, 1  ;;  %v1934_v40 = vsel %vm310_vm9, %v1901_v15, %v1933_v23 }
0x1262   :  { %v1935_v20 = vsel %vm312_vm10, %v1908_v63, %v1934_v40 }
0x1263   :  { %v1915_v18 = vadd.f32 %v1914_v52, %v1913_v25  ;;  %v1922_v39 = vadd.f32 %v1921_v44, %v1920_v31 }
0x1265   :  { %v1936_v12 = vsel %vm314_vm11, %v1915_v18, %v1935_v20 }
0x1266   :  { %v1937_v2 = vsel %vm316_vm12, %v1922_v39, %v1936_v12 }
0x1267   :  { %v1942_v22 = vsel %vm106_vm0, %v1937_v2, %v1940_v3 }
0x1268   :  { %5867 = vmatmul.msk.f32.vlgmr.msrb.gmra.mxu0 %vm111_vm1, %v1942_v22 }
0x1269   :  { %4650 = vmatpush.msrb.mxu0 %v7334_v32 }
0x126b   :  { %4651 = vmatpush.msrb.mxu0 %v7340_v50 }
0x126d   :  { %4652 = vmatpush.msrb.mxu0 %v7346_v56 }
0x126f   :  { %4653 = vmatpush.msrb.mxu0 %v7352_v58 }
0x1271   :  { %4654 = vmatpush.msrb.mxu0 %v7358_v59 }
0x1273   :  { %4655 = vmatpush.msrb.mxu0 %v7364_v41 }
0x1275   :  { %4656 = vmatpush.msrb.mxu0 %v7370_v55 }
0x1277   :  { %4657 = vmatpush.msrb.mxu0 %v7376_v60 }
0x12e5   :  { %v1963_v44 = vpop.f32.mrf.mxu0 }
0x12e6   :  { %v1964_v37 = vadd.f32 %v7382_v62, %v1963_v44 }
0x12e8   :  { %6216 = vtanh.f32 %v1964_v37  ;;  %v5868_v32 = vmul.f32 -1.442695, %v1964_v37 }
0x12ea   :  { %6218 = vpow2.f32 %v5868_v32 }
0x12ee   :  { %v6217_v13 = vpop.eup %6216 }
0x12ef   :  { %1988 = vrot.lane.b32.xlu2 %v6217_v13, %s6788_s0  ;;  %v7776_v13 = vld [vmem:[%s9543_s11] ss:$0 sm:$0xff] }
0x12f0   :  { %v6219_v50 = vpop.eup %6218 }
0x12f1   :  { %v1969_v56 = vadd.f32 1.0, %v6219_v50 }
0x12f3   :  { %6220 = vrcp.f32 %v1969_v56  ;;  %v1981_v55 = vand.u32 2147483648, %v1969_v56  ;;  %vm1975_vm3 = vweird.f32 %v1969_v56  ;;  %v1979_v60 = vand.u32 2147483647, %v1969_v56 }
0x12f5   :  { %v1982_v48 = vor.u32 1.1754944e-38, %v1981_v55  ;;  %vm1980_vm5 = vcmp.eq.f32.partialorder %v1979_v60, 8.507059e+37 }
0x12f9   :  { %v6221_v58 = vpop.eup %6220 }
0x12fa   :  { %v1971_v59 = vmul.f32 %v6221_v58, %v1969_v56  ;;  %vm1976_vm2 = vweird.f32 %v6221_v58 }
0x12fb   :  { %vm1977_vm4 = vmor %vm1975_vm3, %vm1976_vm2 }
0x12fc   :  { %v1972_v36 = vsub.f32 1.0, %v1971_v59 }
0x12fe   :  { %v1973_v41 = vmul.f32 %v6221_v58, %v1972_v36 }
0x1300   :  { %v1974_v21 = vadd.f32 %v6221_v58, %v1973_v41 }
0x1302   :  { %v1978_v62 = vsel %vm1977_vm4, %v6221_v58, %v1974_v21 }
0x1303   :  { %v1983_v24 = vsel %vm1980_vm5, %v1982_v48, %v1978_v62 }
0x1304   :  { %v1986_v43 = vmul.f32 %v1983_v24, %v7388_v19 }
0x1349   :  { %v1989_v34 = vpop.permute.xlu2 %1988 }
0x134a   :  { %v1991_v0 = vmul.f32 %v1989_v34, %v1983_v24 }
0x134c   :  { %1993 = vrot.lane.b32.xlu0 %v1991_v0, %s6787_s28 }
0x13be   :  { %v1994_v61 = vpop.permute.xlu0 %1993 }
0x13bf   :  { %v7745_v5 = vadd.f32 %v1994_v61, %v1986_v43 }
0x13c1   :  { %6222 = vtanh.f32 %v7745_v5 }
0x13c7   :  { %v6223_v51 = vpop.eup %6222 }
0x13c8   :  { %1999 = vrot.lane.b32.xlu1 %v6223_v51, %s6788_s0 }
0x143a   :  { %v2000_v8 = vpop.permute.xlu1 %1999 }
0x143b   :  { %v7749_v46 = vmul.f32 %v2000_v8, %v1983_v24 }
0x143d   :  { %2004 = vrot.lane.b32.xlu2 %v7749_v46, %s6787_s28 }
0x1497   :  { %v2005_v38 = vpop.permute.xlu2 %2004 }
0x1498   :  { %5869 = vmatmul.msk.f32.vlgmr.msra.gmra.mxu1 %vm106_vm0, %v2005_v38 }
0x1499   :  { %3368 = vmatpush.msra.mxu1 %v7400_v35 }
0x149b   :  { %3369 = vmatpush.msra.mxu1 %v7406_v4 }
0x149d   :  { %3370 = vmatpush.msra.mxu1 %v7412_v26 }
0x149f   :  { %3371 = vmatpush.msra.mxu1 %v7418_v27 }
0x1515   :  { %v2025_v19 = vpop.f32.mrf.mxu1 }
0x1516   :  { %v2026_v42 = vadd.f32 %v7424_v29, %v2025_v19 }
0x1518   :  { %v2036_v17 = vperm.slane %v2026_v42, 0  ;;  %v2030_v15 = vrot.slane %v2026_v42, 2  ;;  %v2029_v25 = vrot.slane %v2026_v42, 1  ;;  %v2031_v31 = vrot.slane %v2026_v42, 3 }
0x1519   :  { %v2033_v23 = vrot.slane %v2026_v42, 5  ;;  %v2032_v52 = vrot.slane %v2026_v42, 4  ;;  %v2034_v20 = vrot.slane %v2026_v42, 6 }
0x151a   :  { %v2052_v40 = vadd.f32 %v7430_v54, %v2036_v17  ;;  %v2038_v63 = vperm.slane %v2030_v15, 0  ;;  %v2037_v18 = vperm.slane %v2029_v25, 0  ;;  %v2039_v35 = vperm.slane %v2031_v31, 0 }
0x151b   :  { %v2041_v39 = vperm.slane %v2033_v23, 0  ;;  %v2040_v4 = vperm.slane %v2032_v52, 0  ;;  %v2035_v54 = vrot.slane %v2026_v42, 7  ;;  %v2042_v2 = vperm.slane %v2034_v20, 0 }
0x151c   :  { %6224 = vtanh.f32 %v2052_v40  ;;  %v2054_v26 = vadd.f32 %v7436_v1, %v2038_v63  ;;  %v2053_v27 = vadd.f32 %v7442_v14, %v2037_v18  ;;  %v2055_v29 = vadd.f32 %v7448_v11, %v2039_v35  ;;  %v7769_v14 = vld [vmem:[%s9544_s4 + $0x30] sm:$0xff] }
0x151d   :  { %v2057_v12 = vadd.f32 %v7472_v49, %v2041_v39  ;;  %v2056_v3 = vadd.f32 %v7460_v16, %v2040_v4  ;;  %v2043_v37 = vperm.slane %v2035_v54, 0  ;;  %v2058_v11 = vadd.f32 %v7769_v14, %v2042_v2 }
0x151e   :  { %6226 = vtanh.f32 %v2054_v26 }
0x151f   :  { %6228 = vtanh.f32 %v2053_v27  ;;  %v2059_v58 = vadd.f32 %v7482_v57, %v2043_v37  ;;  %v9617_v27 = vmax.f32 %v7267_v47, 0.0 }
0x1520   :  { %6230 = vtanh.f32 %v2055_v29 }
0x1521   :  { %6232 = vtanh.f32 %v2057_v12  ;;  %v7807_v29 = vmax.f32 %v9617_v27, %v7667_v9 }
0x1522   :  { %v6225_v22 = vpop.eup %6224  ;;  %6234 = vtanh.f32 %v2056_v3 }
0x1523   :  { %v2068_v44 = vmul.f32 %v7466_v10, %v6225_v22  ;;  %6236 = vtanh.f32 %v2058_v11  ;;  %vm2100_vm15 = vcmp.gt.f32.partialorder %v7807_v29, 0.5 }
0x1524   :  { %v6227_v1 = vpop.eup %6226  ;;  %6238 = vtanh.f32 %v2059_v58 }
0x1525   :  { %v6229_v49 = vpop.eup %6228  ;;  %v2076_v16 = vsel %vm106_vm0, %v2068_v44, 0.0  ;;  %v2070_v10 = vmul.f32 %v7776_v13, %v6227_v1 }
0x1526   :  { %v6231_v32 = vpop.eup %6230  ;;  %2077 = vadd.xlane.f32.xlu0 %v2076_v16  ;;  %v2069_v50 = vmul.f32 %v7776_v13, %v6229_v49 }
0x1527   :  { %v2082_v56 = vsel %vm106_vm0, %v2070_v10, 0.0  ;;  %v6233_v59 = vpop.eup %6232  ;;  %v2071_v21 = vmul.f32 %v7776_v13, %v6231_v32 }
0x1528   :  { %2083 = vadd.xlane.f32.xlu2 %v2082_v56  ;;  %v2079_v36 = vsel %vm106_vm0, %v2069_v50, 0.0  ;;  %v6235_v41 = vpop.eup %6234  ;;  %v2073_v55 = vmul.f32 %v7776_v13, %v6233_v59 }
0x1529   :  { %2080 = vadd.xlane.f32.xlu1 %v2079_v36  ;;  %v2072_v60 = vmul.f32 %v7776_v13, %v6235_v41  ;;  %v2085_v62 = vsel %vm106_vm0, %v2071_v21, 0.0  ;;  %v6237_v48 = vpop.eup %6236 }
0x152a   :  { %v2091_v57 = vsel %vm106_vm0, %v2073_v55, 0.0  ;;  %v6239_v24 = vpop.eup %6238  ;;  %v2074_v0 = vmul.f32 %v7776_v13, %v6237_v48 }
0x152b   :  { %v2088_v34 = vsel %vm106_vm0, %v2072_v60, 0.0  ;;  %v2075_v43 = vmul.f32 %v7776_v13, %v6239_v24 }
0x152c   :  { %v2094_v61 = vsel %vm106_vm0, %v2074_v0, 0.0 }
0x152d   :  { %v2097_v51 = vsel %vm106_vm0, %v2075_v43, 0.0 }
0x152e   :  { %2086 = vadd.xlane.f32.xlu0 %v2085_v62 }
0x1530   :  { %2092 = vadd.xlane.f32.xlu2 %v2091_v57 }
0x1531   :  { %2089 = vadd.xlane.f32.xlu1 %v2088_v34 }
0x1536   :  { %2095 = vadd.xlane.f32.xlu0 %v2094_v61 }
0x1539   :  { %2098 = vadd.xlane.f32.xlu1 %v2097_v51 }
0x1599   :  { %v2078_v8 = vpop.xlane.xlu0 %2077 }
0x159a   :  { %v2109_v17 = vperm.slane %v2078_v8, %v7002_v45  ;;  %v7821_v8 = vld [vmem:[%s9544_s4 + $0x8] sm:$0xff] }
0x159b   :  { %v2084_v38 = vpop.xlane.xlu2 %2083 }
0x159c   :  { %v2081_v19 = vpop.xlane.xlu1 %2080  ;;  %v2111_v15 = vperm.slane %v2084_v38, %v7002_v45 }
0x159d   :  { %v2110_v42 = vperm.slane %v2081_v19, %v7002_v45 }
0x159f   :  { %v2117_v25 = vsel %vm304_vm6, %v2110_v42, %v2109_v17  ;;  %v7828_v17 = vld [vmem:[%s9544_s4 + $0x18] sm:$0xff] }
0x15a0   :  { %v2118_v52 = vsel %vm306_vm7, %v2111_v15, %v2117_v25 }
0x15a1   :  { %v2087_v31 = vpop.xlane.xlu0 %2086 }
0x15a2   :  { %v2112_v23 = vperm.slane %v2087_v31, %v7002_v45 }
0x15a3   :  { %v2093_v40 = vpop.xlane.xlu2 %2092 }
0x15a4   :  { %v2090_v63 = vpop.xlane.xlu1 %2089  ;;  %v2119_v18 = vsel %vm308_vm8, %v2112_v23, %v2118_v52  ;;  %v2114_v39 = vperm.slane %v2093_v40, %v7002_v45 }
0x15a5   :  { %v2113_v35 = vperm.slane %v2090_v63, %v7002_v45  ;;  %v7835_v63 = vld [vmem:[%s9544_s4 + $0x10] sm:$0xff] }
0x15a7   :  { %v2120_v4 = vsel %vm310_vm9, %v2113_v35, %v2119_v18 }
0x15a8   :  { %v2121_v12 = vsel %vm312_vm10, %v2114_v39, %v2120_v4  ;;  %v7841_v39 = vld [vmem:[%s9544_s4] sm:$0xff] }
0x15a9   :  { %v2096_v20 = vpop.xlane.xlu0 %2095 }
0x15aa   :  { %v2115_v26 = vperm.slane %v2096_v20, %v7002_v45 }
0x15ac   :  { %v2099_v3 = vpop.xlane.xlu1 %2098  ;;  %v2122_v54 = vsel %vm314_vm11, %v2115_v26, %v2121_v12 }
0x15ad   :  { %v2116_v2 = vperm.slane %v2099_v3, %v7002_v45 }
0x15af   :  { %v2123_v22 = vsel %vm316_vm12, %v2116_v2, %v2122_v54 }
0x15b0   :  { %v2125_v44 = vsel %vm2100_vm15, -inf, %v2123_v22 }
0x15b1   :  { %v2126_v37 = vsel %vm319_vm13, %v2125_v44, -inf }
0x15b2   :  { %2127 = vmax.xlane.f32.xlu2 %v2126_v37 }
0x1625   :  { %v2128_v47 = vpop.xlane.xlu2 %2127 }
0x1626   :  { %v2129_v9 = vsub.f32 %v2125_v44, %v2128_v47 }
0x1628   :  { %v2130_v1 = vmul.f32 1.442695, %v2129_v9 }
0x162a   :  { %6240 = vpow2.f32 %v2130_v1 }
0x1630   :  { %v6241_v11 = vpop.eup %6240 }
0x1631   :  { %v2132_v49 = vsel %vm319_vm13, %v6241_v11, 0.0 }
0x1632   :  { %2133 = vadd.xlane.f32.xlu0 %v2132_v49 }
0x16a5   :  { %v2134_v16 = vpop.xlane.xlu0 %2133 }
0x16a6   :  { %6242 = vrcp.f32 %v2134_v16  ;;  %v2146_v56 = vand.u32 2147483648, %v2134_v16  ;;  %v2144_v59 = vand.u32 2147483647, %v2134_v16  ;;  %vm2140_vm2 = vweird.f32 %v2134_v16 }
0x16a8   :  { %v2147_v41 = vor.u32 1.1754944e-38, %v2146_v56  ;;  %vm2145_vm4 = vcmp.eq.f32.partialorder %v2144_v59, 8.507059e+37 }
0x16ac   :  { %v6243_v10 = vpop.eup %6242 }
0x16ad   :  { %v2136_v32 = vmul.f32 %v6243_v10, %v2134_v16  ;;  %vm2141_vm14 = vweird.f32 %v6243_v10  ;;  %v7851_v16 = vld [vmem:[%s9544_s4 + $0x28] sm:$0xff] }
0x16ae   :  { %vm2142_vm3 = vmor %vm2140_vm2, %vm2141_vm14 }
0x16af   :  { %v2137_v50 = vsub.f32 1.0, %v2136_v32 }
0x16b1   :  { %v2138_v58 = vmul.f32 %v6243_v10, %v2137_v50 }
0x16b3   :  { %v2139_v36 = vadd.f32 %v6243_v10, %v2138_v58  ;;  %v7857_v58 = vld [vmem:[%s9544_s4 + $0x20] sm:$0xff] }
0x16b5   :  { %v2143_v21 = vsel %vm2142_vm3, %v6243_v10, %v2139_v36 }
0x16b6   :  { %v2148_v55 = vsel %vm2145_vm4, %v2147_v41, %v2143_v21 }
0x16b7   :  { %v2150_v60 = vmul.f32 %v6241_v11, %v2148_v55 }
0x16b9   :  { %v2165_v62 = vperm.slane %v2150_v60, 2  ;;  %v2158_v48 = vperm.slane %v2150_v60, 1  ;;  %v2151_v57 = vperm.slane %v2150_v60, 0  ;;  %v2186_v34 = vperm.slane %v2150_v60, 5 }
0x16ba   :  { %v2172_v24 = vperm.slane %v2150_v60, 3  ;;  %v2179_v0 = vperm.slane %v2150_v60, 4  ;;  %v2193_v43 = vperm.slane %v2150_v60, 6  ;;  %v2200_v61 = vperm.slane %v2150_v60, 7 }
0x16bb   :  { %2170 = vperm.xlu0 %5936, %v2165_v62   ;;  %2163 = vperm.xlu2 %5952, %v2158_v48  }
0x16bc   :  { %2156 = vperm.xlu1 %5930, %v2151_v57  }
0x16c3   :  { %2191 = vperm.xlu0 %5936, %v2186_v34   ;;  %2177 = vperm.xlu2 %5952, %v2172_v24  }
0x16c4   :  { %2184 = vperm.xlu1 %5930, %v2179_v0  }
0x16cb   :  { %2198 = vperm.xlu2 %5952, %v2193_v43  }
0x16cc   :  { %2205 = vperm.xlu1 %5930, %v2200_v61  }
0x1715   :  { %v2164_v51 = vpop.permute.xlu2 %2163 }
0x1716   :  { %v2208_v38 = vmul.f32 %v7821_v8, %v2164_v51 }
0x1718   :  { %v2222_v42 = vsel %vm106_vm0, %v2208_v38, 0.0 }
0x1719   :  { %v2223_v25 = vrot.slane %v2222_v42, 4 }
0x171b   :  { %v2224_v40 = vadd.f32 %v2223_v25, %v2222_v42 }
0x171d   :  { %v2178_v19 = vpop.permute.xlu2 %2177  ;;  %v2225_v54 = vrot.slane %v2224_v40, 2 }
0x171e   :  { %v2210_v15 = vmul.f32 %v7828_v17, %v2178_v19 }
0x171f   :  { %v2226_v11 = vadd.f32 %v2225_v54, %v2224_v40 }
0x1720   :  { %v2236_v31 = vsel %vm106_vm0, %v2210_v15, 0.0 }
0x1721   :  { %v2237_v20 = vrot.slane %v2236_v31, 4  ;;  %v2227_v62 = vrot.slane %v2226_v11, 1 }
0x1723   :  { %v2238_v44 = vadd.f32 %v2237_v20, %v2236_v31  ;;  %v2228_v19 = vadd.f32 %v2227_v62, %v2226_v11 }
0x1725   :  { %v2199_v23 = vpop.permute.xlu2 %2198  ;;  %v2239_v36 = vrot.slane %v2238_v44, 2 }
0x1726   :  { %v2213_v26 = vmul.f32 %v7769_v14, %v2199_v23 }
0x1727   :  { %v2240_v43 = vadd.f32 %v2239_v36, %v2238_v44 }
0x1728   :  { %v2257_v37 = vsel %vm106_vm0, %v2213_v26, 0.0 }
0x1729   :  { %v2258_v50 = vrot.slane %v2257_v37, 4 }
0x172b   :  { %v2259_v34 = vadd.f32 %v2258_v50, %v2257_v37 }
0x172d   :  { %v2171_v52 = vpop.permute.xlu0 %2170  ;;  %v2260_v25 = vrot.slane %v2259_v34, 2 }
0x172e   :  { %v2209_v18 = vmul.f32 %v7835_v63, %v2171_v52  ;;  %v2157_v35 = vpop.permute.xlu1 %2156  ;;  %v7865_v52 = vld [vmem:[%s9544_s4 + $0x38] sm:$0xff] }
0x172f   :  { %v2207_v4 = vmul.f32 %v7841_v39, %v2157_v35 }
0x1730   :  { %v2229_v27 = vsel %vm106_vm0, %v2209_v18, 0.0  ;;  %v2241_v18 = vrot.slane %v2240_v43, 1 }
0x1731   :  { %v2230_v12 = vrot.slane %v2229_v27, 4  ;;  %v2215_v3 = vsel %vm106_vm0, %v2207_v4, 0.0 }
0x1732   :  { %v2216_v2 = vrot.slane %v2215_v3, 4 }
0x1733   :  { %v2231_v22 = vadd.f32 %v2230_v12, %v2229_v27 }
0x1734   :  { %v2217_v47 = vadd.f32 %v2216_v2, %v2215_v3  ;;  %v2261_v3 = vadd.f32 %v2260_v25, %v2259_v34  ;;  %v2242_v2 = vadd.f32 %v2241_v18, %v2240_v43 }
0x1735   :  { %v2232_v9 = vrot.slane %v2231_v22, 2  ;;  %v2192_v1 = vpop.permute.xlu0 %2191 }
0x1736   :  { %v2218_v49 = vrot.slane %v2217_v47, 2  ;;  %v2212_v10 = vmul.f32 %v7851_v16, %v2192_v1  ;;  %v2185_v32 = vpop.permute.xlu1 %2184  ;;  %v2262_v1 = vrot.slane %v2261_v3, 1 }
0x1737   :  { %v2233_v56 = vadd.f32 %v2232_v9, %v2231_v22  ;;  %v2211_v59 = vmul.f32 %v7857_v58, %v2185_v32 }
0x1738   :  { %v2219_v41 = vadd.f32 %v2218_v49, %v2217_v47  ;;  %v2250_v21 = vsel %vm106_vm0, %v2212_v10, 0.0  ;;  %v2263_v50 = vadd.f32 %v2262_v1, %v2261_v3 }
0x1739   :  { %v2251_v55 = vrot.slane %v2250_v21, 4  ;;  %v2243_v60 = vsel %vm106_vm0, %v2211_v59, 0.0  ;;  %v2234_v24 = vrot.slane %v2233_v56, 1 }
0x173a   :  { %v2220_v48 = vrot.slane %v2219_v41, 1  ;;  %v2244_v57 = vrot.slane %v2243_v60, 4 }
0x173b   :  { %v2252_v0 = vadd.f32 %v2251_v55, %v2250_v21  ;;  %v2235_v31 = vadd.f32 %v2234_v24, %v2233_v56 }
0x173c   :  { %v2221_v61 = vadd.f32 %v2220_v48, %v2219_v41  ;;  %v2245_v51 = vadd.f32 %v2244_v57, %v2243_v60 }
0x173d   :  { %v2253_v38 = vrot.slane %v2252_v0, 2 }
0x173e   :  { %v2246_v42 = vrot.slane %v2245_v51, 2  ;;  %v2206_v15 = vpop.permute.xlu1 %2205  ;;  %v2279_v35 = vsel %vm304_vm6, %v2228_v19, %v2221_v61 }
0x173f   :  { %v2254_v23 = vadd.f32 %v2253_v38, %v2252_v0  ;;  %v2214_v40 = vmul.f32 %v7865_v52, %v2206_v15  ;;  %v2280_v54 = vsel %vm306_vm7, %v2235_v31, %v2279_v35  ;;  %v9619_v38 = vld [vmem:[#allocation12_spill] sm:$0xff]  ;;  %v9621_v15 = vld [vmem:[#allocation13_spill] sm:$0xff]  ;;  %v9622_v35 = vld [vmem:[#allocation15_spill] sm:$0xff] }
0x1740   :  { %v2247_v4 = vadd.f32 %v2246_v42, %v2245_v51  ;;  %v2281_v9 = vsel %vm308_vm8, %v2242_v2, %v2280_v54  ;;  %v7899_v2 = vld [vmem:[%s9548_s14] ss:$0 sm:$0xff] }
0x1741   :  { %v2264_v20 = vsel %vm106_vm0, %v2214_v40, 0.0  ;;  %v2255_v26 = vrot.slane %v2254_v23, 1 }
0x1742   :  { %v2248_v27 = vrot.slane %v2247_v4, 1  ;;  %v2265_v12 = vrot.slane %v2264_v20, 4 }
0x1743   :  { %v2256_v37 = vadd.f32 %v2255_v26, %v2254_v23 }
0x1744   :  { %v2249_v22 = vadd.f32 %v2248_v27, %v2247_v4  ;;  %v2266_v44 = vadd.f32 %v2265_v12, %v2264_v20  ;;  %v9623_v27 = vld [vmem:[#allocation16_spill] sm:$0xff] }
0x1746   :  { %v2267_v47 = vrot.slane %v2266_v44, 2  ;;  %v2282_v11 = vsel %vm310_vm9, %v2249_v22, %v2281_v9  ;;  %v7907_v9 = vld [vmem:[%s9549_s5 + $0x38] sm:$0xff] }
0x1747   :  { %v2283_v32 = vsel %vm312_vm10, %v2256_v37, %v2282_v11 }
0x1748   :  { %v2268_v49 = vadd.f32 %v2267_v47, %v2266_v44  ;;  %v2284_v59 = vsel %vm314_vm11, %v2263_v50, %v2283_v32 }
0x174a   :  { %v2269_v10 = vrot.slane %v2268_v49, 1 }
0x174c   :  { %v2270_v56 = vadd.f32 %v2269_v10, %v2268_v49 }
0x174e   :  { %v2285_v36 = vsel %vm316_vm12, %v2270_v56, %v2284_v59 }
0x174f   :  { %5870 = vmatmul.msk.f32.vlgmr.msra.gmra.mxu2 %vm106_vm0, %v2285_v36 }
0x1750   :  { %3648 = vmatpush.msra.mxu2 %v7549_v53 }
0x1752   :  { %3649 = vmatpush.msra.mxu2 %v7555_v28 }
0x1754   :  { %3650 = vmatpush.msra.mxu2 %v7561_v6  ;;  %v9618_v6 = vld [vmem:[#allocation11_spill] sm:$0xff] }
0x1756   :  { %3651 = vmatpush.msra.mxu2 %v7567_v33 }
0x17d2   :  { %v2305_v41 = vpop.f32.mrf.mxu2 }
0x17d3   :  { %v2306_v21 = vadd.f32 %v7573_v30, %v2305_v41  ;;  %v9620_v30 = vld [vmem:[#allocation14_spill] sm:$0xff] }
0x17d5   :  { %v2316_v55 = vperm.slane %v2306_v21, 0  ;;  %v2310_v60 = vrot.slane %v2306_v21, 2  ;;  %v2309_v62 = vrot.slane %v2306_v21, 1  ;;  %v2311_v48 = vrot.slane %v2306_v21, 3 }
0x17d6   :  { %v2313_v57 = vrot.slane %v2306_v21, 5  ;;  %v2312_v34 = vrot.slane %v2306_v21, 4  ;;  %v2314_v51 = vrot.slane %v2306_v21, 6  ;;  %v2315_v23 = vrot.slane %v2306_v21, 7 }
0x17d7   :  { %v2332_v24 = vadd.f32 %v7579_v7, %v2316_v55  ;;  %v2318_v0 = vperm.slane %v2310_v60, 0  ;;  %v2317_v43 = vperm.slane %v2309_v62, 0  ;;  %v2319_v53 = vperm.slane %v2311_v48, 0  ;;  %v7890_v7 = vld [vmem:[%s9549_s5 + $0x20] sm:$0xff] }
0x17d8   :  { %v2321_v61 = vperm.slane %v2313_v57, 0  ;;  %v2320_v28 = vperm.slane %v2312_v34, 0  ;;  %v2322_v40 = vperm.slane %v2314_v51, 0  ;;  %v2323_v20 = vperm.slane %v2315_v23, 0 }
0x17d9   :  { %6244 = vtanh.f32 %v2332_v24  ;;  %v2334_v33 = vadd.f32 %v9618_v6, %v2318_v0  ;;  %v2333_v19 = vadd.f32 %v9619_v38, %v2317_v43  ;;  %v2335_v42 = vadd.f32 %v9620_v30, %v2319_v53 }
0x17da   :  { %v2337_v25 = vadd.f32 %v9621_v15, %v2321_v61  ;;  %v2336_v31 = vadd.f32 %v7890_v7, %v2320_v28  ;;  %v2338_v12 = vadd.f32 %v9623_v27, %v2322_v40  ;;  %v2339_v1 = vadd.f32 %v7907_v9, %v2323_v20 }
0x17db   :  { %6246 = vtanh.f32 %v2334_v33 }
0x17dc   :  { %6248 = vtanh.f32 %v2333_v19 }
0x17dd   :  { %6250 = vtanh.f32 %v2335_v42 }
0x17de   :  { %6252 = vtanh.f32 %v2337_v25 }
0x17df   :  { %v6245_v18 = vpop.eup %6244  ;;  %6254 = vtanh.f32 %v2336_v31 }
0x17e0   :  { %v2348_v4 = vmul.f32 %v9622_v35, %v6245_v18  ;;  %6256 = vtanh.f32 %v2338_v12 }
0x17e1   :  { %v6247_v26 = vpop.eup %6246  ;;  %6258 = vtanh.f32 %v2339_v1 }
0x17e2   :  { %v6249_v3 = vpop.eup %6248  ;;  %v2356_v54 = vsel %vm106_vm0, %v2348_v4, 0.0  ;;  %v2350_v22 = vmul.f32 %v7899_v2, %v6247_v26 }
0x17e3   :  { %v6251_v44 = vpop.eup %6250  ;;  %2357 = vadd.xlane.f32.xlu0 %v2356_v54  ;;  %v2349_v37 = vmul.f32 %v7899_v2, %v6249_v3 }
0x17e4   :  { %v2362_v47 = vsel %vm106_vm0, %v2350_v22, 0.0  ;;  %v6253_v11 = vpop.eup %6252  ;;  %v2351_v32 = vmul.f32 %v7899_v2, %v6251_v44 }
0x17e5   :  { %2363 = vadd.xlane.f32.xlu1 %v2362_v47  ;;  %v2359_v49 = vsel %vm106_vm0, %v2349_v37, 0.0  ;;  %v6255_v10 = vpop.eup %6254  ;;  %v2353_v50 = vmul.f32 %v7899_v2, %v6253_v11 }
0x17e6   :  { %2360 = vadd.xlane.f32.xlu2 %v2359_v49  ;;  %v2352_v56 = vmul.f32 %v7899_v2, %v6255_v10  ;;  %v2365_v59 = vsel %vm106_vm0, %v2351_v32, 0.0  ;;  %v6257_v36 = vpop.eup %6256 }
0x17e7   :  { %v2371_v41 = vsel %vm106_vm0, %v2353_v50, 0.0  ;;  %v6259_v55 = vpop.eup %6258  ;;  %v2354_v60 = vmul.f32 %v7899_v2, %v6257_v36 }
0x17e8   :  { %v2368_v21 = vsel %vm106_vm0, %v2352_v56, 0.0  ;;  %v2355_v62 = vmul.f32 %v7899_v2, %v6259_v55  ;;  %v5871_v56 = vld [vmem:[%s9547_s6 + $0x10] sm:$0xff] }
0x17e9   :  { %v2374_v48 = vsel %vm106_vm0, %v2354_v60, 0.0 }
0x17ea   :  { %v2377_v57 = vsel %vm106_vm0, %v2355_v62, 0.0 }
0x17eb   :  { %2366 = vadd.xlane.f32.xlu0 %v2365_v59 }
0x17ed   :  { %2372 = vadd.xlane.f32.xlu1 %v2371_v41 }
0x17ee   :  { %2369 = vadd.xlane.f32.xlu2 %v2368_v21 }
0x17f3   :  { %2375 = vadd.xlane.f32.xlu0 %v2374_v48 }
0x17f6   :  { %2378 = vadd.xlane.f32.xlu2 %v2377_v57 }
0x1856   :  { %v2358_v34 = vpop.xlane.xlu0 %2357 }
0x1857   :  { %6260 = vtanh.f32 %v2358_v34 }
0x1858   :  { %v2364_v24 = vpop.xlane.xlu1 %2363 }
0x1859   :  { %6262 = vtanh.f32 %v2364_v24  ;;  %v2361_v0 = vpop.xlane.xlu2 %2360 }
0x185a   :  { %6264 = vtanh.f32 %v2361_v0 }
0x185d   :  { %v6261_v43 = vpop.eup %6260 }
0x185e   :  { %v2367_v53 = vpop.xlane.xlu0 %2366  ;;  %v2388_v6 = vmul.f32 10.0, %v6261_v43 }
0x185f   :  { %v6263_v61 = vpop.eup %6262  ;;  %6266 = vtanh.f32 %v2367_v53 }
0x1860   :  { %v6265_v28 = vpop.eup %6264  ;;  %v2373_v51 = vpop.xlane.xlu1 %2372  ;;  %v2390_v19 = vmul.f32 10.0, %v6263_v61  ;;  %v2404_v15 = vperm.slane %v2388_v6, %v7002_v45 }
0x1861   :  { %v2389_v33 = vmul.f32 10.0, %v6265_v28  ;;  %6268 = vtanh.f32 %v2373_v51  ;;  %v2370_v38 = vpop.xlane.xlu2 %2369 }
0x1862   :  { %6270 = vtanh.f32 %v2370_v38  ;;  %v2406_v25 = vperm.slane %v2390_v19, %v7002_v45 }
0x1863   :  { %v2405_v30 = vperm.slane %v2389_v33, %v7002_v45  ;;  %v9625_v33 = vmov 0.0  }
0x1865   :  { %v6267_v42 = vpop.eup %6266  ;;  %v2412_v18 = vsel %vm304_vm6, %v2405_v30, %v2404_v15 }
0x1866   :  { %v2391_v31 = vmul.f32 10.0, %v6267_v42  ;;  %v2376_v23 = vpop.xlane.xlu0 %2375  ;;  %v2413_v12 = vsel %vm306_vm7, %v2406_v25, %v2412_v18 }
0x1867   :  { %v6269_v40 = vpop.eup %6268  ;;  %6272 = vtanh.f32 %v2376_v23 }
0x1868   :  { %v6271_v35 = vpop.eup %6270  ;;  %v2407_v4 = vperm.slane %v2391_v31, %v7002_v45  ;;  %v2393_v20 = vmul.f32 10.0, %v6269_v40 }
0x1869   :  { %v2392_v26 = vmul.f32 10.0, %v6271_v35  ;;  %v2379_v27 = vpop.xlane.xlu2 %2378 }
0x186a   :  { %6274 = vtanh.f32 %v2379_v27  ;;  %v2414_v3 = vsel %vm308_vm8, %v2407_v4, %v2413_v12  ;;  %v2409_v44 = vperm.slane %v2393_v20, %v7002_v45 }
0x186b   :  { %v2408_v54 = vperm.slane %v2392_v26, %v7002_v45 }
0x186d   :  { %v6273_v22 = vpop.eup %6272  ;;  %v2415_v37 = vsel %vm310_vm9, %v2408_v54, %v2414_v3  ;;  %v6677_v3 = vld [vmem:[%s9551_s3 + $0x20] sm:$0xff] }
0x186e   :  { %v2394_v47 = vmul.f32 10.0, %v6273_v22  ;;  %v2416_v10 = vsel %vm312_vm10, %v2409_v44, %v2415_v37  ;;  %v6678_v22 = vld [vmem:[%s9551_s3 + $0x28] sm:$0xff] }
0x1870   :  { %v6275_v1 = vpop.eup %6274  ;;  %v2410_v11 = vperm.slane %v2394_v47, %v7002_v45 }
0x1871   :  { %v2395_v49 = vmul.f32 10.0, %v6275_v1 }
0x1872   :  { %v2417_v32 = vsel %vm314_vm11, %v2410_v11, %v2416_v10 }
0x1873   :  { %v2411_v50 = vperm.slane %v2395_v49, %v7002_v45 }
0x1875   :  { %v2418_v59 = vsel %vm316_vm12, %v2411_v50, %v2417_v32 }
0x1876   :  { %v7941_v36 = vsel %vm2100_vm15, -inf, %v2418_v59  ;;  %v7977_v59 = vld [vmem:[%s9551_s3 + $0x18] sm:$0xff] }
0x1877   :  { %9624 = vst [vmem:[#allocation11_spill] sm:$0xff] %v7941_v36  ;;  %v2448_v41 = vadd.f32 %v5871_v56, %v7941_v36 }
0x1879   :  { %v2449_v21 = vsel %vm319_vm13, %v2448_v41, -inf }
0x187a   :  { %2450 = vmax.xlane.f32.xlu1 %v2449_v21  ;;  %v7983_v21 = vld [vmem:[%s9551_s3 + $0x10] sm:$0xff] }
0x18ed   :  { %v2451_v55 = vpop.xlane.xlu1 %2450 }
0x18ee   :  { %vm2452_vm5 = vcmp.ge.f32.partialorder %v2448_v41, %v2451_v55 }
0x18ef   :  { %v2453_v60 = vsel %vm2452_vm5, %v7002_v45, 8 }
0x18f0   :  { %v2454_v62 = vsel %vm319_vm13, %v2453_v60, 2147483647 }
0x18f1   :  { %v2456_v48 = vshra.s32 %v2454_v62, 16  ;;  %v2455_v34 = vand.u32 65535, %v2454_v62  ;;  %v9626_v62 = vld [vmem:[#allocation18_spill] sm:$0xff] }
0x18f3   :  { %v2458_v57 = vcvt.s32.f32 %v2456_v48  ;;  %v2457_v0 = vcvt.s32.f32 %v2455_v34 }
0x18f5   :  { %2459 = vmin.xlane.f32.xlu0 %v2458_v57 }
0x1968   :  { %v2460_v24 = vpop.xlane.xlu0 %2459 }
0x1969   :  { %vm2461_vm14 = vcmp.eq.f32.partialorder %v2458_v57, %v2460_v24  ;;  %v2466_v53 = vcvt.f32.s32 %v2460_v24  ;;  %v9627_v57 = vld [vmem:[#allocation19_spill] sm:$0xff] }
0x196a   :  { %v2462_v43 = vsel %vm2461_vm14, %v2457_v0, inf }
0x196b   :  { %2463 = vmin.xlane.f32.xlu2 %v2462_v43  ;;  %v2467_v28 = vshll.u32 %v2466_v53, 16 }
0x19de   :  { %v2464_v61 = vpop.xlane.xlu2 %2463 }
0x19df   :  { %v2465_v51 = vcvt.f32.s32 %v2464_v61 }
0x19e1   :  { %v2468_v6 = vadd.s32 %v2467_v28, %v2465_v51 }
0x19e3   :  { %vm2469_vm15 = vcmp.eq.s32.totalorder %v7002_v45, %v2468_v6 }
0x19e4   :  { %v7949_v38 = vsel %vm2469_vm15, 1.0, %v9625_v33 }
0x19e5   :  { %v2505_v19 = vperm.slane %v7949_v38, 4  ;;  %v2512_v30 = vperm.slane %v7949_v38, 5  ;;  %v2491_v42 = vperm.slane %v7949_v38, 2  ;;  %v2498_v15 = vperm.slane %v7949_v38, 3  ;;  %5874 = vst.msk [vmem:[%s9550_s16 + $0x10] sm:$0xff] %vm319_vm13, %v7949_v38 }
0x19e6   :  { %v2477_v25 = vperm.slane %v7949_v38, 0  ;;  %v2484_v31 = vperm.slane %v7949_v38, 1  ;;  %v2519_v35 = vperm.slane %v7949_v38, 6  ;;  %v2526_v4 = vperm.slane %v7949_v38, 7 }
0x19e7   :  { %v5983_v23 = vpack.i.bf16 %v2512_v30, %v2505_v19  ;;  %v5978_v40 = vpack.i.bf16 %v2498_v15, %v2491_v42 }
0x19e8   :  { %v5973_v18 = vpack.i.bf16 %v2484_v31, %v2477_v25  ;;  %v5988_v20 = vpack.i.bf16 %v2526_v4, %v2519_v35 }
0x19e9   :  { %5984 = vperm.xlu2 %5952, %v5983_v23   ;;  %5979 = vperm.xlu0 %5936, %v5978_v40  }
0x19ea   :  { %5974 = vperm.xlu1 %5930, %v5973_v18  }
0x19f1   :  { %5989 = vperm.xlu0 %5936, %v5988_v20  }
0x19f2   :  { %2613 = vrot.lane.b32.xlu1 %v7749_v46, %s6788_s0 }
0x1a43   :  { %v5985_v26 = vpop.permute.xlu2 %5984 }
0x1a44   :  { %v5986_v27 = vunpack.i.l.bf16 %v5985_v26  ;;  %v5987_v12 = vunpack.i.h.bf16 %v5985_v26 }
0x1a46   :  { %v2537_v54 = vmul.f32 %v6677_v3, %v5986_v27  ;;  %v2538_v44 = vmul.f32 %v6678_v22, %v5987_v12  ;;  %v9628_v12 = vld [vmem:[#allocation20_spill] sm:$0xff] }
0x1a48   :  { %v2569_v37 = vsel %vm106_vm0, %v2537_v54, 0.0  ;;  %v2576_v47 = vsel %vm106_vm0, %v2538_v44, 0.0  ;;  %v9629_v54 = vld [vmem:[#allocation21_spill] sm:$0xff] }
0x1a49   :  { %v2570_v1 = vrot.slane %v2569_v37, 4  ;;  %v2577_v46 = vrot.slane %v2576_v47, 4 }
0x1a4b   :  { %v2571_v60 = vadd.f32 %v2570_v1, %v2569_v37  ;;  %v2578_v24 = vadd.f32 %v2577_v46, %v2576_v47 }
0x1a4d   :  { %v2572_v30 = vrot.slane %v2571_v60, 2  ;;  %v2579_v35 = vrot.slane %v2578_v24, 2 }
0x1a4f   :  { %v2573_v44 = vadd.f32 %v2572_v30, %v2571_v60 }
0x1a5b   :  { %v5980_v11 = vpop.permute.xlu0 %5979 }
0x1a5c   :  { %v5982_v49 = vunpack.i.h.bf16 %v5980_v11  ;;  %v5981_v10 = vunpack.i.l.bf16 %v5980_v11  ;;  %v5975_v32 = vpop.permute.xlu1 %5974 }
0x1a5d   :  { %v5977_v50 = vunpack.i.h.bf16 %v5975_v32  ;;  %v5976_v56 = vunpack.i.l.bf16 %v5975_v32 }
0x1a5e   :  { %v2536_v41 = vmul.f32 %v7977_v59, %v5982_v49  ;;  %v2535_v55 = vmul.f32 %v7983_v21, %v5981_v10 }
0x1a5f   :  { %v2534_v48 = vmul.f32 %v9626_v62, %v5977_v50  ;;  %v2533_v34 = vmul.f32 %v9627_v57, %v5976_v56  ;;  %v2580_v56 = vadd.f32 %v2579_v35, %v2578_v24 }
0x1a60   :  { %v2562_v0 = vsel %vm106_vm0, %v2536_v41, 0.0  ;;  %v2555_v43 = vsel %vm106_vm0, %v2535_v55, 0.0 }
0x1a61   :  { %v2563_v53 = vrot.slane %v2562_v0, 4  ;;  %v2556_v61 = vrot.slane %v2555_v43, 4  ;;  %v2548_v28 = vsel %vm106_vm0, %v2534_v48, 0.0  ;;  %v2541_v51 = vsel %vm106_vm0, %v2533_v34, 0.0 }
0x1a62   :  { %v2549_v6 = vrot.slane %v2548_v28, 4  ;;  %v2542_v19 = vrot.slane %v2541_v51, 4  ;;  %v2574_v48 = vrot.slane %v2573_v44, 1 }
0x1a63   :  { %v2564_v42 = vadd.f32 %v2563_v53, %v2562_v0  ;;  %v2557_v15 = vadd.f32 %v2556_v61, %v2555_v43  ;;  %v5990_v25 = vpop.permute.xlu0 %5989 }
0x1a64   :  { %v2550_v31 = vadd.f32 %v2549_v6, %v2548_v28  ;;  %v2543_v23 = vadd.f32 %v2542_v19, %v2541_v51  ;;  %v5992_v40 = vunpack.i.h.bf16 %v5990_v25  ;;  %v5991_v18 = vunpack.i.l.bf16 %v5990_v25 }
0x1a65   :  { %v2565_v4 = vrot.slane %v2564_v42, 2  ;;  %v2558_v20 = vrot.slane %v2557_v15, 2  ;;  %v2581_v28 = vrot.slane %v2580_v56, 1  ;;  %v2575_v19 = vadd.f32 %v2574_v48, %v2573_v44  ;;  %v6684_v44 = vld [vmem:[%s9537_s7 + $0x20] sm:$0xff] }
0x1a66   :  { %v2551_v26 = vrot.slane %v2550_v31, 2  ;;  %v2544_v27 = vrot.slane %v2543_v23, 2  ;;  %v2540_v3 = vmul.f32 %v9628_v12, %v5992_v40  ;;  %v2539_v22 = vmul.f32 %v9629_v54, %v5991_v18  ;;  %v6682_v54 = vld [vmem:[%s9537_s7 + $0x30] sm:$0xff] }
0x1a67   :  { %v2566_v37 = vadd.f32 %v2565_v4, %v2564_v42  ;;  %v2559_v47 = vadd.f32 %v2558_v20, %v2557_v15  ;;  %v2582_v40 = vadd.f32 %v2581_v28, %v2580_v56 }
0x1a68   :  { %v2552_v1 = vadd.f32 %v2551_v26, %v2550_v31  ;;  %v2545_v11 = vadd.f32 %v2544_v27, %v2543_v23  ;;  %v2590_v46 = vsel %vm106_vm0, %v2540_v3, 0.0  ;;  %v2583_v49 = vsel %vm106_vm0, %v2539_v22, 0.0  ;;  %v2614_v26 = vpop.permute.xlu1 %2613  ;;  %v6681_v3 = vld [vmem:[%s9537_s7 + $0x38] sm:$0xff]  ;;  %v6683_v22 = vld [vmem:[%s9537_s7 + $0x28] sm:$0xff] }
0x1a69   :  { %v2560_v10 = vrot.slane %v2559_v47, 1  ;;  %v2591_v32 = vrot.slane %v2590_v46, 4  ;;  %v2584_v50 = vrot.slane %v2583_v49, 4  ;;  %v2567_v41 = vrot.slane %v2566_v37, 1 }
0x1a6a   :  { %v2553_v55 = vrot.slane %v2552_v1, 1  ;;  %v2546_v62 = vrot.slane %v2545_v11, 1 }
0x1a6b   :  { %v2561_v57 = vadd.f32 %v2560_v10, %v2559_v47  ;;  %v2592_v34 = vadd.f32 %v2591_v32, %v2590_v46  ;;  %v2585_v0 = vadd.f32 %v2584_v50, %v2583_v49  ;;  %v2568_v51 = vadd.f32 %v2567_v41, %v2566_v37  ;;  %v6685_v37 = vld [vmem:[%s9537_s7 + $0x18] sm:$0xff]  ;;  %v6686_v47 = vld [vmem:[%s9537_s7 + $0x10] sm:$0xff]  ;;  %v8032_v49 = vld [vmem:[%s9538_s8] ss:$0 sm:$0xff] }
0x1a6c   :  { %v2554_v60 = vadd.f32 %v2553_v55, %v2552_v1  ;;  %v2547_v43 = vadd.f32 %v2546_v62, %v2545_v11  ;;  %v6687_v1 = vld [vmem:[%s9537_s7 + $0x8] sm:$0xff]  ;;  %v6688_v11 = vld [vmem:[%s9537_s7] sm:$0xff] }
0x1a6d   :  { %v2593_v53 = vrot.slane %v2592_v34, 2  ;;  %v2586_v61 = vrot.slane %v2585_v0, 2 }
0x1a6e   :  { %v2605_v6 = vsel %vm304_vm6, %v2554_v60, %v2547_v43 }
0x1a6f   :  { %v2587_v30 = vadd.f32 %v2586_v61, %v2585_v0  ;;  %v2594_v42 = vadd.f32 %v2593_v53, %v2592_v34  ;;  %v2606_v24 = vsel %vm306_vm7, %v2561_v57, %v2605_v6 }
0x1a70   :  { %v2607_v15 = vsel %vm308_vm8, %v2568_v51, %v2606_v24 }
0x1a71   :  { %v2588_v25 = vrot.slane %v2587_v30, 1  ;;  %v2595_v31 = vrot.slane %v2594_v42, 1  ;;  %v2608_v23 = vsel %vm310_vm9, %v2575_v19, %v2607_v15 }
0x1a72   :  { %v2609_v4 = vsel %vm312_vm10, %v2582_v40, %v2608_v23  ;;  %v8062_v23 = vld [vmem:[%s9542_s9 + $0x8] sm:$0xff]  ;;  %v8068_v40 = vld [vmem:[%s9542_s9] sm:$0xff] }
0x1a73   :  { %v2589_v18 = vadd.f32 %v2588_v25, %v2587_v30  ;;  %v2596_v35 = vadd.f32 %v2595_v31, %v2594_v42  ;;  %v8056_v31 = vld [vmem:[%s9542_s9 + $0x10] sm:$0xff] }
0x1a75   :  { %v2610_v20 = vsel %vm314_vm11, %v2589_v18, %v2609_v4 }
0x1a76   :  { %v2611_v27 = vsel %vm316_vm12, %v2596_v35, %v2610_v20  ;;  %v8074_v35 = vld [vmem:[%s9541_s10] ss:$0 sm:$0xff] }
0x1a77   :  { %v2616_v12 = vsel %vm106_vm0, %v2611_v27, %v2614_v26 }
0x1a78   :  { %5875 = vmatmul.msk.f32.vlgmr.msrb.gmra.mxu3 %vm111_vm1, %v2616_v12 }
0x1a79   :  { %5324 = vmatpush.msrb.mxu3 %v6681_v3 }
0x1a7b   :  { %5325 = vmatpush.msrb.mxu3 %v6682_v54 }
0x1a7d   :  { %5326 = vmatpush.msrb.mxu3 %v6683_v22 }
0x1a7f   :  { %5327 = vmatpush.msrb.mxu3 %v6684_v44 }
0x1a81   :  { %5328 = vmatpush.msrb.mxu3 %v6685_v37 }
0x1a83   :  { %5329 = vmatpush.msrb.mxu3 %v6686_v47 }
0x1a85   :  { %5330 = vmatpush.msrb.mxu3 %v6687_v1 }
0x1a87   :  { %5331 = vmatpush.msrb.mxu3 %v6688_v11 }
0x1afb   :  { %v2637_v46 = vpop.f32.mrf.mxu3 }
0x1afc   :  { %v2638_v10 = vadd.f32 %v8032_v49, %v2637_v46 }
0x1afe   :  { %6276 = vtanh.f32 %v2638_v10  ;;  %v5876_v50 = vmul.f32 -1.442695, %v2638_v10 }
0x1b00   :  { %6278 = vpow2.f32 %v5876_v50 }
0x1b04   :  { %v6277_v32 = vpop.eup %6276 }
0x1b05   :  { %2662 = vrot.lane.b32.xlu0 %v6277_v32, %s6788_s0 }
0x1b06   :  { %v6279_v56 = vpop.eup %6278 }
0x1b07   :  { %v2643_v41 = vadd.f32 1.0, %v6279_v56 }
0x1b09   :  { %6280 = vrcp.f32 %v2643_v41  ;;  %v2655_v0 = vand.u32 2147483648, %v2643_v41  ;;  %vm2649_vm3 = vweird.f32 %v2643_v41  ;;  %v2653_v60 = vand.u32 2147483647, %v2643_v41 }
0x1b0b   :  { %v2656_v53 = vor.u32 1.1754944e-38, %v2655_v0  ;;  %vm2654_vm5 = vcmp.eq.f32.partialorder %v2653_v60, 8.507059e+37 }
0x1b0f   :  { %v6281_v55 = vpop.eup %6280 }
0x1b10   :  { %v2645_v62 = vmul.f32 %v6281_v55, %v2643_v41  ;;  %vm2650_vm2 = vweird.f32 %v6281_v55 }
0x1b11   :  { %vm2651_vm4 = vmor %vm2649_vm3, %vm2650_vm2 }
0x1b12   :  { %v2646_v48 = vsub.f32 1.0, %v2645_v62 }
0x1b14   :  { %v2647_v57 = vmul.f32 %v6281_v55, %v2646_v48 }
0x1b16   :  { %v2648_v34 = vadd.f32 %v6281_v55, %v2647_v57 }
0x1b18   :  { %v2652_v43 = vsel %vm2651_vm4, %v6281_v55, %v2648_v34 }
0x1b19   :  { %v2657_v28 = vsel %vm2654_vm5, %v2656_v53, %v2652_v43 }
0x1b1a   :  { %v2660_v6 = vmul.f32 %v2657_v28, %v7745_v5  ;;  %v8050_v5 = vld [vmem:[%s9542_s9 + $0x18] sm:$0xff] }
0x1b77   :  { %v2663_v61 = vpop.permute.xlu0 %2662 }
0x1b78   :  { %v2665_v51 = vmul.f32 %v2663_v61, %v2657_v28 }
0x1b7a   :  { %2667 = vrot.lane.b32.xlu2 %v2665_v51, %s6787_s28 }
0x1bd4   :  { %v2668_v19 = vpop.permute.xlu2 %2667 }
0x1bd5   :  { %v8038_v30 = vadd.f32 %v2668_v19, %v2660_v6 }
0x1bd7   :  { %6282 = vtanh.f32 %v8038_v30 }
0x1bdd   :  { %v6283_v42 = vpop.eup %6282 }
0x1bde   :  { %2673 = vrot.lane.b32.xlu1 %v6283_v42, %s6788_s0 }
0x1c50   :  { %v2674_v24 = vpop.permute.xlu1 %2673 }
0x1c51   :  { %v8042_v15 = vmul.f32 %v2674_v24, %v2657_v28 }
0x1c53   :  { %2678 = vrot.lane.b32.xlu0 %v8042_v15, %s6787_s28 }
0x1cc5   :  { %v2679_v25 = vpop.permute.xlu0 %2678 }
0x1cc6   :  { %5877 = vmatmul.msk.f32.vlgmr.msrb.gmra.mxu1 %vm106_vm0, %v2679_v25 }
0x1cc7   :  { %4042 = vmatpush.msrb.mxu1 %v8050_v5 }
0x1cc9   :  { %4043 = vmatpush.msrb.mxu1 %v8056_v31 }
0x1ccb   :  { %4044 = vmatpush.msrb.mxu1 %v8062_v23 }
0x1ccd   :  { %4045 = vmatpush.msrb.mxu1 %v8068_v40 }
0x1d43   :  { %v2699_v18 = vpop.f32.mrf.mxu1 }
0x1d44   :  { %v2700_v4 = vadd.f32 %v8074_v35, %v2699_v18 }
0x1d46   :  { %v2710_v20 = vperm.slane %v2700_v4, 0  ;;  %v2704_v26 = vrot.slane %v2700_v4, 2  ;;  %v2703_v27 = vrot.slane %v2700_v4, 1  ;;  %v2705_v12 = vrot.slane %v2700_v4, 3 }
0x1d47   :  { %v2707_v3 = vrot.slane %v2700_v4, 5  ;;  %v2706_v54 = vrot.slane %v2700_v4, 4  ;;  %v2708_v46 = vrot.slane %v2700_v4, 6  ;;  %v2709_v55 = vrot.slane %v2700_v4, 7 }
0x1d48   :  { %v2726_v22 = vadd.f32 %v7841_v39, %v2710_v20  ;;  %v2712_v44 = vperm.slane %v2704_v26, 0  ;;  %v2711_v37 = vperm.slane %v2703_v27, 0  ;;  %v2713_v47 = vperm.slane %v2705_v12, 0 }
0x1d49   :  { %v2715_v1 = vperm.slane %v2707_v3, 0  ;;  %v2714_v11 = vperm.slane %v2706_v54, 0  ;;  %v2716_v62 = vperm.slane %v2708_v46, 0  ;;  %v2717_v34 = vperm.slane %v2709_v55, 0 }
0x1d4a   :  { %6284 = vtanh.f32 %v2726_v22  ;;  %v2728_v10 = vadd.f32 %v7835_v63, %v2712_v44  ;;  %v2727_v32 = vadd.f32 %v7821_v8, %v2711_v37  ;;  %v2729_v50 = vadd.f32 %v7828_v17, %v2713_v47 }
0x1d4b   :  { %v2731_v56 = vadd.f32 %v7851_v16, %v2715_v1  ;;  %v2730_v41 = vadd.f32 %v7857_v58, %v2714_v11  ;;  %v2732_v8 = vadd.f32 %v7769_v14, %v2716_v62  ;;  %v2733_v51 = vadd.f32 %v7865_v52, %v2717_v34  ;;  %v8094_v14 = vld [vmem:[%s9543_s11] ss:$0 sm:$0xff] }
0x1d4c   :  { %6286 = vtanh.f32 %v2728_v10 }
0x1d4d   :  { %6288 = vtanh.f32 %v2727_v32 }
0x1d4e   :  { %6290 = vtanh.f32 %v2729_v50 }
0x1d4f   :  { %6292 = vtanh.f32 %v2731_v56 }
0x1d50   :  { %v6285_v48 = vpop.eup %6284  ;;  %6294 = vtanh.f32 %v2730_v41 }
0x1d51   :  { %v2742_v57 = vmul.f32 %v7776_v13, %v6285_v48  ;;  %6296 = vtanh.f32 %v2732_v8 }
0x1d52   :  { %v6287_v0 = vpop.eup %6286  ;;  %6298 = vtanh.f32 %v2733_v51 }
0x1d53   :  { %v6289_v60 = vpop.eup %6288  ;;  %v2750_v17 = vsel %vm106_vm0, %v2742_v57, 0.0  ;;  %v2744_v43 = vmul.f32 %v7776_v13, %v6287_v0 }
0x1d54   :  { %v6291_v53 = vpop.eup %6290  ;;  %2751 = vadd.xlane.f32.xlu2 %v2750_v17  ;;  %v2743_v61 = vmul.f32 %v7776_v13, %v6289_v60  ;;  %v8119_v60 = vmax.f32 %v7807_v29, %v7949_v38 }
0x1d55   :  { %v2756_v28 = vsel %vm106_vm0, %v2744_v43, 0.0  ;;  %v6293_v6 = vpop.eup %6292  ;;  %v2745_v24 = vmul.f32 %v8094_v14, %v6291_v53 }
0x1d56   :  { %2757 = vadd.xlane.f32.xlu0 %v2756_v28  ;;  %v2753_v19 = vsel %vm106_vm0, %v2743_v61, 0.0  ;;  %v6295_v42 = vpop.eup %6294  ;;  %v2747_v13 = vmul.f32 %v8094_v14, %v6293_v6  ;;  %vm2774_vm14 = vcmp.gt.f32.partialorder %v8119_v60, 0.5 }
0x1d57   :  { %2754 = vadd.xlane.f32.xlu1 %v2753_v19  ;;  %v2746_v25 = vmul.f32 %v8094_v14, %v6295_v42  ;;  %v2759_v18 = vsel %vm106_vm0, %v2745_v24, 0.0  ;;  %v6297_v4 = vpop.eup %6296 }
0x1d58   :  { %v2765_v20 = vsel %vm106_vm0, %v2747_v13, 0.0  ;;  %v6299_v27 = vpop.eup %6298  ;;  %v2748_v12 = vmul.f32 %v8094_v14, %v6297_v4 }
0x1d59   :  { %v2762_v26 = vsel %vm106_vm0, %v2746_v25, 0.0  ;;  %v2749_v3 = vmul.f32 %v8094_v14, %v6299_v27 }
0x1d5a   :  { %v2768_v54 = vsel %vm106_vm0, %v2748_v12, 0.0 }
0x1d5b   :  { %v2771_v22 = vsel %vm106_vm0, %v2749_v3, 0.0 }
0x1d5c   :  { %2760 = vadd.xlane.f32.xlu2 %v2759_v18 }
0x1d5e   :  { %2766 = vadd.xlane.f32.xlu0 %v2765_v20 }
0x1d5f   :  { %2763 = vadd.xlane.f32.xlu1 %v2762_v26 }
0x1d64   :  { %2769 = vadd.xlane.f32.xlu2 %v2768_v54 }
0x1d67   :  { %2772 = vadd.xlane.f32.xlu1 %v2771_v22 }
0x1dc7   :  { %v2752_v44 = vpop.xlane.xlu2 %2751 }
0x1dc8   :  { %v2783_v11 = vperm.slane %v2752_v44, %v7002_v45 }
0x1dc9   :  { %v2758_v37 = vpop.xlane.xlu0 %2757 }
0x1dca   :  { %v2755_v47 = vpop.xlane.xlu1 %2754  ;;  %v2785_v46 = vperm.slane %v2758_v37, %v7002_v45 }
0x1dcb   :  { %v2784_v1 = vperm.slane %v2755_v47, %v7002_v45 }
0x1dcd   :  { %v2791_v10 = vsel %vm304_vm6, %v2784_v1, %v2783_v11 }
0x1dce   :  { %v2792_v56 = vsel %vm306_vm7, %v2785_v46, %v2791_v10 }
0x1dcf   :  { %v2761_v32 = vpop.xlane.xlu2 %2760 }
0x1dd0   :  { %v2786_v50 = vperm.slane %v2761_v32, %v7002_v45 }
0x1dd1   :  { %v2767_v41 = vpop.xlane.xlu0 %2766 }
0x1dd2   :  { %v2764_v55 = vpop.xlane.xlu1 %2763  ;;  %v2793_v62 = vsel %vm308_vm8, %v2786_v50, %v2792_v56  ;;  %v2788_v57 = vperm.slane %v2767_v41, %v7002_v45 }
0x1dd3   :  { %v2787_v48 = vperm.slane %v2764_v55, %v7002_v45 }
0x1dd5   :  { %v2794_v34 = vsel %vm310_vm9, %v2787_v48, %v2793_v62 }
0x1dd6   :  { %v2795_v17 = vsel %vm312_vm10, %v2788_v57, %v2794_v34  ;;  %v8136_v34 = vld [vmem:[%s9544_s4 + $0x8] sm:$0xff] }
0x1dd7   :  { %v2770_v0 = vpop.xlane.xlu2 %2769 }
0x1dd8   :  { %v2789_v8 = vperm.slane %v2770_v0, %v7002_v45 }
0x1dda   :  { %v2773_v43 = vpop.xlane.xlu1 %2772  ;;  %v2796_v53 = vsel %vm314_vm11, %v2789_v8, %v2795_v17 }
0x1ddb   :  { %v2790_v61 = vperm.slane %v2773_v43, %v7002_v45 }
0x1ddd   :  { %v2797_v28 = vsel %vm316_vm12, %v2790_v61, %v2796_v53 }
0x1dde   :  { %v2799_v51 = vsel %vm2774_vm14, -inf, %v2797_v28 }
0x1ddf   :  { %v2800_v6 = vsel %vm319_vm13, %v2799_v51, -inf }
0x1de0   :  { %2801 = vmax.xlane.f32.xlu0 %v2800_v6 }
0x1e53   :  { %v2802_v19 = vpop.xlane.xlu0 %2801 }
0x1e54   :  { %v2803_v29 = vsub.f32 %v2799_v51, %v2802_v19 }
0x1e56   :  { %v2804_v38 = vmul.f32 1.442695, %v2803_v29 }
0x1e58   :  { %6300 = vpow2.f32 %v2804_v38 }
0x1e5e   :  { %v6301_v42 = vpop.eup %6300 }
0x1e5f   :  { %v2806_v24 = vsel %vm319_vm13, %v6301_v42, 0.0 }
0x1e60   :  { %2807 = vadd.xlane.f32.xlu2 %v2806_v24 }
0x1ed3   :  { %v2808_v13 = vpop.xlane.xlu2 %2807 }
0x1ed4   :  { %6302 = vrcp.f32 %v2808_v13  ;;  %v2820_v20 = vand.u32 2147483648, %v2808_v13  ;;  %v2818_v27 = vand.u32 2147483647, %v2808_v13  ;;  %vm2814_vm2 = vweird.f32 %v2808_v13 }
0x1ed6   :  { %v2821_v3 = vor.u32 1.1754944e-38, %v2820_v20  ;;  %vm2819_vm4 = vcmp.eq.f32.partialorder %v2818_v27, 8.507059e+37 }
0x1eda   :  { %v6303_v25 = vpop.eup %6302 }
0x1edb   :  { %v2810_v18 = vmul.f32 %v6303_v25, %v2808_v13  ;;  %vm2815_vm15 = vweird.f32 %v6303_v25  ;;  %v8146_v13 = vld [vmem:[%s9544_s4 + $0x18] sm:$0xff] }
0x1edc   :  { %vm2816_vm3 = vmor %vm2814_vm2, %vm2815_vm15 }
0x1edd   :  { %v2811_v4 = vsub.f32 1.0, %v2810_v18 }
0x1edf   :  { %v2812_v26 = vmul.f32 %v6303_v25, %v2811_v4 }
0x1ee1   :  { %v2813_v12 = vadd.f32 %v6303_v25, %v2812_v26 }
0x1ee3   :  { %v2817_v54 = vsel %vm2816_vm3, %v6303_v25, %v2813_v12 }
0x1ee4   :  { %v2822_v22 = vsel %vm2819_vm4, %v2821_v3, %v2817_v54 }
0x1ee5   :  { %v2824_v44 = vmul.f32 %v6301_v42, %v2822_v22 }
0x1ee7   :  { %v2839_v37 = vperm.slane %v2824_v44, 2  ;;  %v2832_v47 = vperm.slane %v2824_v44, 1  ;;  %v2825_v1 = vperm.slane %v2824_v44, 0  ;;  %v2860_v11 = vperm.slane %v2824_v44, 5 }
0x1ee8   :  { %v2846_v46 = vperm.slane %v2824_v44, 3  ;;  %v2853_v10 = vperm.slane %v2824_v44, 4  ;;  %v2867_v32 = vperm.slane %v2824_v44, 6  ;;  %v2874_v50 = vperm.slane %v2824_v44, 7 }
0x1ee9   :  { %2844 = vperm.xlu2 %5952, %v2839_v37   ;;  %2837 = vperm.xlu0 %5936, %v2832_v47  }
0x1eea   :  { %2830 = vperm.xlu1 %5930, %v2825_v1  }
0x1ef1   :  { %2865 = vperm.xlu2 %5952, %v2860_v11   ;;  %2851 = vperm.xlu0 %5936, %v2846_v46  }
0x1ef2   :  { %2858 = vperm.xlu1 %5930, %v2853_v10  }
0x1ef9   :  { %2872 = vperm.xlu0 %5936, %v2867_v32  }
0x1efa   :  { %2879 = vperm.xlu1 %5930, %v2874_v50  }
0x1f43   :  { %v2845_v56 = vpop.permute.xlu2 %2844 }
0x1f44   :  { %v2883_v41 = vmul.f32 %v7835_v63, %v2845_v56 }
0x1f46   :  { %v2903_v62 = vsel %vm106_vm0, %v2883_v41, 0.0 }
0x1f47   :  { %v2904_v17 = vrot.slane %v2903_v62, 4 }
0x1f4b   :  { %v2866_v55 = vpop.permute.xlu2 %2865 }
0x1f4c   :  { %v2886_v57 = vmul.f32 %v7851_v16, %v2866_v55  ;;  %v2905_v16 = vadd.f32 %v2904_v17, %v2903_v62 }
0x1f4e   :  { %v2924_v28 = vsel %vm106_vm0, %v2886_v57, 0.0  ;;  %v2906_v18 = vrot.slane %v2905_v16, 2 }
0x1f4f   :  { %v2925_v29 = vrot.slane %v2924_v28, 4 }
0x1f50   :  { %v2907_v47 = vadd.f32 %v2906_v18, %v2905_v16 }
0x1f51   :  { %v2926_v12 = vadd.f32 %v2925_v29, %v2924_v28 }
0x1f53   :  { %v2927_v46 = vrot.slane %v2926_v12, 2 }
0x1f5b   :  { %v2838_v48 = vpop.permute.xlu0 %2837 }
0x1f5c   :  { %v2882_v0 = vmul.f32 %v8136_v34, %v2838_v48  ;;  %v2831_v8 = vpop.permute.xlu1 %2830  ;;  %v2908_v48 = vrot.slane %v2907_v47, 1 }
0x1f5d   :  { %v2881_v43 = vmul.f32 %v7841_v39, %v2831_v8 }
0x1f5e   :  { %v2896_v53 = vsel %vm106_vm0, %v2882_v0, 0.0 }
0x1f5f   :  { %v2897_v63 = vrot.slane %v2896_v53, 4  ;;  %v2889_v61 = vsel %vm106_vm0, %v2881_v43, 0.0 }
0x1f60   :  { %v2890_v51 = vrot.slane %v2889_v61, 4 }
0x1f61   :  { %v2898_v6 = vadd.f32 %v2897_v63, %v2896_v53 }
0x1f62   :  { %v2891_v19 = vadd.f32 %v2890_v51, %v2889_v61  ;;  %v2928_v61 = vadd.f32 %v2927_v46, %v2926_v12  ;;  %v8184_v46 = vld [vmem:[%s9546_s12 + $0x8] sm:$0xff] }
0x1f63   :  { %v2899_v38 = vrot.slane %v2898_v6, 2  ;;  %v2852_v42 = vpop.permute.xlu0 %2851 }
0x1f64   :  { %v2892_v24 = vrot.slane %v2891_v19, 2  ;;  %v2884_v39 = vmul.f32 %v8146_v13, %v2852_v42  ;;  %v2859_v25 = vpop.permute.xlu1 %2858 }
0x1f65   :  { %v2900_v4 = vadd.f32 %v2899_v38, %v2898_v6  ;;  %v2885_v20 = vmul.f32 %v7857_v58, %v2859_v25  ;;  %v8155_v58 = vld [vmem:[%s9544_s4 + $0x30] sm:$0xff]  ;;  %v2909_v6 = vadd.f32 %v2908_v48, %v2907_v47 }
0x1f66   :  { %v2893_v26 = vadd.f32 %v2892_v24, %v2891_v19  ;;  %v2910_v27 = vsel %vm106_vm0, %v2884_v39, 0.0  ;;  %v2929_v39 = vrot.slane %v2928_v61, 1 }
0x1f67   :  { %v2911_v3 = vrot.slane %v2910_v27, 4  ;;  %v2917_v54 = vsel %vm106_vm0, %v2885_v20, 0.0  ;;  %v2901_v22 = vrot.slane %v2900_v4, 1 }
0x1f68   :  { %v2894_v44 = vrot.slane %v2893_v26, 1  ;;  %v2918_v37 = vrot.slane %v2917_v54, 4  ;;  %v2930_v12 = vadd.f32 %v2929_v39, %v2928_v61 }
0x1f69   :  { %v2912_v1 = vadd.f32 %v2911_v3, %v2910_v27  ;;  %v2902_v50 = vadd.f32 %v2901_v22, %v2900_v4 }
0x1f6a   :  { %v2919_v11 = vadd.f32 %v2918_v37, %v2917_v54  ;;  %v2895_v56 = vadd.f32 %v2894_v44, %v2893_v26 }
0x1f6b   :  { %v2913_v10 = vrot.slane %v2912_v1, 2  ;;  %v2873_v32 = vpop.permute.xlu0 %2872 }
0x1f6c   :  { %v2920_v41 = vrot.slane %v2919_v11, 2  ;;  %v2887_v55 = vmul.f32 %v8155_v58, %v2873_v32  ;;  %v2880_v62 = vpop.permute.xlu1 %2879  ;;  %v2953_v28 = vsel %vm304_vm6, %v2902_v50, %v2895_v56  ;;  %v8196_v50 = vld [vmem:[%s9545_s13] ss:$0 sm:$0xff] }
0x1f6d   :  { %v2914_v57 = vadd.f32 %v2913_v10, %v2912_v1  ;;  %v2888_v0 = vmul.f32 %v7865_v52, %v2880_v62  ;;  %v2954_v42 = vsel %vm306_vm7, %v2909_v6, %v2953_v28  ;;  %v8172_v1 = vld [vmem:[%s9546_s12 + $0x18] sm:$0xff]  ;;  %v8190_v10 = vld [vmem:[%s9546_s12] sm:$0xff] }
0x1f6e   :  { %v2921_v8 = vadd.f32 %v2920_v41, %v2919_v11  ;;  %v2931_v17 = vsel %vm106_vm0, %v2887_v55, 0.0  ;;  %v8178_v11 = vld [vmem:[%s9546_s12 + $0x10] sm:$0xff] }
0x1f6f   :  { %v2915_v43 = vrot.slane %v2914_v57, 1  ;;  %v2932_v53 = vrot.slane %v2931_v17, 4  ;;  %v2938_v63 = vsel %vm106_vm0, %v2888_v0, 0.0 }
0x1f70   :  { %v2922_v51 = vrot.slane %v2921_v8, 1  ;;  %v2939_v16 = vrot.slane %v2938_v63, 4 }
0x1f71   :  { %v2916_v19 = vadd.f32 %v2915_v43, %v2914_v57  ;;  %v2933_v29 = vadd.f32 %v2932_v53, %v2931_v17 }
0x1f72   :  { %v2940_v38 = vadd.f32 %v2939_v16, %v2938_v63  ;;  %v2923_v24 = vadd.f32 %v2922_v51, %v2921_v8  ;;  %v8202_v8 = vld [vmem:[%s9549_s5] sm:$0xff]  ;;  %v8208_v16 = vld [vmem:[%s9549_s5 + $0x10] sm:$0xff] }
0x1f73   :  { %v2934_v52 = vrot.slane %v2933_v29, 2  ;;  %v2955_v25 = vsel %vm308_vm8, %v2916_v19, %v2954_v42  ;;  %v8214_v19 = vld [vmem:[%s9549_s5 + $0x8] sm:$0xff] }
0x1f74   :  { %v2941_v18 = vrot.slane %v2940_v38, 2  ;;  %v2956_v27 = vsel %vm310_vm9, %v2923_v24, %v2955_v25  ;;  %v8226_v24 = vld [vmem:[%s9549_s5 + $0x28] sm:$0xff] }
0x1f75   :  { %v2935_v4 = vadd.f32 %v2934_v52, %v2933_v29  ;;  %v2957_v44 = vsel %vm312_vm10, %v2930_v12, %v2956_v27  ;;  %v8234_v12 = vld [vmem:[%s9549_s5 + $0x30] sm:$0xff] }
0x1f76   :  { %v2942_v20 = vadd.f32 %v2941_v18, %v2940_v38  ;;  %v8220_v38 = vld [vmem:[%s9549_s5 + $0x18] sm:$0xff] }
0x1f77   :  { %v2936_v26 = vrot.slane %v2935_v4, 1 }
0x1f78   :  { %v2943_v3 = vrot.slane %v2942_v20, 1 }
0x1f79   :  { %v2937_v54 = vadd.f32 %v2936_v26, %v2935_v4 }
0x1f7a   :  { %v2944_v22 = vadd.f32 %v2943_v3, %v2942_v20 }
0x1f7b   :  { %v2958_v37 = vsel %vm314_vm11, %v2937_v54, %v2957_v44 }
0x1f7c   :  { %v2959_v47 = vsel %vm316_vm12, %v2944_v22, %v2958_v37 }
0x1f7d   :  { %5878 = vmatmul.msk.f32.vlgmr.msrb.gmra.mxu2 %vm106_vm0, %v2959_v47 }
0x1f7e   :  { %4322 = vmatpush.msrb.mxu2 %v8172_v1 }
0x1f80   :  { %4323 = vmatpush.msrb.mxu2 %v8178_v11 }
0x1f82   :  { %4324 = vmatpush.msrb.mxu2 %v8184_v46 }
0x1f84   :  { %4325 = vmatpush.msrb.mxu2 %v8190_v10 }
0x2000   :  { %v2979_v32 = vpop.f32.mrf.mxu2 }
0x2001   :  { %v2980_v56 = vadd.f32 %v8196_v50, %v2979_v32 }
0x2003   :  { %v2990_v41 = vperm.slane %v2980_v56, 0  ;;  %v2984_v55 = vrot.slane %v2980_v56, 2  ;;  %v2983_v62 = vrot.slane %v2980_v56, 1  ;;  %v2985_v48 = vrot.slane %v2980_v56, 3 }
0x2004   :  { %v2987_v57 = vrot.slane %v2980_v56, 5  ;;  %v2986_v0 = vrot.slane %v2980_v56, 4  ;;  %v2988_v51 = vrot.slane %v2980_v56, 6  ;;  %v2989_v25 = vrot.slane %v2980_v56, 7 }
0x2005   :  { %v3006_v17 = vadd.f32 %v8202_v8, %v2990_v41  ;;  %v2992_v43 = vperm.slane %v2984_v55, 0  ;;  %v2991_v53 = vperm.slane %v2983_v62, 0  ;;  %v2993_v63 = vperm.slane %v2985_v48, 0  ;;  %v8246_v62 = vld [vmem:[%s9548_s14] ss:$0 sm:$0xff] }
0x2006   :  { %v2995_v61 = vperm.slane %v2987_v57, 0  ;;  %v2994_v28 = vperm.slane %v2986_v0, 0  ;;  %v2996_v18 = vperm.slane %v2988_v51, 0  ;;  %v2997_v26 = vperm.slane %v2989_v25, 0 }
0x2007   :  { %6304 = vtanh.f32 %v3006_v17  ;;  %v3008_v6 = vadd.f32 %v8208_v16, %v2992_v43  ;;  %v3007_v29 = vadd.f32 %v8214_v19, %v2991_v53  ;;  %v3009_v42 = vadd.f32 %v8220_v38, %v2993_v63 }
0x2008   :  { %v3011_v52 = vadd.f32 %v8226_v24, %v2995_v61  ;;  %v3010_v39 = vadd.f32 %v7890_v7, %v2994_v28  ;;  %v3012_v3 = vadd.f32 %v8234_v12, %v2996_v18  ;;  %v3013_v32 = vadd.f32 %v7907_v9, %v2997_v26 }
0x2009   :  { %6306 = vtanh.f32 %v3008_v6 }
0x200a   :  { %6308 = vtanh.f32 %v3007_v29 }
0x200b   :  { %6310 = vtanh.f32 %v3009_v42 }
0x200c   :  { %6312 = vtanh.f32 %v3011_v52 }
0x200d   :  { %v6305_v4 = vpop.eup %6304  ;;  %6314 = vtanh.f32 %v3010_v39 }
0x200e   :  { %v3022_v20 = vmul.f32 %v7899_v2, %v6305_v4  ;;  %6316 = vtanh.f32 %v3012_v3 }
0x200f   :  { %v6307_v27 = vpop.eup %6306  ;;  %6318 = vtanh.f32 %v3013_v32 }
0x2010   :  { %v6309_v54 = vpop.eup %6308  ;;  %v3030_v7 = vsel %vm106_vm0, %v3022_v20, 0.0  ;;  %v3024_v22 = vmul.f32 %v7899_v2, %v6307_v27 }
0x2011   :  { %v6311_v44 = vpop.eup %6310  ;;  %3031 = vadd.xlane.f32.xlu2 %v3030_v7  ;;  %v3023_v37 = vmul.f32 %v7899_v2, %v6309_v54 }
0x2012   :  { %v3036_v47 = vsel %vm106_vm0, %v3024_v22, 0.0  ;;  %v6313_v56 = vpop.eup %6312  ;;  %v3025_v48 = vmul.f32 %v8246_v62, %v6311_v44 }
0x2013   :  { %3037 = vadd.xlane.f32.xlu1 %v3036_v47  ;;  %v3033_v41 = vsel %vm106_vm0, %v3023_v37, 0.0  ;;  %v6315_v55 = vpop.eup %6314  ;;  %v3027_v2 = vmul.f32 %v8246_v62, %v6313_v56 }
0x2014   :  { %3034 = vadd.xlane.f32.xlu0 %v3033_v41  ;;  %v3026_v57 = vmul.f32 %v8246_v62, %v6315_v55  ;;  %v3039_v9 = vsel %vm106_vm0, %v3025_v48, 0.0  ;;  %v6317_v0 = vpop.eup %6316 }
0x2015   :  { %v3045_v17 = vsel %vm106_vm0, %v3027_v2, 0.0  ;;  %v6319_v53 = vpop.eup %6318  ;;  %v3028_v63 = vmul.f32 %v8246_v62, %v6317_v0 }
0x2016   :  { %v3042_v43 = vsel %vm106_vm0, %v3026_v57, 0.0  ;;  %v3029_v61 = vmul.f32 %v8246_v62, %v6319_v53 }
0x2017   :  { %v3048_v28 = vsel %vm106_vm0, %v3028_v63, 0.0 }
0x2018   :  { %v3051_v51 = vsel %vm106_vm0, %v3029_v61, 0.0 }
0x2019   :  { %3040 = vadd.xlane.f32.xlu2 %v3039_v9 }
0x201b   :  { %3046 = vadd.xlane.f32.xlu1 %v3045_v17 }
0x201c   :  { %3043 = vadd.xlane.f32.xlu0 %v3042_v43 }
0x2021   :  { %3049 = vadd.xlane.f32.xlu2 %v3048_v28 }
0x2024   :  { %3052 = vadd.xlane.f32.xlu0 %v3051_v51 }
0x2084   :  { %v3032_v6 = vpop.xlane.xlu2 %3031 }
0x2085   :  { %6320 = vtanh.f32 %v3032_v6 }
0x2086   :  { %v3038_v29 = vpop.xlane.xlu1 %3037 }
0x2087   :  { %6322 = vtanh.f32 %v3038_v29  ;;  %v3035_v42 = vpop.xlane.xlu0 %3034 }
0x2088   :  { %6324 = vtanh.f32 %v3035_v42 }
0x208b   :  { %v6321_v52 = vpop.eup %6320 }
0x208c   :  { %v3041_v39 = vpop.xlane.xlu2 %3040  ;;  %v3062_v20 = vmul.f32 10.0, %v6321_v52 }
0x208d   :  { %v6323_v25 = vpop.eup %6322  ;;  %6326 = vtanh.f32 %v3041_v39  ;;  %v5879_v39 = vld [vmem:[%s9547_s6 + $0x18] sm:$0xff] }
0x208e   :  { %v6325_v18 = vpop.eup %6324  ;;  %v3047_v4 = vpop.xlane.xlu1 %3046  ;;  %v3064_v3 = vmul.f32 10.0, %v6323_v25  ;;  %v3078_v22 = vperm.slane %v3062_v20, %v7002_v45 }
0x208f   :  { %v3063_v26 = vmul.f32 10.0, %v6325_v18  ;;  %6328 = vtanh.f32 %v3047_v4  ;;  %v3044_v27 = vpop.xlane.xlu0 %3043 }
0x2090   :  { %6330 = vtanh.f32 %v3044_v27  ;;  %v3080_v44 = vperm.slane %v3064_v3, %v7002_v45 }
0x2091   :  { %v3079_v54 = vperm.slane %v3063_v26, %v7002_v45 }
0x2093   :  { %v6327_v7 = vpop.eup %6326  ;;  %v3086_v56 = vsel %vm304_vm6, %v3079_v54, %v3078_v22 }
0x2094   :  { %v3065_v37 = vmul.f32 10.0, %v6327_v7  ;;  %v3050_v47 = vpop.xlane.xlu2 %3049  ;;  %v3087_v9 = vsel %vm306_vm7, %v3080_v44, %v3086_v56 }
0x2095   :  { %v6329_v32 = vpop.eup %6328  ;;  %6332 = vtanh.f32 %v3050_v47 }
0x2096   :  { %v6331_v41 = vpop.eup %6330  ;;  %v3081_v55 = vperm.slane %v3065_v37, %v7002_v45  ;;  %v3067_v48 = vmul.f32 10.0, %v6329_v32 }
0x2097   :  { %v3066_v2 = vmul.f32 10.0, %v6331_v41  ;;  %v3053_v57 = vpop.xlane.xlu0 %3052 }
0x2098   :  { %6334 = vtanh.f32 %v3053_v57  ;;  %v3088_v0 = vsel %vm308_vm8, %v3081_v55, %v3087_v9  ;;  %v3083_v53 = vperm.slane %v3067_v48, %v7002_v45 }
0x2099   :  { %v3082_v17 = vperm.slane %v3066_v2, %v7002_v45 }
0x209b   :  { %v6333_v43 = vpop.eup %6332  ;;  %v3089_v63 = vsel %vm310_vm9, %v3082_v17, %v3088_v0 }
0x209c   :  { %v3068_v61 = vmul.f32 10.0, %v6333_v43  ;;  %v3090_v29 = vsel %vm312_vm10, %v3083_v53, %v3089_v63 }
0x209e   :  { %v6335_v28 = vpop.eup %6334  ;;  %v3084_v51 = vperm.slane %v3068_v61, %v7002_v45 }
0x209f   :  { %v3069_v6 = vmul.f32 10.0, %v6335_v28 }
0x20a0   :  { %v3091_v42 = vsel %vm314_vm11, %v3084_v51, %v3090_v29 }
0x20a1   :  { %v3085_v52 = vperm.slane %v3069_v6, %v7002_v45 }
0x20a3   :  { %v3092_v25 = vsel %vm316_vm12, %v3085_v52, %v3091_v42 }
0x20a4   :  { %v8278_v18 = vsel %vm2774_vm14, -inf, %v3092_v25 }
0x20a5   :  { %9630 = vst [vmem:[#allocation12_spill] sm:$0xff] %v8278_v18  ;;  %v3122_v4 = vadd.f32 %v5879_v39, %v8278_v18 }
0x20a7   :  { %v3123_v20 = vsel %vm319_vm13, %v3122_v4, -inf }
0x20a8   :  { %3124 = vmax.xlane.f32.xlu1 %v3123_v20 }
0x211b   :  { %v3125_v26 = vpop.xlane.xlu1 %3124 }
0x211c   :  { %vm3126_vm5 = vcmp.ge.f32.partialorder %v3122_v4, %v3125_v26 }
0x211d   :  { %v3127_v27 = vsel %vm3126_vm5, %v7002_v45, 8 }
0x211e   :  { %v3128_v3 = vsel %vm319_vm13, %v3127_v27, 2147483647 }
0x211f   :  { %v3130_v54 = vshra.s32 %v3128_v3, 16  ;;  %v3129_v22 = vand.u32 65535, %v3128_v3 }
0x2121   :  { %v3132_v7 = vcvt.s32.f32 %v3130_v54  ;;  %v3131_v37 = vcvt.s32.f32 %v3129_v22 }
0x2123   :  { %3133 = vmin.xlane.f32.xlu2 %v3132_v7 }
0x2196   :  { %v3134_v44 = vpop.xlane.xlu2 %3133 }
0x2197   :  { %vm3135_vm15 = vcmp.eq.f32.partialorder %v3132_v7, %v3134_v44  ;;  %v3140_v32 = vcvt.f32.s32 %v3134_v44 }
0x2198   :  { %v3136_v47 = vsel %vm3135_vm15, %v3131_v37, inf }
0x2199   :  { %3137 = vmin.xlane.f32.xlu0 %v3136_v47  ;;  %v3141_v41 = vshll.u32 %v3140_v32, 16 }
0x220c   :  { %v3138_v56 = vpop.xlane.xlu0 %3137 }
0x220d   :  { %v3139_v55 = vcvt.f32.s32 %v3138_v56  ;;  %v8316_v56 = vld [vmem:[%s9551_s3 + $0x20] sm:$0xff] }
0x220f   :  { %v3142_v48 = vadd.s32 %v3141_v41, %v3139_v55  ;;  %v8322_v55 = vld [vmem:[%s9551_s3 + $0x8] sm:$0xff] }
0x2211   :  { %vm3143_vm14 = vcmp.eq.s32.totalorder %v7002_v45, %v3142_v48 }
0x2212   :  { %v8286_v2 = vsel %vm3143_vm14, 1.0, %v9625_v33 }
0x2213   :  { %v3179_v57 = vperm.slane %v8286_v2, 4  ;;  %v3186_v9 = vperm.slane %v8286_v2, 5  ;;  %v3165_v0 = vperm.slane %v8286_v2, 2  ;;  %v3172_v17 = vperm.slane %v8286_v2, 3  ;;  %5882 = vst.msk [vmem:[%s9550_s16 + $0x18] sm:$0xff] %vm319_vm13, %v8286_v2 }
0x2214   :  { %v3151_v43 = vperm.slane %v8286_v2, 0  ;;  %v3158_v53 = vperm.slane %v8286_v2, 1  ;;  %v3193_v51 = vperm.slane %v8286_v2, 6  ;;  %v3200_v6 = vperm.slane %v8286_v2, 7 }
0x2215   :  { %v6003_v63 = vpack.i.bf16 %v3186_v9, %v3179_v57  ;;  %v5998_v61 = vpack.i.bf16 %v3172_v17, %v3165_v0  ;;  %v8328_v57 = vld [vmem:[%s9551_s3] sm:$0xff] }
0x2216   :  { %v5993_v28 = vpack.i.bf16 %v3158_v53, %v3151_v43  ;;  %v6008_v29 = vpack.i.bf16 %v3200_v6, %v3193_v51 }
0x2217   :  { %6004 = vperm.xlu0 %5936, %v6003_v63   ;;  %5999 = vperm.xlu2 %5952, %v5998_v61  }
0x2218   :  { %5994 = vperm.xlu1 %5930, %v5993_v28  }
0x221f   :  { %3287 = vrot.lane.b32.xlu2 %v8042_v15, %s6788_s0 }
0x2220   :  { %6009 = vperm.xlu1 %5930, %v6008_v29  }
0x2271   :  { %v6000_v42 = vpop.permute.xlu2 %5999 }
0x2272   :  { %v6002_v52 = vunpack.i.h.bf16 %v6000_v42  ;;  %v6001_v39 = vunpack.i.l.bf16 %v6000_v42 }
0x2274   :  { %v3210_v25 = vmul.f32 %v7977_v59, %v6002_v52  ;;  %v3209_v4 = vmul.f32 %v7983_v21, %v6001_v39  ;;  %v8310_v59 = vld [vmem:[%s9551_s3 + $0x28] sm:$0xff] }
0x2276   :  { %v3236_v20 = vsel %vm106_vm0, %v3210_v25, 0.0  ;;  %v3229_v26 = vsel %vm106_vm0, %v3209_v4, 0.0 }
0x2277   :  { %v3237_v27 = vrot.slane %v3236_v20, 4  ;;  %v3230_v3 = vrot.slane %v3229_v26, 4 }
0x2279   :  { %v3238_v7 = vadd.f32 %v3237_v27, %v3236_v20  ;;  %v3231_v22 = vadd.f32 %v3230_v3, %v3229_v26 }
0x227b   :  { %v3239_v0 = vrot.slane %v3238_v7, 2  ;;  %v3232_v17 = vrot.slane %v3231_v22, 2 }
0x227d   :  { %v3240_v39 = vadd.f32 %v3239_v0, %v3238_v7  ;;  %v3233_v26 = vadd.f32 %v3232_v17, %v3231_v22  ;;  %v8344_v7 = vld [vmem:[%s9551_s3 + $0x30] sm:$0xff] }
0x227e   :  { %9631 = vst [vmem:[#allocation14_spill] sm:$0xff] %v8344_v7 }
0x227f   :  { %v3234_v0 = vrot.slane %v3233_v26, 1 }
0x2289   :  { %v6005_v54 = vpop.permute.xlu0 %6004 }
0x228a   :  { %v6007_v44 = vunpack.i.h.bf16 %v6005_v54  ;;  %v6006_v37 = vunpack.i.l.bf16 %v6005_v54  ;;  %v5995_v15 = vpop.permute.xlu1 %5994 }
0x228b   :  { %v5997_v47 = vunpack.i.h.bf16 %v5995_v15  ;;  %v5996_v32 = vunpack.i.l.bf16 %v5995_v15 }
0x228c   :  { %v3212_v21 = vmul.f32 %v8310_v59, %v6007_v44  ;;  %v3211_v41 = vmul.f32 %v8316_v56, %v6006_v37 }
0x228d   :  { %v3208_v48 = vmul.f32 %v8322_v55, %v5997_v47  ;;  %v3207_v9 = vmul.f32 %v8328_v57, %v5996_v32  ;;  %v8338_v32 = vld [vmem:[%s9551_s3 + $0x38] sm:$0xff] }
0x228e   :  { %v3250_v43 = vsel %vm106_vm0, %v3212_v21, 0.0  ;;  %v3243_v53 = vsel %vm106_vm0, %v3211_v41, 0.0 }
0x228f   :  { %v3251_v63 = vrot.slane %v3250_v43, 4  ;;  %v3244_v61 = vrot.slane %v3243_v53, 4  ;;  %v3222_v28 = vsel %vm106_vm0, %v3208_v48, 0.0  ;;  %v3215_v51 = vsel %vm106_vm0, %v3207_v9, 0.0 }
0x2290   :  { %v3223_v6 = vrot.slane %v3222_v28, 4  ;;  %v3216_v29 = vrot.slane %v3215_v51, 4  ;;  %v3241_v9 = vrot.slane %v3240_v39, 1 }
0x2291   :  { %v3252_v42 = vadd.f32 %v3251_v63, %v3250_v43  ;;  %v3245_v52 = vadd.f32 %v3244_v61, %v3243_v53 }
0x2292   :  { %v3224_v25 = vadd.f32 %v3223_v6, %v3222_v28  ;;  %v3217_v4 = vadd.f32 %v3216_v29, %v3215_v51  ;;  %v6010_v20 = vpop.permute.xlu1 %6009 }
0x2293   :  { %v3246_v27 = vrot.slane %v3245_v52, 2  ;;  %v6012_v3 = vunpack.i.h.bf16 %v6010_v20  ;;  %v6011_v54 = vunpack.i.l.bf16 %v6010_v20  ;;  %v3253_v15 = vrot.slane %v3252_v42, 2 }
0x2294   :  { %v3225_v44 = vrot.slane %v3224_v25, 2  ;;  %v3218_v37 = vrot.slane %v3217_v4, 2 }
0x2295   :  { %v3247_v47 = vadd.f32 %v3246_v27, %v3245_v52  ;;  %v3214_v21 = vmul.f32 %v8338_v32, %v6012_v3  ;;  %v3213_v22 = vmul.f32 %v8344_v7, %v6011_v54  ;;  %v3254_v51 = vadd.f32 %v3253_v15, %v3252_v42 }
0x2296   :  { %v3226_v41 = vadd.f32 %v3225_v44, %v3224_v25  ;;  %v3219_v48 = vadd.f32 %v3218_v37, %v3217_v4  ;;  %v3235_v3 = vadd.f32 %v3234_v0, %v3233_v26  ;;  %v3242_v54 = vadd.f32 %v3241_v9, %v3240_v39  ;;  %v3288_v0 = vpop.permute.xlu2 %3287 }
0x2297   :  { %v3264_v17 = vsel %vm106_vm0, %v3214_v21, 0.0  ;;  %v3257_v43 = vsel %vm106_vm0, %v3213_v22, 0.0  ;;  %v3248_v6 = vrot.slane %v3247_v47, 1  ;;  %v3255_v37 = vrot.slane %v3254_v51, 1 }
0x2298   :  { %v3227_v53 = vrot.slane %v3226_v41, 1  ;;  %v3220_v63 = vrot.slane %v3219_v48, 1  ;;  %v3265_v61 = vrot.slane %v3264_v17, 4  ;;  %v3258_v28 = vrot.slane %v3257_v43, 4 }
0x2299   :  { %v3249_v22 = vadd.f32 %v3248_v6, %v3247_v47 }
0x229a   :  { %v3228_v29 = vadd.f32 %v3227_v53, %v3226_v41  ;;  %v3221_v52 = vadd.f32 %v3220_v63, %v3219_v48  ;;  %v3266_v20 = vadd.f32 %v3265_v61, %v3264_v17  ;;  %v3259_v27 = vadd.f32 %v3258_v28, %v3257_v43 }
0x229b   :  { %v3256_v48 = vadd.f32 %v3255_v37, %v3254_v51 }
0x229c   :  { %v3279_v25 = vsel %vm304_vm6, %v3228_v29, %v3221_v52  ;;  %v3267_v4 = vrot.slane %v3266_v20, 2  ;;  %v3260_v44 = vrot.slane %v3259_v27, 2 }
0x229d   :  { %v3280_v21 = vsel %vm306_vm7, %v3235_v3, %v3279_v25 }
0x229e   :  { %v3268_v18 = vadd.f32 %v3267_v4, %v3266_v20  ;;  %v3261_v36 = vadd.f32 %v3260_v44, %v3259_v27  ;;  %v3281_v7 = vsel %vm308_vm8, %v3242_v54, %v3280_v21 }
0x229f   :  { %v3282_v41 = vsel %vm310_vm9, %v3249_v22, %v3281_v7 }
0x22a0   :  { %v3269_v42 = vrot.slane %v3268_v18, 1  ;;  %v3262_v15 = vrot.slane %v3261_v36, 1  ;;  %v3283_v39 = vsel %vm312_vm10, %v3256_v48, %v3282_v41 }
0x22a2   :  { %v3263_v17 = vadd.f32 %v3262_v15, %v3261_v36  ;;  %v3270_v26 = vadd.f32 %v3269_v42, %v3268_v18 }
0x22a4   :  { %v3284_v9 = vsel %vm314_vm11, %v3263_v17, %v3283_v39 }
0x22a5   :  { %v3285_v43 = vsel %vm316_vm12, %v3270_v26, %v3284_v9 }
0x22a6   :  { %v3290_v47 = vsel %vm106_vm0, %v3285_v43, %v3288_v0 }
0x22a7   :  { %5883 = vmatmul.msk.f32.vlgmr.msra.gmra.mxu0 %vm111_vm1, %v3290_v47  ;;  %v8379_v47 = vld [vmem:[%s9544_s4] sm:$0xff] }
0x2324   :  { %v3311_v53 = vpop.f32.mrf.mxu0 }
0x2325   :  { %v3312_v63 = vadd.f32 %v8032_v49, %v3311_v53 }
0x2327   :  { %6336 = vtanh.f32 %v3312_v63  ;;  %v5884_v36 = vmul.f32 -1.442695, %v3312_v63 }
0x2329   :  { %6338 = vpow2.f32 %v5884_v36 }
0x232d   :  { %v6337_v61 = vpop.eup %6336 }
0x232e   :  { %3336 = vrot.lane.b32.xlu0 %v6337_v61, %s6788_s0 }
0x232f   :  { %v6339_v18 = vpop.eup %6338 }
0x2330   :  { %v3317_v7 = vadd.f32 1.0, %v6339_v18 }
0x2332   :  { %6340 = vrcp.f32 %v3317_v7  ;;  %v3329_v20 = vand.u32 2147483648, %v3317_v7  ;;  %vm3323_vm3 = vweird.f32 %v3317_v7  ;;  %v3327_v27 = vand.u32 2147483647, %v3317_v7 }
0x2334   :  { %v3330_v3 = vor.u32 1.1754944e-38, %v3329_v20  ;;  %vm3328_vm5 = vcmp.eq.f32.partialorder %v3327_v27, 8.507059e+37 }
0x2338   :  { %v6341_v28 = vpop.eup %6340 }
0x2339   :  { %v3319_v51 = vmul.f32 %v6341_v28, %v3317_v7  ;;  %vm3324_vm2 = vweird.f32 %v6341_v28 }
0x233a   :  { %vm3325_vm4 = vmor %vm3323_vm3, %vm3324_vm2 }
0x233b   :  { %v3320_v6 = vsub.f32 1.0, %v3319_v51 }
0x233d   :  { %v3321_v29 = vmul.f32 %v6341_v28, %v3320_v6  ;;  %v8399_v6 = vld [vmem:[%s9544_s4 + $0x20] sm:$0xff] }
0x233f   :  { %v3322_v52 = vadd.f32 %v6341_v28, %v3321_v29 }
0x2341   :  { %v3326_v49 = vsel %vm3325_vm4, %v6341_v28, %v3322_v52  ;;  %v8393_v28 = vld [vmem:[%s9544_s4 + $0x28] sm:$0xff] }
0x2342   :  { %v3331_v25 = vsel %vm3328_vm5, %v3330_v3, %v3326_v49 }
0x2343   :  { %v3334_v44 = vmul.f32 %v3331_v25, %v8038_v30 }
0x23a0   :  { %v3337_v54 = vpop.permute.xlu0 %3336 }
0x23a1   :  { %v3339_v4 = vmul.f32 %v3337_v54, %v3331_v25 }
0x23a3   :  { %3341 = vrot.lane.b32.xlu1 %v3339_v4, %s6787_s28 }
0x2415   :  { %v3342_v37 = vpop.permute.xlu1 %3341 }
0x2416   :  { %v8362_v21 = vadd.f32 %v3342_v37, %v3334_v44 }
0x2418   :  { %6342 = vtanh.f32 %v8362_v21 }
0x241e   :  { %v6343_v22 = vpop.eup %6342 }
0x241f   :  { %3347 = vrot.lane.b32.xlu2 %v6343_v22, %s6788_s0 }
0x2479   :  { %v3348_v42 = vpop.permute.xlu2 %3347 }
0x247a   :  { %v8366_v15 = vmul.f32 %v3348_v42, %v3331_v25 }
0x247c   :  { %3352 = vrot.lane.b32.xlu0 %v8366_v15, %s6787_s28 }
0x24ee   :  { %v3353_v41 = vpop.permute.xlu0 %3352 }
0x24ef   :  { %5885 = vmatmul.msk.f32.vlgmr.msra.gmra.mxu1 %vm106_vm0, %v3353_v41 }
0x24f0   :  { %4716 = vmatpush.msra.mxu1 %v8050_v5 }
0x24f2   :  { %4717 = vmatpush.msra.mxu1 %v8056_v31 }
0x24f4   :  { %4718 = vmatpush.msra.mxu1 %v8062_v23 }
0x24f6   :  { %4719 = vmatpush.msra.mxu1 %v8068_v40 }
0x256c   :  { %v3373_v30 = vpop.f32.mrf.mxu1 }
0x256d   :  { %v3374_v48 = vadd.f32 %v8074_v35, %v3373_v30  ;;  %v8385_v35 = vld [vmem:[%s9544_s4 + $0x10] sm:$0xff]  ;;  %v8411_v30 = vld [vmem:[%s9544_s4 + $0x38] sm:$0xff] }
0x256f   :  { %v3384_v17 = vperm.slane %v3374_v48, 0  ;;  %v3378_v26 = vrot.slane %v3374_v48, 2  ;;  %v3377_v39 = vrot.slane %v3374_v48, 1  ;;  %v3379_v9 = vrot.slane %v3374_v48, 3 }
0x2570   :  { %v3381_v0 = vrot.slane %v3374_v48, 5  ;;  %v3380_v43 = vrot.slane %v3374_v48, 4  ;;  %v3382_v61 = vrot.slane %v3374_v48, 6  ;;  %v3383_v52 = vrot.slane %v3374_v48, 7 }
0x2571   :  { %v3400_v5 = vadd.f32 %v8379_v47, %v3384_v17  ;;  %v3386_v31 = vperm.slane %v3378_v26, 0  ;;  %v3385_v23 = vperm.slane %v3377_v39, 0  ;;  %v3387_v53 = vperm.slane %v3379_v9, 0 }
0x2572   :  { %v3389_v40 = vperm.slane %v3381_v0, 0  ;;  %v3388_v63 = vperm.slane %v3380_v43, 0  ;;  %v3390_v20 = vperm.slane %v3382_v61, 0  ;;  %v3391_v3 = vperm.slane %v3383_v52, 0 }
0x2573   :  { %6344 = vtanh.f32 %v3400_v5  ;;  %v3402_v36 = vadd.f32 %v8385_v35, %v3386_v31  ;;  %v3401_v18 = vadd.f32 %v8136_v34, %v3385_v23  ;;  %v3403_v7 = vadd.f32 %v8146_v13, %v3387_v53 }
0x2574   :  { %v3405_v51 = vadd.f32 %v8393_v28, %v3389_v40  ;;  %v3404_v29 = vadd.f32 %v8399_v6, %v3388_v63  ;;  %v3406_v25 = vadd.f32 %v8155_v58, %v3390_v20  ;;  %v3407_v48 = vadd.f32 %v8411_v30, %v3391_v3  ;;  %v8424_v63 = vld [vmem:[%s9543_s11] ss:$0 sm:$0xff] }
0x2575   :  { %6346 = vtanh.f32 %v3402_v36 }
0x2576   :  { %6348 = vtanh.f32 %v3401_v18 }
0x2577   :  { %6350 = vtanh.f32 %v3403_v7 }
0x2578   :  { %6352 = vtanh.f32 %v3405_v51 }
0x2579   :  { %v6345_v27 = vpop.eup %6344  ;;  %6354 = vtanh.f32 %v3404_v29 }
0x257a   :  { %v3416_v49 = vmul.f32 %v8094_v14, %v6345_v27  ;;  %6356 = vtanh.f32 %v3406_v25 }
0x257b   :  { %v6347_v54 = vpop.eup %6346  ;;  %6358 = vtanh.f32 %v3407_v48 }
0x257c   :  { %v6349_v4 = vpop.eup %6348  ;;  %v3424_v44 = vsel %vm106_vm0, %v3416_v49, 0.0  ;;  %v3418_v37 = vmul.f32 %v8094_v14, %v6347_v54 }
0x257d   :  { %v6351_v22 = vpop.eup %6350  ;;  %3425 = vadd.xlane.f32.xlu1 %v3424_v44  ;;  %v3417_v42 = vmul.f32 %v8094_v14, %v6349_v4 }
0x257e   :  { %v3430_v41 = vsel %vm106_vm0, %v3418_v37, 0.0  ;;  %v6353_v17 = vpop.eup %6352  ;;  %v3419_v9 = vmul.f32 %v8094_v14, %v6351_v22 }
0x257f   :  { %3431 = vadd.xlane.f32.xlu0 %v3430_v41  ;;  %v3427_v26 = vsel %vm106_vm0, %v3417_v42, 0.0  ;;  %v6355_v39 = vpop.eup %6354  ;;  %v3421_v0 = vmul.f32 %v8094_v14, %v6353_v17 }
0x2580   :  { %3428 = vadd.xlane.f32.xlu2 %v3427_v26  ;;  %v3420_v43 = vmul.f32 %v8094_v14, %v6355_v39  ;;  %v3433_v5 = vsel %vm106_vm0, %v3419_v9, 0.0  ;;  %v6357_v31 = vpop.eup %6356  ;;  %v8443_v26 = vmax.f32 %v8119_v60, %v8286_v2 }
0x2581   :  { %v3439_v23 = vsel %vm106_vm0, %v3421_v0, 0.0  ;;  %v6359_v40 = vpop.eup %6358  ;;  %v3422_v61 = vmul.f32 %v8424_v63, %v6357_v31 }
0x2582   :  { %v3436_v53 = vsel %vm106_vm0, %v3420_v43, 0.0  ;;  %v3423_v14 = vmul.f32 %v8424_v63, %v6359_v40  ;;  %vm3448_vm15 = vcmp.gt.f32.partialorder %v8443_v26, 0.5 }
0x2583   :  { %v3442_v36 = vsel %vm106_vm0, %v3422_v61, 0.0 }
0x2584   :  { %v3445_v18 = vsel %vm106_vm0, %v3423_v14, 0.0 }
0x2585   :  { %3434 = vadd.xlane.f32.xlu1 %v3433_v5 }
0x2587   :  { %3440 = vadd.xlane.f32.xlu0 %v3439_v23 }
0x2588   :  { %3437 = vadd.xlane.f32.xlu2 %v3436_v53 }
0x258d   :  { %3443 = vadd.xlane.f32.xlu1 %v3442_v36 }
0x2590   :  { %3446 = vadd.xlane.f32.xlu2 %v3445_v18 }
0x25f0   :  { %v3426_v7 = vpop.xlane.xlu1 %3425 }
0x25f1   :  { %v3457_v20 = vperm.slane %v3426_v7, %v7002_v45 }
0x25f2   :  { %v3432_v51 = vpop.xlane.xlu0 %3431 }
0x25f3   :  { %v3429_v29 = vpop.xlane.xlu2 %3428  ;;  %v3459_v27 = vperm.slane %v3432_v51, %v7002_v45 }
0x25f4   :  { %v3458_v52 = vperm.slane %v3429_v29, %v7002_v45 }
0x25f6   :  { %v3465_v49 = vsel %vm304_vm6, %v3458_v52, %v3457_v20 }
0x25f7   :  { %v3466_v25 = vsel %vm306_vm7, %v3459_v27, %v3465_v49 }
0x25f8   :  { %v3435_v3 = vpop.xlane.xlu1 %3434 }
0x25f9   :  { %v3460_v54 = vperm.slane %v3435_v3, %v7002_v45 }
0x25fa   :  { %v3441_v4 = vpop.xlane.xlu0 %3440 }
0x25fb   :  { %v3438_v44 = vpop.xlane.xlu2 %3437  ;;  %v3467_v37 = vsel %vm308_vm8, %v3460_v54, %v3466_v25  ;;  %v3462_v42 = vperm.slane %v3441_v4, %v7002_v45 }
0x25fc   :  { %v3461_v22 = vperm.slane %v3438_v44, %v7002_v45 }
0x25fe   :  { %v3468_v41 = vsel %vm310_vm9, %v3461_v22, %v3467_v37 }
0x25ff   :  { %v3469_v39 = vsel %vm312_vm10, %v3462_v42, %v3468_v41 }
0x2600   :  { %v3444_v48 = vpop.xlane.xlu1 %3443 }
0x2601   :  { %v3463_v17 = vperm.slane %v3444_v48, %v7002_v45 }
0x2603   :  { %v3447_v9 = vpop.xlane.xlu2 %3446  ;;  %v3470_v0 = vsel %vm314_vm11, %v3463_v17, %v3469_v39 }
0x2604   :  { %v3464_v43 = vperm.slane %v3447_v9, %v7002_v45 }
0x2606   :  { %v3471_v5 = vsel %vm316_vm12, %v3464_v43, %v3470_v0 }
0x2607   :  { %v3473_v31 = vsel %vm3448_vm15, -inf, %v3471_v5 }
0x2608   :  { %v3474_v23 = vsel %vm319_vm13, %v3473_v31, -inf }
0x2609   :  { %3475 = vmax.xlane.f32.xlu0 %v3474_v23 }
0x267c   :  { %v3476_v53 = vpop.xlane.xlu0 %3475 }
0x267d   :  { %v3477_v60 = vsub.f32 %v3473_v31, %v3476_v53 }
0x267f   :  { %v3478_v2 = vmul.f32 1.442695, %v3477_v60 }
0x2681   :  { %6360 = vpow2.f32 %v3478_v2 }
0x2687   :  { %v6361_v40 = vpop.eup %6360 }
0x2688   :  { %v3480_v61 = vsel %vm319_vm13, %v6361_v40, 0.0 }
0x2689   :  { %3481 = vadd.xlane.f32.xlu1 %v3480_v61 }
0x26fc   :  { %v3482_v14 = vpop.xlane.xlu1 %3481 }
0x26fd   :  { %6362 = vrcp.f32 %v3482_v14  ;;  %v3494_v51 = vand.u32 2147483648, %v3482_v14  ;;  %v3492_v52 = vand.u32 2147483647, %v3482_v14  ;;  %vm3488_vm2 = vweird.f32 %v3482_v14 }
0x26ff   :  { %v3495_v27 = vor.u32 1.1754944e-38, %v3494_v51  ;;  %vm3493_vm4 = vcmp.eq.f32.partialorder %v3492_v52, 8.507059e+37 }
0x2703   :  { %v6363_v36 = vpop.eup %6362 }
0x2704   :  { %v3484_v18 = vmul.f32 %v6363_v36, %v3482_v14  ;;  %vm3489_vm14 = vweird.f32 %v6363_v36 }
0x2705   :  { %vm3490_vm3 = vmor %vm3488_vm2, %vm3489_vm14 }
0x2706   :  { %v3485_v7 = vsub.f32 1.0, %v3484_v18 }
0x2708   :  { %v3486_v29 = vmul.f32 %v6363_v36, %v3485_v7 }
0x270a   :  { %v3487_v20 = vadd.f32 %v6363_v36, %v3486_v29 }
0x270c   :  { %v3491_v49 = vsel %vm3490_vm3, %v6363_v36, %v3487_v20 }
0x270d   :  { %v3496_v3 = vsel %vm3493_vm4, %v3495_v27, %v3491_v49 }
0x270e   :  { %v3498_v54 = vmul.f32 %v6361_v40, %v3496_v3 }
0x2710   :  { %v3513_v25 = vperm.slane %v3498_v54, 2  ;;  %v3506_v4 = vperm.slane %v3498_v54, 1  ;;  %v3499_v44 = vperm.slane %v3498_v54, 0  ;;  %v3548_v37 = vperm.slane %v3498_v54, 7 }
0x2711   :  { %v3520_v22 = vperm.slane %v3498_v54, 3  ;;  %v3527_v42 = vperm.slane %v3498_v54, 4  ;;  %v3534_v41 = vperm.slane %v3498_v54, 5  ;;  %v3541_v48 = vperm.slane %v3498_v54, 6 }
0x2712   :  { %3518 = vperm.xlu1 %5930, %v3513_v25   ;;  %3511 = vperm.xlu0 %5936, %v3506_v4  }
0x2713   :  { %3504 = vperm.xlu2 %5952, %v3499_v44  }
0x271a   :  { %3553 = vperm.xlu1 %5930, %v3548_v37   ;;  %3525 = vperm.xlu0 %5936, %v3520_v22  }
0x271b   :  { %3532 = vperm.xlu2 %5952, %v3527_v42  }
0x2722   :  { %3539 = vperm.xlu0 %5936, %v3534_v41  }
0x2723   :  { %3546 = vperm.xlu2 %5952, %v3541_v48  }
0x276d   :  { %v3505_v17 = vpop.permute.xlu2 %3504 }
0x276e   :  { %v3555_v9 = vmul.f32 %v8379_v47, %v3505_v17 }
0x2770   :  { %v3563_v0 = vsel %vm106_vm0, %v3555_v9, 0.0 }
0x2771   :  { %v3564_v60 = vrot.slane %v3563_v0, 4 }
0x2773   :  { %v3565_v7 = vadd.f32 %v3564_v60, %v3563_v0 }
0x2775   :  { %v3533_v39 = vpop.permute.xlu2 %3532  ;;  %v3566_v4 = vrot.slane %v3565_v7, 2 }
0x2776   :  { %v3559_v2 = vmul.f32 %v8399_v6, %v3533_v39 }
0x2777   :  { %v3567_v39 = vadd.f32 %v3566_v4, %v3565_v7 }
0x2778   :  { %v3591_v51 = vsel %vm106_vm0, %v3559_v2, 0.0 }
0x2779   :  { %v3592_v3 = vrot.slane %v3591_v51, 4  ;;  %v3568_v2 = vrot.slane %v3567_v39, 1 }
0x277b   :  { %v3593_v17 = vadd.f32 %v3592_v3, %v3591_v51 }
0x277d   :  { %v3547_v31 = vpop.permute.xlu2 %3546 }
0x277e   :  { %v3561_v14 = vmul.f32 %v8155_v58, %v3547_v31 }
0x2780   :  { %v3605_v20 = vsel %vm106_vm0, %v3561_v14, 0.0 }
0x2781   :  { %v3606_v44 = vrot.slane %v3605_v20, 4 }
0x2783   :  { %v3607_v0 = vadd.f32 %v3606_v44, %v3605_v20  ;;  %v3569_v20 = vadd.f32 %v3568_v2, %v3567_v39 }
0x2784   :  { %v3519_v43 = vpop.permute.xlu1 %3518  ;;  %v3512_v5 = vpop.permute.xlu0 %3511 }
0x2785   :  { %v3557_v23 = vmul.f32 %v8385_v35, %v3519_v43  ;;  %v3556_v53 = vmul.f32 %v8136_v34, %v3512_v5 }
0x2787   :  { %v3577_v40 = vsel %vm106_vm0, %v3557_v23, 0.0  ;;  %v3570_v61 = vsel %vm106_vm0, %v3556_v53, 0.0 }
0x2788   :  { %v3578_v36 = vrot.slane %v3577_v40, 4  ;;  %v3571_v18 = vrot.slane %v3570_v61, 4 }
0x278a   :  { %v3572_v29 = vadd.f32 %v3571_v18, %v3570_v61  ;;  %v3579_v52 = vadd.f32 %v3578_v36, %v3577_v40  ;;  %v3608_v61 = vrot.slane %v3607_v0, 2 }
0x278c   :  { %v3573_v27 = vrot.slane %v3572_v29, 2  ;;  %v3554_v34 = vpop.permute.xlu1 %3553  ;;  %v3526_v49 = vpop.permute.xlu0 %3525  ;;  %v3580_v58 = vrot.slane %v3579_v52, 2 }
0x278d   :  { %v3562_v54 = vmul.f32 %v8411_v30, %v3554_v34  ;;  %v3558_v25 = vmul.f32 %v8146_v13, %v3526_v49  ;;  %v3594_v13 = vrot.slane %v3593_v17, 2  ;;  %v3609_v34 = vadd.f32 %v3608_v61, %v3607_v0 }
0x278e   :  { %v3574_v42 = vadd.f32 %v3573_v27, %v3572_v29  ;;  %v3581_v43 = vadd.f32 %v3580_v58, %v3579_v52 }
0x278f   :  { %v3612_v37 = vsel %vm106_vm0, %v3562_v54, 0.0  ;;  %v3584_v22 = vsel %vm106_vm0, %v3558_v25, 0.0  ;;  %v3595_v27 = vadd.f32 %v3594_v13, %v3593_v17 }
0x2790   :  { %v3613_v41 = vrot.slane %v3612_v37, 4  ;;  %v3585_v48 = vrot.slane %v3584_v22, 4  ;;  %v3575_v5 = vrot.slane %v3574_v42, 1  ;;  %v3582_v14 = vrot.slane %v3581_v43, 1 }
0x2791   :  { %v3596_v44 = vrot.slane %v3595_v27, 1 }
0x2792   :  { %v3586_v9 = vadd.f32 %v3585_v48, %v3584_v22  ;;  %v3614_v31 = vadd.f32 %v3613_v41, %v3612_v37  ;;  %v3576_v18 = vadd.f32 %v3575_v5, %v3574_v42  ;;  %v3583_v49 = vadd.f32 %v3582_v14, %v3581_v43 }
0x2793   :  { %v3610_v37 = vrot.slane %v3609_v34, 1 }
0x2794   :  { %v3587_v23 = vrot.slane %v3586_v9, 2  ;;  %v3540_v53 = vpop.permute.xlu0 %3539  ;;  %v3615_v29 = vrot.slane %v3614_v31, 2  ;;  %v3627_v3 = vsel %vm304_vm6, %v3576_v18, %v3569_v20 }
0x2795   :  { %v3560_v60 = vmul.f32 %v8393_v28, %v3540_v53  ;;  %v3628_v22 = vsel %vm306_vm7, %v3583_v49, %v3627_v3  ;;  %v3611_v39 = vadd.f32 %v3610_v37, %v3609_v34 }
0x2796   :  { %v3588_v40 = vadd.f32 %v3587_v23, %v3586_v9  ;;  %v3616_v54 = vadd.f32 %v3615_v29, %v3614_v31  ;;  %v3597_v9 = vadd.f32 %v3596_v44, %v3595_v27 }
0x2797   :  { %v3598_v36 = vsel %vm106_vm0, %v3560_v60, 0.0 }
0x2798   :  { %v3589_v51 = vrot.slane %v3588_v40, 1  ;;  %v3599_v7 = vrot.slane %v3598_v36, 4  ;;  %v3617_v41 = vrot.slane %v3616_v54, 1 }
0x279a   :  { %v3600_v52 = vadd.f32 %v3599_v7, %v3598_v36  ;;  %v3590_v25 = vadd.f32 %v3589_v51, %v3588_v40  ;;  %v3618_v43 = vadd.f32 %v3617_v41, %v3616_v54 }
0x279c   :  { %v3601_v4 = vrot.slane %v3600_v52, 2  ;;  %v3629_v42 = vsel %vm308_vm8, %v3590_v25, %v3628_v22  ;;  %v8503_v22 = vld [vmem:[%s9549_s5 + $0x38] sm:$0xff] }
0x279d   :  { %v3630_v0 = vsel %vm310_vm9, %v3597_v9, %v3629_v42 }
0x279e   :  { %v3602_v58 = vadd.f32 %v3601_v4, %v3600_v52 }
0x27a0   :  { %v3603_v48 = vrot.slane %v3602_v58, 1 }
0x27a2   :  { %v3604_v17 = vadd.f32 %v3603_v48, %v3602_v58 }
0x27a4   :  { %v3631_v5 = vsel %vm312_vm10, %v3604_v17, %v3630_v0 }
0x27a5   :  { %v3632_v31 = vsel %vm314_vm11, %v3611_v39, %v3631_v5 }
0x27a6   :  { %v3633_v23 = vsel %vm316_vm12, %v3618_v43, %v3632_v31 }
0x27a7   :  { %5886 = vmatmul.msk.f32.vlgmr.msra.gmra.mxu2 %vm106_vm0, %v3633_v23 }
0x27a8   :  { %4996 = vmatpush.msra.mxu2 %v8172_v1 }
0x27aa   :  { %4997 = vmatpush.msra.mxu2 %v8178_v11 }
0x27ac   :  { %4998 = vmatpush.msra.mxu2 %v8184_v46 }
0x27ae   :  { %4999 = vmatpush.msra.mxu2 %v8190_v10 }
0x282a   :  { %v3653_v53 = vpop.f32.mrf.mxu2 }
0x282b   :  { %v3654_v13 = vadd.f32 %v8196_v50, %v3653_v53  ;;  %v8516_v53 = vld [vmem:[%s9548_s14] ss:$0 sm:$0xff] }
0x282d   :  { %v3664_v60 = vperm.slane %v3654_v13, 0  ;;  %v3658_v2 = vrot.slane %v3654_v13, 2  ;;  %v3657_v40 = vrot.slane %v3654_v13, 1  ;;  %v3659_v61 = vrot.slane %v3654_v13, 3 }
0x282e   :  { %v3661_v14 = vrot.slane %v3654_v13, 5  ;;  %v3660_v36 = vrot.slane %v3654_v13, 4  ;;  %v3662_v27 = vrot.slane %v3654_v13, 6  ;;  %v3663_v34 = vrot.slane %v3654_v13, 7 }
0x282f   :  { %v3680_v18 = vadd.f32 %v8202_v8, %v3664_v60  ;;  %v3666_v29 = vperm.slane %v3658_v2, 0  ;;  %v3665_v51 = vperm.slane %v3657_v40, 0  ;;  %v3667_v1 = vperm.slane %v3659_v61, 0  ;;  %v8491_v8 = vld [vmem:[%s9549_s5 + $0x20] sm:$0xff] }
0x2830   :  { %v3669_v7 = vperm.slane %v3661_v14, 0  ;;  %v3668_v11 = vperm.slane %v3660_v36, 0  ;;  %v3670_v49 = vperm.slane %v3662_v27, 0 }
0x2831   :  { %6364 = vtanh.f32 %v3680_v18  ;;  %v3682_v46 = vadd.f32 %v8208_v16, %v3666_v29  ;;  %v3681_v10 = vadd.f32 %v8214_v19, %v3665_v51  ;;  %v3683_v50 = vadd.f32 %v8220_v38, %v3667_v1 }
0x2832   :  { %v3685_v20 = vadd.f32 %v8226_v24, %v3669_v7  ;;  %v3684_v52 = vadd.f32 %v8491_v8, %v3668_v11  ;;  %v3671_v19 = vperm.slane %v3663_v34, 0  ;;  %v3686_v24 = vadd.f32 %v8234_v12, %v3670_v49 }
0x2833   :  { %6366 = vtanh.f32 %v3682_v46 }
0x2834   :  { %6368 = vtanh.f32 %v3681_v10  ;;  %v3687_v41 = vadd.f32 %v8503_v22, %v3671_v19 }
0x2835   :  { %6370 = vtanh.f32 %v3683_v50 }
0x2836   :  { %6372 = vtanh.f32 %v3685_v20 }
0x2837   :  { %v6365_v3 = vpop.eup %6364  ;;  %6374 = vtanh.f32 %v3684_v52 }
0x2838   :  { %v3696_v16 = vmul.f32 %v8246_v62, %v6365_v3  ;;  %6376 = vtanh.f32 %v3686_v24 }
0x2839   :  { %v6367_v38 = vpop.eup %6366  ;;  %6378 = vtanh.f32 %v3687_v41 }
0x283a   :  { %v6369_v54 = vpop.eup %6368  ;;  %v3704_v25 = vsel %vm106_vm0, %v3696_v16, 0.0  ;;  %v3698_v4 = vmul.f32 %v8246_v62, %v6367_v38 }
0x283b   :  { %v6371_v44 = vpop.eup %6370  ;;  %3705 = vadd.xlane.f32.xlu0 %v3704_v25  ;;  %v3697_v58 = vmul.f32 %v8246_v62, %v6369_v54 }
0x283c   :  { %v3710_v37 = vsel %vm106_vm0, %v3698_v4, 0.0  ;;  %v6373_v42 = vpop.eup %6372  ;;  %v3699_v9 = vmul.f32 %v8246_v62, %v6371_v44 }
0x283d   :  { %3711 = vadd.xlane.f32.xlu1 %v3710_v37  ;;  %v3707_v12 = vsel %vm106_vm0, %v3697_v58, 0.0  ;;  %v6375_v48 = vpop.eup %6374  ;;  %v3701_v17 = vmul.f32 %v8246_v62, %v6373_v42 }
0x283e   :  { %3708 = vadd.xlane.f32.xlu2 %v3707_v12  ;;  %v3700_v39 = vmul.f32 %v8246_v62, %v6375_v48  ;;  %v3713_v0 = vsel %vm106_vm0, %v3699_v9, 0.0  ;;  %v6377_v43 = vpop.eup %6376 }
0x283f   :  { %v3719_v5 = vsel %vm106_vm0, %v3701_v17, 0.0  ;;  %v6379_v23 = vpop.eup %6378  ;;  %v3702_v13 = vmul.f32 %v8516_v53, %v6377_v43 }
0x2840   :  { %v3716_v31 = vsel %vm106_vm0, %v3700_v39, 0.0  ;;  %v3703_v62 = vmul.f32 %v8516_v53, %v6379_v23 }
0x2841   :  { %v3722_v60 = vsel %vm106_vm0, %v3702_v13, 0.0 }
0x2842   :  { %v3725_v2 = vsel %vm106_vm0, %v3703_v62, 0.0 }
0x2843   :  { %3714 = vadd.xlane.f32.xlu0 %v3713_v0 }
0x2845   :  { %3720 = vadd.xlane.f32.xlu1 %v3719_v5  ;;  %v5887_v5 = vld [vmem:[%s9547_s6 + $0x20] sm:$0xff] }
0x2846   :  { %3717 = vadd.xlane.f32.xlu2 %v3716_v31 }
0x284b   :  { %3723 = vadd.xlane.f32.xlu0 %v3722_v60 }
0x284e   :  { %3726 = vadd.xlane.f32.xlu2 %v3725_v2 }
0x28ae   :  { %v3706_v40 = vpop.xlane.xlu0 %3705 }
0x28af   :  { %6380 = vtanh.f32 %v3706_v40 }
0x28b0   :  { %v3712_v61 = vpop.xlane.xlu1 %3711 }
0x28b1   :  { %6382 = vtanh.f32 %v3712_v61  ;;  %v3709_v14 = vpop.xlane.xlu2 %3708 }
0x28b2   :  { %6384 = vtanh.f32 %v3709_v14 }
0x28b5   :  { %v6381_v36 = vpop.eup %6380 }
0x28b6   :  { %v3715_v18 = vpop.xlane.xlu0 %3714  ;;  %v3736_v7 = vmul.f32 10.0, %v6381_v36 }
0x28b7   :  { %v6383_v29 = vpop.eup %6382  ;;  %6386 = vtanh.f32 %v3715_v18 }
0x28b8   :  { %v6385_v51 = vpop.eup %6384  ;;  %v3721_v1 = vpop.xlane.xlu1 %3720  ;;  %v3738_v46 = vmul.f32 10.0, %v6383_v29  ;;  %v3752_v20 = vperm.slane %v3736_v7, %v7002_v45 }
0x28b9   :  { %v3737_v11 = vmul.f32 10.0, %v6385_v51  ;;  %6388 = vtanh.f32 %v3721_v1  ;;  %v3718_v27 = vpop.xlane.xlu2 %3717 }
0x28ba   :  { %6390 = vtanh.f32 %v3718_v27  ;;  %v3754_v52 = vperm.slane %v3738_v46, %v7002_v45 }
0x28bb   :  { %v3753_v10 = vperm.slane %v3737_v11, %v7002_v45 }
0x28bd   :  { %v6387_v50 = vpop.eup %6386  ;;  %v3760_v16 = vsel %vm304_vm6, %v3753_v10, %v3752_v20 }
0x28be   :  { %v3739_v34 = vmul.f32 10.0, %v6387_v50  ;;  %v3724_v49 = vpop.xlane.xlu0 %3723  ;;  %v3761_v4 = vsel %vm306_vm7, %v3754_v52, %v3760_v16 }
0x28bf   :  { %v6389_v3 = vpop.eup %6388  ;;  %6392 = vtanh.f32 %v3724_v49 }
0x28c0   :  { %v6391_v19 = vpop.eup %6390  ;;  %v3755_v38 = vperm.slane %v3739_v34, %v7002_v45  ;;  %v3741_v24 = vmul.f32 10.0, %v6389_v3 }
0x28c1   :  { %v3740_v54 = vmul.f32 10.0, %v6391_v19  ;;  %v3727_v25 = vpop.xlane.xlu2 %3726 }
0x28c2   :  { %6394 = vtanh.f32 %v3727_v25  ;;  %v3762_v44 = vsel %vm308_vm8, %v3755_v38, %v3761_v4  ;;  %v3757_v41 = vperm.slane %v3741_v24, %v7002_v45 }
0x28c3   :  { %v3756_v58 = vperm.slane %v3740_v54, %v7002_v45 }
0x28c5   :  { %v6393_v37 = vpop.eup %6392  ;;  %v3763_v42 = vsel %vm310_vm9, %v3756_v58, %v3762_v44 }
0x28c6   :  { %v3742_v12 = vmul.f32 10.0, %v6393_v37  ;;  %v3764_v17 = vsel %vm312_vm10, %v3757_v41, %v3763_v42 }
0x28c8   :  { %v6395_v48 = vpop.eup %6394  ;;  %v3758_v9 = vperm.slane %v3742_v12, %v7002_v45 }
0x28c9   :  { %v3743_v39 = vmul.f32 10.0, %v6395_v48 }
0x28ca   :  { %v3765_v0 = vsel %vm314_vm11, %v3758_v9, %v3764_v17 }
0x28cb   :  { %v3759_v43 = vperm.slane %v3743_v39, %v7002_v45 }
0x28cd   :  { %v3766_v31 = vsel %vm316_vm12, %v3759_v43, %v3765_v0 }
0x28ce   :  { %v8542_v23 = vsel %vm3448_vm15, -inf, %v3766_v31 }
0x28cf   :  { %v3796_v13 = vadd.f32 %v5887_v5, %v8542_v23 }
0x28d1   :  { %v3797_v62 = vsel %vm319_vm13, %v3796_v13, -inf }
0x28d2   :  { %3798 = vmax.xlane.f32.xlu1 %v3797_v62 }
0x2945   :  { %v3799_v60 = vpop.xlane.xlu1 %3798 }
0x2946   :  { %vm3800_vm5 = vcmp.ge.f32.partialorder %v3796_v13, %v3799_v60 }
0x2947   :  { %v3801_v2 = vsel %vm3800_vm5, %v7002_v45, 8 }
0x2948   :  { %v3802_v40 = vsel %vm319_vm13, %v3801_v2, 2147483647 }
0x2949   :  { %v3804_v61 = vshra.s32 %v3802_v40, 16  ;;  %v3803_v36 = vand.u32 65535, %v3802_v40 }
0x294b   :  { %v3806_v14 = vcvt.s32.f32 %v3804_v61  ;;  %v3805_v29 = vcvt.s32.f32 %v3803_v36 }
0x294d   :  { %3807 = vmin.xlane.f32.xlu0 %v3806_v14 }
0x29c0   :  { %v3808_v18 = vpop.xlane.xlu0 %3807 }
0x29c1   :  { %vm3809_vm14 = vcmp.eq.f32.partialorder %v3806_v14, %v3808_v18  ;;  %v3814_v1 = vcvt.f32.s32 %v3808_v18 }
0x29c2   :  { %v3810_v51 = vsel %vm3809_vm14, %v3805_v29, inf }
0x29c3   :  { %3811 = vmin.xlane.f32.xlu2 %v3810_v51  ;;  %v3815_v11 = vshll.u32 %v3814_v1, 16 }
0x2a36   :  { %v3812_v7 = vpop.xlane.xlu2 %3811 }
0x2a37   :  { %v3813_v27 = vcvt.f32.s32 %v3812_v7 }
0x2a39   :  { %v3816_v46 = vadd.s32 %v3815_v11, %v3813_v27 }
0x2a3b   :  { %vm3817_vm15 = vcmp.eq.s32.totalorder %v7002_v45, %v3816_v46 }
0x2a3c   :  { %v8550_v10 = vsel %vm3817_vm15, 1.0, %v9625_v33 }
0x2a3d   :  { %v3853_v50 = vperm.slane %v8550_v10, 4  ;;  %v3860_v20 = vperm.slane %v8550_v10, 5  ;;  %v3839_v52 = vperm.slane %v8550_v10, 2  ;;  %v3846_v34 = vperm.slane %v8550_v10, 3  ;;  %5890 = vst.msk [vmem:[%s9550_s16 + $0x20] sm:$0xff] %vm319_vm13, %v8550_v10 }
0x2a3e   :  { %v3825_v49 = vperm.slane %v8550_v10, 0  ;;  %v3832_v3 = vperm.slane %v8550_v10, 1  ;;  %v3867_v24 = vperm.slane %v8550_v10, 6  ;;  %v3874_v54 = vperm.slane %v8550_v10, 7 }
0x2a3f   :  { %v6023_v16 = vpack.i.bf16 %v3860_v20, %v3853_v50  ;;  %v6018_v19 = vpack.i.bf16 %v3846_v34, %v3839_v52 }
0x2a40   :  { %v6013_v38 = vpack.i.bf16 %v3832_v3, %v3825_v49  ;;  %v6028_v25 = vpack.i.bf16 %v3874_v54, %v3867_v24  ;;  %v9632_v24 = vld [vmem:[#allocation14_spill] sm:$0xff] }
0x2a41   :  { %6024 = vperm.xlu2 %5952, %v6023_v16   ;;  %6019 = vperm.xlu0 %5936, %v6018_v19  }
0x2a42   :  { %6014 = vperm.xlu1 %5930, %v6013_v38  }
0x2a49   :  { %6029 = vperm.xlu0 %5936, %v6028_v25  }
0x2a4a   :  { %3961 = vrot.lane.b32.xlu1 %v8366_v15, %s6788_s0  ;;  %v8574_v15 = vld [vmem:[%s9551_s3 + $0x18] sm:$0xff] }
0x2a9b   :  { %v6025_v4 = vpop.permute.xlu2 %6024 }
0x2a9c   :  { %v6026_v44 = vunpack.i.l.bf16 %v6025_v4  ;;  %v6027_v58 = vunpack.i.h.bf16 %v6025_v4 }
0x2a9e   :  { %v3885_v37 = vmul.f32 %v8316_v56, %v6026_v44  ;;  %v3886_v41 = vmul.f32 %v8310_v59, %v6027_v58  ;;  %v8580_v59 = vld [vmem:[%s9551_s3 + $0x10] sm:$0xff] }
0x2aa0   :  { %v3917_v42 = vsel %vm106_vm0, %v3885_v37, 0.0  ;;  %v3924_v12 = vsel %vm106_vm0, %v3886_v41, 0.0 }
0x2aa1   :  { %v3918_v48 = vrot.slane %v3917_v42, 4  ;;  %v3925_v17 = vrot.slane %v3924_v12, 4 }
0x2aa3   :  { %v3919_v62 = vadd.f32 %v3918_v48, %v3917_v42  ;;  %v3926_v40 = vadd.f32 %v3925_v17, %v3924_v12 }
0x2aa5   :  { %v3920_v11 = vrot.slane %v3919_v62, 2  ;;  %v3927_v34 = vrot.slane %v3926_v40, 2 }
0x2aa7   :  { %v3921_v25 = vadd.f32 %v3920_v11, %v3919_v62  ;;  %v3928_v17 = vadd.f32 %v3927_v34, %v3926_v40 }
0x2ab3   :  { %v6020_v9 = vpop.permute.xlu0 %6019 }
0x2ab4   :  { %v6022_v39 = vunpack.i.h.bf16 %v6020_v9  ;;  %v6021_v0 = vunpack.i.l.bf16 %v6020_v9  ;;  %v6015_v43 = vpop.permute.xlu1 %6014 }
0x2ab5   :  { %v6017_v5 = vunpack.i.h.bf16 %v6015_v43  ;;  %v6016_v31 = vunpack.i.l.bf16 %v6015_v43 }
0x2ab6   :  { %v3884_v56 = vmul.f32 %v8574_v15, %v6022_v39  ;;  %v3883_v13 = vmul.f32 %v8580_v59, %v6021_v0 }
0x2ab7   :  { %v3882_v60 = vmul.f32 %v8322_v55, %v6017_v5  ;;  %v3881_v2 = vmul.f32 %v8328_v57, %v6016_v31  ;;  %v3922_v5 = vrot.slane %v3921_v25, 1 }
0x2ab8   :  { %v3910_v61 = vsel %vm106_vm0, %v3884_v56, 0.0  ;;  %v3903_v14 = vsel %vm106_vm0, %v3883_v13, 0.0 }
0x2ab9   :  { %v3911_v36 = vrot.slane %v3910_v61, 4  ;;  %v3904_v18 = vrot.slane %v3903_v14, 4  ;;  %v3896_v29 = vsel %vm106_vm0, %v3882_v60, 0.0  ;;  %v3889_v51 = vsel %vm106_vm0, %v3881_v2, 0.0 }
0x2aba   :  { %v3897_v1 = vrot.slane %v3896_v29, 4  ;;  %v3890_v7 = vrot.slane %v3889_v51, 4 }
0x2abb   :  { %v3912_v27 = vadd.f32 %v3911_v36, %v3910_v61  ;;  %v3905_v46 = vadd.f32 %v3904_v18, %v3903_v14  ;;  %v6030_v50 = vpop.permute.xlu0 %6029  ;;  %v3929_v61 = vrot.slane %v3928_v17, 1  ;;  %v3923_v18 = vadd.f32 %v3922_v5, %v3921_v25 }
0x2abc   :  { %v3898_v55 = vadd.f32 %v3897_v1, %v3896_v29  ;;  %v3891_v20 = vadd.f32 %v3890_v7, %v3889_v51  ;;  %v6032_v57 = vunpack.i.h.bf16 %v6030_v50  ;;  %v6031_v52 = vunpack.i.l.bf16 %v6030_v50 }
0x2abd   :  { %v3913_v49 = vrot.slane %v3912_v27, 2  ;;  %v3906_v3 = vrot.slane %v3905_v46, 2 }
0x2abe   :  { %v3899_v16 = vrot.slane %v3898_v55, 2  ;;  %v3892_v19 = vrot.slane %v3891_v20, 2  ;;  %v3888_v38 = vmul.f32 %v8338_v32, %v6032_v57  ;;  %v3887_v54 = vmul.f32 %v9632_v24, %v6031_v52  ;;  %v3962_v52 = vpop.permute.xlu1 %3961 }
0x2abf   :  { %v3914_v4 = vadd.f32 %v3913_v49, %v3912_v27  ;;  %v3907_v44 = vadd.f32 %v3906_v3, %v3905_v46  ;;  %v3930_v46 = vadd.f32 %v3929_v61, %v3928_v17  ;;  %v6732_v61 = vld [vmem:[%s9542_s9] sm:$0xff] }
0x2ac0   :  { %v3900_v58 = vadd.f32 %v3899_v16, %v3898_v55  ;;  %v3893_v37 = vadd.f32 %v3892_v19, %v3891_v20  ;;  %v3938_v41 = vsel %vm106_vm0, %v3888_v38, 0.0  ;;  %v3931_v42 = vsel %vm106_vm0, %v3887_v54, 0.0  ;;  %v8605_v16 = vld [vmem:[%s9538_s8] ss:$0 sm:$0xff] }
0x2ac1   :  { %v3908_v12 = vrot.slane %v3907_v44, 1  ;;  %v3939_v48 = vrot.slane %v3938_v41, 4  ;;  %v3932_v9 = vrot.slane %v3931_v42, 4  ;;  %v3915_v39 = vrot.slane %v3914_v4, 1 }
0x2ac2   :  { %v3901_v0 = vrot.slane %v3900_v58, 1  ;;  %v3894_v43 = vrot.slane %v3893_v37, 1 }
0x2ac3   :  { %v3909_v32 = vadd.f32 %v3908_v12, %v3907_v44  ;;  %v3940_v31 = vadd.f32 %v3939_v48, %v3938_v41  ;;  %v3933_v56 = vadd.f32 %v3932_v9, %v3931_v42  ;;  %v3916_v14 = vadd.f32 %v3915_v39, %v3914_v4 }
0x2ac4   :  { %v3902_v13 = vadd.f32 %v3901_v0, %v3900_v58  ;;  %v3895_v62 = vadd.f32 %v3894_v43, %v3893_v37 }
0x2ac5   :  { %v3941_v60 = vrot.slane %v3940_v31, 2  ;;  %v3934_v2 = vrot.slane %v3933_v56, 2 }
0x2ac6   :  { %v3953_v36 = vsel %vm304_vm6, %v3902_v13, %v3895_v62 }
0x2ac7   :  { %v3935_v29 = vadd.f32 %v3934_v2, %v3933_v56  ;;  %v3942_v51 = vadd.f32 %v3941_v60, %v3940_v31  ;;  %v3954_v40 = vsel %vm306_vm7, %v3909_v32, %v3953_v36  ;;  %v6730_v60 = vld [vmem:[%s9542_s9 + $0x10] sm:$0xff]  ;;  %v6731_v2 = vld [vmem:[%s9542_s9 + $0x8] sm:$0xff]  ;;  %v8635_v36 = vld [vmem:[%s9541_s10] ss:$0 sm:$0xff] }
0x2ac8   :  { %v3955_v1 = vsel %vm308_vm8, %v3916_v14, %v3954_v40 }
0x2ac9   :  { %v3936_v7 = vrot.slane %v3935_v29, 1  ;;  %v3943_v11 = vrot.slane %v3942_v51, 1  ;;  %v3956_v27 = vsel %vm310_vm9, %v3923_v18, %v3955_v1 }
0x2aca   :  { %v3957_v20 = vsel %vm312_vm10, %v3930_v46, %v3956_v27 }
0x2acb   :  { %v3937_v50 = vadd.f32 %v3936_v7, %v3935_v29  ;;  %v3944_v55 = vadd.f32 %v3943_v11, %v3942_v51 }
0x2acd   :  { %v3958_v57 = vsel %vm314_vm11, %v3937_v50, %v3957_v20 }
0x2ace   :  { %v3959_v34 = vsel %vm316_vm12, %v3944_v55, %v3958_v57 }
0x2acf   :  { %v3964_v49 = vsel %vm106_vm0, %v3959_v34, %v3962_v52 }
0x2ad0   :  { %5891 = vmatmul.msk.f32.vlgmr.msra.gmra.mxu3 %vm111_vm1, %v3964_v49  ;;  %v8643_v49 = vld [vmem:[%s9544_s4 + $0x8] sm:$0xff] }
0x2b53   :  { %v3985_v3 = vpop.f32.mrf.mxu3 }
0x2b54   :  { %v3986_v19 = vadd.f32 %v8605_v16, %v3985_v3 }
0x2b56   :  { %6396 = vtanh.f32 %v3986_v19  ;;  %v5892_v24 = vmul.f32 -1.442695, %v3986_v19 }
0x2b58   :  { %6398 = vpow2.f32 %v5892_v24 }
0x2b5c   :  { %v6397_v38 = vpop.eup %6396 }
0x2b5d   :  { %4010 = vrot.lane.b32.xlu2 %v6397_v38, %s6788_s0 }
0x2b5e   :  { %v6399_v54 = vpop.eup %6398 }
0x2b5f   :  { %v3991_v25 = vadd.f32 1.0, %v6399_v54 }
0x2b61   :  { %6400 = vrcp.f32 %v3991_v25  ;;  %v4003_v42 = vand.u32 2147483648, %v3991_v25  ;;  %vm3997_vm3 = vweird.f32 %v3991_v25  ;;  %v4001_v12 = vand.u32 2147483647, %v3991_v25 }
0x2b63   :  { %v4004_v9 = vor.u32 1.1754944e-38, %v4003_v42  ;;  %vm4002_vm5 = vcmp.eq.f32.partialorder %v4001_v12, 8.507059e+37 }
0x2b67   :  { %v6401_v4 = vpop.eup %6400 }
0x2b68   :  { %v3993_v44 = vmul.f32 %v6401_v4, %v3991_v25  ;;  %vm3998_vm2 = vweird.f32 %v6401_v4 }
0x2b69   :  { %vm3999_vm4 = vmor %vm3997_vm3, %vm3998_vm2 }
0x2b6a   :  { %v3994_v58 = vsub.f32 1.0, %v3993_v44 }
0x2b6c   :  { %v3995_v37 = vmul.f32 %v6401_v4, %v3994_v58 }
0x2b6e   :  { %v3996_v41 = vadd.f32 %v6401_v4, %v3995_v37  ;;  %v8658_v37 = vld [vmem:[%s9544_s4 + $0x30] sm:$0xff] }
0x2b70   :  { %v4000_v48 = vsel %vm3999_vm4, %v6401_v4, %v3996_v41 }
0x2b71   :  { %v4005_v39 = vsel %vm4002_vm5, %v4004_v9, %v4000_v48 }
0x2b72   :  { %v4008_v43 = vmul.f32 %v4005_v39, %v8362_v21  ;;  %v6729_v21 = vld [vmem:[%s9542_s9 + $0x18] sm:$0xff] }
0x2bb7   :  { %v4011_v17 = vpop.permute.xlu2 %4010 }
0x2bb8   :  { %v4013_v0 = vmul.f32 %v4011_v17, %v4005_v39 }
0x2bba   :  { %4015 = vrot.lane.b32.xlu0 %v4013_v0, %s6787_s28 }
0x2c2c   :  { %v4016_v5 = vpop.permute.xlu0 %4015 }
0x2c2d   :  { %v8611_v32 = vadd.f32 %v4016_v5, %v4008_v43 }
0x2c2f   :  { %6402 = vtanh.f32 %v8611_v32 }
0x2c35   :  { %v6403_v31 = vpop.eup %6402 }
0x2c36   :  { %4021 = vrot.lane.b32.xlu1 %v6403_v31, %s6788_s0 }
0x2ca8   :  { %v4022_v56 = vpop.permute.xlu1 %4021 }
0x2ca9   :  { %v8615_v13 = vmul.f32 %v4022_v56, %v4005_v39 }
0x2cab   :  { %4026 = vrot.lane.b32.xlu2 %v8615_v13, %s6787_s28 }
0x2d05   :  { %v4027_v62 = vpop.permute.xlu2 %4026 }
0x2d06   :  { %5893 = vmatmul.msk.f32.vlgmr.msrb.gmra.mxu1 %vm106_vm0, %v4027_v62 }
0x2d07   :  { %5390 = vmatpush.msrb.mxu1 %v6729_v21 }
0x2d09   :  { %5391 = vmatpush.msrb.mxu1 %v6730_v60 }
0x2d0b   :  { %5392 = vmatpush.msrb.mxu1 %v6731_v2 }
0x2d0d   :  { %5393 = vmatpush.msrb.mxu1 %v6732_v61 }
0x2d83   :  { %v4047_v14 = vpop.f32.mrf.mxu1 }
0x2d84   :  { %v4048_v18 = vadd.f32 %v8635_v36, %v4047_v14 }
0x2d86   :  { %v4058_v29 = vperm.slane %v4048_v18, 0  ;;  %v4052_v51 = vrot.slane %v4048_v18, 2  ;;  %v4051_v40 = vrot.slane %v4048_v18, 1  ;;  %v4053_v1 = vrot.slane %v4048_v18, 3 }
0x2d87   :  { %v4055_v7 = vrot.slane %v4048_v18, 5  ;;  %v4054_v11 = vrot.slane %v4048_v18, 4  ;;  %v4056_v52 = vrot.slane %v4048_v18, 6  ;;  %v4057_v24 = vrot.slane %v4048_v18, 7 }
0x2d88   :  { %v4074_v27 = vadd.f32 %v8379_v47, %v4058_v29  ;;  %v4060_v46 = vperm.slane %v4052_v51, 0  ;;  %v4059_v50 = vperm.slane %v4051_v40, 0  ;;  %v4061_v55 = vperm.slane %v4053_v1, 0  ;;  %v8649_v47 = vld [vmem:[%s9544_s4 + $0x18] sm:$0xff] }
0x2d89   :  { %v4063_v20 = vperm.slane %v4055_v7, 0  ;;  %v4062_v57 = vperm.slane %v4054_v11, 0  ;;  %v4064_v54 = vperm.slane %v4056_v52, 0  ;;  %v4065_v44 = vperm.slane %v4057_v24, 0 }
0x2d8a   :  { %6404 = vtanh.f32 %v4074_v27  ;;  %v4076_v34 = vadd.f32 %v8385_v35, %v4060_v46  ;;  %v4075_v3 = vadd.f32 %v8643_v49, %v4059_v50  ;;  %v4077_v19 = vadd.f32 %v8649_v47, %v4061_v55 }
0x2d8b   :  { %v4079_v38 = vadd.f32 %v8393_v28, %v4063_v20  ;;  %v4078_v35 = vadd.f32 %v8399_v6, %v4062_v57  ;;  %v4080_v28 = vadd.f32 %v8658_v37, %v4064_v54  ;;  %v4081_v17 = vadd.f32 %v8411_v30, %v4065_v44 }
0x2d8c   :  { %6406 = vtanh.f32 %v4076_v34  ;;  %v8691_v54 = vmax.f32 %v8443_v26, %v8550_v10 }
0x2d8d   :  { %6408 = vtanh.f32 %v4075_v3 }
0x2d8e   :  { %6410 = vtanh.f32 %v4077_v19  ;;  %vm4122_vm14 = vcmp.gt.f32.partialorder %v8691_v54, 0.5 }
0x2d8f   :  { %6412 = vtanh.f32 %v4079_v38 }
0x2d90   :  { %v6405_v25 = vpop.eup %6404  ;;  %6414 = vtanh.f32 %v4078_v35 }
0x2d91   :  { %v4090_v4 = vmul.f32 %v8424_v63, %v6405_v25  ;;  %6416 = vtanh.f32 %v4080_v28 }
0x2d92   :  { %v6407_v58 = vpop.eup %6406  ;;  %6418 = vtanh.f32 %v4081_v17 }
0x2d93   :  { %v6409_v41 = vpop.eup %6408  ;;  %v4098_v6 = vsel %vm106_vm0, %v4090_v4, 0.0  ;;  %v4092_v42 = vmul.f32 %v8424_v63, %v6407_v58 }
0x2d94   :  { %v6411_v12 = vpop.eup %6410  ;;  %4099 = vadd.xlane.f32.xlu0 %v4098_v6  ;;  %v4091_v48 = vmul.f32 %v8424_v63, %v6409_v41 }
0x2d95   :  { %v4104_v9 = vsel %vm106_vm0, %v4092_v42, 0.0  ;;  %v6413_v39 = vpop.eup %6412  ;;  %v4093_v5 = vmul.f32 %v8424_v63, %v6411_v12 }
0x2d96   :  { %4105 = vadd.xlane.f32.xlu2 %v4104_v9  ;;  %v4101_v0 = vsel %vm106_vm0, %v4091_v48, 0.0  ;;  %v6415_v43 = vpop.eup %6414  ;;  %v4095_v31 = vmul.f32 %v8424_v63, %v6413_v39 }
0x2d97   :  { %4102 = vadd.xlane.f32.xlu1 %v4101_v0  ;;  %v4094_v56 = vmul.f32 %v8424_v63, %v6415_v43  ;;  %v4107_v62 = vsel %vm106_vm0, %v4093_v5, 0.0  ;;  %v6417_v21 = vpop.eup %6416 }
0x2d98   :  { %v4113_v30 = vsel %vm106_vm0, %v4095_v31, 0.0  ;;  %v6419_v2 = vpop.eup %6418  ;;  %v4096_v61 = vmul.f32 %v8424_v63, %v6417_v21 }
0x2d99   :  { %v4110_v60 = vsel %vm106_vm0, %v4094_v56, 0.0  ;;  %v4097_v14 = vmul.f32 %v8424_v63, %v6419_v2 }
0x2d9a   :  { %v4116_v18 = vsel %vm106_vm0, %v4096_v61, 0.0 }
0x2d9b   :  { %v4119_v29 = vsel %vm106_vm0, %v4097_v14, 0.0 }
0x2d9c   :  { %4108 = vadd.xlane.f32.xlu0 %v4107_v62 }
0x2d9e   :  { %4114 = vadd.xlane.f32.xlu2 %v4113_v30 }
0x2d9f   :  { %4111 = vadd.xlane.f32.xlu1 %v4110_v60 }
0x2da4   :  { %4117 = vadd.xlane.f32.xlu0 %v4116_v18 }
0x2da7   :  { %4120 = vadd.xlane.f32.xlu1 %v4119_v29 }
0x2e07   :  { %v4100_v51 = vpop.xlane.xlu0 %4099 }
0x2e08   :  { %v4131_v11 = vperm.slane %v4100_v51, %v7002_v45 }
0x2e09   :  { %v4106_v40 = vpop.xlane.xlu2 %4105 }
0x2e0a   :  { %v4103_v1 = vpop.xlane.xlu1 %4102  ;;  %v4133_v27 = vperm.slane %v4106_v40, %v7002_v45 }
0x2e0b   :  { %v4132_v7 = vperm.slane %v4103_v1, %v7002_v45 }
0x2e0d   :  { %v4139_v46 = vsel %vm304_vm6, %v4132_v7, %v4131_v11 }
0x2e0e   :  { %v4140_v55 = vsel %vm306_vm7, %v4133_v27, %v4139_v46 }
0x2e0f   :  { %v4109_v50 = vpop.xlane.xlu0 %4108 }
0x2e10   :  { %v4134_v63 = vperm.slane %v4109_v50, %v7002_v45 }
0x2e11   :  { %v4115_v20 = vpop.xlane.xlu2 %4114 }
0x2e12   :  { %v4112_v57 = vpop.xlane.xlu1 %4111  ;;  %v4141_v52 = vsel %vm308_vm8, %v4134_v63, %v4140_v55  ;;  %v4136_v3 = vperm.slane %v4115_v20, %v7002_v45  ;;  %v8706_v63 = vld [vmem:[%s9544_s4 + $0x10] sm:$0xff] }
0x2e13   :  { %v4135_v34 = vperm.slane %v4112_v57, %v7002_v45  ;;  %v8712_v57 = vld [vmem:[%s9544_s4] sm:$0xff] }
0x2e15   :  { %v4142_v19 = vsel %vm310_vm9, %v4135_v34, %v4141_v52  ;;  %v8718_v34 = vld [vmem:[%s9544_s4 + $0x28] sm:$0xff] }
0x2e16   :  { %v4143_v24 = vsel %vm312_vm10, %v4136_v3, %v4142_v19 }
0x2e17   :  { %v4118_v38 = vpop.xlane.xlu0 %4117 }
0x2e18   :  { %v4137_v35 = vperm.slane %v4118_v38, %v7002_v45 }
0x2e1a   :  { %v4144_v25 = vsel %vm314_vm11, %v4137_v35, %v4143_v24  ;;  %v4121_v4 = vpop.xlane.xlu1 %4120 }
0x2e1b   :  { %v4138_v44 = vperm.slane %v4121_v4, %v7002_v45 }
0x2e1d   :  { %v4145_v58 = vsel %vm316_vm12, %v4138_v44, %v4144_v25 }
0x2e1e   :  { %v4147_v28 = vsel %vm4122_vm14, -inf, %v4145_v58 }
0x2e1f   :  { %v4148_v41 = vsel %vm319_vm13, %v4147_v28, -inf }
0x2e20   :  { %4149 = vmax.xlane.f32.xlu2 %v4148_v41 }
0x2e93   :  { %v4150_v6 = vpop.xlane.xlu2 %4149 }
0x2e94   :  { %v4151_v42 = vsub.f32 %v4147_v28, %v4150_v6 }
0x2e96   :  { %v4152_v12 = vmul.f32 1.442695, %v4151_v42 }
0x2e98   :  { %6420 = vpow2.f32 %v4152_v12  ;;  %v8727_v12 = vld [vmem:[%s9544_s4 + $0x20] sm:$0xff] }
0x2e9e   :  { %v6421_v26 = vpop.eup %6420 }
0x2e9f   :  { %v4154_v10 = vsel %vm319_vm13, %v6421_v26, 0.0 }
0x2ea0   :  { %4155 = vadd.xlane.f32.xlu0 %v4154_v10 }
0x2f13   :  { %v4156_v48 = vpop.xlane.xlu0 %4155 }
0x2f14   :  { %6422 = vrcp.f32 %v4156_v48  ;;  %v4168_v0 = vand.u32 2147483648, %v4156_v48  ;;  %v4166_v5 = vand.u32 2147483647, %v4156_v48  ;;  %vm4162_vm2 = vweird.f32 %v4156_v48 }
0x2f16   :  { %v4169_v56 = vor.u32 1.1754944e-38, %v4168_v0  ;;  %vm4167_vm4 = vcmp.eq.f32.partialorder %v4166_v5, 8.507059e+37 }
0x2f1a   :  { %v6423_v9 = vpop.eup %6422 }
0x2f1b   :  { %v4158_v17 = vmul.f32 %v6423_v9, %v4156_v48  ;;  %vm4163_vm15 = vweird.f32 %v6423_v9 }
0x2f1c   :  { %vm4164_vm3 = vmor %vm4162_vm2, %vm4163_vm15 }
0x2f1d   :  { %v4159_v39 = vsub.f32 1.0, %v4158_v17 }
0x2f1f   :  { %v4160_v43 = vmul.f32 %v6423_v9, %v4159_v39 }
0x2f21   :  { %v4161_v31 = vadd.f32 %v6423_v9, %v4160_v43 }
0x2f23   :  { %v4165_v62 = vsel %vm4164_vm3, %v6423_v9, %v4161_v31 }
0x2f24   :  { %v4170_v21 = vsel %vm4167_vm4, %v4169_v56, %v4165_v62 }
0x2f25   :  { %v4172_v30 = vmul.f32 %v6421_v26, %v4170_v21 }
0x2f27   :  { %v4187_v60 = vperm.slane %v4172_v30, 2  ;;  %v4180_v2 = vperm.slane %v4172_v30, 1  ;;  %v4173_v61 = vperm.slane %v4172_v30, 0  ;;  %v4201_v14 = vperm.slane %v4172_v30, 4 }
0x2f28   :  { %v4208_v18 = vperm.slane %v4172_v30, 5  ;;  %v4194_v29 = vperm.slane %v4172_v30, 3  ;;  %v4222_v51 = vperm.slane %v4172_v30, 7  ;;  %v4215_v40 = vperm.slane %v4172_v30, 6 }
0x2f29   :  { %4192 = vperm.xlu0 %5936, %v4187_v60   ;;  %4185 = vperm.xlu2 %5952, %v4180_v2  }
0x2f2a   :  { %4178 = vperm.xlu1 %5930, %v4173_v61  }
0x2f31   :  { %4206 = vperm.xlu0 %5936, %v4201_v14   ;;  %4213 = vperm.xlu2 %5952, %v4208_v18  }
0x2f32   :  { %4199 = vperm.xlu1 %5930, %v4194_v29  }
0x2f39   :  { %4227 = vperm.xlu0 %5936, %v4222_v51   ;;  %v8736_v51 = vld [vmem:[%s9544_s4 + $0x38] sm:$0xff] }
0x2f3a   :  { %4220 = vperm.xlu1 %5930, %v4215_v40  }
0x2f83   :  { %v4186_v1 = vpop.permute.xlu2 %4185 }
0x2f84   :  { %v4230_v7 = vmul.f32 %v8643_v49, %v4186_v1 }
0x2f86   :  { %v4244_v11 = vsel %vm106_vm0, %v4230_v7, 0.0 }
0x2f87   :  { %v4245_v27 = vrot.slane %v4244_v11, 4 }
0x2f89   :  { %v4246_v38 = vadd.f32 %v4245_v27, %v4244_v11 }
0x2f8b   :  { %v4214_v46 = vpop.permute.xlu2 %4213  ;;  %v4247_v28 = vrot.slane %v4246_v38, 2 }
0x2f8c   :  { %v4234_v3 = vmul.f32 %v8718_v34, %v4214_v46 }
0x2f8d   :  { %v4248_v0 = vadd.f32 %v4247_v28, %v4246_v38 }
0x2f8e   :  { %v4272_v44 = vsel %vm106_vm0, %v4234_v3, 0.0 }
0x2f8f   :  { %v4273_v48 = vrot.slane %v4272_v44, 4  ;;  %v4249_v2 = vrot.slane %v4248_v0, 1 }
0x2f91   :  { %v4274_v62 = vadd.f32 %v4273_v48, %v4272_v44 }
0x2f93   :  { %v4275_v7 = vrot.slane %v4274_v62, 2 }
0x2f9b   :  { %v4193_v50 = vpop.permute.xlu0 %4192 }
0x2f9c   :  { %v4231_v55 = vmul.f32 %v8706_v63, %v4193_v50  ;;  %v4179_v20 = vpop.permute.xlu1 %4178 }
0x2f9d   :  { %v4229_v52 = vmul.f32 %v8712_v57, %v4179_v20  ;;  %v4250_v20 = vadd.f32 %v4249_v2, %v4248_v0  ;;  %v6743_v2 = vld [vmem:[%s9546_s12 + $0x10] sm:$0xff] }
0x2f9e   :  { %v4251_v19 = vsel %vm106_vm0, %v4231_v55, 0.0 }
0x2f9f   :  { %v4252_v35 = vrot.slane %v4251_v19, 4  ;;  %v4237_v24 = vsel %vm106_vm0, %v4229_v52, 0.0 }
0x2fa0   :  { %v4238_v25 = vrot.slane %v4237_v24, 4 }
0x2fa1   :  { %v4253_v4 = vadd.f32 %v4252_v35, %v4251_v19 }
0x2fa2   :  { %v4239_v58 = vadd.f32 %v4238_v25, %v4237_v24  ;;  %v4276_v25 = vadd.f32 %v4275_v7, %v4274_v62 }
0x2fa3   :  { %v4207_v41 = vpop.permute.xlu0 %4206  ;;  %v4254_v6 = vrot.slane %v4253_v4, 2 }
0x2fa4   :  { %v4240_v42 = vrot.slane %v4239_v58, 2  ;;  %v4233_v26 = vmul.f32 %v8727_v12, %v4207_v41  ;;  %v4200_v10 = vpop.permute.xlu1 %4199 }
0x2fa5   :  { %v4232_v9 = vmul.f32 %v8649_v47, %v4200_v10  ;;  %v4255_v31 = vadd.f32 %v4254_v6, %v4253_v4  ;;  %v4277_v10 = vrot.slane %v4276_v25, 1 }
0x2fa6   :  { %v4241_v17 = vadd.f32 %v4240_v42, %v4239_v58  ;;  %v4265_v39 = vsel %vm106_vm0, %v4233_v26, 0.0 }
0x2fa7   :  { %v4266_v43 = vrot.slane %v4265_v39, 4  ;;  %v4258_v5 = vsel %vm106_vm0, %v4232_v9, 0.0  ;;  %v4256_v18 = vrot.slane %v4255_v31, 1 }
0x2fa8   :  { %v4259_v56 = vrot.slane %v4258_v5, 4  ;;  %v4242_v21 = vrot.slane %v4241_v17, 1 }
0x2fa9   :  { %v4267_v30 = vadd.f32 %v4266_v43, %v4265_v39  ;;  %v4257_v19 = vadd.f32 %v4256_v18, %v4255_v31 }
0x2faa   :  { %v4260_v60 = vadd.f32 %v4259_v56, %v4258_v5  ;;  %v4243_v11 = vadd.f32 %v4242_v21, %v4241_v17  ;;  %v4278_v5 = vadd.f32 %v4277_v10, %v4276_v25  ;;  %v8777_v25 = vld [vmem:[%s9549_s5 + $0x10] sm:$0xff] }
0x2fab   :  { %v4268_v61 = vrot.slane %v4267_v30, 2  ;;  %v4228_v14 = vpop.permute.xlu0 %4227 }
0x2fac   :  { %v4261_v29 = vrot.slane %v4260_v60, 2  ;;  %v4236_v40 = vmul.f32 %v8736_v51, %v4228_v14  ;;  %v4221_v1 = vpop.permute.xlu1 %4220  ;;  %v4301_v4 = vsel %vm304_vm6, %v4250_v20, %v4243_v11  ;;  %v6745_v14 = vld [vmem:[%s9546_s12] sm:$0xff] }
0x2fad   :  { %v4269_v27 = vadd.f32 %v4268_v61, %v4267_v30  ;;  %v4235_v46 = vmul.f32 %v8658_v37, %v4221_v1  ;;  %v4302_v42 = vsel %vm306_vm7, %v4257_v19, %v4301_v4  ;;  %v6744_v61 = vld [vmem:[%s9546_s12 + $0x8] sm:$0xff] }
0x2fae   :  { %v4262_v50 = vadd.f32 %v4261_v29, %v4260_v60  ;;  %v4286_v55 = vsel %vm106_vm0, %v4236_v40, 0.0  ;;  %v6742_v60 = vld [vmem:[%s9546_s12 + $0x18] sm:$0xff]  ;;  %v8765_v29 = vld [vmem:[%s9545_s13] ss:$0 sm:$0xff] }
0x2faf   :  { %v4287_v52 = vrot.slane %v4286_v55, 4  ;;  %v4279_v3 = vsel %vm106_vm0, %v4235_v46, 0.0  ;;  %v4270_v38 = vrot.slane %v4269_v27, 1 }
0x2fb0   :  { %v4263_v35 = vrot.slane %v4262_v50, 1  ;;  %v4280_v24 = vrot.slane %v4279_v3, 4 }
0x2fb1   :  { %v4288_v44 = vadd.f32 %v4287_v52, %v4286_v55  ;;  %v4271_v6 = vadd.f32 %v4270_v38, %v4269_v27  ;;  %v8771_v55 = vld [vmem:[%s9549_s5] sm:$0xff] }
0x2fb2   :  { %v4264_v58 = vadd.f32 %v4263_v35, %v4262_v50  ;;  %v4281_v28 = vadd.f32 %v4280_v24, %v4279_v3 }
0x2fb3   :  { %v4289_v41 = vrot.slane %v4288_v44, 2 }
0x2fb4   :  { %v4282_v26 = vrot.slane %v4281_v28, 2  ;;  %v4303_v48 = vsel %vm308_vm8, %v4264_v58, %v4302_v42 }
0x2fb5   :  { %v4290_v9 = vadd.f32 %v4289_v41, %v4288_v44  ;;  %v4304_v43 = vsel %vm310_vm9, %v4271_v6, %v4303_v48  ;;  %v8783_v44 = vld [vmem:[%s9549_s5 + $0x8] sm:$0xff]  ;;  %v8795_v6 = vld [vmem:[%s9549_s5 + $0x30] sm:$0xff] }
0x2fb6   :  { %v4283_v17 = vadd.f32 %v4282_v26, %v4281_v28  ;;  %v4305_v62 = vsel %vm312_vm10, %v4278_v5, %v4304_v43  ;;  %v8789_v28 = vld [vmem:[%s9549_s5 + $0x18] sm:$0xff]  ;;  %v8803_v43 = vld [vmem:[%s9549_s5 + $0x28] sm:$0xff] }
0x2fb7   :  { %v4291_v39 = vrot.slane %v4290_v9, 1 }
0x2fb8   :  { %v4284_v0 = vrot.slane %v4283_v17, 1 }
0x2fb9   :  { %v4292_v31 = vadd.f32 %v4291_v39, %v4290_v9 }
0x2fba   :  { %v4285_v56 = vadd.f32 %v4284_v0, %v4283_v17 }
0x2fbc   :  { %v4306_v21 = vsel %vm314_vm11, %v4285_v56, %v4305_v62 }
0x2fbd   :  { %v4307_v30 = vsel %vm316_vm12, %v4292_v31, %v4306_v21 }
0x2fbe   :  { %5894 = vmatmul.msk.f32.vlgmr.msrb.gmra.mxu2 %vm106_vm0, %v4307_v30 }
0x2fbf   :  { %5670 = vmatpush.msrb.mxu2 %v6742_v60 }
0x2fc1   :  { %5671 = vmatpush.msrb.mxu2 %v6743_v2 }
0x2fc3   :  { %5672 = vmatpush.msrb.mxu2 %v6744_v61 }
0x2fc5   :  { %5673 = vmatpush.msrb.mxu2 %v6745_v14 }
0x3041   :  { %v4327_v18 = vpop.f32.mrf.mxu2 }
0x3042   :  { %v4328_v40 = vadd.f32 %v8765_v29, %v4327_v18 }
0x3044   :  { %v4338_v1 = vperm.slane %v4328_v40, 0  ;;  %v4332_v7 = vrot.slane %v4328_v40, 2  ;;  %v4331_v11 = vrot.slane %v4328_v40, 1  ;;  %v4333_v27 = vrot.slane %v4328_v40, 3 }
0x3045   :  { %v4336_v46 = vrot.slane %v4328_v40, 6  ;;  %v4334_v50 = vrot.slane %v4328_v40, 4  ;;  %v4335_v24 = vrot.slane %v4328_v40, 5  ;;  %v4337_v10 = vrot.slane %v4328_v40, 7 }
0x3046   :  { %v4354_v20 = vadd.f32 %v8771_v55, %v4338_v1  ;;  %v4340_v52 = vperm.slane %v4332_v7, 0  ;;  %v4339_v3 = vperm.slane %v4331_v11, 0  ;;  %v4341_v19 = vperm.slane %v4333_v27, 0 }
0x3047   :  { %v4344_v38 = vperm.slane %v4336_v46, 0  ;;  %v4342_v35 = vperm.slane %v4334_v50, 0  ;;  %v4343_v48 = vperm.slane %v4335_v24, 0  ;;  %v4345_v39 = vperm.slane %v4337_v10, 0 }
0x3048   :  { %6424 = vtanh.f32 %v4354_v20  ;;  %v4356_v4 = vadd.f32 %v8777_v25, %v4340_v52  ;;  %v4355_v58 = vadd.f32 %v8783_v44, %v4339_v3  ;;  %v4357_v41 = vadd.f32 %v8789_v28, %v4341_v19 }
0x3049   :  { %v4360_v42 = vadd.f32 %v8795_v6, %v4344_v38  ;;  %v4358_v26 = vadd.f32 %v8491_v8, %v4342_v35  ;;  %v4359_v5 = vadd.f32 %v8803_v43, %v4343_v48  ;;  %v4361_v60 = vadd.f32 %v8503_v22, %v4345_v39 }
0x304a   :  { %6426 = vtanh.f32 %v4356_v4 }
0x304b   :  { %6428 = vtanh.f32 %v4355_v58 }
0x304c   :  { %6430 = vtanh.f32 %v4357_v41 }
0x304d   :  { %6432 = vtanh.f32 %v4360_v42 }
0x304e   :  { %v6425_v9 = vpop.eup %6424  ;;  %6434 = vtanh.f32 %v4358_v26 }
0x304f   :  { %v4370_v17 = vmul.f32 %v8516_v53, %v6425_v9  ;;  %6436 = vtanh.f32 %v4359_v5 }
0x3050   :  { %v6427_v0 = vpop.eup %6426  ;;  %6438 = vtanh.f32 %v4361_v60 }
0x3051   :  { %v6429_v31 = vpop.eup %6428  ;;  %v4378_v8 = vsel %vm106_vm0, %v4370_v17, 0.0  ;;  %v4372_v56 = vmul.f32 %v8516_v53, %v6427_v0 }
0x3052   :  { %v6431_v62 = vpop.eup %6430  ;;  %4379 = vadd.xlane.f32.xlu2 %v4378_v8  ;;  %v4371_v21 = vmul.f32 %v8516_v53, %v6429_v31 }
0x3053   :  { %v4384_v30 = vsel %vm106_vm0, %v4372_v56, 0.0  ;;  %v6433_v2 = vpop.eup %6432  ;;  %v4373_v18 = vmul.f32 %v8516_v53, %v6431_v62 }
0x3054   :  { %4385 = vadd.xlane.f32.xlu0 %v4384_v30  ;;  %v4381_v61 = vsel %vm106_vm0, %v4371_v21, 0.0  ;;  %v6435_v14 = vpop.eup %6434  ;;  %v4376_v40 = vmul.f32 %v8516_v53, %v6433_v2 }
0x3055   :  { %4382 = vadd.xlane.f32.xlu1 %v4381_v61  ;;  %v4374_v1 = vmul.f32 %v8516_v53, %v6435_v14  ;;  %v4387_v7 = vsel %vm106_vm0, %v4373_v18, 0.0  ;;  %v6437_v11 = vpop.eup %6436 }
0x3056   :  { %v4396_v22 = vsel %vm106_vm0, %v4376_v40, 0.0  ;;  %v6439_v46 = vpop.eup %6438  ;;  %v4375_v50 = vmul.f32 %v8516_v53, %v6437_v11 }
0x3057   :  { %v4390_v27 = vsel %vm106_vm0, %v4374_v1, 0.0  ;;  %v4377_v20 = vmul.f32 %v8516_v53, %v6439_v46 }
0x3058   :  { %v4393_v52 = vsel %vm106_vm0, %v4375_v50, 0.0 }
0x3059   :  { %v4399_v3 = vsel %vm106_vm0, %v4377_v20, 0.0 }
0x305a   :  { %4388 = vadd.xlane.f32.xlu2 %v4387_v7 }
0x305c   :  { %4397 = vadd.xlane.f32.xlu0 %v4396_v22 }
0x305d   :  { %4391 = vadd.xlane.f32.xlu1 %v4390_v27 }
0x3062   :  { %4394 = vadd.xlane.f32.xlu2 %v4393_v52 }
0x3065   :  { %4400 = vadd.xlane.f32.xlu1 %v4399_v3  ;;  %v5895_v3 = vld [vmem:[%s9547_s6 + $0x28] sm:$0xff] }
0x30c5   :  { %v4380_v19 = vpop.xlane.xlu2 %4379 }
0x30c7   :  { %v4386_v38 = vpop.xlane.xlu0 %4385 }
0x30c8   :  { %v4383_v35 = vpop.xlane.xlu1 %4382 }
0x30c9   :  { %6440 = vtanh.f32 %v4383_v35 }
0x30ca   :  { %6442 = vtanh.f32 %v4380_v19 }
0x30cb   :  { %6444 = vtanh.f32 %v4386_v38 }
0x30cd   :  { %v4389_v24 = vpop.xlane.xlu2 %4388 }
0x30ce   :  { %6446 = vtanh.f32 %v4389_v24 }
0x30cf   :  { %v6441_v4 = vpop.eup %6440  ;;  %v4398_v41 = vpop.xlane.xlu0 %4397 }
0x30d0   :  { %v6443_v58 = vpop.eup %6442  ;;  %v4392_v42 = vpop.xlane.xlu1 %4391  ;;  %v4411_v53 = vmul.f32 10.0, %v6441_v4 }
0x30d1   :  { %v6445_v26 = vpop.eup %6444  ;;  %6448 = vtanh.f32 %v4392_v42  ;;  %v4410_v10 = vmul.f32 10.0, %v6443_v58 }
0x30d2   :  { %6450 = vtanh.f32 %v4398_v41  ;;  %v4412_v9 = vmul.f32 10.0, %v6445_v26  ;;  %v4427_v17 = vperm.slane %v4411_v53, %v7002_v45 }
0x30d3   :  { %v4426_v31 = vperm.slane %v4410_v10, %v7002_v45 }
0x30d4   :  { %v6447_v48 = vpop.eup %6446  ;;  %v4428_v8 = vperm.slane %v4412_v9, %v7002_v45 }
0x30d5   :  { %v4413_v39 = vmul.f32 10.0, %v6447_v48  ;;  %v4395_v0 = vpop.xlane.xlu2 %4394  ;;  %v4434_v30 = vsel %vm304_vm6, %v4427_v17, %v4426_v31 }
0x30d6   :  { %6452 = vtanh.f32 %v4395_v0  ;;  %v4435_v61 = vsel %vm306_vm7, %v4428_v8, %v4434_v30 }
0x30d7   :  { %v6449_v5 = vpop.eup %6448  ;;  %v4429_v60 = vperm.slane %v4413_v39, %v7002_v45 }
0x30d8   :  { %v4414_v56 = vmul.f32 10.0, %v6449_v5  ;;  %v4401_v62 = vpop.xlane.xlu1 %4400  ;;  %v6451_v21 = vpop.eup %6450 }
0x30d9   :  { %6454 = vtanh.f32 %v4401_v62  ;;  %v4416_v14 = vmul.f32 10.0, %v6451_v21  ;;  %v4436_v40 = vsel %vm308_vm8, %v4429_v60, %v4435_v61 }
0x30da   :  { %v4430_v18 = vperm.slane %v4414_v56, %v7002_v45 }
0x30db   :  { %v4432_v22 = vperm.slane %v4416_v14, %v7002_v45 }
0x30dc   :  { %v6453_v2 = vpop.eup %6452  ;;  %v4437_v27 = vsel %vm310_vm9, %v4430_v18, %v4436_v40 }
0x30dd   :  { %v4415_v1 = vmul.f32 10.0, %v6453_v2 }
0x30df   :  { %v6455_v7 = vpop.eup %6454  ;;  %v4431_v11 = vperm.slane %v4415_v1, %v7002_v45 }
0x30e0   :  { %v4417_v46 = vmul.f32 10.0, %v6455_v7 }
0x30e1   :  { %v4438_v50 = vsel %vm312_vm10, %v4431_v11, %v4437_v27 }
0x30e2   :  { %v4433_v20 = vperm.slane %v4417_v46, %v7002_v45  ;;  %v4439_v52 = vsel %vm314_vm11, %v4432_v22, %v4438_v50  ;;  %v8870_v46 = vld [vmem:[%s9551_s3 + $0x8] sm:$0xff] }
0x30e4   :  { %v4440_v19 = vsel %vm316_vm12, %v4433_v20, %v4439_v52  ;;  %v8876_v20 = vld [vmem:[%s9551_s3] sm:$0xff] }
0x30e5   :  { %v8842_v38 = vsel %vm4122_vm14, -inf, %v4440_v19 }
0x30e6   :  { %v4470_v35 = vadd.f32 %v5895_v3, %v8842_v38 }
0x30e8   :  { %v4471_v24 = vsel %vm319_vm13, %v4470_v35, -inf }
0x30e9   :  { %4472 = vmax.xlane.f32.xlu2 %v4471_v24 }
0x315c   :  { %v4473_v4 = vpop.xlane.xlu2 %4472 }
0x315d   :  { %vm4474_vm5 = vcmp.ge.f32.partialorder %v4470_v35, %v4473_v4 }
0x315e   :  { %v4475_v58 = vsel %vm4474_vm5, %v7002_v45, 8 }
0x315f   :  { %v4476_v41 = vsel %vm319_vm13, %v4475_v58, 2147483647 }
0x3160   :  { %v4478_v42 = vshra.s32 %v4476_v41, 16  ;;  %v4477_v53 = vand.u32 65535, %v4476_v41 }
0x3162   :  { %v4480_v26 = vcvt.s32.f32 %v4478_v42  ;;  %v4479_v48 = vcvt.s32.f32 %v4477_v53 }
0x3164   :  { %4481 = vmin.xlane.f32.xlu0 %v4480_v26 }
0x31d7   :  { %v4482_v10 = vpop.xlane.xlu0 %4481 }
0x31d8   :  { %vm4483_vm15 = vcmp.eq.f32.partialorder %v4480_v26, %v4482_v10  ;;  %v4488_v17 = vcvt.f32.s32 %v4482_v10 }
0x31d9   :  { %v4484_v9 = vsel %vm4483_vm15, %v4479_v48, inf }
0x31da   :  { %4485 = vmin.xlane.f32.xlu1 %v4484_v9  ;;  %v4489_v0 = vshll.u32 %v4488_v17, 16 }
0x324d   :  { %v4486_v39 = vpop.xlane.xlu1 %4485 }
0x324e   :  { %v4487_v5 = vcvt.f32.s32 %v4486_v39  ;;  %v8884_v39 = vld [vmem:[%s9551_s3 + $0x28] sm:$0xff] }
0x3250   :  { %v4490_v31 = vadd.s32 %v4489_v0, %v4487_v5  ;;  %v8890_v5 = vld [vmem:[%s9551_s3 + $0x20] sm:$0xff] }
0x3252   :  { %vm4491_vm14 = vcmp.eq.s32.totalorder %v7002_v45, %v4490_v31 }
0x3253   :  { %v8850_v8 = vsel %vm4491_vm14, 1.0, %v9625_v33 }
0x3254   :  { %v4527_v56 = vperm.slane %v8850_v8, 4  ;;  %v4534_v62 = vperm.slane %v8850_v8, 5  ;;  %v4513_v21 = vperm.slane %v8850_v8, 2  ;;  %v4520_v30 = vperm.slane %v8850_v8, 3  ;;  %5898 = vst.msk [vmem:[%s9550_s16 + $0x28] sm:$0xff] %vm319_vm13, %v8850_v8 }
0x3255   :  { %v4499_v60 = vperm.slane %v8850_v8, 0  ;;  %v4506_v2 = vperm.slane %v8850_v8, 1  ;;  %v4541_v40 = vperm.slane %v8850_v8, 6  ;;  %v4548_v1 = vperm.slane %v8850_v8, 7 }
0x3256   :  { %v6043_v61 = vpack.i.bf16 %v4534_v62, %v4527_v56  ;;  %v6038_v14 = vpack.i.bf16 %v4520_v30, %v4513_v21 }
0x3257   :  { %v6033_v18 = vpack.i.bf16 %v4506_v2, %v4499_v60  ;;  %v6048_v7 = vpack.i.bf16 %v4548_v1, %v4541_v40 }
0x3258   :  { %6044 = vperm.xlu1 %5930, %v6043_v61   ;;  %6039 = vperm.xlu0 %5936, %v6038_v14  }
0x3259   :  { %6034 = vperm.xlu2 %5952, %v6033_v18  }
0x3260   :  { %6049 = vperm.xlu0 %5936, %v6048_v7  }
0x3261   :  { %4635 = vrot.lane.b32.xlu2 %v8615_v13, %s6788_s0 }
0x32b3   :  { %v6035_v11 = vpop.permute.xlu2 %6034 }
0x32b4   :  { %v6037_v22 = vunpack.i.h.bf16 %v6035_v11  ;;  %v6036_v27 = vunpack.i.l.bf16 %v6035_v11 }
0x32b6   :  { %v4556_v50 = vmul.f32 %v8870_v46, %v6037_v22  ;;  %v4555_v52 = vmul.f32 %v8876_v20, %v6036_v27 }
0x32b8   :  { %v4570_v3 = vsel %vm106_vm0, %v4556_v50, 0.0  ;;  %v4563_v13 = vsel %vm106_vm0, %v4555_v52, 0.0 }
0x32b9   :  { %v4571_v19 = vrot.slane %v4570_v3, 4  ;;  %v4564_v35 = vrot.slane %v4563_v13, 4 }
0x32bb   :  { %v4572_v24 = vadd.f32 %v4571_v19, %v4570_v3  ;;  %v4565_v4 = vadd.f32 %v4564_v35, %v4563_v13 }
0x32bd   :  { %v4573_v58 = vrot.slane %v4572_v24, 2  ;;  %v4566_v41 = vrot.slane %v4565_v4, 2 }
0x32bf   :  { %v4574_v17 = vadd.f32 %v4573_v58, %v4572_v24  ;;  %v4567_v21 = vadd.f32 %v4566_v41, %v4565_v4  ;;  %v8902_v24 = vld [vmem:[%s9551_s3 + $0x38] sm:$0xff]  ;;  %v8908_v58 = vld [vmem:[%s9551_s3 + $0x30] sm:$0xff] }
0x32c1   :  { %v4575_v7 = vrot.slane %v4574_v17, 1 }
0x32ca   :  { %v6045_v42 = vpop.permute.xlu1 %6044  ;;  %v6040_v26 = vpop.permute.xlu0 %6039 }
0x32cb   :  { %v6047_v53 = vunpack.i.h.bf16 %v6045_v42  ;;  %v6046_v10 = vunpack.i.l.bf16 %v6045_v42  ;;  %v6042_v48 = vunpack.i.h.bf16 %v6040_v26  ;;  %v6041_v9 = vunpack.i.l.bf16 %v6040_v26 }
0x32cc   :  { %v4576_v42 = vadd.f32 %v4575_v7, %v4574_v17 }
0x32cd   :  { %v4560_v0 = vmul.f32 %v8884_v39, %v6047_v53  ;;  %v4559_v31 = vmul.f32 %v8890_v5, %v6046_v10  ;;  %v4558_v56 = vmul.f32 %v8574_v15, %v6042_v48  ;;  %v4557_v62 = vmul.f32 %v8580_v59, %v6041_v9 }
0x32ce   :  { %v4568_v59 = vrot.slane %v4567_v21, 1 }
0x32cf   :  { %v4598_v30 = vsel %vm106_vm0, %v4560_v0, 0.0  ;;  %v4591_v60 = vsel %vm106_vm0, %v4559_v31, 0.0  ;;  %v4584_v2 = vsel %vm106_vm0, %v4558_v56, 0.0  ;;  %v4577_v61 = vsel %vm106_vm0, %v4557_v62, 0.0 }
0x32d0   :  { %v4599_v14 = vrot.slane %v4598_v30, 4  ;;  %v4592_v18 = vrot.slane %v4591_v60, 4  ;;  %v4585_v40 = vrot.slane %v4584_v2, 4  ;;  %v4578_v1 = vrot.slane %v4577_v61, 4 }
0x32d1   :  { %v4569_v48 = vadd.f32 %v4568_v59, %v4567_v21 }
0x32d2   :  { %v4600_v11 = vadd.f32 %v4599_v14, %v4598_v30  ;;  %v4593_v22 = vadd.f32 %v4592_v18, %v4591_v60  ;;  %v4586_v27 = vadd.f32 %v4585_v40, %v4584_v2  ;;  %v4579_v15 = vadd.f32 %v4578_v1, %v4577_v61  ;;  %v6050_v50 = vpop.permute.xlu0 %6049 }
0x32d3   :  { %v6052_v52 = vunpack.i.h.bf16 %v6050_v50  ;;  %v6051_v3 = vunpack.i.l.bf16 %v6050_v50  ;;  %v4627_v18 = vsel %vm304_vm6, %v4576_v42, %v4569_v48 }
0x32d4   :  { %v4594_v13 = vrot.slane %v4593_v22, 2  ;;  %v4587_v19 = vrot.slane %v4586_v27, 2  ;;  %v4580_v35 = vrot.slane %v4579_v15, 2  ;;  %v4601_v26 = vrot.slane %v4600_v11, 2 }
0x32d5   :  { %v4562_v4 = vmul.f32 %v8902_v24, %v6052_v52  ;;  %v4561_v41 = vmul.f32 %v8908_v58, %v6051_v3 }
0x32d6   :  { %v4588_v53 = vadd.f32 %v4587_v19, %v4586_v27  ;;  %v4581_v10 = vadd.f32 %v4580_v35, %v4579_v15  ;;  %v4595_v9 = vadd.f32 %v4594_v13, %v4593_v22  ;;  %v4602_v2 = vadd.f32 %v4601_v26, %v4600_v11  ;;  %v4636_v26 = vpop.permute.xlu2 %4635 }
0x32d7   :  { %v4612_v0 = vsel %vm106_vm0, %v4562_v4, 0.0  ;;  %v4605_v31 = vsel %vm106_vm0, %v4561_v41, 0.0 }
0x32d8   :  { %v4589_v56 = vrot.slane %v4588_v53, 1  ;;  %v4582_v62 = vrot.slane %v4581_v10, 1  ;;  %v4613_v30 = vrot.slane %v4612_v0, 4  ;;  %v4606_v60 = vrot.slane %v4605_v31, 4 }
0x32d9   :  { %v4596_v40 = vrot.slane %v4595_v9, 1  ;;  %v4603_v27 = vrot.slane %v4602_v2, 1 }
0x32da   :  { %v4590_v61 = vadd.f32 %v4589_v56, %v4588_v53  ;;  %v4583_v14 = vadd.f32 %v4582_v62, %v4581_v10  ;;  %v4614_v17 = vadd.f32 %v4613_v30, %v4612_v0  ;;  %v4607_v1 = vadd.f32 %v4606_v60, %v4605_v31 }
0x32db   :  { %v4597_v50 = vadd.f32 %v4596_v40, %v4595_v9  ;;  %v4604_v19 = vadd.f32 %v4603_v27, %v4602_v2 }
0x32dc   :  { %v4628_v7 = vsel %vm306_vm7, %v4583_v14, %v4627_v18  ;;  %v4615_v21 = vrot.slane %v4614_v17, 2  ;;  %v4608_v22 = vrot.slane %v4607_v1, 2 }
0x32dd   :  { %v4629_v15 = vsel %vm308_vm8, %v4590_v61, %v4628_v7 }
0x32de   :  { %v4616_v59 = vadd.f32 %v4615_v21, %v4614_v17  ;;  %v4609_v52 = vadd.f32 %v4608_v22, %v4607_v1  ;;  %v4630_v11 = vsel %vm310_vm9, %v4597_v50, %v4629_v15 }
0x32df   :  { %v4631_v41 = vsel %vm312_vm10, %v4604_v19, %v4630_v11 }
0x32e0   :  { %v4617_v3 = vrot.slane %v4616_v59, 1  ;;  %v4610_v13 = vrot.slane %v4609_v52, 1 }
0x32e2   :  { %v4618_v35 = vadd.f32 %v4617_v3, %v4616_v59  ;;  %v4611_v4 = vadd.f32 %v4610_v13, %v4609_v52 }
0x32e4   :  { %v4632_v42 = vsel %vm314_vm11, %v4611_v4, %v4631_v41 }
0x32e5   :  { %v4633_v53 = vsel %vm316_vm12, %v4618_v35, %v4632_v42 }
0x32e6   :  { %v4638_v10 = vsel %vm106_vm0, %v4633_v53, %v4636_v26 }
0x32e7   :  { %5899 = vmatmul.msk.f32.vlgmr.msrb.gmra.mxu0 %vm111_vm1, %v4638_v10 }
0x3364   :  { %v4659_v48 = vpop.f32.mrf.mxu0 }
0x3365   :  { %v4660_v9 = vadd.f32 %v8605_v16, %v4659_v48 }
0x3367   :  { %6456 = vtanh.f32 %v4660_v9  ;;  %v5900_v31 = vmul.f32 -1.442695, %v4660_v9 }
0x3369   :  { %6458 = vpow2.f32 %v5900_v31 }
0x336d   :  { %v6457_v0 = vpop.eup %6456 }
0x336e   :  { %4684 = vrot.lane.b32.xlu0 %v6457_v0, %s6788_s0 }
0x336f   :  { %v6459_v56 = vpop.eup %6458 }
0x3370   :  { %v4665_v62 = vadd.f32 1.0, %v6459_v56 }
0x3372   :  { %6460 = vrcp.f32 %v4665_v62  ;;  %v4677_v18 = vand.u32 2147483648, %v4665_v62  ;;  %vm4671_vm3 = vweird.f32 %v4665_v62  ;;  %v4675_v40 = vand.u32 2147483647, %v4665_v62 }
0x3374   :  { %v4678_v17 = vor.u32 1.1754944e-38, %v4677_v18  ;;  %vm4676_vm5 = vcmp.eq.f32.partialorder %v4675_v40, 8.507059e+37  ;;  %v8945_v18 = vld [vmem:[%s9543_s11] ss:$0 sm:$0xff] }
0x3378   :  { %v6461_v30 = vpop.eup %6460 }
0x3379   :  { %v4667_v60 = vmul.f32 %v6461_v30, %v4665_v62  ;;  %vm4672_vm2 = vweird.f32 %v6461_v30 }
0x337a   :  { %vm4673_vm4 = vmor %vm4671_vm3, %vm4672_vm2 }
0x337b   :  { %v4668_v2 = vsub.f32 1.0, %v4667_v60 }
0x337d   :  { %v4669_v61 = vmul.f32 %v6461_v30, %v4668_v2 }
0x337f   :  { %v4670_v14 = vadd.f32 %v6461_v30, %v4669_v61 }
0x3381   :  { %v4674_v16 = vsel %vm4673_vm4, %v6461_v30, %v4670_v14 }
0x3382   :  { %v4679_v7 = vsel %vm4676_vm5, %v4678_v17, %v4674_v16 }
0x3383   :  { %v4682_v22 = vmul.f32 %v4679_v7, %v8611_v32 }
0x33e0   :  { %v4685_v1 = vpop.permute.xlu0 %4684 }
0x33e1   :  { %v4687_v21 = vmul.f32 %v4685_v1, %v4679_v7 }
0x33e3   :  { %4689 = vrot.lane.b32.xlu1 %v4687_v21, %s6787_s28 }
0x3455   :  { %v4690_v27 = vpop.permute.xlu1 %4689 }
0x3456   :  { %v8926_v15 = vadd.f32 %v4690_v27, %v4682_v22 }
0x3458   :  { %6462 = vtanh.f32 %v8926_v15 }
0x345e   :  { %v6463_v50 = vpop.eup %6462 }
0x345f   :  { %4695 = vrot.lane.b32.xlu2 %v6463_v50, %s6788_s0 }
0x34b9   :  { %v4696_v59 = vpop.permute.xlu2 %4695 }
0x34ba   :  { %v8930_v52 = vmul.f32 %v4696_v59, %v4679_v7 }
0x34bc   :  { %4700 = vrot.lane.b32.xlu0 %v8930_v52, %s6787_s28 }
0x352e   :  { %v4701_v3 = vpop.permute.xlu0 %4700 }
0x352f   :  { %5901 = vmatmul.msk.f32.vlgmr.msra.gmra.mxu1 %vm106_vm0, %v4701_v3 }
0x35ac   :  { %v4721_v13 = vpop.f32.mrf.mxu1 }
0x35ad   :  { %v4722_v32 = vadd.f32 %v8635_v36, %v4721_v13 }
0x35af   :  { %v4732_v11 = vperm.slane %v4722_v32, 0  ;;  %v4726_v19 = vrot.slane %v4722_v32, 2  ;;  %v4725_v35 = vrot.slane %v4722_v32, 1  ;;  %v4727_v4 = vrot.slane %v4722_v32, 3 }
0x35b0   :  { %v4729_v41 = vrot.slane %v4722_v32, 5  ;;  %v4728_v42 = vrot.slane %v4722_v32, 4  ;;  %v4730_v31 = vrot.slane %v4722_v32, 6  ;;  %v4731_v2 = vrot.slane %v4722_v32, 7 }
0x35b1   :  { %v4748_v26 = vadd.f32 %v8712_v57, %v4732_v11  ;;  %v4734_v53 = vperm.slane %v4726_v19, 0  ;;  %v4733_v10 = vperm.slane %v4725_v35, 0  ;;  %v4735_v48 = vperm.slane %v4727_v4, 0 }
0x35b2   :  { %v4737_v9 = vperm.slane %v4729_v41, 0  ;;  %v4736_v0 = vperm.slane %v4728_v42, 0  ;;  %v4738_v61 = vperm.slane %v4730_v31, 0 }
0x35b3   :  { %6464 = vtanh.f32 %v4748_v26  ;;  %v4750_v56 = vadd.f32 %v8706_v63, %v4734_v53  ;;  %v4749_v62 = vadd.f32 %v8643_v49, %v4733_v10  ;;  %v4751_v36 = vadd.f32 %v8649_v47, %v4735_v48 }
0x35b4   :  { %v4753_v30 = vadd.f32 %v8718_v34, %v4737_v9  ;;  %v4752_v60 = vadd.f32 %v8727_v12, %v4736_v0  ;;  %v4739_v47 = vperm.slane %v4731_v2, 0  ;;  %v4754_v16 = vadd.f32 %v8658_v37, %v4738_v61 }
0x35b5   :  { %6466 = vtanh.f32 %v4750_v56 }
0x35b6   :  { %6468 = vtanh.f32 %v4749_v62  ;;  %v4755_v50 = vadd.f32 %v8736_v51, %v4739_v47 }
0x35b7   :  { %6470 = vtanh.f32 %v4751_v36 }
0x35b8   :  { %6472 = vtanh.f32 %v4753_v30 }
0x35b9   :  { %v6465_v14 = vpop.eup %6464  ;;  %6474 = vtanh.f32 %v4752_v60 }
0x35ba   :  { %v4764_v49 = vmul.f32 %v8945_v18, %v6465_v14  ;;  %6476 = vtanh.f32 %v4754_v16 }
0x35bb   :  { %v6467_v40 = vpop.eup %6466  ;;  %6478 = vtanh.f32 %v4755_v50 }
0x35bc   :  { %v6469_v17 = vpop.eup %6468  ;;  %v4772_v1 = vsel %vm106_vm0, %v4764_v49, 0.0  ;;  %v4766_v7 = vmul.f32 %v8945_v18, %v6467_v40 }
0x35bd   :  { %v6471_v21 = vpop.eup %6470  ;;  %4773 = vadd.xlane.f32.xlu1 %v4772_v1  ;;  %v4765_v22 = vmul.f32 %v8945_v18, %v6469_v17 }
0x35be   :  { %v4778_v27 = vsel %vm106_vm0, %v4766_v7, 0.0  ;;  %v6473_v59 = vpop.eup %6472  ;;  %v4767_v37 = vmul.f32 %v8945_v18, %v6471_v21 }
0x35bf   :  { %4779 = vadd.xlane.f32.xlu0 %v4778_v27  ;;  %v4775_v3 = vsel %vm106_vm0, %v4765_v22, 0.0  ;;  %v6475_v13 = vpop.eup %6474  ;;  %v4769_v32 = vmul.f32 %v8945_v18, %v6473_v59  ;;  %v8979_v22 = vmax.f32 %v8691_v54, %v8850_v8 }
0x35c0   :  { %4776 = vadd.xlane.f32.xlu2 %v4775_v3  ;;  %v4768_v11 = vmul.f32 %v8945_v18, %v6475_v13  ;;  %v4781_v19 = vsel %vm106_vm0, %v4767_v37, 0.0  ;;  %v6477_v35 = vpop.eup %6476 }
0x35c1   :  { %v4787_v4 = vsel %vm106_vm0, %v4769_v32, 0.0  ;;  %v6479_v42 = vpop.eup %6478  ;;  %v4770_v26 = vmul.f32 %v8945_v18, %v6477_v35  ;;  %vm4796_vm15 = vcmp.gt.f32.partialorder %v8979_v22, 0.5 }
0x35c2   :  { %v4784_v41 = vsel %vm106_vm0, %v4768_v11, 0.0  ;;  %v4771_v53 = vmul.f32 %v8945_v18, %v6479_v42 }
0x35c3   :  { %v4790_v10 = vsel %vm106_vm0, %v4770_v26, 0.0 }
0x35c4   :  { %v4793_v48 = vsel %vm106_vm0, %v4771_v53, 0.0 }
0x35c5   :  { %4782 = vadd.xlane.f32.xlu1 %v4781_v19 }
0x35c7   :  { %4788 = vadd.xlane.f32.xlu0 %v4787_v4 }
0x35c8   :  { %4785 = vadd.xlane.f32.xlu2 %v4784_v41 }
0x35cd   :  { %4791 = vadd.xlane.f32.xlu1 %v4790_v10 }
0x35d0   :  { %4794 = vadd.xlane.f32.xlu2 %v4793_v48 }
0x3630   :  { %v4774_v9 = vpop.xlane.xlu1 %4773 }
0x3631   :  { %v4805_v62 = vperm.slane %v4774_v9, %v7002_v45 }
0x3632   :  { %v4780_v0 = vpop.xlane.xlu0 %4779 }
0x3633   :  { %v4777_v31 = vpop.xlane.xlu2 %4776  ;;  %v4807_v36 = vperm.slane %v4780_v0, %v7002_v45 }
0x3634   :  { %v4806_v56 = vperm.slane %v4777_v31, %v7002_v45 }
0x3636   :  { %v4813_v30 = vsel %vm304_vm6, %v4806_v56, %v4805_v62 }
0x3637   :  { %v4814_v61 = vsel %vm306_vm7, %v4807_v36, %v4813_v30 }
0x3638   :  { %v4783_v60 = vpop.xlane.xlu1 %4782 }
0x3639   :  { %v4808_v2 = vperm.slane %v4783_v60, %v7002_v45 }
0x363a   :  { %v4789_v14 = vpop.xlane.xlu0 %4788 }
0x363b   :  { %v4786_v49 = vpop.xlane.xlu2 %4785  ;;  %v4815_v47 = vsel %vm308_vm8, %v4808_v2, %v4814_v61  ;;  %v4810_v16 = vperm.slane %v4789_v14, %v7002_v45 }
0x363c   :  { %v4809_v40 = vperm.slane %v4786_v49, %v7002_v45 }
0x363e   :  { %v4816_v17 = vsel %vm310_vm9, %v4809_v40, %v4815_v47 }
0x363f   :  { %v4817_v21 = vsel %vm312_vm10, %v4810_v16, %v4816_v17 }
0x3640   :  { %v4792_v1 = vpop.xlane.xlu1 %4791 }
0x3641   :  { %v4811_v7 = vperm.slane %v4792_v1, %v7002_v45  ;;  %v8994_v1 = vld [vmem:[%s9544_s4 + $0x18] sm:$0xff] }
0x3643   :  { %v4818_v27 = vsel %vm314_vm11, %v4811_v7, %v4817_v21  ;;  %v4795_v50 = vpop.xlane.xlu2 %4794 }
0x3644   :  { %v4812_v59 = vperm.slane %v4795_v50, %v7002_v45 }
0x3646   :  { %v4819_v3 = vsel %vm316_vm12, %v4812_v59, %v4818_v27 }
0x3647   :  { %v4821_v13 = vsel %vm4796_vm15, -inf, %v4819_v3 }
0x3648   :  { %v4822_v37 = vsel %vm319_vm13, %v4821_v13, -inf }
0x3649   :  { %4823 = vmax.xlane.f32.xlu0 %v4822_v37 }
0x36bc   :  { %v4824_v32 = vpop.xlane.xlu0 %4823 }
0x36bd   :  { %v4825_v11 = vsub.f32 %v4821_v13, %v4824_v32 }
0x36bf   :  { %v4826_v19 = vmul.f32 1.442695, %v4825_v11  ;;  %v9003_v11 = vld [vmem:[%s9544_s4 + $0x8] sm:$0xff] }
0x36c1   :  { %6480 = vpow2.f32 %v4826_v19 }
0x36c7   :  { %v6481_v54 = vpop.eup %6480 }
0x36c8   :  { %v4828_v8 = vsel %vm319_vm13, %v6481_v54, 0.0 }
0x36c9   :  { %4829 = vadd.xlane.f32.xlu1 %v4828_v8 }
0x373c   :  { %v4830_v35 = vpop.xlane.xlu1 %4829 }
0x373d   :  { %6482 = vrcp.f32 %v4830_v35  ;;  %v4842_v26 = vand.u32 2147483648, %v4830_v35  ;;  %v4840_v10 = vand.u32 2147483647, %v4830_v35  ;;  %vm4836_vm2 = vweird.f32 %v4830_v35 }
0x373f   :  { %v4843_v9 = vor.u32 1.1754944e-38, %v4842_v26  ;;  %vm4841_vm4 = vcmp.eq.f32.partialorder %v4840_v10, 8.507059e+37 }
0x3743   :  { %v6483_v4 = vpop.eup %6482 }
0x3744   :  { %v4832_v41 = vmul.f32 %v6483_v4, %v4830_v35  ;;  %vm4837_vm14 = vweird.f32 %v6483_v4 }
0x3745   :  { %vm4838_vm3 = vmor %vm4836_vm2, %vm4837_vm14 }
0x3746   :  { %v4833_v42 = vsub.f32 1.0, %v4832_v41 }
0x3748   :  { %v4834_v53 = vmul.f32 %v6483_v4, %v4833_v42 }
0x374a   :  { %v4835_v48 = vadd.f32 %v6483_v4, %v4834_v53 }
0x374c   :  { %v4839_v0 = vsel %vm4838_vm3, %v6483_v4, %v4835_v48 }
0x374d   :  { %v4844_v31 = vsel %vm4841_vm4, %v4843_v9, %v4839_v0 }
0x374e   :  { %v4846_v56 = vmul.f32 %v6481_v54, %v4844_v31 }
0x3750   :  { %v4861_v62 = vperm.slane %v4846_v56, 2  ;;  %v4854_v36 = vperm.slane %v4846_v56, 1  ;;  %v4847_v30 = vperm.slane %v4846_v56, 0  ;;  %v4889_v60 = vperm.slane %v4846_v56, 6 }
0x3751   :  { %v4875_v2 = vperm.slane %v4846_v56, 4  ;;  %v4868_v61 = vperm.slane %v4846_v56, 3  ;;  %v4896_v14 = vperm.slane %v4846_v56, 7  ;;  %v4882_v49 = vperm.slane %v4846_v56, 5 }
0x3752   :  { %4866 = vperm.xlu1 %5930, %v4861_v62   ;;  %4859 = vperm.xlu0 %5936, %v4854_v36   ;;  %v9012_v62 = vld [vmem:[%s9544_s4 + $0x30] sm:$0xff] }
0x3753   :  { %4852 = vperm.xlu2 %5952, %v4847_v30  }
0x375a   :  { %4894 = vperm.xlu1 %5930, %v4889_v60   ;;  %4880 = vperm.xlu0 %5936, %v4875_v2  }
0x375b   :  { %4873 = vperm.xlu2 %5952, %v4868_v61  }
0x3762   :  { %4901 = vperm.xlu0 %5936, %v4896_v14  }
0x3763   :  { %4887 = vperm.xlu2 %5952, %v4882_v49  }
0x37ad   :  { %v4853_v47 = vpop.permute.xlu2 %4852 }
0x37ae   :  { %v4903_v16 = vmul.f32 %v8712_v57, %v4853_v47 }
0x37b0   :  { %v4911_v17 = vsel %vm106_vm0, %v4903_v16, 0.0 }
0x37b1   :  { %v4912_v21 = vrot.slane %v4911_v17, 4 }
0x37b3   :  { %v4913_v3 = vadd.f32 %v4912_v21, %v4911_v17 }
0x37b5   :  { %v4874_v40 = vpop.permute.xlu2 %4873 }
0x37b6   :  { %v4906_v7 = vmul.f32 %v8994_v1, %v4874_v40 }
0x37b8   :  { %v4932_v50 = vsel %vm106_vm0, %v4906_v7, 0.0 }
0x37b9   :  { %v4933_v32 = vrot.slane %v4932_v50, 4 }
0x37bb   :  { %v4934_v42 = vadd.f32 %v4933_v32, %v4932_v50 }
0x37bd   :  { %v4888_v27 = vpop.permute.xlu2 %4887  ;;  %v4935_v56 = vrot.slane %v4934_v42, 2 }
0x37be   :  { %v4908_v59 = vmul.f32 %v8718_v34, %v4888_v27  ;;  %v4914_v34 = vrot.slane %v4913_v3, 2 }
0x37bf   :  { %v4936_v7 = vadd.f32 %v4935_v56, %v4934_v42 }
0x37c0   :  { %v4946_v54 = vsel %vm106_vm0, %v4908_v59, 0.0  ;;  %v4915_v10 = vadd.f32 %v4914_v34, %v4913_v3 }
0x37c1   :  { %v4947_v26 = vrot.slane %v4946_v54, 4 }
0x37c2   :  { %v4916_v47 = vrot.slane %v4915_v10, 1 }
0x37c3   :  { %v4948_v60 = vadd.f32 %v4947_v26, %v4946_v54  ;;  %v4937_v54 = vrot.slane %v4936_v7, 1 }
0x37c4   :  { %v4867_v13 = vpop.permute.xlu1 %4866  ;;  %v4860_v37 = vpop.permute.xlu0 %4859 }
0x37c5   :  { %v4905_v57 = vmul.f32 %v8706_v63, %v4867_v13  ;;  %v4904_v19 = vmul.f32 %v9003_v11, %v4860_v37  ;;  %v4949_v27 = vrot.slane %v4948_v60, 2  ;;  %v4917_v13 = vadd.f32 %v4916_v47, %v4915_v10 }
0x37c7   :  { %v4925_v8 = vsel %vm106_vm0, %v4905_v57, 0.0  ;;  %v4918_v35 = vsel %vm106_vm0, %v4904_v19, 0.0 }
0x37c8   :  { %v4926_v4 = vrot.slane %v4925_v8, 4  ;;  %v4919_v41 = vrot.slane %v4918_v35, 4 }
0x37ca   :  { %v4927_v53 = vadd.f32 %v4926_v4, %v4925_v8  ;;  %v4920_v63 = vadd.f32 %v4919_v41, %v4918_v35  ;;  %v4950_v8 = vadd.f32 %v4949_v27, %v4948_v60 }
0x37cc   :  { %v4928_v48 = vrot.slane %v4927_v53, 2  ;;  %v4921_v9 = vrot.slane %v4920_v63, 2  ;;  %v4895_v0 = vpop.permute.xlu1 %4894  ;;  %v4881_v31 = vpop.permute.xlu0 %4880  ;;  %v4951_v10 = vrot.slane %v4950_v8, 1 }
0x37cd   :  { %v4909_v36 = vmul.f32 %v9012_v62, %v4895_v0  ;;  %v4907_v30 = vmul.f32 %v8727_v12, %v4881_v31 }
0x37ce   :  { %v4929_v2 = vadd.f32 %v4928_v48, %v4927_v53  ;;  %v4922_v61 = vadd.f32 %v4921_v9, %v4920_v63  ;;  %v4938_v63 = vadd.f32 %v4937_v54, %v4936_v7 }
0x37cf   :  { %v4953_v14 = vsel %vm106_vm0, %v4909_v36, 0.0  ;;  %v4939_v49 = vsel %vm106_vm0, %v4907_v30, 0.0  ;;  %v4952_v36 = vadd.f32 %v4951_v10, %v4950_v8 }
0x37d0   :  { %v4923_v40 = vrot.slane %v4922_v61, 1  ;;  %v4954_v16 = vrot.slane %v4953_v14, 4  ;;  %v4940_v17 = vrot.slane %v4939_v49, 4  ;;  %v4930_v21 = vrot.slane %v4929_v2, 1 }
0x37d2   :  { %v4924_v50 = vadd.f32 %v4923_v40, %v4922_v61  ;;  %v4955_v59 = vadd.f32 %v4954_v16, %v4953_v14  ;;  %v4941_v3 = vadd.f32 %v4940_v17, %v4939_v49  ;;  %v4931_v32 = vadd.f32 %v4930_v21, %v4929_v2 }
0x37d4   :  { %v4942_v37 = vrot.slane %v4941_v3, 2  ;;  %v4902_v12 = vpop.permute.xlu0 %4901  ;;  %v4956_v57 = vrot.slane %v4955_v59, 2  ;;  %v4975_v35 = vsel %vm304_vm6, %v4924_v50, %v4917_v13 }
0x37d5   :  { %v4910_v19 = vmul.f32 %v8736_v51, %v4902_v12  ;;  %v4976_v26 = vsel %vm306_vm7, %v4931_v32, %v4975_v35 }
0x37d6   :  { %v4943_v34 = vadd.f32 %v4942_v37, %v4941_v3  ;;  %v4957_v53 = vadd.f32 %v4956_v57, %v4955_v59  ;;  %v4977_v0 = vsel %vm308_vm8, %v4938_v63, %v4976_v26 }
0x37d7   :  { %v4960_v4 = vsel %vm106_vm0, %v4910_v19, 0.0 }
0x37d8   :  { %v4944_v41 = vrot.slane %v4943_v34, 1  ;;  %v4961_v42 = vrot.slane %v4960_v4, 4  ;;  %v4958_v51 = vrot.slane %v4957_v53, 1 }
0x37da   :  { %v4945_v48 = vadd.f32 %v4944_v41, %v4943_v34  ;;  %v4962_v9 = vadd.f32 %v4961_v42, %v4960_v4  ;;  %v4959_v61 = vadd.f32 %v4958_v51, %v4957_v53 }
0x37dc   :  { %v4963_v31 = vrot.slane %v4962_v9, 2  ;;  %v4978_v56 = vsel %vm310_vm9, %v4945_v48, %v4977_v0 }
0x37dd   :  { %v4979_v2 = vsel %vm312_vm10, %v4952_v36, %v4978_v56 }
0x37de   :  { %v4964_v30 = vadd.f32 %v4963_v31, %v4962_v9  ;;  %v4980_v49 = vsel %vm314_vm11, %v4959_v61, %v4979_v2  ;;  %v6765_v31 = vld [vmem:[%s9549_s5 + $0x38] sm:$0xff] }
0x37e0   :  { %v4965_v60 = vrot.slane %v4964_v30, 1 }
0x37e2   :  { %v4966_v14 = vadd.f32 %v4965_v60, %v4964_v30 }
0x37e4   :  { %v4981_v47 = vsel %vm316_vm12, %v4966_v14, %v4980_v49 }
0x37e5   :  { %5902 = vmatmul.msk.f32.vlgmr.msra.gmra.mxu2 %vm106_vm0, %v4981_v47 }
0x3868   :  { %v5001_v40 = vpop.f32.mrf.mxu2 }
0x3869   :  { %v5002_v16 = vadd.f32 %v8765_v29, %v5001_v40 }
0x386b   :  { %v5012_v17 = vperm.slane %v5002_v16, 0  ;;  %v5006_v7 = vrot.slane %v5002_v16, 2  ;;  %v5005_v21 = vrot.slane %v5002_v16, 1  ;;  %v5007_v27 = vrot.slane %v5002_v16, 3 }
0x386c   :  { %v5009_v50 = vrot.slane %v5002_v16, 5  ;;  %v5008_v59 = vrot.slane %v5002_v16, 4  ;;  %v5010_v19 = vrot.slane %v5002_v16, 6  ;;  %v5011_v4 = vrot.slane %v5002_v16, 7 }
0x386d   :  { %v5028_v3 = vadd.f32 %v8771_v55, %v5012_v17  ;;  %v5014_v13 = vperm.slane %v5006_v7, 0  ;;  %v5013_v37 = vperm.slane %v5005_v21, 0  ;;  %v5015_v12 = vperm.slane %v5007_v27, 0  ;;  %v6763_v55 = vld [vmem:[%s9549_s5 + $0x20] sm:$0xff] }
0x386e   :  { %v5017_v32 = vperm.slane %v5009_v50, 0  ;;  %v5016_v57 = vperm.slane %v5008_v59, 0  ;;  %v5018_v41 = vperm.slane %v5010_v19, 0 }
0x386f   :  { %6484 = vtanh.f32 %v5028_v3  ;;  %v5030_v54 = vadd.f32 %v8777_v25, %v5014_v13  ;;  %v5029_v8 = vadd.f32 %v8783_v44, %v5013_v37  ;;  %v5031_v29 = vadd.f32 %v8789_v28, %v5015_v12  ;;  %v6764_v25 = vld [vmem:[%s9548_s14] ss:$0 sm:$0xff] }
0x3870   :  { %v5033_v35 = vadd.f32 %v8803_v43, %v5017_v32  ;;  %v5032_v34 = vadd.f32 %v6763_v55, %v5016_v57  ;;  %v5019_v28 = vperm.slane %v5011_v4, 0  ;;  %v5034_v43 = vadd.f32 %v8795_v6, %v5018_v41 }
0x3871   :  { %6486 = vtanh.f32 %v5030_v54 }
0x3872   :  { %6488 = vtanh.f32 %v5029_v8  ;;  %v5035_v51 = vadd.f32 %v6765_v31, %v5019_v28 }
0x3873   :  { %6490 = vtanh.f32 %v5031_v29 }
0x3874   :  { %6492 = vtanh.f32 %v5033_v35 }
0x3875   :  { %v6485_v42 = vpop.eup %6484  ;;  %6494 = vtanh.f32 %v5032_v34 }
0x3876   :  { %v5044_v44 = vmul.f32 %v6764_v25, %v6485_v42  ;;  %6496 = vtanh.f32 %v5034_v43 }
0x3877   :  { %v6487_v26 = vpop.eup %6486  ;;  %6498 = vtanh.f32 %v5035_v51 }
0x3878   :  { %v6489_v53 = vpop.eup %6488  ;;  %v5052_v63 = vsel %vm106_vm0, %v5044_v44, 0.0  ;;  %v5046_v10 = vmul.f32 %v6764_v25, %v6487_v26 }
0x3879   :  { %v6491_v48 = vpop.eup %6490  ;;  %5053 = vadd.xlane.f32.xlu2 %v5052_v63  ;;  %v5045_v9 = vmul.f32 %v6764_v25, %v6489_v53 }
0x387a   :  { %v5058_v0 = vsel %vm106_vm0, %v5046_v10, 0.0  ;;  %v6493_v56 = vpop.eup %6492  ;;  %v5047_v30 = vmul.f32 %v6764_v25, %v6491_v48 }
0x387b   :  { %5059 = vadd.xlane.f32.xlu0 %v5058_v0  ;;  %v5055_v36 = vsel %vm106_vm0, %v5045_v9, 0.0  ;;  %v6495_v6 = vpop.eup %6494  ;;  %v5049_v60 = vmul.f32 %v6764_v25, %v6493_v56 }
0x387c   :  { %5056 = vadd.xlane.f32.xlu1 %v5055_v36  ;;  %v5048_v2 = vmul.f32 %v6764_v25, %v6495_v6  ;;  %v5061_v61 = vsel %vm106_vm0, %v5047_v30, 0.0  ;;  %v6497_v14 = vpop.eup %6496 }
0x387d   :  { %v5067_v49 = vsel %vm106_vm0, %v5049_v60, 0.0  ;;  %v6499_v40 = vpop.eup %6498  ;;  %v5050_v16 = vmul.f32 %v6764_v25, %v6497_v14 }
0x387e   :  { %v5064_v47 = vsel %vm106_vm0, %v5048_v2, 0.0  ;;  %v5051_v17 = vmul.f32 %v6764_v25, %v6499_v40 }
0x387f   :  { %v5070_v7 = vsel %vm106_vm0, %v5050_v16, 0.0 }
0x3880   :  { %v5073_v21 = vsel %vm106_vm0, %v5051_v17, 0.0 }
0x3881   :  { %5062 = vadd.xlane.f32.xlu2 %v5061_v61  ;;  %v5903_v61 = vld [vmem:[%s9547_s6 + $0x30] sm:$0xff] }
0x3883   :  { %5068 = vadd.xlane.f32.xlu0 %v5067_v49 }
0x3884   :  { %5065 = vadd.xlane.f32.xlu1 %v5064_v47 }
0x3889   :  { %5071 = vadd.xlane.f32.xlu2 %v5070_v7 }
0x388c   :  { %5074 = vadd.xlane.f32.xlu1 %v5073_v21 }
0x38ec   :  { %v5054_v27 = vpop.xlane.xlu2 %5053 }
0x38ed   :  { %6500 = vtanh.f32 %v5054_v27 }
0x38ee   :  { %v5060_v50 = vpop.xlane.xlu0 %5059 }
0x38ef   :  { %6502 = vtanh.f32 %v5060_v50  ;;  %v5057_v59 = vpop.xlane.xlu1 %5056 }
0x38f0   :  { %6504 = vtanh.f32 %v5057_v59 }
0x38f3   :  { %v6501_v3 = vpop.eup %6500 }
0x38f4   :  { %v5063_v13 = vpop.xlane.xlu2 %5062  ;;  %v5084_v57 = vmul.f32 10.0, %v6501_v3 }
0x38f5   :  { %v6503_v37 = vpop.eup %6502  ;;  %6506 = vtanh.f32 %v5063_v13 }
0x38f6   :  { %v6505_v12 = vpop.eup %6504  ;;  %v5069_v32 = vpop.xlane.xlu0 %5068  ;;  %v5086_v8 = vmul.f32 10.0, %v6503_v37  ;;  %v5100_v55 = vperm.slane %v5084_v57, %v7002_v45 }
0x38f7   :  { %v5085_v19 = vmul.f32 10.0, %v6505_v12  ;;  %6508 = vtanh.f32 %v5069_v32  ;;  %v5066_v54 = vpop.xlane.xlu1 %5065 }
0x38f8   :  { %6510 = vtanh.f32 %v5066_v54  ;;  %v5102_v34 = vperm.slane %v5086_v8, %v7002_v45 }
0x38f9   :  { %v5101_v29 = vperm.slane %v5085_v19, %v7002_v45 }
0x38fb   :  { %v6507_v35 = vpop.eup %6506  ;;  %v5108_v25 = vsel %vm304_vm6, %v5101_v29, %v5100_v55 }
0x38fc   :  { %v5087_v4 = vmul.f32 10.0, %v6507_v35  ;;  %v5072_v41 = vpop.xlane.xlu2 %5071  ;;  %v5109_v63 = vsel %vm306_vm7, %v5102_v34, %v5108_v25 }
0x38fd   :  { %v6509_v42 = vpop.eup %6508  ;;  %6512 = vtanh.f32 %v5072_v41 }
0x38fe   :  { %v6511_v44 = vpop.eup %6510  ;;  %v5103_v28 = vperm.slane %v5087_v4, %v7002_v45  ;;  %v5089_v26 = vmul.f32 10.0, %v6509_v42 }
0x38ff   :  { %v5088_v43 = vmul.f32 10.0, %v6511_v44  ;;  %v5075_v53 = vpop.xlane.xlu1 %5074 }
0x3900   :  { %6514 = vtanh.f32 %v5075_v53  ;;  %v5110_v10 = vsel %vm308_vm8, %v5103_v28, %v5109_v63  ;;  %v5105_v0 = vperm.slane %v5089_v26, %v7002_v45 }
0x3901   :  { %v5104_v48 = vperm.slane %v5088_v43, %v7002_v45 }
0x3903   :  { %v6513_v9 = vpop.eup %6512  ;;  %v5111_v31 = vsel %vm310_vm9, %v5104_v48, %v5110_v10  ;;  %v6766_v10 = vld [vmem:[%s9551_s3 + $0x18] sm:$0xff] }
0x3904   :  { %v5090_v51 = vmul.f32 10.0, %v6513_v9  ;;  %v5112_v6 = vsel %vm312_vm10, %v5105_v0, %v5111_v31  ;;  %v6767_v9 = vld [vmem:[%s9551_s3 + $0x10] sm:$0xff] }
0x3906   :  { %v6515_v56 = vpop.eup %6514  ;;  %v5106_v36 = vperm.slane %v5090_v51, %v7002_v45 }
0x3907   :  { %v5091_v30 = vmul.f32 10.0, %v6515_v56 }
0x3908   :  { %v5113_v60 = vsel %vm314_vm11, %v5106_v36, %v5112_v6 }
0x3909   :  { %v5107_v2 = vperm.slane %v5091_v30, %v7002_v45 }
0x390b   :  { %v5114_v14 = vsel %vm316_vm12, %v5107_v2, %v5113_v60 }
0x390c   :  { %v9072_v49 = vsel %vm4796_vm15, -inf, %v5114_v14 }
0x390d   :  { %v5144_v47 = vadd.f32 %v5903_v61, %v9072_v49 }
0x390f   :  { %v5145_v40 = vsel %vm319_vm13, %v5144_v47, -inf }
0x3910   :  { %5146 = vmax.xlane.f32.xlu0 %v5145_v40 }
0x3983   :  { %v5147_v16 = vpop.xlane.xlu0 %5146 }
0x3984   :  { %vm5148_vm5 = vcmp.ge.f32.partialorder %v5144_v47, %v5147_v16 }
0x3985   :  { %v5149_v17 = vsel %vm5148_vm5, %v7002_v45, 8 }
0x3986   :  { %v5150_v7 = vsel %vm319_vm13, %v5149_v17, 2147483647 }
0x3987   :  { %v5152_v21 = vshra.s32 %v5150_v7, 16  ;;  %v5151_v50 = vand.u32 65535, %v5150_v7 }
0x3989   :  { %v5154_v27 = vcvt.s32.f32 %v5152_v21  ;;  %v5153_v3 = vcvt.s32.f32 %v5151_v50 }
0x398b   :  { %5155 = vmin.xlane.f32.xlu2 %v5154_v27 }
0x39fe   :  { %v5156_v59 = vpop.xlane.xlu2 %5155 }
0x39ff   :  { %vm5157_vm14 = vcmp.eq.f32.partialorder %v5154_v27, %v5156_v59  ;;  %v5162_v37 = vcvt.f32.s32 %v5156_v59 }
0x3a00   :  { %v5158_v13 = vsel %vm5157_vm14, %v5153_v3, inf }
0x3a01   :  { %5159 = vmin.xlane.f32.xlu1 %v5158_v13  ;;  %v5163_v32 = vshll.u32 %v5162_v37, 16 }
0x3a74   :  { %v5160_v12 = vpop.xlane.xlu1 %5159 }
0x3a75   :  { %v5161_v57 = vcvt.f32.s32 %v5160_v12 }
0x3a77   :  { %v5164_v19 = vadd.s32 %v5163_v32, %v5161_v57 }
0x3a79   :  { %vm5165_vm15 = vcmp.eq.s32.totalorder %v7002_v45, %v5164_v19 }
0x3a7a   :  { %v9080_v54 = vsel %vm5165_vm15, 1.0, %v9625_v33 }
0x3a7b   :  { %v5201_v8 = vperm.slane %v9080_v54, 4  ;;  %v5208_v29 = vperm.slane %v9080_v54, 5  ;;  %v5187_v35 = vperm.slane %v9080_v54, 2  ;;  %v5194_v55 = vperm.slane %v9080_v54, 3  ;;  %5906 = vst.msk [vmem:[%s9550_s16 + $0x30] sm:$0xff] %vm319_vm13, %v9080_v54 }
0x3a7c   :  { %v5173_v34 = vperm.slane %v9080_v54, 0  ;;  %v5180_v4 = vperm.slane %v9080_v54, 1  ;;  %v5215_v44 = vperm.slane %v9080_v54, 6  ;;  %v5222_v28 = vperm.slane %v9080_v54, 7 }
0x3a7d   :  { %v6063_v41 = vpack.i.bf16 %v5208_v29, %v5201_v8  ;;  %v6058_v42 = vpack.i.bf16 %v5194_v55, %v5187_v35 }
0x3a7e   :  { %v6053_v25 = vpack.i.bf16 %v5180_v4, %v5173_v34  ;;  %v6068_v26 = vpack.i.bf16 %v5222_v28, %v5215_v44 }
0x3a7f   :  { %6064 = vperm.xlu1 %5930, %v6063_v41   ;;  %6059 = vperm.xlu2 %5952, %v6058_v42  }
0x3a80   :  { %6054 = vperm.xlu0 %5936, %v6053_v25  }
0x3a88   :  { %6069 = vperm.xlu0 %5936, %v6068_v26  }
0x3a90   :  { %5309 = vrot.lane.b32.xlu0 %v8930_v52, %s6788_s0 }
0x3ad9   :  { %v6060_v43 = vpop.permute.xlu2 %6059 }
0x3ada   :  { %v6062_v53 = vunpack.i.h.bf16 %v6060_v43  ;;  %v6061_v63 = vunpack.i.l.bf16 %v6060_v43 }
0x3adc   :  { %v5232_v48 = vmul.f32 %v6766_v10, %v6062_v53  ;;  %v5231_v0 = vmul.f32 %v6767_v9, %v6061_v63 }
0x3ade   :  { %v5258_v31 = vsel %vm106_vm0, %v5232_v48, 0.0  ;;  %v5251_v51 = vsel %vm106_vm0, %v5231_v0, 0.0 }
0x3adf   :  { %v5259_v56 = vrot.slane %v5258_v31, 4  ;;  %v5252_v36 = vrot.slane %v5251_v51, 4 }
0x3ae1   :  { %v5260_v6 = vadd.f32 %v5259_v56, %v5258_v31  ;;  %v5253_v30 = vadd.f32 %v5252_v36, %v5251_v51 }
0x3ae3   :  { %v5261_v21 = vrot.slane %v5260_v6, 2  ;;  %v5254_v27 = vrot.slane %v5253_v30, 2 }
0x3ae5   :  { %v5262_v19 = vadd.f32 %v5261_v21, %v5260_v6  ;;  %v5255_v29 = vadd.f32 %v5254_v27, %v5253_v30 }
0x3ae7   :  { %v5263_v53 = vrot.slane %v5262_v19, 1  ;;  %v5256_v63 = vrot.slane %v5255_v29, 1 }
0x3af1   :  { %v6065_v52 = vpop.permute.xlu1 %6064 }
0x3af2   :  { %v6067_v60 = vunpack.i.h.bf16 %v6065_v52  ;;  %v6066_v2 = vunpack.i.l.bf16 %v6065_v52  ;;  %v6055_v61 = vpop.permute.xlu0 %6054 }
0x3af3   :  { %v6057_v14 = vunpack.i.h.bf16 %v6055_v61  ;;  %v6056_v47 = vunpack.i.l.bf16 %v6055_v61 }
0x3af4   :  { %v5234_v40 = vmul.f32 %v8884_v39, %v6067_v60  ;;  %v5233_v16 = vmul.f32 %v8890_v5, %v6066_v2  ;;  %v5257_v60 = vadd.f32 %v5256_v63, %v5255_v29 }
0x3af5   :  { %v5230_v17 = vmul.f32 %v8870_v46, %v6057_v14  ;;  %v5229_v7 = vmul.f32 %v8876_v20, %v6056_v47 }
0x3af6   :  { %v5272_v50 = vsel %vm106_vm0, %v5234_v40, 0.0  ;;  %v5265_v59 = vsel %vm106_vm0, %v5233_v16, 0.0 }
0x3af7   :  { %v5273_v3 = vrot.slane %v5272_v50, 4  ;;  %v5266_v13 = vrot.slane %v5265_v59, 4  ;;  %v5244_v37 = vsel %vm106_vm0, %v5230_v17, 0.0  ;;  %v5237_v12 = vsel %vm106_vm0, %v5229_v7, 0.0 }
0x3af8   :  { %v5245_v32 = vrot.slane %v5244_v37, 4  ;;  %v5238_v39 = vrot.slane %v5237_v12, 4 }
0x3af9   :  { %v5274_v57 = vadd.f32 %v5273_v3, %v5272_v50  ;;  %v5267_v5 = vadd.f32 %v5266_v13, %v5265_v59 }
0x3afa   :  { %v5246_v46 = vadd.f32 %v5245_v32, %v5244_v37  ;;  %v5239_v8 = vadd.f32 %v5238_v39, %v5237_v12  ;;  %v6070_v20 = vpop.permute.xlu0 %6069 }
0x3afb   :  { %v5268_v35 = vrot.slane %v5267_v5, 2  ;;  %v6072_v55 = vunpack.i.h.bf16 %v6070_v20  ;;  %v6071_v34 = vunpack.i.l.bf16 %v6070_v20  ;;  %v5275_v42 = vrot.slane %v5274_v57, 2 }
0x3afc   :  { %v5247_v4 = vrot.slane %v5246_v46, 2  ;;  %v5240_v41 = vrot.slane %v5239_v8, 2 }
0x3afd   :  { %v5269_v25 = vadd.f32 %v5268_v35, %v5267_v5  ;;  %v5236_v44 = vmul.f32 %v8902_v24, %v6072_v55  ;;  %v5235_v28 = vmul.f32 %v8908_v58, %v6071_v34  ;;  %v5276_v56 = vadd.f32 %v5275_v42, %v5274_v57 }
0x3afe   :  { %v5248_v26 = vadd.f32 %v5247_v4, %v5246_v46  ;;  %v5241_v43 = vadd.f32 %v5240_v41, %v5239_v8  ;;  %v5264_v58 = vadd.f32 %v5263_v53, %v5262_v19  ;;  %v6768_v46 = vld [vmem:[%s9538_s8] ss:$0 sm:$0xff] }
0x3aff   :  { %v5286_v10 = vsel %vm106_vm0, %v5236_v44, 0.0  ;;  %v5279_v48 = vsel %vm106_vm0, %v5235_v28, 0.0  ;;  %v5270_v36 = vrot.slane %v5269_v25, 1  ;;  %v5277_v47 = vrot.slane %v5276_v56, 1 }
0x3b00   :  { %v5249_v9 = vrot.slane %v5248_v26, 1  ;;  %v5242_v0 = vrot.slane %v5241_v43, 1  ;;  %v5287_v31 = vrot.slane %v5286_v10, 4  ;;  %v5280_v51 = vrot.slane %v5279_v48, 4 }
0x3b01   :  { %v5271_v16 = vadd.f32 %v5270_v36, %v5269_v25  ;;  %v5278_v3 = vadd.f32 %v5277_v47, %v5276_v56 }
0x3b02   :  { %v5250_v52 = vadd.f32 %v5249_v9, %v5248_v26  ;;  %v5243_v6 = vadd.f32 %v5242_v0, %v5241_v43  ;;  %v5288_v30 = vadd.f32 %v5287_v31, %v5286_v10  ;;  %v5281_v24 = vadd.f32 %v5280_v51, %v5279_v48  ;;  %v5310_v39 = vpop.permute.xlu0 %5309 }
0x3b04   :  { %v5301_v2 = vsel %vm304_vm6, %v5250_v52, %v5243_v6  ;;  %v5289_v61 = vrot.slane %v5288_v30, 2  ;;  %v5282_v14 = vrot.slane %v5281_v24, 2  ;;  %v6769_v6 = vld [vmem:[%s9541_s10] ss:$0 sm:$0xff] }
0x3b05   :  { %v5302_v40 = vsel %vm306_vm7, %v5257_v60, %v5301_v2 }
0x3b06   :  { %v5290_v17 = vadd.f32 %v5289_v61, %v5288_v30  ;;  %v5283_v7 = vadd.f32 %v5282_v14, %v5281_v24  ;;  %v5303_v21 = vsel %vm308_vm8, %v5264_v58, %v5302_v40  ;;  %v9141_v14 = vld [vmem:[%s9544_s4] sm:$0xff] }
0x3b07   :  { %v5304_v59 = vsel %vm310_vm9, %v5271_v16, %v5303_v21 }
0x3b08   :  { %v5284_v27 = vrot.slane %v5283_v7, 1  ;;  %v5291_v50 = vrot.slane %v5290_v17, 1  ;;  %v5305_v12 = vsel %vm312_vm10, %v5278_v3, %v5304_v59 }
0x3b0a   :  { %v5285_v13 = vadd.f32 %v5284_v27, %v5283_v7  ;;  %v5292_v37 = vadd.f32 %v5291_v50, %v5290_v17  ;;  %v9147_v50 = vld [vmem:[%s9544_s4 + $0x10] sm:$0xff] }
0x3b0c   :  { %v5306_v32 = vsel %vm314_vm11, %v5285_v13, %v5305_v12 }
0x3b0d   :  { %v5307_v57 = vsel %vm316_vm12, %v5292_v37, %v5306_v32  ;;  %v9155_v37 = vld [vmem:[%s9544_s4 + $0x28] sm:$0xff]  ;;  %v9161_v32 = vld [vmem:[%s9544_s4 + $0x20] sm:$0xff] }
0x3b0e   :  { %v5312_v5 = vsel %vm106_vm0, %v5307_v57, %v5310_v39 }
0x3b0f   :  { %5907 = vmatmul.msk.f32.vlgmr.msrb.gmra.mxu3 %vm111_vm1, %v5312_v5 }
0x3b92   :  { %v5333_v19 = vpop.f32.mrf.mxu3 }
0x3b93   :  { %v5334_v8 = vadd.f32 %v6768_v46, %v5333_v19 }
0x3b95   :  { %6516 = vtanh.f32 %v5334_v8  ;;  %v5908_v29 = vmul.f32 -1.442695, %v5334_v8 }
0x3b97   :  { %6518 = vpow2.f32 %v5908_v29 }
0x3b9b   :  { %v6517_v20 = vpop.eup %6516 }
0x3b9c   :  { %5358 = vrot.lane.b32.xlu2 %v6517_v20, %s6788_s0 }
0x3b9d   :  { %v6519_v35 = vpop.eup %6518 }
0x3b9e   :  { %v5339_v55 = vadd.f32 1.0, %v6519_v35 }
0x3ba0   :  { %6520 = vrcp.f32 %v5339_v55  ;;  %v5351_v44 = vand.u32 2147483648, %v5339_v55  ;;  %vm5345_vm2 = vweird.f32 %v5339_v55  ;;  %v5349_v28 = vand.u32 2147483647, %v5339_v55 }
0x3ba2   :  { %v5352_v43 = vor.u32 1.1754944e-38, %v5351_v44  ;;  %vm5350_vm4 = vcmp.eq.f32.partialorder %v5349_v28, 8.507059e+37 }
0x3ba6   :  { %v6521_v34 = vpop.eup %6520 }
0x3ba7   :  { %v5341_v4 = vmul.f32 %v6521_v34, %v5339_v55  ;;  %vm5346_vm1 = vweird.f32 %v6521_v34 }
0x3ba8   :  { %vm5347_vm3 = vmor %vm5345_vm2, %vm5346_vm1 }
0x3ba9   :  { %v5342_v41 = vsub.f32 1.0, %v5341_v4 }
0x3bab   :  { %v5343_v42 = vmul.f32 %v6521_v34, %v5342_v41 }
0x3bad   :  { %v5344_v25 = vadd.f32 %v6521_v34, %v5343_v42  ;;  %v9173_v42 = vld [vmem:[%s9544_s4 + $0x38] sm:$0xff] }
0x3baf   :  { %v5348_v26 = vsel %vm5347_vm3, %v6521_v34, %v5344_v25 }
0x3bb0   :  { %v5353_v63 = vsel %vm5350_vm4, %v5352_v43, %v5348_v26 }
0x3bb1   :  { %v5356_v48 = vmul.f32 %v5353_v63, %v8926_v15 }
0x3bf6   :  { %v5359_v53 = vpop.permute.xlu2 %5358 }
0x3bf7   :  { %v5361_v10 = vmul.f32 %v5359_v53, %v5353_v63  ;;  %v6775_v53 = vld [vmem:[%s9543_s11] ss:$0 sm:$0xff] }
0x3bf9   :  { %5363 = vrot.lane.b32.xlu1 %v5361_v10, %s6787_s28 }
0x3c6b   :  { %v5364_v9 = vpop.permute.xlu1 %5363 }
0x3c6c   :  { %v5366_v0 = vadd.f32 %v5364_v9, %v5356_v48 }
0x3c6e   :  { %6522 = vtanh.f32 %v5366_v0 }
0x3c74   :  { %v6523_v31 = vpop.eup %6522 }
0x3c75   :  { %5369 = vrot.lane.b32.xlu0 %v6523_v31, %s6788_s0 }
0x3ce7   :  { %v5370_v51 = vpop.permute.xlu0 %5369 }
0x3ce8   :  { %v5372_v56 = vmul.f32 %v5370_v51, %v5353_v63 }
0x3cea   :  { %5374 = vrot.lane.b32.xlu2 %v5372_v56, %s6787_s28 }
0x3d44   :  { %v5375_v36 = vpop.permute.xlu2 %5374 }
0x3d45   :  { %5909 = vmatmul.msk.f32.vlgmr.msrb.gmra.mxu1 %vm106_vm0, %v5375_v36 }
0x3dc2   :  { %v5395_v52 = vpop.f32.mrf.mxu1 }
0x3dc3   :  { %v5396_v30 = vadd.f32 %v6769_v6, %v5395_v52 }
0x3dc5   :  { %v5406_v15 = vperm.slane %v5396_v30, 0  ;;  %v5400_v24 = vrot.slane %v5396_v30, 2  ;;  %v5399_v60 = vrot.slane %v5396_v30, 1  ;;  %v5401_v58 = vrot.slane %v5396_v30, 3 }
0x3dc6   :  { %v5403_v2 = vrot.slane %v5396_v30, 5  ;;  %v5402_v61 = vrot.slane %v5396_v30, 4  ;;  %v5404_v27 = vrot.slane %v5396_v30, 6  ;;  %v5405_v57 = vrot.slane %v5396_v30, 7 }
0x3dc7   :  { %v5422_v47 = vadd.f32 %v9141_v14, %v5406_v15  ;;  %v5408_v40 = vperm.slane %v5400_v24, 0  ;;  %v5407_v16 = vperm.slane %v5399_v60, 0  ;;  %v5409_v17 = vperm.slane %v5401_v58, 0 }
0x3dc8   :  { %v5411_v7 = vperm.slane %v5403_v2, 0  ;;  %v5410_v21 = vperm.slane %v5402_v61, 0  ;;  %v5412_v5 = vperm.slane %v5404_v27, 0  ;;  %v5413_v46 = vperm.slane %v5405_v57, 0 }
0x3dc9   :  { %6524 = vtanh.f32 %v5422_v47  ;;  %v5424_v59 = vadd.f32 %v9147_v50, %v5408_v40  ;;  %v5423_v3 = vadd.f32 %v9003_v11, %v5407_v16  ;;  %v5425_v13 = vadd.f32 %v8994_v1, %v5409_v17 }
0x3dca   :  { %v5427_v12 = vadd.f32 %v9155_v37, %v5411_v7  ;;  %v5426_v39 = vadd.f32 %v9161_v32, %v5410_v21  ;;  %v5428_v20 = vadd.f32 %v9012_v62, %v5412_v5  ;;  %v5429_v25 = vadd.f32 %v9173_v42, %v5413_v46 }
0x3dcb   :  { %6526 = vtanh.f32 %v5424_v59 }
0x3dcc   :  { %6528 = vtanh.f32 %v5423_v3 }
0x3dcd   :  { %6530 = vtanh.f32 %v5425_v13 }
0x3dce   :  { %6532 = vtanh.f32 %v5427_v12 }
0x3dcf   :  { %v6525_v1 = vpop.eup %6524  ;;  %6534 = vtanh.f32 %v5426_v39  ;;  %v5172_v39 = vmax.f32 %v8979_v22, %v9080_v54 }
0x3dd0   :  { %v5438_v19 = vmul.f32 %v8945_v18, %v6525_v1  ;;  %6536 = vtanh.f32 %v5428_v20 }
0x3dd1   :  { %v6527_v8 = vpop.eup %6526  ;;  %6538 = vtanh.f32 %v5429_v25  ;;  %vm9202_vm5 = vcmp.gt.f32.partialorder %v5172_v39, 0.5 }
0x3dd2   :  { %v6529_v29 = vpop.eup %6528  ;;  %v5446_v35 = vsel %vm106_vm0, %v5438_v19, 0.0  ;;  %v5440_v55 = vmul.f32 %v8945_v18, %v6527_v8 }
0x3dd3   :  { %v6531_v34 = vpop.eup %6530  ;;  %5447 = vadd.xlane.f32.xlu1 %v5446_v35  ;;  %v5439_v4 = vmul.f32 %v8945_v18, %v6529_v29 }
0x3dd4   :  { %v5452_v41 = vsel %vm106_vm0, %v5440_v55, 0.0  ;;  %v6533_v44 = vpop.eup %6532  ;;  %v5441_v43 = vmul.f32 %v8945_v18, %v6531_v34 }
0x3dd5   :  { %5453 = vadd.xlane.f32.xlu2 %v5452_v41  ;;  %v5449_v28 = vsel %vm106_vm0, %v5439_v4, 0.0  ;;  %v6535_v26 = vpop.eup %6534  ;;  %v5443_v63 = vmul.f32 %v6775_v53, %v6533_v44 }
0x3dd6   :  { %5450 = vadd.xlane.f32.xlu0 %v5449_v28  ;;  %v5442_v10 = vmul.f32 %v6775_v53, %v6535_v26  ;;  %v5455_v48 = vsel %vm106_vm0, %v5441_v43, 0.0  ;;  %v6537_v9 = vpop.eup %6536 }
0x3dd7   :  { %v5461_v0 = vsel %vm106_vm0, %v5443_v63, 0.0  ;;  %v6539_v51 = vpop.eup %6538  ;;  %v5444_v56 = vmul.f32 %v6775_v53, %v6537_v9 }
0x3dd8   :  { %v5458_v31 = vsel %vm106_vm0, %v5442_v10, 0.0  ;;  %v5445_v18 = vmul.f32 %v6775_v53, %v6539_v51 }
0x3dd9   :  { %v5464_v36 = vsel %vm106_vm0, %v5444_v56, 0.0 }
0x3dda   :  { %v5467_v52 = vsel %vm106_vm0, %v5445_v18, 0.0 }
0x3ddb   :  { %5456 = vadd.xlane.f32.xlu1 %v5455_v48 }
0x3ddd   :  { %5462 = vadd.xlane.f32.xlu2 %v5461_v0 }
0x3dde   :  { %5459 = vadd.xlane.f32.xlu0 %v5458_v31 }
0x3de3   :  { %5465 = vadd.xlane.f32.xlu1 %v5464_v36 }
0x3de6   :  { %5468 = vadd.xlane.f32.xlu0 %v5467_v52 }
0x3e46   :  { %v5448_v6 = vpop.xlane.xlu1 %5447 }
0x3e47   :  { %v5479_v60 = vperm.slane %v5448_v6, %v7002_v45  ;;  %v9635_v6 = vmov 0  }
0x3e48   :  { %v5454_v30 = vpop.xlane.xlu2 %5453 }
0x3e49   :  { %v5451_v15 = vpop.xlane.xlu0 %5450  ;;  %v5481_v58 = vperm.slane %v5454_v30, %v7002_v45  ;;  %v9636_v30 = vld [vmem:[#allocation5_spill] sm:$0xff] }
0x3e4a   :  { %v5480_v24 = vperm.slane %v5451_v15, %v7002_v45  ;;  %v707_v15 = vperm.slane %v9636_v30, %v7002_v45 }
0x3e4c   :  { %v5487_v2 = vsel %vm304_vm6, %v5480_v24, %v5479_v60  ;;  %v9637_v24 = vld [vmem:[#allocation3_spill] sm:$0xff] }
0x3e4d   :  { %v5488_v40 = vsel %vm306_vm7, %v5481_v58, %v5487_v2  ;;  %v706_v60 = vperm.slane %v9637_v24, %v7002_v45  ;;  %v9638_v58 = vld [vmem:[#allocation4_spill] sm:$0xff] }
0x3e4e   :  { %v5457_v61 = vpop.xlane.xlu1 %5456  ;;  %v708_v2 = vperm.slane %v9638_v58, %v7002_v45 }
0x3e4f   :  { %v5482_v47 = vperm.slane %v5457_v61, %v7002_v45  ;;  %v714_v61 = vsel %vm304_vm6, %v707_v15, %v706_v60 }
0x3e50   :  { %v5463_v16 = vpop.xlane.xlu2 %5462 }
0x3e51   :  { %v5460_v17 = vpop.xlane.xlu0 %5459  ;;  %v5489_v7 = vsel %vm308_vm8, %v5482_v47, %v5488_v40  ;;  %v5484_v27 = vperm.slane %v5463_v16, %v7002_v45  ;;  %v9639_v47 = vld [vmem:[#allocation6_spill] sm:$0xff]  ;;  %v9640_v16 = vld [vmem:[#allocation7_spill] sm:$0xff] }
0x3e52   :  { %v5483_v21 = vperm.slane %v5460_v17, %v7002_v45  ;;  %v709_v40 = vperm.slane %v9639_v47, %v7002_v45  ;;  %v710_v17 = vperm.slane %v9640_v16, %v7002_v45 }
0x3e54   :  { %v5490_v59 = vsel %vm310_vm9, %v5483_v21, %v5489_v7  ;;  %v9641_v7 = vld [vmem:[#allocation9_spill] sm:$0xff] }
0x3e55   :  { %v5491_v12 = vsel %vm312_vm10, %v5484_v27, %v5490_v59  ;;  %v711_v21 = vperm.slane %v9641_v7, %v7002_v45  ;;  %v715_v27 = vsel %vm306_vm7, %v708_v2, %v714_v61  ;;  %v9642_v59 = vld [vmem:[#allocation10_spill] sm:$0xff] }
0x3e56   :  { %v5466_v3 = vpop.xlane.xlu1 %5465 }
0x3e57   :  { %v5485_v13 = vperm.slane %v5466_v3, %v7002_v45  ;;  %v712_v3 = vperm.slane %v9642_v59, %v7002_v45 }
0x3e59   :  { %v5492_v57 = vsel %vm314_vm11, %v5485_v13, %v5491_v12  ;;  %v5469_v5 = vpop.xlane.xlu0 %5468  ;;  %v716_v13 = vsel %vm308_vm8, %v709_v40, %v715_v27 }
0x3e5a   :  { %v5486_v1 = vperm.slane %v5469_v5, %v7002_v45  ;;  %v717_v12 = vsel %vm310_vm9, %v710_v17, %v716_v13  ;;  %v9643_v5 = vld [vmem:[#allocation8_spill] sm:$0xff] }
0x3e5b   :  { %v718_v39 = vsel %vm312_vm10, %v711_v21, %v717_v12 }
0x3e5c   :  { %v5493_v46 = vsel %vm316_vm12, %v5486_v1, %v5492_v57  ;;  %v719_v57 = vsel %vm314_vm11, %v712_v3, %v718_v39  ;;  %v713_v1 = vperm.slane %v9643_v5, %v7002_v45 }
0x3e5d   :  { %v5495_v8 = vsel %vm9202_vm5, -inf, %v5493_v46 }
0x3e5e   :  { %v5496_v20 = vsel %vm319_vm13, %v5495_v8, -inf  ;;  %v720_v46 = vsel %vm316_vm12, %v713_v1, %v719_v57 }
0x3e5f   :  { %5497 = vmax.xlane.f32.xlu2 %v5496_v20 }
0x3ed2   :  { %v5498_v29 = vpop.xlane.xlu2 %5497 }
0x3ed3   :  { %v5499_v35 = vsub.f32 %v5495_v8, %v5498_v29  ;;  %v722_v8 = vsel %vm319_vm13, %v720_v46, -inf }
0x3ed5   :  { %v5500_v22 = vmul.f32 1.442695, %v5499_v35 }
0x3ed7   :  { %6540 = vpow2.f32 %v5500_v22 }
0x3edd   :  { %v6541_v54 = vpop.eup %6540 }
0x3ede   :  { %v5502_v55 = vsel %vm319_vm13, %v6541_v54, 0.0 }
0x3edf   :  { %5503 = vadd.xlane.f32.xlu1 %v5502_v55 }
0x3f52   :  { %v5504_v34 = vpop.xlane.xlu1 %5503 }
0x3f53   :  { %6542 = vrcp.f32 %v5504_v34  ;;  %v5516_v44 = vand.u32 2147483648, %v5504_v34  ;;  %v5514_v26 = vand.u32 2147483647, %v5504_v34  ;;  %vm5510_vm15 = vweird.f32 %v5504_v34 }
0x3f55   :  { %v5517_v53 = vor.u32 1.1754944e-38, %v5516_v44  ;;  %vm5515_vm2 = vcmp.eq.f32.partialorder %v5514_v26, 8.507059e+37 }
0x3f59   :  { %v6543_v4 = vpop.eup %6542 }
0x3f5a   :  { %v5506_v41 = vmul.f32 %v6543_v4, %v5504_v34  ;;  %vm5511_vm14 = vweird.f32 %v6543_v4 }
0x3f5b   :  { %vm5512_vm1 = vmor %vm5510_vm15, %vm5511_vm14 }
0x3f5c   :  { %v5507_v25 = vsub.f32 1.0, %v5506_v41 }
0x3f5e   :  { %v5508_v28 = vmul.f32 %v6543_v4, %v5507_v25 }
0x3f60   :  { %v5509_v43 = vadd.f32 %v6543_v4, %v5508_v28 }
0x3f62   :  { %v5513_v63 = vsel %vm5512_vm1, %v6543_v4, %v5509_v43 }
0x3f63   :  { %v5518_v10 = vsel %vm5515_vm2, %v5517_v53, %v5513_v63 }
0x3f64   :  { %v5520_v48 = vmul.f32 %v6541_v54, %v5518_v10 }
0x3f66   :  { %v5535_v9 = vperm.slane %v5520_v48, 2  ;;  %v5528_v0 = vperm.slane %v5520_v48, 1  ;;  %v5521_v31 = vperm.slane %v5520_v48, 0  ;;  %v5563_v51 = vperm.slane %v5520_v48, 6 }
0x3f67   :  { %v5549_v56 = vperm.slane %v5520_v48, 4  ;;  %v5542_v18 = vperm.slane %v5520_v48, 3  ;;  %v5570_v36 = vperm.slane %v5520_v48, 7  ;;  %v5556_v52 = vperm.slane %v5520_v48, 5 }
0x3f68   :  { %5540 = vperm.xlu1 %5930, %v5535_v9   ;;  %5533 = vperm.xlu2 %5952, %v5528_v0  }
0x3f69   :  { %5526 = vperm.xlu0 %5936, %v5521_v31  }
0x3f70   :  { %5568 = vperm.xlu1 %5930, %v5563_v51   ;;  %5554 = vperm.xlu2 %5952, %v5549_v56   ;;  %v6776_v56 = vld [vmem:[%s9544_s4 + $0x18] sm:$0xff] }
0x3f71   :  { %5547 = vperm.xlu0 %5936, %v5542_v18  }
0x3f78   :  { %5575 = vperm.xlu2 %5952, %v5570_v36   ;;  %6074 = vset.pattern.permute.xlu1 %v9635_v6 }
0x3f79   :  { %5561 = vperm.xlu0 %5936, %v5556_v52  }
0x3f80   :  { %6075 = vset.pattern.permute.xlu2 %v9635_v6 }
0x3f81   :  { %6073 = vset.pattern.permute.xlu0 %v9635_v6 }
0x3fa3   :  { %723 = vmax.xlane.f32.xlu0 %v722_v8 }
0x3fc2   :  { %v5534_v20 = vpop.permute.xlu2 %5533 }
0x3fc3   :  { %v5578_v35 = vmul.f32 %v9003_v11, %v5534_v20 }
0x3fc5   :  { %v5592_v22 = vsel %vm106_vm0, %v5578_v35, 0.0 }
0x3fc6   :  { %v5593_v41 = vrot.slane %v5592_v22, 4 }
0x3fc8   :  { %v5594_v63 = vadd.f32 %v5593_v41, %v5592_v22 }
0x3fca   :  { %v5555_v29 = vpop.permute.xlu2 %5554  ;;  %v5595_v36 = vrot.slane %v5594_v63, 2 }
0x3fcb   :  { %v5581_v25 = vmul.f32 %v9161_v32, %v5555_v29 }
0x3fcc   :  { %v5596_v40 = vadd.f32 %v5595_v36, %v5594_v63 }
0x3fcd   :  { %v5613_v10 = vsel %vm106_vm0, %v5581_v25, 0.0 }
0x3fce   :  { %v5614_v32 = vrot.slane %v5613_v10, 4  ;;  %v5597_v46 = vrot.slane %v5596_v40, 1 }
0x3fd0   :  { %v5598_v41 = vadd.f32 %v5597_v46, %v5596_v40  ;;  %v6777_v46 = vld [vmem:[%s9545_s13] ss:$0 sm:$0xff] }
0x3fd2   :  { %v5576_v44 = vpop.permute.xlu2 %5575 }
0x3fd3   :  { %v5584_v11 = vmul.f32 %v9173_v42, %v5576_v44 }
0x3fd5   :  { %v5634_v51 = vsel %vm106_vm0, %v5584_v11, 0.0 }
0x3fd6   :  { %v5635_v60 = vrot.slane %v5634_v51, 4 }
0x3fd8   :  { %v5636_v3 = vadd.f32 %v5635_v60, %v5634_v51 }
0x3fda   :  { %v5541_v54 = vpop.permute.xlu1 %5540  ;;  %v5637_v22 = vrot.slane %v5636_v3, 2 }
0x3fdb   :  { %v5579_v55 = vmul.f32 %v9147_v50, %v5541_v54  ;;  %v5527_v34 = vpop.permute.xlu0 %5526 }
0x3fdc   :  { %v5577_v4 = vmul.f32 %v9141_v14, %v5527_v34 }
0x3fdd   :  { %v5599_v28 = vsel %vm106_vm0, %v5579_v55, 0.0 }
0x3fde   :  { %v5600_v26 = vrot.slane %v5599_v28, 4  ;;  %v5585_v43 = vsel %vm106_vm0, %v5577_v4, 0.0 }
0x3fdf   :  { %v5586_v53 = vrot.slane %v5585_v43, 4 }
0x3fe0   :  { %v5601_v50 = vadd.f32 %v5600_v26, %v5599_v28  ;;  %v5638_v26 = vadd.f32 %v5637_v22, %v5636_v3 }
0x3fe1   :  { %v5587_v48 = vadd.f32 %v5586_v53, %v5585_v43 }
0x3fe2   :  { %v5569_v9 = vpop.permute.xlu1 %5568  ;;  %v5602_v52 = vrot.slane %v5601_v50, 2 }
0x3fe3   :  { %v5588_v0 = vrot.slane %v5587_v48, 2  ;;  %v5583_v14 = vmul.f32 %v9012_v62, %v5569_v9  ;;  %v5548_v31 = vpop.permute.xlu0 %5547  ;;  %v5615_v62 = vadd.f32 %v5614_v32, %v5613_v10 }
0x3fe4   :  { %v5580_v18 = vmul.f32 %v6776_v56, %v5548_v31  ;;  %v5603_v21 = vadd.f32 %v5602_v52, %v5601_v50  ;;  %v5639_v50 = vrot.slane %v5638_v26, 1 }
0x3fe5   :  { %v5627_v42 = vsel %vm106_vm0, %v5583_v14, 0.0  ;;  %v5589_v2 = vadd.f32 %v5588_v0, %v5587_v48  ;;  %v5616_v57 = vrot.slane %v5615_v62, 2 }
0x3fe6   :  { %v5628_v6 = vrot.slane %v5627_v42, 4  ;;  %v5606_v15 = vsel %vm106_vm0, %v5580_v18, 0.0  ;;  %v5604_v20 = vrot.slane %v5603_v21, 1  ;;  %v5640_v56 = vadd.f32 %v5639_v50, %v5638_v26  ;;  %v6782_v50 = vld [vmem:[%s9549_s5 + $0x20] sm:$0xff] }
0x3fe7   :  { %v5607_v61 = vrot.slane %v5606_v15, 4  ;;  %v5590_v13 = vrot.slane %v5589_v2, 1  ;;  %v5617_v4 = vadd.f32 %v5616_v57, %v5615_v62 }
0x3fe8   :  { %v5629_v27 = vadd.f32 %v5628_v6, %v5627_v42  ;;  %v5605_v44 = vadd.f32 %v5604_v20, %v5603_v21 }
0x3fe9   :  { %v5608_v17 = vadd.f32 %v5607_v61, %v5606_v15  ;;  %v5591_v54 = vadd.f32 %v5590_v13, %v5589_v2  ;;  %v5618_v11 = vrot.slane %v5617_v4, 1 }
0x3fea   :  { %v5630_v29 = vrot.slane %v5629_v27, 2 }
0x3feb   :  { %v5609_v12 = vrot.slane %v5608_v17, 2  ;;  %v5562_v39 = vpop.permute.xlu0 %5561  ;;  %v5649_v43 = vsel %vm304_vm6, %v5598_v41, %v5591_v54  ;;  %v5619_v14 = vadd.f32 %v5618_v11, %v5617_v4  ;;  %v6780_v11 = vld [vmem:[%s9549_s5 + $0x10] sm:$0xff] }
0x3fec   :  { %v5582_v1 = vmul.f32 %v9155_v37, %v5562_v39  ;;  %v5631_v28 = vadd.f32 %v5630_v29, %v5629_v27  ;;  %v5650_v48 = vsel %vm306_vm7, %v5605_v44, %v5649_v43 }
0x3fed   :  { %v5610_v8 = vadd.f32 %v5609_v12, %v5608_v17 }
0x3fee   :  { %v5620_v35 = vsel %vm106_vm0, %v5582_v1, 0.0  ;;  %v5632_v10 = vrot.slane %v5631_v28, 1 }
0x3fef   :  { %v5611_v55 = vrot.slane %v5610_v8, 1  ;;  %v5621_v34 = vrot.slane %v5620_v35, 4 }
0x3ff0   :  { %v5633_v32 = vadd.f32 %v5632_v10, %v5631_v28  ;;  %v6781_v10 = vld [vmem:[%s9549_s5 + $0x18] sm:$0xff] }
0x3ff1   :  { %v5622_v25 = vadd.f32 %v5621_v34, %v5620_v35  ;;  %v5612_v53 = vadd.f32 %v5611_v55, %v5610_v8  ;;  %v6778_v34 = vld [vmem:[%s9549_s5] sm:$0xff] }
0x3ff3   :  { %v5623_v37 = vrot.slane %v5622_v25, 2  ;;  %v5651_v9 = vsel %vm308_vm8, %v5612_v53, %v5650_v48  ;;  %v6779_v53 = vld [vmem:[%s9549_s5 + $0x8] sm:$0xff] }
0x3ff4   :  { %v5652_v51 = vsel %vm310_vm9, %v5619_v14, %v5651_v9  ;;  %v6783_v14 = vld [vmem:[%s9549_s5 + $0x28] sm:$0xff] }
0x3ff5   :  { %v5624_v63 = vadd.f32 %v5623_v37, %v5622_v25 }
0x3ff7   :  { %v5625_v0 = vrot.slane %v5624_v63, 1 }
0x3ff9   :  { %v5626_v31 = vadd.f32 %v5625_v0, %v5624_v63 }
0x3ffb   :  { %v5653_v18 = vsel %vm312_vm10, %v5626_v31, %v5652_v51 }
0x3ffc   :  { %v5654_v36 = vsel %vm314_vm11, %v5633_v32, %v5653_v18  ;;  %v6784_v18 = vld [vmem:[%s9548_s14] ss:$0 sm:$0xff] }
0x3ffd   :  { %v5655_v42 = vsel %vm316_vm12, %v5640_v56, %v5654_v36 }
0x3ffe   :  { %5910 = vmatmul.msk.f32.vlgmr.msrb.gmra.mxu2 %vm106_vm0, %v5655_v42 }
0x4016   :  { %v9264_v52 = vpop.xlane.xlu0 %723 }
0x4017   :  { %v726_v6 = vperm.slane %v9264_v52, 0  ;;  %v727_v15 = vperm.slane %v9264_v52, 1  ;;  %v728_v60 = vperm.slane %v9264_v52, 2  ;;  %v729_v40 = vperm.slane %v9264_v52, 3 }
0x4018   :  { %v730_v17 = vperm.slane %v9264_v52, 4 }
0x4019   :  { %v742_v2 = vsub.f32 %v9637_v24, %v726_v6  ;;  %v743_v61 = vsub.f32 %v9636_v30, %v727_v15  ;;  %v744_v62 = vsub.f32 %v9638_v58, %v728_v60  ;;  %v745_v13 = vsub.f32 %v9639_v47, %v729_v40  ;;  %v6785_v6 = vld [vmem:[%s9549_s5 + $0x30] sm:$0xff] }
0x401a   :  { %v746_v12 = vsub.f32 %v9640_v16, %v730_v17  ;;  %v6786_v17 = vld [vmem:[%s9549_s5 + $0x38] sm:$0xff] }
0x401b   :  { %v750_v21 = vmul.f32 1.442695, %v742_v2  ;;  %v752_v27 = vmul.f32 1.442695, %v743_v61  ;;  %v754_v3 = vmul.f32 1.442695, %v744_v62 }
0x401c   :  { %v756_v39 = vmul.f32 1.442695, %v745_v13  ;;  %v758_v30 = vmul.f32 1.442695, %v746_v12 }
0x401d   :  { %6544 = vpow2.f32 %v750_v21 }
0x401e   :  { %6546 = vpow2.f32 %v752_v27 }
0x401f   :  { %6548 = vpow2.f32 %v754_v3 }
0x4020   :  { %6550 = vpow2.f32 %v756_v39 }
0x4021   :  { %6552 = vpow2.f32 %v758_v30 }
0x4023   :  { %v9276_v24 = vpop.eup %6544 }
0x4024   :  { %v9278_v57 = vpop.eup %6546  ;;  %775 = vperm.xlu0 %6073, %v9276_v24  }
0x4025   :  { %v9281_v58 = vpop.eup %6548  ;;  %778 = vperm.xlu1 %6074, %v9278_v57  }
0x4026   :  { %781 = vperm.xlu2 %6075, %v9281_v58   ;;  %v9285_v47 = vpop.eup %6550 }
0x4027   :  { %v9287_v16 = vpop.eup %6552 }
0x402d   :  { %784 = vperm.xlu1 %6074, %v9285_v47  }
0x402e   :  { %787 = vperm.xlu2 %6075, %v9287_v16  }
0x4081   :  { %v5675_v1 = vpop.f32.mrf.mxu2 }
0x4082   :  { %v5676_v8 = vadd.f32 %v6777_v46, %v5675_v1 }
0x4084   :  { %v5686_v20 = vperm.slane %v5676_v8, 0  ;;  %v5679_v29 = vrot.slane %v5676_v8, 1  ;;  %v5680_v35 = vrot.slane %v5676_v8, 2  ;;  %v5681_v22 = vrot.slane %v5676_v8, 3 }
0x4085   :  { %v5682_v54 = vrot.slane %v5676_v8, 4  ;;  %v5683_v55 = vrot.slane %v5676_v8, 5  ;;  %v5684_v43 = vrot.slane %v5676_v8, 6  ;;  %v5685_v0 = vrot.slane %v5676_v8, 7 }
0x4086   :  { %v5702_v4 = vadd.f32 %v6778_v34, %v5686_v20  ;;  %v5687_v41 = vperm.slane %v5679_v29, 0  ;;  %v5688_v25 = vperm.slane %v5680_v35, 0  ;;  %v5689_v44 = vperm.slane %v5681_v22, 0 }
0x4087   :  { %v5690_v28 = vperm.slane %v5682_v54, 0  ;;  %v5691_v26 = vperm.slane %v5683_v55, 0  ;;  %v5692_v32 = vperm.slane %v5684_v43, 0  ;;  %v5693_v56 = vperm.slane %v5685_v0, 0 }
0x4088   :  { %6554 = vtanh.f32 %v5702_v4  ;;  %v5703_v37 = vadd.f32 %v6779_v53, %v5687_v41  ;;  %v5704_v63 = vadd.f32 %v6780_v11, %v5688_v25  ;;  %v5705_v48 = vadd.f32 %v6781_v10, %v5689_v44  ;;  %v9645_v10 = vld [vmem:[#allocation12_spill] sm:$0xff] }
0x4089   :  { %v5706_v9 = vadd.f32 %v6782_v50, %v5690_v28  ;;  %v5707_v31 = vadd.f32 %v6783_v14, %v5691_v26  ;;  %v5708_v15 = vadd.f32 %v6785_v6, %v5692_v32  ;;  %v5709_v21 = vadd.f32 %v6786_v17, %v5693_v56  ;;  %v9646_v50 = vld [vmem:[#allocation17_spill] sm:$0xff]  ;;  %v782_v32 = vpop.permute.xlu2 %781 }
0x408a   :  { %6556 = vtanh.f32 %v5703_v37  ;;  %v733_v54 = vperm.slane %v9264_v52, 7  ;;  %v731_v44 = vperm.slane %v9264_v52, 5  ;;  %v732_v28 = vperm.slane %v9264_v52, 6  ;;  %v9644_v52 = vld [vmem:[#allocation11_spill] sm:$0xff] }
0x408b   :  { %6558 = vtanh.f32 %v5704_v63  ;;  %v5117_v0 = vsel %vm319_vm13, %v9072_v49, -inf  ;;  %v3769_v14 = vsel %vm319_vm13, %v8542_v23, -inf }
0x408c   :  { %6560 = vtanh.f32 %v5705_v48  ;;  %v749_v4 = vsub.f32 %v9643_v5, %v733_v54  ;;  %v747_v26 = vsub.f32 %v9641_v7, %v731_v44  ;;  %v748_v43 = vsub.f32 %v9642_v59, %v732_v28 }
0x408d   :  { %6562 = vtanh.f32 %v5706_v9  ;;  %v2421_v7 = vsel %vm319_vm13, %v9644_v52, -inf  ;;  %v4443_v59 = vsel %vm319_vm13, %v8842_v38, -inf  ;;  %v3095_v48 = vsel %vm319_vm13, %v9645_v10, -inf }
0x408e   :  { %v6555_v51 = vpop.eup %6554  ;;  %6564 = vtanh.f32 %v5707_v31  ;;  %v764_v25 = vmul.f32 1.442695, %v749_v4  ;;  %v760_v37 = vmul.f32 1.442695, %v747_v26  ;;  %v762_v11 = vmul.f32 1.442695, %v748_v43 }
0x408f   :  { %v5718_v36 = vmul.f32 %v6784_v18, %v6555_v51  ;;  %6566 = vtanh.f32 %v5708_v15  ;;  %v1747_v9 = vsel %vm319_vm13, %v9646_v50, -inf }
0x4090   :  { %v6557_v42 = vpop.eup %6556  ;;  %6568 = vtanh.f32 %v5709_v21 }
0x4091   :  { %v6559_v60 = vpop.eup %6558  ;;  %v5726_v2 = vsel %vm106_vm0, %v5718_v36, 0.0  ;;  %v5719_v61 = vmul.f32 %v6784_v18, %v6557_v42  ;;  %6570 = vpow2.f32 %v764_v25  ;;  %v9356_v56 = vpop.permute.xlu2 %787 }
0x4092   :  { %v6561_v62 = vpop.eup %6560  ;;  %5727 = vadd.xlane.f32.xlu1 %v5726_v2  ;;  %v5720_v40 = vmul.f32 %v6784_v18, %v6559_v60  ;;  %6572 = vpow2.f32 %v760_v37  ;;  %v802_v19 = vperm.slane %v9356_v56, %v7002_v45 }
0x4093   :  { %v5729_v27 = vsel %vm106_vm0, %v5719_v61, 0.0  ;;  %v6563_v3 = vpop.eup %6562  ;;  %v5721_v39 = vmul.f32 %v6784_v18, %v6561_v62  ;;  %6574 = vpow2.f32 %v762_v11 }
0x4094   :  { %5730 = vadd.xlane.f32.xlu2 %v5729_v27  ;;  %v5732_v13 = vsel %vm106_vm0, %v5720_v40, 0.0  ;;  %v6565_v12 = vpop.eup %6564  ;;  %v5722_v30 = vmul.f32 %v6784_v18, %v6563_v3 }
0x4095   :  { %5733 = vadd.xlane.f32.xlu0 %v5732_v13  ;;  %v5723_v1 = vmul.f32 %v6784_v18, %v6565_v12  ;;  %v5735_v46 = vsel %vm106_vm0, %v5721_v39, 0.0  ;;  %v6567_v8 = vpop.eup %6566 }
0x4096   :  { %v5738_v20 = vsel %vm106_vm0, %v5722_v30, 0.0  ;;  %v6569_v29 = vpop.eup %6568  ;;  %v5724_v22 = vmul.f32 %v6784_v18, %v6567_v8 }
0x4097   :  { %v5741_v35 = vsel %vm106_vm0, %v5723_v1, 0.0  ;;  %v5725_v55 = vmul.f32 %v6784_v18, %v6569_v29  ;;  %v9335_v53 = vpop.eup %6570  ;;  %v779_v31 = vpop.permute.xlu1 %778 }
0x4098   :  { %v5744_v34 = vsel %vm106_vm0, %v5724_v22, 0.0  ;;  %v9338_v5 = vpop.eup %6572  ;;  %v776_v18 = vpop.permute.xlu0 %775 }
0x4099   :  { %v5747_v41 = vsel %vm106_vm0, %v5725_v55, 0.0  ;;  %v9340_v63 = vpop.eup %6574 }
0x409a   :  { %5736 = vadd.xlane.f32.xlu1 %v5735_v46 }
0x409c   :  { %5739 = vadd.xlane.f32.xlu2 %v5738_v20 }
0x409d   :  { %5742 = vadd.xlane.f32.xlu0 %v5741_v35 }
0x409f   :  { %v785_v51 = vpop.permute.xlu1 %784 }
0x40a2   :  { %5745 = vadd.xlane.f32.xlu1 %v5744_v34 }
0x40a4   :  { %5748 = vadd.xlane.f32.xlu2 %v5747_v41 }
0x40b1   :  { %796 = vperm.xlu0 %6073, %v9335_v53  }
0x40bb   :  { %790 = vperm.xlu1 %6074, %v9338_v5  }
0x40bc   :  { %793 = vperm.xlu2 %6075, %v9340_v63  }
0x40db   :  { %2422 = vmax.xlane.f32.xlu0 %v2421_v7 }
0x40e3   :  { %4444 = vmax.xlane.f32.xlu0 %v4443_v59 }
0x40e5   :  { %3096 = vmax.xlane.f32.xlu1 %v3095_v48  ;;  %1748 = vmax.xlane.f32.xlu2 %v1747_v9  ;;  %v799_v9 = vperm.slane %v779_v31, %v7002_v45 }
0x40ed   :  { %5118 = vmax.xlane.f32.xlu1 %v5117_v0  ;;  %3770 = vmax.xlane.f32.xlu2 %v3769_v14  ;;  %v798_v0 = vperm.slane %v776_v18, %v7002_v45 }
0x4105   :  { %v5728_v36 = vpop.xlane.xlu1 %5727 }
0x4106   :  { %6576 = vtanh.f32 %v5728_v36 }
0x4107   :  { %v5731_v42 = vpop.xlane.xlu2 %5730 }
0x4108   :  { %6578 = vtanh.f32 %v5731_v42  ;;  %v5734_v6 = vpop.xlane.xlu0 %5733  ;;  %v806_v42 = vsel %vm304_vm6, %v799_v9, %v798_v0 }
0x4109   :  { %6580 = vtanh.f32 %v5734_v6  ;;  %v801_v6 = vperm.slane %v785_v51, %v7002_v45 }
0x410c   :  { %v6577_v15 = vpop.eup %6576 }
0x410d   :  { %v5737_v60 = vpop.xlane.xlu1 %5736  ;;  %v5758_v17 = vmul.f32 10.0, %v6577_v15  ;;  %v800_v15 = vperm.slane %v782_v32, %v7002_v45 }
0x410e   :  { %v6579_v2 = vpop.eup %6578  ;;  %6582 = vtanh.f32 %v5737_v60 }
0x410f   :  { %v6581_v61 = vpop.eup %6580  ;;  %v5759_v62 = vmul.f32 10.0, %v6579_v2  ;;  %v5740_v40 = vpop.xlane.xlu2 %5739  ;;  %v5774_v12 = vperm.slane %v5758_v17, %v7002_v45  ;;  %v807_v60 = vsel %vm306_vm7, %v800_v15, %v806_v42 }
0x4110   :  { %6584 = vtanh.f32 %v5740_v40  ;;  %v5743_v21 = vpop.xlane.xlu0 %5742  ;;  %v5760_v27 = vmul.f32 10.0, %v6581_v61  ;;  %v808_v31 = vsel %vm308_vm8, %v801_v6, %v807_v60 }
0x4111   :  { %6586 = vtanh.f32 %v5743_v21  ;;  %v5775_v3 = vperm.slane %v5759_v62, %v7002_v45  ;;  %v809_v17 = vsel %vm310_vm9, %v802_v19, %v808_v31 }
0x4112   :  { %v5776_v39 = vperm.slane %v5760_v27, %v7002_v45 }
0x4113   :  { %v5782_v8 = vsel %vm304_vm6, %v5775_v3, %v5774_v12 }
0x4114   :  { %v6583_v13 = vpop.eup %6582  ;;  %v5783_v55 = vsel %vm306_vm7, %v5776_v39, %v5782_v8 }
0x4115   :  { %v5761_v30 = vmul.f32 10.0, %v6583_v13  ;;  %v5746_v1 = vpop.xlane.xlu1 %5745 }
0x4116   :  { %v6585_v46 = vpop.eup %6584  ;;  %6588 = vtanh.f32 %v5746_v1 }
0x4117   :  { %v6587_v20 = vpop.eup %6586  ;;  %v5777_v29 = vperm.slane %v5761_v30, %v7002_v45  ;;  %v5762_v35 = vmul.f32 10.0, %v6585_v46  ;;  %v5749_v22 = vpop.xlane.xlu2 %5748 }
0x4118   :  { %v5763_v54 = vmul.f32 10.0, %v6587_v20  ;;  %6590 = vtanh.f32 %v5749_v22 }
0x4119   :  { %v5778_v34 = vperm.slane %v5762_v35, %v7002_v45  ;;  %v5784_v4 = vsel %vm308_vm8, %v5777_v29, %v5783_v55  ;;  %v5911_v29 = vld [vmem:[%s9547_s6 + $0x38] sm:$0xff] }
0x411a   :  { %v5779_v25 = vperm.slane %v5763_v54, %v7002_v45 }
0x411b   :  { %v5785_v44 = vsel %vm310_vm9, %v5778_v34, %v5784_v4 }
0x411c   :  { %v6589_v41 = vpop.eup %6588  ;;  %v5786_v11 = vsel %vm312_vm10, %v5779_v25, %v5785_v44 }
0x411d   :  { %v5764_v28 = vmul.f32 10.0, %v6589_v41 }
0x411e   :  { %v6591_v26 = vpop.eup %6590 }
0x411f   :  { %v5780_v43 = vperm.slane %v5764_v28, %v7002_v45  ;;  %v5765_v37 = vmul.f32 10.0, %v6591_v26  ;;  %v794_v2 = vpop.permute.xlu2 %793 }
0x4120   :  { %v804_v40 = vperm.slane %v794_v2, %v7002_v45 }
0x4121   :  { %v5781_v7 = vperm.slane %v5765_v37, %v7002_v45  ;;  %v5787_v59 = vsel %vm314_vm11, %v5780_v43, %v5786_v11 }
0x4123   :  { %v5788_v48 = vsel %vm316_vm12, %v5781_v7, %v5787_v59  ;;  %v797_v18 = vpop.permute.xlu0 %796 }
0x4124   :  { %v9377_v14 = vsel %vm9202_vm5, -inf, %v5788_v48  ;;  %v805_v51 = vperm.slane %v797_v18, %v7002_v45 }
0x4125   :  { %v5791_v36 = vsel %vm319_vm13, %v9377_v14, -inf }
0x4126   :  { %5792 = vmax.xlane.f32.xlu2 %v5791_v36 }
0x412d   :  { %v791_v61 = vpop.permute.xlu1 %790 }
0x412e   :  { %v803_v62 = vperm.slane %v791_v61, %v7002_v45 }
0x4130   :  { %v810_v32 = vsel %vm312_vm10, %v803_v62, %v809_v17 }
0x4131   :  { %v811_v21 = vsel %vm314_vm11, %v804_v40, %v810_v32 }
0x4132   :  { %v812_v27 = vsel %vm316_vm12, %v805_v51, %v811_v21 }
0x4133   :  { %v814_v3 = vsel %vm319_vm13, %v812_v27, 0.0 }
0x4134   :  { %815 = vadd.xlane.f32.xlu0 %v814_v3 }
0x414e   :  { %v2423_v56 = vpop.xlane.xlu0 %2422 }
0x414f   :  { %v2424_v13 = vsub.f32 %v9644_v52, %v2423_v56  ;;  %v9407_v52 = vadd.f32 %v5911_v29, %v9377_v14 }
0x4151   :  { %v2425_v12 = vmul.f32 1.442695, %v2424_v13  ;;  %v5819_v4 = vsel %vm319_vm13, %v9407_v52, -inf }
0x4153   :  { %6592 = vpow2.f32 %v2425_v12 }
0x4156   :  { %v4445_v22 = vpop.xlane.xlu0 %4444 }
0x4157   :  { %v4446_v41 = vsub.f32 %v8842_v38, %v4445_v22 }
0x4158   :  { %v3097_v39 = vpop.xlane.xlu1 %3096  ;;  %v1749_v30 = vpop.xlane.xlu2 %1748 }
0x4159   :  { %v9397_v1 = vpop.eup %6592  ;;  %v1750_v46 = vsub.f32 %v9646_v50, %v1749_v30  ;;  %v3098_v35 = vsub.f32 %v9645_v10, %v3097_v39  ;;  %v4447_v26 = vmul.f32 1.442695, %v4446_v41 }
0x415a   :  { %v2427_v8 = vsel %vm319_vm13, %v9397_v1, 0.0 }
0x415b   :  { %v1751_v20 = vmul.f32 1.442695, %v1750_v46  ;;  %2428 = vadd.xlane.f32.xlu1 %v2427_v8  ;;  %v3099_v54 = vmul.f32 1.442695, %v3098_v35 }
0x415d   :  { %6594 = vpow2.f32 %v1751_v20 }
0x415e   :  { %6596 = vpow2.f32 %v3099_v54 }
0x4160   :  { %v3771_v55 = vpop.xlane.xlu2 %3770  ;;  %v5119_v34 = vpop.xlane.xlu1 %5118 }
0x4161   :  { %v3772_v50 = vsub.f32 %v8542_v23, %v3771_v55  ;;  %v5120_v10 = vsub.f32 %v9072_v49, %v5119_v34 }
0x4163   :  { %v3773_v25 = vmul.f32 1.442695, %v3772_v50  ;;  %5820 = vmax.xlane.f32.xlu1 %v5819_v4  ;;  %v9413_v44 = vpop.eup %6594  ;;  %v5121_v43 = vmul.f32 1.442695, %v5120_v10 }
0x4164   :  { %v1753_v28 = vsel %vm319_vm13, %v9413_v44, 0.0  ;;  %v9418_v23 = vpop.eup %6596 }
0x4165   :  { %6598 = vpow2.f32 %v3773_v25  ;;  %1754 = vadd.xlane.f32.xlu0 %v1753_v28  ;;  %v3101_v38 = vsel %vm319_vm13, %v9418_v23, 0.0 }
0x4166   :  { %6600 = vpow2.f32 %v4447_v26 }
0x4167   :  { %6602 = vpow2.f32 %v5121_v43 }
0x416b   :  { %v9420_v37 = vpop.eup %6598 }
0x416c   :  { %v3775_v11 = vsel %vm319_vm13, %v9420_v37, 0.0  ;;  %v9426_v49 = vpop.eup %6600 }
0x416d   :  { %3102 = vadd.xlane.f32.xlu0 %v3101_v38  ;;  %3776 = vadd.xlane.f32.xlu1 %v3775_v11  ;;  %v9428_v7 = vpop.eup %6602  ;;  %v4449_v59 = vsel %vm319_vm13, %v9426_v49, 0.0 }
0x416e   :  { %v5123_v48 = vsel %vm319_vm13, %v9428_v7, 0.0 }
0x4175   :  { %4450 = vadd.xlane.f32.xlu0 %v4449_v59  ;;  %5124 = vadd.xlane.f32.xlu1 %v5123_v48  ;;  %v9647_v48 = vld [vmem:[#allocation2_spill] sm:$0xff] }
0x4199   :  { %v5793_v13 = vpop.xlane.xlu2 %5792 }
0x41a7   :  { %v816_v9 = vpop.xlane.xlu0 %815 }
0x41a8   :  { %6604 = vrcp.f32 %v816_v9  ;;  %v828_v6 = vand.u32 2147483648, %v816_v9  ;;  %v826_v60 = vand.u32 2147483647, %v816_v9  ;;  %vm822_vm3 = vweird.f32 %v816_v9 }
0x41aa   :  { %v829_v2 = vor.u32 1.1754944e-38, %v828_v6  ;;  %vm827_vm5 = vcmp.eq.f32.partialorder %v826_v60, 8.507059e+37 }
0x41ae   :  { %v6605_v0 = vpop.eup %6604 }
0x41af   :  { %v818_v36 = vmul.f32 %v6605_v0, %v816_v9  ;;  %vm823_vm0 = vweird.f32 %v6605_v0 }
0x41b0   :  { %vm824_vm4 = vmor %vm822_vm3, %vm823_vm0 }
0x41b1   :  { %v819_v42 = vsub.f32 1.0, %v818_v36 }
0x41b3   :  { %v820_v15 = vmul.f32 %v6605_v0, %v819_v42 }
0x41b5   :  { %v821_v31 = vadd.f32 %v6605_v0, %v820_v15 }
0x41b7   :  { %v825_v19 = vsel %vm824_vm4, %v6605_v0, %v821_v31 }
0x41b8   :  { %v9434_v18 = vsel %vm827_vm5, %v829_v2, %v825_v19 }
0x41b9   :  { %v833_v61 = vperm.slane %v9434_v18, 0  ;;  %v834_v62 = vperm.slane %v9434_v18, 1  ;;  %v836_v51 = vperm.slane %v9434_v18, 3  ;;  %v837_v21 = vperm.slane %v9434_v18, 4 }
0x41ba   :  { %v839_v56 = vperm.slane %v9434_v18, 6 }
0x41bb   :  { %v849_v40 = vmul.f32 %v9276_v24, %v833_v61  ;;  %v850_v17 = vmul.f32 %v9278_v57, %v834_v62  ;;  %v852_v32 = vmul.f32 %v9285_v47, %v836_v51  ;;  %v853_v27 = vmul.f32 %v9287_v16, %v837_v21 }
0x41bc   :  { %v855_v24 = vmul.f32 %v9340_v63, %v839_v56  ;;  %v5794_v57 = vsub.f32 %v9377_v14, %v5793_v13  ;;  %v840_v47 = vperm.slane %v9434_v18, 7 }
0x41bd   :  { %1087 = vperm.xlu2 %6075, %v849_v40   ;;  %1090 = vperm.xlu0 %6073, %v850_v17  }
0x41be   :  { %v5795_v46 = vmul.f32 1.442695, %v5794_v57  ;;  %v856_v54 = vmul.f32 %v9335_v53, %v840_v47  ;;  %v835_v57 = vperm.slane %v9434_v18, 2 }
0x41c5   :  { %1096 = vperm.xlu0 %6073, %v852_v32  }
0x41cd   :  { %1099 = vperm.xlu0 %6073, %v853_v27  }
0x41ce   :  { %v2429_v3 = vpop.xlane.xlu1 %2428 }
0x41cf   :  { %6606 = vrcp.f32 %v2429_v3  ;;  %v2439_v20 = vand.u32 2147483647, %v2429_v3  ;;  %v2441_v29 = vand.u32 2147483648, %v2429_v3  ;;  %vm2435_vm1 = vweird.f32 %v2429_v3 }
0x41d1   :  { %v2442_v34 = vor.u32 1.1754944e-38, %v2441_v29  ;;  %vm2440_vm0 = vcmp.eq.f32.partialorder %v2439_v20, 8.507059e+37 }
0x41d5   :  { %v6607_v12 = vpop.eup %6606  ;;  %1105 = vperm.xlu0 %6073, %v855_v24  }
0x41d6   :  { %v2431_v39 = vmul.f32 %v6607_v12, %v2429_v3  ;;  %v5821_v30 = vpop.xlane.xlu1 %5820  ;;  %vm2436_vm15 = vweird.f32 %v6607_v12 }
0x41d7   :  { %vm5822_vm14 = vcmp.ge.f32.partialorder %v9407_v52, %v5821_v30  ;;  %vm2437_vm2 = vmor %vm2435_vm1, %vm2436_vm15 }
0x41d8   :  { %v2432_v16 = vsub.f32 1.0, %v2431_v39  ;;  %v5823_v8 = vsel %vm5822_vm14, %v7002_v45, 8  ;;  %v1755_v63 = vpop.xlane.xlu0 %1754 }
0x41d9   :  { %v9451_v35 = vsel %vm319_vm13, %v5823_v8, 2147483647  ;;  %6608 = vrcp.f32 %v1755_v63  ;;  %v1767_v38 = vand.u32 2147483648, %v1755_v63  ;;  %v1765_v59 = vand.u32 2147483647, %v1755_v63 }
0x41da   :  { %v2433_v22 = vmul.f32 %v6607_v12, %v2432_v16  ;;  %v5826_v14 = vshra.s32 %v9451_v35, 16  ;;  %6610 = vpow2.f32 %v5795_v46  ;;  %vm1761_vm4 = vweird.f32 %v1755_v63 }
0x41db   :  { %v1768_v36 = vor.u32 1.1754944e-38, %v1767_v38  ;;  %vm1766_vm14 = vcmp.eq.f32.partialorder %v1765_v59, 8.507059e+37 }
0x41dc   :  { %v2434_v52 = vadd.f32 %v6607_v12, %v2433_v22  ;;  %v9455_v55 = vcvt.s32.f32 %v5826_v14 }
0x41dd   :  { %1108 = vperm.xlu0 %6073, %v856_v54   ;;  %v851_v54 = vmul.f32 %v9281_v58, %v835_v57 }
0x41de   :  { %v2438_v50 = vsel %vm2437_vm2, %v6607_v12, %v2434_v52  ;;  %5829 = vmin.xlane.f32.xlu1 %v9455_v55 }
0x41df   :  { %v2443_v4 = vsel %vm2440_vm0, %v2442_v34, %v2438_v50  ;;  %v6609_v41 = vpop.eup %6608 }
0x41e0   :  { %v2445_v25 = vmul.f32 %v9397_v1, %v2443_v4  ;;  %v1757_v10 = vmul.f32 %v6609_v41, %v1755_v63  ;;  %v3103_v28 = vpop.xlane.xlu0 %3102  ;;  %v3777_v26 = vpop.xlane.xlu1 %3776  ;;  %vm1762_vm3 = vweird.f32 %v6609_v41 }
0x41e1   :  { %v9459_v53 = vpop.eup %6610  ;;  %6612 = vrcp.f32 %v3103_v28  ;;  %vm1763_vm5 = vmor %vm1761_vm4, %vm1762_vm3  ;;  %v3115_v40 = vand.u32 2147483648, %v3103_v28  ;;  %v3113_v32 = vand.u32 2147483647, %v3103_v28  ;;  %v3789_v21 = vand.u32 2147483648, %v3777_v26 }
0x41e2   :  { %5873 = vst.msk [vmem:[%s9552_s15 + $0x10] sm:$0xff] %vm319_vm13, %v2445_v25  ;;  %v1758_v43 = vsub.f32 1.0, %v1757_v10  ;;  %6614 = vrcp.f32 %v3777_v26  ;;  %v5797_v1 = vsel %vm319_vm13, %v9459_v53, 0.0  ;;  %v3787_v3 = vand.u32 2147483647, %v3777_v26 }
0x41e3   :  { %vm3109_vm2 = vweird.f32 %v3103_v28  ;;  %v3116_v13 = vor.u32 1.1754944e-38, %v3115_v40  ;;  %vm3783_vm3 = vweird.f32 %v3777_v26  ;;  %vm3114_vm4 = vcmp.eq.f32.partialorder %v3113_v32, 8.507059e+37 }
0x41e4   :  { %v1759_v11 = vmul.f32 %v6609_v41, %v1758_v43  ;;  %v3790_v39 = vor.u32 1.1754944e-38, %v3789_v21  ;;  %v838_v25 = vperm.slane %v9434_v18, 5 }
0x41e5   :  { %6076 = vset.pattern.permute.xlu0 %v9647_v48 }
0x41e6   :  { %5798 = vadd.xlane.f32.xlu2 %v5797_v1  ;;  %v1760_v9 = vadd.f32 %v6609_v41, %v1759_v11  ;;  %v854_v1 = vmul.f32 %v9338_v5, %v838_v25 }
0x41e7   :  { %v6613_v0 = vpop.eup %6612 }
0x41e8   :  { %v6615_v42 = vpop.eup %6614  ;;  %v1764_v6 = vsel %vm1763_vm5, %v6609_v41, %v1760_v9  ;;  %v3105_v15 = vmul.f32 %v6613_v0, %v3103_v28  ;;  %v4451_v60 = vpop.xlane.xlu0 %4450  ;;  %vm3110_vm15 = vweird.f32 %v6613_v0 }
0x41e9   :  { %v9468_v31 = vpop.xlane.xlu1 %5124  ;;  %v1769_v2 = vsel %vm1766_vm14, %v1768_v36, %v1764_v6  ;;  %v3779_v19 = vmul.f32 %v6615_v42, %v3777_v26  ;;  %6616 = vrcp.f32 %v4451_v60  ;;  %vm3784_vm1 = vweird.f32 %v6615_v42  ;;  %vm3111_vm0 = vmor %vm3109_vm2, %vm3110_vm15 }
0x41ea   :  { %v1771_v61 = vmul.f32 %v9413_v44, %v1769_v2  ;;  %v3106_v62 = vsub.f32 1.0, %v3105_v15  ;;  %6618 = vrcp.f32 %v9468_v31  ;;  %vm3785_vm5 = vmor %vm3783_vm3, %vm3784_vm1  ;;  %vm3788_vm14 = vcmp.eq.f32.partialorder %v3787_v3, 8.507059e+37 }
0x41eb   :  { %v3780_v17 = vsub.f32 1.0, %v3779_v19  ;;  %v4463_v14 = vand.u32 2147483648, %v4451_v60  ;;  %v4461_v34 = vand.u32 2147483647, %v4451_v60  ;;  %vm4457_vm1 = vweird.f32 %v4451_v60 }
0x41ec   :  { %5865 = vst.msk [vmem:[%s9552_s15 + $0x8] sm:$0xff] %vm319_vm13, %v1771_v61  ;;  %v3107_v51 = vmul.f32 %v6613_v0, %v3106_v62  ;;  %v5135_v58 = vand.u32 2147483647, %v9468_v31 }
0x41ed   :  { %v3781_v27 = vmul.f32 %v6615_v42, %v3780_v17  ;;  %v4464_v41 = vor.u32 1.1754944e-38, %v4463_v14  ;;  %vm4462_vm3 = vcmp.eq.f32.partialorder %v4461_v34, 8.507059e+37 }
0x41ee   :  { %v3108_v56 = vadd.f32 %v6613_v0, %v3107_v51 }
0x41ef   :  { %v6617_v44 = vpop.eup %6616  ;;  %v3782_v24 = vadd.f32 %v6615_v42, %v3781_v27 }
0x41f0   :  { %v3112_v12 = vsel %vm3111_vm0, %v6613_v0, %v3108_v56  ;;  %v4453_v30 = vmul.f32 %v6617_v44, %v4451_v60  ;;  %v6619_v47 = vpop.eup %6618  ;;  %vm4458_vm15 = vweird.f32 %v6617_v44 }
0x41f1   :  { %v3117_v46 = vsel %vm3114_vm4, %v3116_v13, %v3112_v12  ;;  %v3786_v16 = vsel %vm3785_vm5, %v6615_v42, %v3782_v24  ;;  %v5127_v63 = vmul.f32 %v6619_v47, %v9468_v31  ;;  %vm5132_vm2 = vweird.f32 %v6619_v47  ;;  %vm4459_vm0 = vmor %vm4457_vm1, %vm4458_vm15 }
0x41f2   :  { %v3119_v8 = vmul.f32 %v9418_v23, %v3117_v46  ;;  %v3791_v20 = vsel %vm3788_vm14, %v3790_v39, %v3786_v16  ;;  %v4454_v29 = vsub.f32 1.0, %v4453_v30  ;;  %v5137_v23 = vand.u32 2147483648, %v9468_v31 }
0x41f3   :  { %v3793_v22 = vmul.f32 %v9420_v37, %v3791_v20  ;;  %v5128_v50 = vsub.f32 1.0, %v5127_v63  ;;  %vm5131_vm4 = vweird.f32 %v9468_v31  ;;  %vm5136_vm14 = vcmp.eq.f32.partialorder %v5135_v58, 8.507059e+37 }
0x41f4   :  { %5881 = vst.msk [vmem:[%s9552_s15 + $0x18] sm:$0xff] %vm319_vm13, %v3119_v8  ;;  %v4455_v52 = vmul.f32 %v6617_v44, %v4454_v29  ;;  %vm5133_vm5 = vmor %vm5131_vm4, %vm5132_vm2  ;;  %v5138_v43 = vor.u32 1.1754944e-38, %v5137_v23 }
0x41f5   :  { %5889 = vst.msk [vmem:[%s9552_s15 + $0x20] sm:$0xff] %vm319_vm13, %v3793_v22  ;;  %v5129_v4 = vmul.f32 %v6619_v47, %v5128_v50 }
0x41f6   :  { %v4456_v37 = vadd.f32 %v6617_v44, %v4455_v52 }
0x41f7   :  { %1093 = vperm.xlu1 %6074, %v851_v54   ;;  %v5130_v28 = vadd.f32 %v6619_v47, %v5129_v4 }
0x41f8   :  { %v4460_v10 = vsel %vm4459_vm0, %v6617_v44, %v4456_v37 }
0x41f9   :  { %v4465_v26 = vsel %vm4462_vm3, %v4464_v41, %v4460_v10  ;;  %v5134_v11 = vsel %vm5133_vm5, %v6619_v47, %v5130_v28 }
0x41fa   :  { %v4467_v38 = vmul.f32 %v9426_v49, %v4465_v26  ;;  %v5139_v59 = vsel %vm5136_vm14, %v5138_v43, %v5134_v11  ;;  %v5825_v49 = vand.u32 65535, %v9451_v35 }
0x41fb   :  { %v5141_v18 = vmul.f32 %v9428_v7, %v5139_v59 }
0x41fc   :  { %5897 = vst.msk [vmem:[%s9552_s15 + $0x28] sm:$0xff] %vm319_vm13, %v4467_v38  ;;  %v5827_v5 = vcvt.s32.f32 %v5825_v49 }
0x41fd   :  { %5905 = vst.msk [vmem:[%s9552_s15 + $0x30] sm:$0xff] %vm319_vm13, %v5141_v18 }
0x41fe   :  { %1102 = vperm.xlu2 %6075, %v854_v1  }
0x4217   :  { %v1088_v0 = vpop.permute.xlu2 %1087 }
0x422f   :  { %v1091_v48 = vpop.permute.xlu0 %1090 }
0x4230   :  { %v1111_v35 = vperm.slane %v1091_v48, %v7002_v45 }
0x4237   :  { %v1097_v9 = vpop.permute.xlu0 %1096 }
0x4238   :  { %v1113_v44 = vperm.slane %v1097_v9, %v7002_v45 }
0x423f   :  { %v1100_v6 = vpop.permute.xlu0 %1099 }
0x4240   :  { %v1114_v24 = vperm.slane %v1100_v6, %v7002_v45 }
0x4247   :  { %v1106_v31 = vpop.permute.xlu0 %1105 }
0x4248   :  { %v1116_v47 = vperm.slane %v1106_v31, %v7002_v45 }
0x424f   :  { %v1109_v57 = vpop.permute.xlu0 %1108 }
0x4251   :  { %v5830_v36 = vpop.xlane.xlu1 %5829 }
0x4252   :  { %vm5831_vm15 = vcmp.eq.f32.partialorder %v9455_v55, %v5830_v36  ;;  %v1110_v55 = vperm.slane %v1088_v0, %v7002_v45  ;;  %v5836_v29 = vcvt.f32.s32 %v5830_v36 }
0x4253   :  { %v5832_v42 = vsel %vm5831_vm15, %v5827_v5, inf }
0x4254   :  { %5833 = vmin.xlane.f32.xlu1 %v5832_v42  ;;  %v1118_v56 = vsel %vm304_vm6, %v1111_v35, %v1110_v55  ;;  %v5837_v22 = vshll.u32 %v5836_v29, 16 }
0x4259   :  { %v5799_v15 = vpop.xlane.xlu2 %5798 }
0x425a   :  { %6620 = vrcp.f32 %v5799_v15  ;;  %v5811_v19 = vand.u32 2147483648, %v5799_v15  ;;  %v5809_v62 = vand.u32 2147483647, %v5799_v15  ;;  %vm5805_vm2 = vweird.f32 %v5799_v15 }
0x425c   :  { %v5812_v17 = vor.u32 1.1754944e-38, %v5811_v19  ;;  %vm5810_vm3 = vcmp.eq.f32.partialorder %v5809_v62, 8.507059e+37 }
0x4260   :  { %v6621_v7 = vpop.eup %6620 }
0x4261   :  { %v5801_v60 = vmul.f32 %v6621_v7, %v5799_v15  ;;  %vm5806_vm1 = vweird.f32 %v6621_v7  ;;  %v1103_v27 = vpop.permute.xlu2 %1102 }
0x4262   :  { %vm5807_vm0 = vmor %vm5805_vm2, %vm5806_vm1  ;;  %v1115_v39 = vperm.slane %v1103_v27, %v7002_v45 }
0x4263   :  { %v5802_v2 = vsub.f32 1.0, %v5801_v60 }
0x4265   :  { %v5803_v61 = vmul.f32 %v6621_v7, %v5802_v2 }
0x4267   :  { %v5804_v40 = vadd.f32 %v6621_v7, %v5803_v61 }
0x4269   :  { %v5808_v51 = vsel %vm5807_vm0, %v6621_v7, %v5804_v40  ;;  %v1094_v32 = vpop.permute.xlu1 %1093 }
0x426a   :  { %v5813_v21 = vsel %vm5810_vm3, %v5812_v17, %v5808_v51  ;;  %v1112_v3 = vperm.slane %v1094_v32, %v7002_v45 }
0x426b   :  { %v5815_v13 = vmul.f32 %v9459_v53, %v5813_v21  ;;  %v1117_v53 = vperm.slane %v1109_v57, %v7002_v45 }
0x426c   :  { %v1119_v12 = vsel %vm306_vm7, %v1112_v3, %v1118_v56 }
0x426d   :  { %5913 = vst.msk [vmem:[%s9552_s15 + $0x38] sm:$0xff] %vm319_vm13, %v5815_v13  ;;  %v1120_v30 = vsel %vm308_vm8, %v1113_v44, %v1119_v12 }
0x426e   :  { %v1121_v46 = vsel %vm310_vm9, %v1114_v24, %v1120_v30 }
0x426f   :  { %v1122_v16 = vsel %vm312_vm10, %v1115_v39, %v1121_v46 }
0x4270   :  { %v1123_v8 = vsel %vm314_vm11, %v1116_v47, %v1122_v16 }
0x4271   :  { %v1124_v20 = vsel %vm316_vm12, %v1117_v53, %v1123_v8 }
0x4272   :  { %1126 = vst.msk [vmem:[%s9552_s15] sm:$0xff] %vm319_vm13, %v1124_v20 }
0x42c7   :  { %v5834_v63 = vpop.xlane.xlu1 %5833 }
0x42c8   :  { %v5835_v14 = vcvt.f32.s32 %v5834_v63 }
0x42ca   :  { %v5838_v54 = vadd.s32 %v5837_v22, %v5835_v14 }
0x42cc   :  { %vm5839_vm6 = vcmp.eq.s32.totalorder %v7002_v45, %v5838_v54 }
0x42cd   :  { %v5912_v52 = vsel %vm5839_vm6, 1.0, %v9625_v33 }
0x42ce   :  { %5914 = vst.msk [vmem:[%s9550_s16 + $0x38] sm:$0xff] %vm319_vm13, %v5912_v52 }

</bundles_post_ra>
